<compile_context>
chip_gen: v7x
topology: tpu7x:2x2x1
jax: 0.10.0
libtpu: 0.0.40
codegen_flags: <defaults>
</compile_context>

<pallas_src>
import functools

import jax
import jax.numpy as jnp
from jax.experimental import pallas as pl
from jax.experimental.pallas import tpu as pltpu


# ---------------------------------------------------------------------------
# Kernel 1: depthwise reduction conv (K and V) + fc_k / fc_v, fused.
# ---------------------------------------------------------------------------
def kv_proj_kernel(patch_ref, dwk_w_ref, dwk_b_ref, dwv_w_ref, dwv_b_ref,
                   wk_ref, bk_ref, wv_ref, bv_ref, k_out_ref, v_out_ref, *, kk):
    # patch_ref : (1, kk, Lkv, C)  shared patches of x (kernel == stride => no
    #                               traffic inflation); tap t is patch_ref[0, t].
    # dw*_w     : (kk, C) f32       depthwise weights (per-channel taps)
    # dw*_b, b* : (1, C) f32
    # wk/wv     : (C, C) bf16       fc weights, already transposed to (in, out)
    # outputs   : (1, Lkv, C) f32
    wdk = dwk_w_ref[...]                                   # (kk, C)
    wdv = dwv_w_ref[...]

    p0 = patch_ref[0, 0]                                   # (Lkv, C)
    acc_k = p0 * wdk[0:1, :]
    acc_v = p0 * wdv[0:1, :]
    for t in range(1, kk):                                 # kk = r*r is tiny; unrolled VPU adds
        pt = patch_ref[0, t]
        acc_k = acc_k + pt * wdk[t:t + 1, :]
        acc_v = acc_v + pt * wdv[t:t + 1, :]
    acc_k = acc_k + dwk_b_ref[...]
    acc_v = acc_v + dwv_b_ref[...]

    # fc_k / fc_v on the MXU: bf16 operands, f32 accumulation.
    k = jnp.dot(acc_k.astype(jnp.bfloat16), wk_ref[...],
                preferred_element_type=jnp.float32) + bk_ref[...]
    v = jnp.dot(acc_v.astype(jnp.bfloat16), wv_ref[...],
                preferred_element_type=jnp.float32) + bv_ref[...]
    k_out_ref[0] = k
    v_out_ref[0] = v


# ---------------------------------------------------------------------------
# Kernel 2: fc_q + multi-head attention (with learned bias) + fc_o, fused.
# ---------------------------------------------------------------------------
def attention_kernel(x_ref, wq_ref, bq_ref, k_ref, v_ref, bias_ref,
                     wo_ref, bo_ref, o_ref, *, heads, d_head):
    # x_ref    : (1, TQ, C)            query tile of x_reshape
    # wq/wo    : (C, C) bf16           (wq pre-scaled by d_head**-0.5)
    # bq/bo    : (1, C) f32            (bq pre-scaled)
    # k/v_ref  : (1, Lkv, C) f32
    # bias_ref : (1, heads, TQ, Lkv) f32
    # o_ref    : (1, C, TQ) f32        transposed => lane-dense store + NCHW order
    xq = x_ref[0].astype(jnp.bfloat16)                                 # (TQ, C)
    q = jnp.dot(xq, wq_ref[...],
                preferred_element_type=jnp.float32) + bq_ref[...]      # (TQ, C)
    kb = k_ref[0].astype(jnp.bfloat16)                                 # (Lkv, C)
    vb = v_ref[0].astype(jnp.bfloat16)

    head_outs = []
    for h in range(heads):                                             # heads is small; unrolled
        sl = slice(h * d_head, (h + 1) * d_head)
        qh = q[:, sl].astype(jnp.bfloat16)                             # (TQ, d)
        kh = kb[:, sl]                                                 # (Lkv, d)
        vh = vb[:, sl]
        # scores = qh @ kh^T  (scale already folded into wq/bq) + bias
        s = jax.lax.dot_general(qh, kh, (((1,), (1,)), ((), ())),
                                preferred_element_type=jnp.float32)    # (TQ, Lkv)
        s = s + bias_ref[0, h]
        # numerically stable softmax over the (lane) key axis
        m = jnp.max(s, axis=-1, keepdims=True)
        p = jnp.exp(s - m)
        denom = jnp.sum(p, axis=-1, keepdims=True)
        p = p * pl.reciprocal(denom, approx=True)
        head_outs.append(jnp.dot(p.astype(jnp.bfloat16), vh,
                                 preferred_element_type=jnp.float32))  # (TQ, d)

    att = jnp.concatenate(head_outs, axis=-1)                          # (TQ, C)
    out = jnp.dot(att.astype(jnp.bfloat16), wo_ref[...],
                  preferred_element_type=jnp.float32) + bo_ref[...]    # (TQ, C)
    # Store transposed: (C, TQ) with TQ a multiple of 128 => unmasked stores.
    o_ref[0] = out.T.astype(o_ref.dtype)


# ---------------------------------------------------------------------------
# Wrapper helpers
# ---------------------------------------------------------------------------
def _extract_kv_patches(x_nchw, r):
    """Non-overlapping r x r patches (kernel == stride, padding = 1).

    Returns patches of shape (B, r*r, kv*kv, C) and the reduced spatial size kv.
    Because kernel == stride, every input element appears at most once: no
    traffic inflation (unlike a generic im2col).
    """
    b, c, h, w = x_nchw.shape
    kv = (h + 2 - r) // r + 1
    xn = jnp.transpose(x_nchw, (0, 2, 3, 1))                    # (B, H, W, C)
    xp = jnp.pad(xn, ((0, 0), (1, 1), (1, 1), (0, 0)))
    cols = []
    for i in range(r):
        for j in range(r):
            cols.append(xp[:, i:i + r * kv:r, j:j + r * kv:r, :])   # (B, kv, kv, C)
    patches = jnp.stack(cols, axis=1)                           # (B, r*r, kv, kv, C)
    return patches.reshape(b, r * r, kv * kv, c), kv


def _pick_query_tile(flat):
    for t in (1024, 512, 256, 128):
        if flat % t == 0:
            return t
    return flat


# ---------------------------------------------------------------------------
# Forward
# ---------------------------------------------------------------------------
@functools.partial(jax.jit, static_argnames=("heads", "reduction_rate"))
def lmhsa_forward(x, params, *, heads, reduction_rate):
    b, c, h, w = x.shape
    assert c % heads == 0
    d_head = c // heads
    flat = h * w
    scale = d_head ** (-0.5)
    r = reduction_rate
    kk = r * r

    # ---- K / V path: depthwise reduction conv + fc_k / fc_v (one fused call) ----
    patches, kv_s = _extract_kv_patches(x, r)
    lkv = kv_s * kv_s

    dwk_w = params["dwk_w"].reshape(kk, c)
    dwv_w = params["dwv_w"].reshape(kk, c)
    wk_t = params["wk"].T.astype(jnp.bfloat16)
    wv_t = params["wv"].T.astype(jnp.bfloat16)

    k_proj, v_proj = pl.pallas_call(
        functools.partial(kv_proj_kernel, kk=kk),
        grid=(b,),
        in_specs=[
            pl.BlockSpec((1, kk, lkv, c), lambda i: (i, 0, 0, 0)),
            pl.BlockSpec((kk, c), lambda i: (0, 0)),
            pl.BlockSpec((1, c), lambda i: (0, 0)),
            pl.BlockSpec((kk, c), lambda i: (0, 0)),
            pl.BlockSpec((1, c), lambda i: (0, 0)),
            pl.BlockSpec((c, c), lambda i: (0, 0)),
            pl.BlockSpec((1, c), lambda i: (0, 0)),
            pl.BlockSpec((c, c), lambda i: (0, 0)),
            pl.BlockSpec((1, c), lambda i: (0, 0)),
        ],
        out_specs=[
            pl.BlockSpec((1, lkv, c), lambda i: (i, 0, 0)),
            pl.BlockSpec((1, lkv, c), lambda i: (i, 0, 0)),
        ],
        out_shape=[
            jax.ShapeDtypeStruct((b, lkv, c), jnp.float32),
            jax.ShapeDtypeStruct((b, lkv, c), jnp.float32),
        ],
        compiler_params=pltpu.CompilerParams(
            dimension_semantics=("parallel",)),
    )(patches, dwk_w, params["dwk_b"].reshape(1, c),
      dwv_w, params["dwv_b"].reshape(1, c),
      wk_t, params["bk"].reshape(1, c),
      wv_t, params["bv"].reshape(1, c))

    # ---- Q path + attention + fc_o, tiled over (batch, query tile) ----
    x_reshape = jnp.transpose(x.reshape(b, c, flat), (0, 2, 1))        # (B, HW, C)
    wq_t = (params["wq"].T * scale).astype(jnp.bfloat16)               # scale folded in
    bq_s = (params["bq"] * scale).reshape(1, c).astype(jnp.float32)
    wo_t = params["wo"].T.astype(jnp.bfloat16)
    bo = params["bo"].reshape(1, c)

    tile_q = _pick_query_tile(flat)
    assert flat % tile_q == 0
    grid = (b, flat // tile_q)

    out_cq = pl.pallas_call(
        functools.partial(attention_kernel, heads=heads, d_head=d_head),
        grid=grid,
        in_specs=[
            pl.BlockSpec((1, tile_q, c), lambda i, j: (i, j, 0)),
            pl.BlockSpec((c, c), lambda i, j: (0, 0)),
            pl.BlockSpec((1, c), lambda i, j: (0, 0)),
            pl.BlockSpec((1, lkv, c), lambda i, j: (i, 0, 0)),
            pl.BlockSpec((1, lkv, c), lambda i, j: (i, 0, 0)),
            pl.BlockSpec((1, heads, tile_q, lkv), lambda i, j: (0, 0, j, 0)),
            pl.BlockSpec((c, c), lambda i, j: (0, 0)),
            pl.BlockSpec((1, c), lambda i, j: (0, 0)),
        ],
        out_specs=pl.BlockSpec((1, c, tile_q), lambda i, j: (i, 0, j)),
        out_shape=jax.ShapeDtypeStruct((b, c, flat), jnp.float32),
        compiler_params=pltpu.CompilerParams(
            dimension_semantics=("parallel", "parallel"),
            vmem_limit_bytes=32 * 1024 * 1024),
    )(x_reshape, wq_t, bq_s, k_proj, v_proj, params["bias"], wo_t, bo)

    # (B, C, HW) is already NCHW-ordered — just reshape.
    return out_cq.reshape(b, c, h, w)


# ---------------------------------------------------------------------------
# Deterministic parameter init (mirrors nn.Conv2d / nn.Linear default shapes).
# NOTE: the PyTorch module leaves `self.bias` (the attention position bias)
# uninitialized (raw torch.Tensor); here it is initialized with small normals.
# ---------------------------------------------------------------------------
def init_params(key, channels, heads, input_size, reduction_rate):
    r = reduction_rate
    kv_s = (input_size + 2 - r) // r + 1
    flat = input_size * input_size
    keys = jax.random.split(key, 13)

    def uni(k, shape, fan_in):
        bound = 1.0 / (fan_in ** 0.5)
        return jax.random.uniform(k, shape, jnp.float32, -bound, bound)

    return dict(
        dwk_w=uni(keys[0], (r, r, channels), r * r),
        dwk_b=uni(keys[1], (channels,), r * r),
        dwv_w=uni(keys[2], (r, r, channels), r * r),
        dwv_b=uni(keys[3], (channels,), r * r),
        wq=uni(keys[4], (channels, channels), channels),
        bq=uni(keys[5], (channels,), channels),
        wk=uni(keys[6], (channels, channels), channels),
        bk=uni(keys[7], (channels,), channels),
        wv=uni(keys[8], (channels, channels), channels),
        bv=uni(keys[9], (channels,), channels),
        wo=uni(keys[10], (channels, channels), channels),
        bo=uni(keys[11], (channels,), channels),
        bias=0.02 * jax.random.normal(
            keys[12], (1, heads, flat, kv_s * kv_s), jnp.float32),
    )


# ---------------------------------------------------------------------------
# Pure-JAX f32 reference for a numerical sanity check.
# ---------------------------------------------------------------------------
def _ref_forward(x, params, heads, reduction_rate):
    b, c, h, w = x.shape
    d_head = c // heads
    r = reduction_rate
    flat = h * w
    scale = d_head ** (-0.5)
    kv_s = (h + 2 - r) // r + 1

    x_reshape = jnp.transpose(x.reshape(b, c, flat), (0, 2, 1))
    q = x_reshape @ params["wq"].T + params["bq"]

    def dwconv(w_dw, b_dw):
        xn = jnp.transpose(x, (0, 2, 3, 1))
        xp = jnp.pad(xn, ((0, 0), (1, 1), (1, 1), (0, 0)))
        out = jnp.zeros((b, kv_s, kv_s, c), jnp.float32)
        for i in range(r):
            for j in range(r):
                out = out + xp[:, i:i + r * kv_s:r, j:j + r * kv_s:r, :] * w_dw[i, j]
        return (out + b_dw).reshape(b, kv_s * kv_s, c)

    k = dwconv(params["dwk_w"], params["dwk_b"]) @ params["wk"].T + params["bk"]
    v = dwconv(params["dwv_w"], params["dwv_b"]) @ params["wv"].T + params["bv"]

    def split(t):
        return t.reshape(b, -1, heads, d_head).transpose(0, 2, 1, 3)

    qh, kh, vh = split(q), split(k), split(v)
    att = jnp.einsum("bhqd,bhkd->bhqk", qh, kh) * scale + params["bias"]
    att = jax.nn.softmax(att, axis=-1)
    out = jnp.einsum("bhqk,bhkd->bhqd", att, vh)
    out = out.transpose(0, 2, 1, 3).reshape(b, flat, c)
    out = out @ params["wo"].T + params["bo"]
    return jnp.transpose(out, (0, 2, 1)).reshape(b, c, h, w)


if __name__ == "__main__":
    key = jax.random.PRNGKey(0)
    kx, kp = jax.random.split(key)

    batch, channels, input_size = 2, 32, 16
    heads, reduction_rate = 4, 2

    x = jax.random.normal(kx, (batch, channels, input_size, input_size),
                          jnp.float32)
    params = init_params(kp, channels, heads, input_size, reduction_rate)

    out = lmhsa_forward(x, params, heads=heads, reduction_rate=reduction_rate)
    out = jax.block_until_ready(out)

    assert out.shape == (batch, channels, input_size, input_size), out.shape
    assert bool(jnp.all(jnp.isfinite(out)))

    ref = jax.block_until_ready(_ref_forward(x, params, heads, reduction_rate))
    max_err = float(jnp.max(jnp.abs(out - ref)))
    # bf16 MXU operands + approx reciprocal vs an all-f32 reference.
    assert max_err < 5e-2, max_err

    print("KERNEL_OK")
</pallas_src>

<mosaic_0001>
module attributes {stable_mosaic.version = 11 : i64} {
  func.func @kv_proj_kernel(%arg0: i32, %arg1: memref<1x4x81x32xf32, #tpu.memory_space<vmem>>, %arg2: memref<4x32xf32, #tpu.memory_space<vmem>>, %arg3: memref<1x32xf32, #tpu.memory_space<vmem>>, %arg4: memref<4x32xf32, #tpu.memory_space<vmem>>, %arg5: memref<1x32xf32, #tpu.memory_space<vmem>>, %arg6: memref<32x32xbf16, #tpu.memory_space<vmem>>, %arg7: memref<1x32xf32, #tpu.memory_space<vmem>>, %arg8: memref<32x32xbf16, #tpu.memory_space<vmem>>, %arg9: memref<1x32xf32, #tpu.memory_space<vmem>>, %arg10: memref<1x81x32xf32, #tpu.memory_space<vmem>>, %arg11: memref<1x81x32xf32, #tpu.memory_space<vmem>>) attributes {dimension_semantics = [#tpu.dimension_semantics<parallel>], iteration_bounds = array<i64: 2>, scalar_prefetch = 0 : i64, scratch_operands = 0 : i64, tpu.core_type = #tpu.core_type<tc>, window_params = [{transform_indices = @transform_0, window_bounds = array<i64: 1, 4, 81, 32>}, {pipeline_mode = #tpu.pipeline_mode<synchronous>, transform_indices = @transform_1, window_bounds = array<i64: 4, 32>}, {pipeline_mode = #tpu.pipeline_mode<synchronous>, transform_indices = @transform_2, window_bounds = array<i64: 1, 32>}, {pipeline_mode = #tpu.pipeline_mode<synchronous>, transform_indices = @transform_3, window_bounds = array<i64: 4, 32>}, {pipeline_mode = #tpu.pipeline_mode<synchronous>, transform_indices = @transform_4, window_bounds = array<i64: 1, 32>}, {pipeline_mode = #tpu.pipeline_mode<synchronous>, transform_indices = @transform_5, window_bounds = array<i64: 32, 32>}, {pipeline_mode = #tpu.pipeline_mode<synchronous>, transform_indices = @transform_6, window_bounds = array<i64: 1, 32>}, {pipeline_mode = #tpu.pipeline_mode<synchronous>, transform_indices = @transform_7, window_bounds = array<i64: 32, 32>}, {pipeline_mode = #tpu.pipeline_mode<synchronous>, transform_indices = @transform_8, window_bounds = array<i64: 1, 32>}, {transform_indices = @transform_9, window_bounds = array<i64: 1, 81, 32>}, {transform_indices = @transform_10, window_bounds = array<i64: 1, 81, 32>}]} {
    %c0 = arith.constant 0 : index
    %c0_0 = arith.constant 0 : index
    %0 = vector.load %arg2[%c0, %c0_0] : memref<4x32xf32, #tpu.memory_space<vmem>>, vector<4x32xf32>
    %c0_1 = arith.constant 0 : index
    %c0_2 = arith.constant 0 : index
    %1 = vector.load %arg4[%c0_1, %c0_2] : memref<4x32xf32, #tpu.memory_space<vmem>>, vector<4x32xf32>
    %c0_3 = arith.constant 0 : index
    %c0_4 = arith.constant 0 : index
    %c0_5 = arith.constant 0 : index
    %c0_6 = arith.constant 0 : index
    %2 = vector.load %arg1[%c0_3, %c0_4, %c0_5, %c0_6] : memref<1x4x81x32xf32, #tpu.memory_space<vmem>>, vector<1x1x81x32xf32>
    %3 = vector.shape_cast %2 : vector<1x1x81x32xf32> to vector<81x32xf32>
    %4 = vector.extract_strided_slice %0 {offsets = [0, 0], sizes = [1, 32], strides = [1, 1]} : vector<4x32xf32> to vector<1x32xf32>
    %5 = vector.broadcast %4 : vector<1x32xf32> to vector<81x32xf32>
    %6 = arith.mulf %3, %5 : vector<81x32xf32>
    %7 = vector.extract_strided_slice %1 {offsets = [0, 0], sizes = [1, 32], strides = [1, 1]} : vector<4x32xf32> to vector<1x32xf32>
    %8 = vector.broadcast %7 : vector<1x32xf32> to vector<81x32xf32>
    %9 = arith.mulf %3, %8 : vector<81x32xf32>
    %c0_7 = arith.constant 0 : index
    %c1 = arith.constant 1 : index
    %c0_8 = arith.constant 0 : index
    %c0_9 = arith.constant 0 : index
    %10 = vector.load %arg1[%c0_7, %c1, %c0_8, %c0_9] : memref<1x4x81x32xf32, #tpu.memory_space<vmem>>, vector<1x1x81x32xf32>
    %11 = vector.shape_cast %10 : vector<1x1x81x32xf32> to vector<81x32xf32>
    %12 = vector.extract_strided_slice %0 {offsets = [1, 0], sizes = [1, 32], strides = [1, 1]} : vector<4x32xf32> to vector<1x32xf32>
    %13 = vector.broadcast %12 : vector<1x32xf32> to vector<81x32xf32>
    %14 = arith.mulf %11, %13 : vector<81x32xf32>
    %15 = arith.addf %6, %14 : vector<81x32xf32>
    %16 = vector.extract_strided_slice %1 {offsets = [1, 0], sizes = [1, 32], strides = [1, 1]} : vector<4x32xf32> to vector<1x32xf32>
    %17 = vector.broadcast %16 : vector<1x32xf32> to vector<81x32xf32>
    %18 = arith.mulf %11, %17 : vector<81x32xf32>
    %19 = arith.addf %9, %18 : vector<81x32xf32>
    %c0_10 = arith.constant 0 : index
    %c2 = arith.constant 2 : index
    %c0_11 = arith.constant 0 : index
    %c0_12 = arith.constant 0 : index
    %20 = vector.load %arg1[%c0_10, %c2, %c0_11, %c0_12] : memref<1x4x81x32xf32, #tpu.memory_space<vmem>>, vector<1x1x81x32xf32>
    %21 = vector.shape_cast %20 : vector<1x1x81x32xf32> to vector<81x32xf32>
    %22 = vector.extract_strided_slice %0 {offsets = [2, 0], sizes = [1, 32], strides = [1, 1]} : vector<4x32xf32> to vector<1x32xf32>
    %23 = vector.broadcast %22 : vector<1x32xf32> to vector<81x32xf32>
    %24 = arith.mulf %21, %23 : vector<81x32xf32>
    %25 = arith.addf %15, %24 : vector<81x32xf32>
    %26 = vector.extract_strided_slice %1 {offsets = [2, 0], sizes = [1, 32], strides = [1, 1]} : vector<4x32xf32> to vector<1x32xf32>
    %27 = vector.broadcast %26 : vector<1x32xf32> to vector<81x32xf32>
    %28 = arith.mulf %21, %27 : vector<81x32xf32>
    %29 = arith.addf %19, %28 : vector<81x32xf32>
    %c0_13 = arith.constant 0 : index
    %c3 = arith.constant 3 : index
    %c0_14 = arith.constant 0 : index
    %c0_15 = arith.constant 0 : index
    %30 = vector.load %arg1[%c0_13, %c3, %c0_14, %c0_15] : memref<1x4x81x32xf32, #tpu.memory_space<vmem>>, vector<1x1x81x32xf32>
    %31 = vector.shape_cast %30 : vector<1x1x81x32xf32> to vector<81x32xf32>
    %32 = vector.extract_strided_slice %0 {offsets = [3, 0], sizes = [1, 32], strides = [1, 1]} : vector<4x32xf32> to vector<1x32xf32>
    %33 = vector.broadcast %32 : vector<1x32xf32> to vector<81x32xf32>
    %34 = arith.mulf %31, %33 : vector<81x32xf32>
    %35 = arith.addf %25, %34 : vector<81x32xf32>
    %36 = vector.extract_strided_slice %1 {offsets = [3, 0], sizes = [1, 32], strides = [1, 1]} : vector<4x32xf32> to vector<1x32xf32>
    %37 = vector.broadcast %36 : vector<1x32xf32> to vector<81x32xf32>
    %38 = arith.mulf %31, %37 : vector<81x32xf32>
    %39 = arith.addf %29, %38 : vector<81x32xf32>
    %c0_16 = arith.constant 0 : index
    %c0_17 = arith.constant 0 : index
    %40 = vector.load %arg3[%c0_16, %c0_17] : memref<1x32xf32, #tpu.memory_space<vmem>>, vector<1x32xf32>
    %41 = vector.broadcast %40 : vector<1x32xf32> to vector<81x32xf32>
    %42 = arith.addf %35, %41 : vector<81x32xf32>
    %c0_18 = arith.constant 0 : index
    %c0_19 = arith.constant 0 : index
    %43 = vector.load %arg5[%c0_18, %c0_19] : memref<1x32xf32, #tpu.memory_space<vmem>>, vector<1x32xf32>
    %44 = vector.broadcast %43 : vector<1x32xf32> to vector<81x32xf32>
    %45 = arith.addf %39, %44 : vector<81x32xf32>
    %46 = arith.truncf %42 : vector<81x32xf32> to vector<81x32xbf16>
    %c0_20 = arith.constant 0 : index
    %c0_21 = arith.constant 0 : index
    %47 = vector.load %arg6[%c0_20, %c0_21] : memref<32x32xbf16, #tpu.memory_space<vmem>>, vector<32x32xbf16>
    %cst = arith.constant dense<0.000000e+00> : vector<81x32xf32>
    %48 = tpu.matmul %46, %47, %cst {dimension_numbers = #tpu.dot_dimension_numbers<[1], [0], [0], [1], [0, 0, 1, 1], [], []>} : vector<81x32xbf16>, vector<32x32xbf16>, vector<81x32xf32> -> vector<81x32xf32>
    %c0_22 = arith.constant 0 : index
    %c0_23 = arith.constant 0 : index
    %49 = vector.load %arg7[%c0_22, %c0_23] : memref<1x32xf32, #tpu.memory_space<vmem>>, vector<1x32xf32>
    %50 = vector.broadcast %49 : vector<1x32xf32> to vector<81x32xf32>
    %51 = arith.addf %48, %50 : vector<81x32xf32>
    %52 = arith.truncf %45 : vector<81x32xf32> to vector<81x32xbf16>
    %c0_24 = arith.constant 0 : index
    %c0_25 = arith.constant 0 : index
    %53 = vector.load %arg8[%c0_24, %c0_25] : memref<32x32xbf16, #tpu.memory_space<vmem>>, vector<32x32xbf16>
    %cst_26 = arith.constant dense<0.000000e+00> : vector<81x32xf32>
    %54 = tpu.matmul %52, %53, %cst_26 {dimension_numbers = #tpu.dot_dimension_numbers<[1], [0], [0], [1], [0, 0, 1, 1], [], []>} : vector<81x32xbf16>, vector<32x32xbf16>, vector<81x32xf32> -> vector<81x32xf32>
    %c0_27 = arith.constant 0 : index
    %c0_28 = arith.constant 0 : index
    %55 = vector.load %arg9[%c0_27, %c0_28] : memref<1x32xf32, #tpu.memory_space<vmem>>, vector<1x32xf32>
    %56 = vector.broadcast %55 : vector<1x32xf32> to vector<81x32xf32>
    %57 = arith.addf %54, %56 : vector<81x32xf32>
    %c0_29 = arith.constant 0 : index
    %c0_30 = arith.constant 0 : index
    %c0_31 = arith.constant 0 : index
    %58 = vector.load %arg10[%c0_29, %c0_30, %c0_31] : memref<1x81x32xf32, #tpu.memory_space<vmem>>, vector<1x81x32xf32>
    %59 = vector.shape_cast %58 : vector<1x81x32xf32> to vector<81x32xf32>
    %60 = vector.shape_cast %51 : vector<81x32xf32> to vector<1x81x32xf32>
    tpu.vector_store %arg10[%c0_29, %c0_30, %c0_31], %60 {strides = array<i32>} : memref<1x81x32xf32, #tpu.memory_space<vmem>>, vector<1x81x32xf32>,
    %c0_32 = arith.constant 0 : index
    %c0_33 = arith.constant 0 : index
    %c0_34 = arith.constant 0 : index
    %61 = vector.load %arg11[%c0_32, %c0_33, %c0_34] : memref<1x81x32xf32, #tpu.memory_space<vmem>>, vector<1x81x32xf32>
    %62 = vector.shape_cast %61 : vector<1x81x32xf32> to vector<81x32xf32>
    %63 = vector.shape_cast %57 : vector<81x32xf32> to vector<1x81x32xf32>
    tpu.vector_store %arg11[%c0_32, %c0_33, %c0_34], %63 {strides = array<i32>} : memref<1x81x32xf32, #tpu.memory_space<vmem>>, vector<1x81x32xf32>,
    return
  }
  func.func @transform_0(%arg0: i32) -> (i32, i32, i32, i32) {
    %c0_i32 = arith.constant 0 : i32
    %c0_i32_0 = arith.constant 0 : i32
    %c0_i32_1 = arith.constant 0 : i32
    %c0_i32_2 = arith.constant 0 : i32
    return %arg0, %c0_i32, %c0_i32_0, %c0_i32_1 : i32, i32, i32, i32
  }
  func.func @transform_1(%arg0: i32) -> (i32, i32) {
    %c0_i32 = arith.constant 0 : i32
    %c0_i32_0 = arith.constant 0 : i32
    %c0_i32_1 = arith.constant 0 : i32
    return %c0_i32, %c0_i32_0 : i32, i32
  }
  func.func @transform_2(%arg0: i32) -> (i32, i32) {
    %c0_i32 = arith.constant 0 : i32
    %c0_i32_0 = arith.constant 0 : i32
    %c0_i32_1 = arith.constant 0 : i32
    return %c0_i32, %c0_i32_0 : i32, i32
  }
  func.func @transform_3(%arg0: i32) -> (i32, i32) {
    %c0_i32 = arith.constant 0 : i32
    %c0_i32_0 = arith.constant 0 : i32
    %c0_i32_1 = arith.constant 0 : i32
    return %c0_i32, %c0_i32_0 : i32, i32
  }
  func.func @transform_4(%arg0: i32) -> (i32, i32) {
    %c0_i32 = arith.constant 0 : i32
    %c0_i32_0 = arith.constant 0 : i32
    %c0_i32_1 = arith.constant 0 : i32
    return %c0_i32, %c0_i32_0 : i32, i32
  }
  func.func @transform_5(%arg0: i32) -> (i32, i32) {
    %c0_i32 = arith.constant 0 : i32
    %c0_i32_0 = arith.constant 0 : i32
    %c0_i32_1 = arith.constant 0 : i32
    return %c0_i32, %c0_i32_0 : i32, i32
  }
  func.func @transform_6(%arg0: i32) -> (i32, i32) {
    %c0_i32 = arith.constant 0 : i32
    %c0_i32_0 = arith.constant 0 : i32
    %c0_i32_1 = arith.constant 0 : i32
    return %c0_i32, %c0_i32_0 : i32, i32
  }
  func.func @transform_7(%arg0: i32) -> (i32, i32) {
    %c0_i32 = arith.constant 0 : i32
    %c0_i32_0 = arith.constant 0 : i32
    %c0_i32_1 = arith.constant 0 : i32
    return %c0_i32, %c0_i32_0 : i32, i32
  }
  func.func @transform_8(%arg0: i32) -> (i32, i32) {
    %c0_i32 = arith.constant 0 : i32
    %c0_i32_0 = arith.constant 0 : i32
    %c0_i32_1 = arith.constant 0 : i32
    return %c0_i32, %c0_i32_0 : i32, i32
  }
  func.func @transform_9(%arg0: i32) -> (i32, i32, i32) {
    %c0_i32 = arith.constant 0 : i32
    %c0_i32_0 = arith.constant 0 : i32
    %c0_i32_1 = arith.constant 0 : i32
    return %arg0, %c0_i32, %c0_i32_0 : i32, i32, i32
  }
  func.func @transform_10(%arg0: i32) -> (i32, i32, i32) {
    %c0_i32 = arith.constant 0 : i32
    %c0_i32_0 = arith.constant 0 : i32
    %c0_i32_1 = arith.constant 0 : i32
    return %arg0, %c0_i32, %c0_i32_0 : i32, i32, i32
  }
}

module attributes {stable_mosaic.version = 11 : i64} {
  func.func @attention_kernel(%arg0: i32, %arg1: i32, %arg2: memref<1x256x32xf32, #tpu.memory_space<vmem>>, %arg3: memref<32x32xbf16, #tpu.memory_space<vmem>>, %arg4: memref<1x32xf32, #tpu.memory_space<vmem>>, %arg5: memref<1x81x32xf32, #tpu.memory_space<vmem>>, %arg6: memref<1x81x32xf32, #tpu.memory_space<vmem>>, %arg7: memref<1x4x256x81xf32, #tpu.memory_space<vmem>>, %arg8: memref<32x32xbf16, #tpu.memory_space<vmem>>, %arg9: memref<1x32xf32, #tpu.memory_space<vmem>>, %arg10: memref<1x32x256xf32, #tpu.memory_space<vmem>>) attributes {dimension_semantics = [#tpu.dimension_semantics<parallel>, #tpu.dimension_semantics<parallel>], iteration_bounds = array<i64: 2, 1>, scalar_prefetch = 0 : i64, scratch_operands = 0 : i64, tpu.core_type = #tpu.core_type<tc>, window_params = [{transform_indices = @transform_0, window_bounds = array<i64: 1, 256, 32>}, {pipeline_mode = #tpu.pipeline_mode<synchronous>, transform_indices = @transform_1, window_bounds = array<i64: 32, 32>}, {pipeline_mode = #tpu.pipeline_mode<synchronous>, transform_indices = @transform_2, window_bounds = array<i64: 1, 32>}, {transform_indices = @transform_3, window_bounds = array<i64: 1, 81, 32>}, {transform_indices = @transform_4, window_bounds = array<i64: 1, 81, 32>}, {transform_indices = @transform_5, window_bounds = array<i64: 1, 4, 256, 81>}, {pipeline_mode = #tpu.pipeline_mode<synchronous>, transform_indices = @transform_6, window_bounds = array<i64: 32, 32>}, {pipeline_mode = #tpu.pipeline_mode<synchronous>, transform_indices = @transform_7, window_bounds = array<i64: 1, 32>}, {transform_indices = @transform_8, window_bounds = array<i64: 1, 32, 256>}]} {
    %c0 = arith.constant 0 : index
    %c0_0 = arith.constant 0 : index
    %c0_1 = arith.constant 0 : index
    %0 = vector.load %arg2[%c0, %c0_0, %c0_1] : memref<1x256x32xf32, #tpu.memory_space<vmem>>, vector<1x256x32xf32>
    %1 = vector.shape_cast %0 : vector<1x256x32xf32> to vector<256x32xf32>
    %2 = arith.truncf %1 : vector<256x32xf32> to vector<256x32xbf16>
    %c0_2 = arith.constant 0 : index
    %c0_3 = arith.constant 0 : index
    %3 = vector.load %arg3[%c0_2, %c0_3] : memref<32x32xbf16, #tpu.memory_space<vmem>>, vector<32x32xbf16>
    %cst = arith.constant dense<0.000000e+00> : vector<256x32xf32>
    %4 = tpu.matmul %2, %3, %cst {dimension_numbers = #tpu.dot_dimension_numbers<[1], [0], [0], [1], [0, 0, 1, 1], [], []>} : vector<256x32xbf16>, vector<32x32xbf16>, vector<256x32xf32> -> vector<256x32xf32>
    %c0_4 = arith.constant 0 : index
    %c0_5 = arith.constant 0 : index
    %5 = vector.load %arg4[%c0_4, %c0_5] : memref<1x32xf32, #tpu.memory_space<vmem>>, vector<1x32xf32>
    %6 = vector.broadcast %5 : vector<1x32xf32> to vector<256x32xf32>
    %7 = arith.addf %4, %6 : vector<256x32xf32>
    %c0_6 = arith.constant 0 : index
    %c0_7 = arith.constant 0 : index
    %c0_8 = arith.constant 0 : index
    %8 = vector.load %arg5[%c0_6, %c0_7, %c0_8] : memref<1x81x32xf32, #tpu.memory_space<vmem>>, vector<1x81x32xf32>
    %9 = vector.shape_cast %8 : vector<1x81x32xf32> to vector<81x32xf32>
    %10 = arith.truncf %9 : vector<81x32xf32> to vector<81x32xbf16>
    %c0_9 = arith.constant 0 : index
    %c0_10 = arith.constant 0 : index
    %c0_11 = arith.constant 0 : index
    %11 = vector.load %arg6[%c0_9, %c0_10, %c0_11] : memref<1x81x32xf32, #tpu.memory_space<vmem>>, vector<1x81x32xf32>
    %12 = vector.shape_cast %11 : vector<1x81x32xf32> to vector<81x32xf32>
    %13 = arith.truncf %12 : vector<81x32xf32> to vector<81x32xbf16>
    %14 = vector.extract_strided_slice %7 {offsets = [0, 0], sizes = [256, 8], strides = [1, 1]} : vector<256x32xf32> to vector<256x8xf32>
    %15 = arith.truncf %14 : vector<256x8xf32> to vector<256x8xbf16>
    %16 = vector.extract_strided_slice %10 {offsets = [0, 0], sizes = [81, 8], strides = [1, 1]} : vector<81x32xbf16> to vector<81x8xbf16>
    %17 = vector.extract_strided_slice %13 {offsets = [0, 0], sizes = [81, 8], strides = [1, 1]} : vector<81x32xbf16> to vector<81x8xbf16>
    %cst_12 = arith.constant dense<0.000000e+00> : vector<256x81xf32>
    %18 = tpu.matmul %15, %16, %cst_12 {dimension_numbers = #tpu.dot_dimension_numbers<[1], [1], [0], [0], [0, 0, 1, 0], [], []>} : vector<256x8xbf16>, vector<81x8xbf16>, vector<256x81xf32> -> vector<256x81xf32>
    %c0_13 = arith.constant 0 : index
    %c0_14 = arith.constant 0 : index
    %c0_15 = arith.constant 0 : index
    %c0_16 = arith.constant 0 : index
    %19 = vector.load %arg7[%c0_13, %c0_14, %c0_15, %c0_16] : memref<1x4x256x81xf32, #tpu.memory_space<vmem>>, vector<1x1x256x81xf32>
    %20 = vector.shape_cast %19 : vector<1x1x256x81xf32> to vector<256x81xf32>
    %21 = arith.addf %18, %20 : vector<256x81xf32>
    %cst_17 = arith.constant dense<0xFF800000> : vector<256xf32>
    %22 = vector.multi_reduction <maximumf>, %21, %cst_17 [1] : vector<256x81xf32> to vector<256xf32>
    %23 = vector.shape_cast %22 : vector<256xf32> to vector<256x1xf32>
    %24 = vector.broadcast %23 : vector<256x1xf32> to vector<256x81xf32>
    %25 = arith.subf %21, %24 : vector<256x81xf32>
    %26 = math.exp %25 : vector<256x81xf32>
    %cst_18 = arith.constant dense<0.000000e+00> : vector<256xf32>
    %27 = vector.multi_reduction <add>, %26, %cst_18 [1] : vector<256x81xf32> to vector<256xf32>
    %28 = vector.shape_cast %27 : vector<256xf32> to vector<256x1xf32>
    %29 = tpu.reciprocal %28 {approx = true} : vector<256x1xf32> -> vector<256x1xf32>
    %30 = vector.broadcast %29 : vector<256x1xf32> to vector<256x81xf32>
    %31 = arith.mulf %26, %30 : vector<256x81xf32>
    %32 = arith.truncf %31 : vector<256x81xf32> to vector<256x81xbf16>
    %cst_19 = arith.constant dense<0.000000e+00> : vector<256x8xf32>
    %33 = tpu.matmul %32, %17, %cst_19 {dimension_numbers = #tpu.dot_dimension_numbers<[1], [0], [0], [1], [0, 0, 1, 1], [], []>} : vector<256x81xbf16>, vector<81x8xbf16>, vector<256x8xf32> -> vector<256x8xf32>
    %34 = vector.extract_strided_slice %7 {offsets = [0, 8], sizes = [256, 8], strides = [1, 1]} : vector<256x32xf32> to vector<256x8xf32>
    %35 = arith.truncf %34 : vector<256x8xf32> to vector<256x8xbf16>
    %36 = vector.extract_strided_slice %10 {offsets = [0, 8], sizes = [81, 8], strides = [1, 1]} : vector<81x32xbf16> to vector<81x8xbf16>
    %37 = vector.extract_strided_slice %13 {offsets = [0, 8], sizes = [81, 8], strides = [1, 1]} : vector<81x32xbf16> to vector<81x8xbf16>
    %cst_20 = arith.constant dense<0.000000e+00> : vector<256x81xf32>
    %38 = tpu.matmul %35, %36, %cst_20 {dimension_numbers = #tpu.dot_dimension_numbers<[1], [1], [0], [0], [0, 0, 1, 0], [], []>} : vector<256x8xbf16>, vector<81x8xbf16>, vector<256x81xf32> -> vector<256x81xf32>
    %c0_21 = arith.constant 0 : index
    %c1 = arith.constant 1 : index
    %c0_22 = arith.constant 0 : index
    %c0_23 = arith.constant 0 : index
    %39 = vector.load %arg7[%c0_21, %c1, %c0_22, %c0_23] : memref<1x4x256x81xf32, #tpu.memory_space<vmem>>, vector<1x1x256x81xf32>
    %40 = vector.shape_cast %39 : vector<1x1x256x81xf32> to vector<256x81xf32>
    %41 = arith.addf %38, %40 : vector<256x81xf32>
    %cst_24 = arith.constant dense<0xFF800000> : vector<256xf32>
    %42 = vector.multi_reduction <maximumf>, %41, %cst_24 [1] : vector<256x81xf32> to vector<256xf32>
    %43 = vector.shape_cast %42 : vector<256xf32> to vector<256x1xf32>
    %44 = vector.broadcast %43 : vector<256x1xf32> to vector<256x81xf32>
    %45 = arith.subf %41, %44 : vector<256x81xf32>
    %46 = math.exp %45 : vector<256x81xf32>
    %cst_25 = arith.constant dense<0.000000e+00> : vector<256xf32>
    %47 = vector.multi_reduction <add>, %46, %cst_25 [1] : vector<256x81xf32> to vector<256xf32>
    %48 = vector.shape_cast %47 : vector<256xf32> to vector<256x1xf32>
    %49 = tpu.reciprocal %48 {approx = true} : vector<256x1xf32> -> vector<256x1xf32>
    %50 = vector.broadcast %49 : vector<256x1xf32> to vector<256x81xf32>
    %51 = arith.mulf %46, %50 : vector<256x81xf32>
    %52 = arith.truncf %51 : vector<256x81xf32> to vector<256x81xbf16>
    %cst_26 = arith.constant dense<0.000000e+00> : vector<256x8xf32>
    %53 = tpu.matmul %52, %37, %cst_26 {dimension_numbers = #tpu.dot_dimension_numbers<[1], [0], [0], [1], [0, 0, 1, 1], [], []>} : vector<256x81xbf16>, vector<81x8xbf16>, vector<256x8xf32> -> vector<256x8xf32>
    %54 = vector.extract_strided_slice %7 {offsets = [0, 16], sizes = [256, 8], strides = [1, 1]} : vector<256x32xf32> to vector<256x8xf32>
    %55 = arith.truncf %54 : vector<256x8xf32> to vector<256x8xbf16>
    %56 = vector.extract_strided_slice %10 {offsets = [0, 16], sizes = [81, 8], strides = [1, 1]} : vector<81x32xbf16> to vector<81x8xbf16>
    %57 = vector.extract_strided_slice %13 {offsets = [0, 16], sizes = [81, 8], strides = [1, 1]} : vector<81x32xbf16> to vector<81x8xbf16>
    %cst_27 = arith.constant dense<0.000000e+00> : vector<256x81xf32>
    %58 = tpu.matmul %55, %56, %cst_27 {dimension_numbers = #tpu.dot_dimension_numbers<[1], [1], [0], [0], [0, 0, 1, 0], [], []>} : vector<256x8xbf16>, vector<81x8xbf16>, vector<256x81xf32> -> vector<256x81xf32>
    %c0_28 = arith.constant 0 : index
    %c2 = arith.constant 2 : index
    %c0_29 = arith.constant 0 : index
    %c0_30 = arith.constant 0 : index
    %59 = vector.load %arg7[%c0_28, %c2, %c0_29, %c0_30] : memref<1x4x256x81xf32, #tpu.memory_space<vmem>>, vector<1x1x256x81xf32>
    %60 = vector.shape_cast %59 : vector<1x1x256x81xf32> to vector<256x81xf32>
    %61 = arith.addf %58, %60 : vector<256x81xf32>
    %cst_31 = arith.constant dense<0xFF800000> : vector<256xf32>
    %62 = vector.multi_reduction <maximumf>, %61, %cst_31 [1] : vector<256x81xf32> to vector<256xf32>
    %63 = vector.shape_cast %62 : vector<256xf32> to vector<256x1xf32>
    %64 = vector.broadcast %63 : vector<256x1xf32> to vector<256x81xf32>
    %65 = arith.subf %61, %64 : vector<256x81xf32>
    %66 = math.exp %65 : vector<256x81xf32>
    %cst_32 = arith.constant dense<0.000000e+00> : vector<256xf32>
    %67 = vector.multi_reduction <add>, %66, %cst_32 [1] : vector<256x81xf32> to vector<256xf32>
    %68 = vector.shape_cast %67 : vector<256xf32> to vector<256x1xf32>
    %69 = tpu.reciprocal %68 {approx = true} : vector<256x1xf32> -> vector<256x1xf32>
    %70 = vector.broadcast %69 : vector<256x1xf32> to vector<256x81xf32>
    %71 = arith.mulf %66, %70 : vector<256x81xf32>
    %72 = arith.truncf %71 : vector<256x81xf32> to vector<256x81xbf16>
    %cst_33 = arith.constant dense<0.000000e+00> : vector<256x8xf32>
    %73 = tpu.matmul %72, %57, %cst_33 {dimension_numbers = #tpu.dot_dimension_numbers<[1], [0], [0], [1], [0, 0, 1, 1], [], []>} : vector<256x81xbf16>, vector<81x8xbf16>, vector<256x8xf32> -> vector<256x8xf32>
    %74 = vector.extract_strided_slice %7 {offsets = [0, 24], sizes = [256, 8], strides = [1, 1]} : vector<256x32xf32> to vector<256x8xf32>
    %75 = arith.truncf %74 : vector<256x8xf32> to vector<256x8xbf16>
    %76 = vector.extract_strided_slice %10 {offsets = [0, 24], sizes = [81, 8], strides = [1, 1]} : vector<81x32xbf16> to vector<81x8xbf16>
    %77 = vector.extract_strided_slice %13 {offsets = [0, 24], sizes = [81, 8], strides = [1, 1]} : vector<81x32xbf16> to vector<81x8xbf16>
    %cst_34 = arith.constant dense<0.000000e+00> : vector<256x81xf32>
    %78 = tpu.matmul %75, %76, %cst_34 {dimension_numbers = #tpu.dot_dimension_numbers<[1], [1], [0], [0], [0, 0, 1, 0], [], []>} : vector<256x8xbf16>, vector<81x8xbf16>, vector<256x81xf32> -> vector<256x81xf32>
    %c0_35 = arith.constant 0 : index
    %c3 = arith.constant 3 : index
    %c0_36 = arith.constant 0 : index
    %c0_37 = arith.constant 0 : index
    %79 = vector.load %arg7[%c0_35, %c3, %c0_36, %c0_37] : memref<1x4x256x81xf32, #tpu.memory_space<vmem>>, vector<1x1x256x81xf32>
    %80 = vector.shape_cast %79 : vector<1x1x256x81xf32> to vector<256x81xf32>
    %81 = arith.addf %78, %80 : vector<256x81xf32>
    %cst_38 = arith.constant dense<0xFF800000> : vector<256xf32>
    %82 = vector.multi_reduction <maximumf>, %81, %cst_38 [1] : vector<256x81xf32> to vector<256xf32>
    %83 = vector.shape_cast %82 : vector<256xf32> to vector<256x1xf32>
    %84 = vector.broadcast %83 : vector<256x1xf32> to vector<256x81xf32>
    %85 = arith.subf %81, %84 : vector<256x81xf32>
    %86 = math.exp %85 : vector<256x81xf32>
    %cst_39 = arith.constant dense<0.000000e+00> : vector<256xf32>
    %87 = vector.multi_reduction <add>, %86, %cst_39 [1] : vector<256x81xf32> to vector<256xf32>
    %88 = vector.shape_cast %87 : vector<256xf32> to vector<256x1xf32>
    %89 = tpu.reciprocal %88 {approx = true} : vector<256x1xf32> -> vector<256x1xf32>
    %90 = vector.broadcast %89 : vector<256x1xf32> to vector<256x81xf32>
    %91 = arith.mulf %86, %90 : vector<256x81xf32>
    %92 = arith.truncf %91 : vector<256x81xf32> to vector<256x81xbf16>
    %cst_40 = arith.constant dense<0.000000e+00> : vector<256x8xf32>
    %93 = tpu.matmul %92, %77, %cst_40 {dimension_numbers = #tpu.dot_dimension_numbers<[1], [0], [0], [1], [0, 0, 1, 1], [], []>} : vector<256x81xbf16>, vector<81x8xbf16>, vector<256x8xf32> -> vector<256x8xf32>
    %94 = tpu.concatenate %33, %53, %73, %93 in 1 : vector<256x8xf32>, vector<256x8xf32>, vector<256x8xf32>, vector<256x8xf32> -> vector<256x32xf32>
    %95 = arith.truncf %94 : vector<256x32xf32> to vector<256x32xbf16>
    %c0_41 = arith.constant 0 : index
    %c0_42 = arith.constant 0 : index
    %96 = vector.load %arg8[%c0_41, %c0_42] : memref<32x32xbf16, #tpu.memory_space<vmem>>, vector<32x32xbf16>
    %cst_43 = arith.constant dense<0.000000e+00> : vector<256x32xf32>
    %97 = tpu.matmul %95, %96, %cst_43 {dimension_numbers = #tpu.dot_dimension_numbers<[1], [0], [0], [1], [0, 0, 1, 1], [], []>} : vector<256x32xbf16>, vector<32x32xbf16>, vector<256x32xf32> -> vector<256x32xf32>
    %c0_44 = arith.constant 0 : index
    %c0_45 = arith.constant 0 : index
    %98 = vector.load %arg9[%c0_44, %c0_45] : memref<1x32xf32, #tpu.memory_space<vmem>>, vector<1x32xf32>
    %99 = vector.broadcast %98 : vector<1x32xf32> to vector<256x32xf32>
    %100 = arith.addf %97, %99 : vector<256x32xf32>
    %101 = tpu.transpose %100, [1, 0] : vector<256x32xf32> -> vector<32x256xf32>
    %c0_46 = arith.constant 0 : index
    %c0_47 = arith.constant 0 : index
    %c0_48 = arith.constant 0 : index
    %102 = vector.load %arg10[%c0_46, %c0_47, %c0_48] : memref<1x32x256xf32, #tpu.memory_space<vmem>>, vector<1x32x256xf32>
    %103 = vector.shape_cast %102 : vector<1x32x256xf32> to vector<32x256xf32>
    %104 = vector.shape_cast %101 : vector<32x256xf32> to vector<1x32x256xf32>
    tpu.vector_store %arg10[%c0_46, %c0_47, %c0_48], %104 {strides = array<i32>} : memref<1x32x256xf32, #tpu.memory_space<vmem>>, vector<1x32x256xf32>,
    return
  }
  func.func @transform_0(%arg0: i32, %arg1: i32) -> (i32, i32, i32) {
    %c0_i32 = arith.constant 0 : i32
    %c0_i32_0 = arith.constant 0 : i32
    return %arg0, %arg1, %c0_i32 : i32, i32, i32
  }
  func.func @transform_1(%arg0: i32, %arg1: i32) -> (i32, i32) {
    %c0_i32 = arith.constant 0 : i32
    %c0_i32_0 = arith.constant 0 : i32
    %c0_i32_1 = arith.constant 0 : i32
    return %c0_i32, %c0_i32_0 : i32, i32
  }
  func.func @transform_2(%arg0: i32, %arg1: i32) -> (i32, i32) {
    %c0_i32 = arith.constant 0 : i32
    %c0_i32_0 = arith.constant 0 : i32
    %c0_i32_1 = arith.constant 0 : i32
    return %c0_i32, %c0_i32_0 : i32, i32
  }
  func.func @transform_3(%arg0: i32, %arg1: i32) -> (i32, i32, i32) {
    %c0_i32 = arith.constant 0 : i32
    %c0_i32_0 = arith.constant 0 : i32
    %c0_i32_1 = arith.constant 0 : i32
    return %arg0, %c0_i32, %c0_i32_0 : i32, i32, i32
  }
  func.func @transform_4(%arg0: i32, %arg1: i32) -> (i32, i32, i32) {
    %c0_i32 = arith.constant 0 : i32
    %c0_i32_0 = arith.constant 0 : i32
    %c0_i32_1 = arith.constant 0 : i32
    return %arg0, %c0_i32, %c0_i32_0 : i32, i32, i32
  }
  func.func @transform_5(%arg0: i32, %arg1: i32) -> (i32, i32, i32, i32) {
    %c0_i32 = arith.constant 0 : i32
    %c0_i32_0 = arith.constant 0 : i32
    %c0_i32_1 = arith.constant 0 : i32
    %c0_i32_2 = arith.constant 0 : i32
    return %c0_i32, %c0_i32_0, %arg1, %c0_i32_1 : i32, i32, i32, i32
  }
  func.func @transform_6(%arg0: i32, %arg1: i32) -> (i32, i32) {
    %c0_i32 = arith.constant 0 : i32
    %c0_i32_0 = arith.constant 0 : i32
    %c0_i32_1 = arith.constant 0 : i32
    return %c0_i32, %c0_i32_0 : i32, i32
  }
  func.func @transform_7(%arg0: i32, %arg1: i32) -> (i32, i32) {
    %c0_i32 = arith.constant 0 : i32
    %c0_i32_0 = arith.constant 0 : i32
    %c0_i32_1 = arith.constant 0 : i32
    return %c0_i32, %c0_i32_0 : i32, i32
  }
  func.func @transform_8(%arg0: i32, %arg1: i32) -> (i32, i32, i32) {
    %c0_i32 = arith.constant 0 : i32
    %c0_i32_0 = arith.constant 0 : i32
    return %arg0, %c0_i32, %arg1 : i32, i32, i32
  }
}

</mosaic_0001>

<bundles_post_ra>
// kernel: lmhsa_forward.2
= control target key start
LH: loop header
LB: loop body
LE: loop exit
PB: predicated region body
PF: predicated region fallthrough
CT: control target
= control target key end

     0   :  { %s1199_s13 = smov 0   ;;  %s1500_s0 = inlined_call_operand.vmem [shape: f32[2,4,81,32], index: 0, kind: input, shape index: {}]   ;;  %s1501_s1 = inlined_call_operand.vmem [shape: f32[4,32], index: 1, kind: input, shape index: {}]   ;;  %s1502_s2 = inlined_call_operand.vmem [shape: f32[1,32], index: 2, kind: input, shape index: {}]   ;;  %s1503_s3 = inlined_call_operand.vmem [shape: f32[4,32], index: 3, kind: input, shape index: {}]   ;;  %s1504_s4 = inlined_call_operand.vmem [shape: f32[1,32], index: 4, kind: input, shape index: {}]   ;;  %s1505_s5 = inlined_call_operand.vmem [shape: bf16[32,32], index: 5, kind: input, shape index: {}]   ;;  %s1506_s6 = inlined_call_operand.vmem [shape: f32[1,32], index: 6, kind: input, shape index: {}]   ;;  %s1507_s7 = inlined_call_operand.vmem [shape: bf16[32,32], index: 7, kind: input, shape index: {}]   ;;  %s1508_s8 = inlined_call_operand.vmem [shape: f32[1,32], index: 8, kind: input, shape index: {}]   ;;  %s1509_s9 = inlined_call_operand.vmem [shape: f32[2,81,32], index: 9, kind: output, shape index: {0}]   ;;  %s1510_s10 = inlined_call_operand.vmem [shape: f32[2,81,32], index: 10, kind: output, shape index: {1}]  }
   0x1 LB: > { %s1011_s14 = sadd.s32 4294967295, %s1142_s13   ;;  %p1015_p0 = scmp.ge.s32.totalorder %s1142_s13, 1  ;;  %s1142_s13 = sphi %s1199_s13, %s21_s13  }
   0x2   : > { %p315_p1 = scmp.lt.s32.totalorder %s1142_s13, 3 }
   0x4   : > { %p316_p2 = pnand %p1015_p0, %p315_p1 }
   0x5   : > { %v1132_v0 = vld [vmem:[%s1505_s5] sm:$0xff] (!%p316_p2)   ;;  %p358_p3 = scmp.lt.s32.totalorder (!%p316_p2), %s1011_s14, 1  ;;  %v387_v1 = vlaneseq (!%p316_p2)  ;;  %v1134_v3 = vld [vmem:[%s1505_s5 + $0x8] sm:$0xff] (!%p316_p2)   ;;  %vm674_vm0 = vcmask (!%p316_p2), 261120   ;;  %vm910_vm1 = vcmask (!%p316_p2), 253952  }
   0x6   : > { %319 = sbr.rel (%p316_p2) target bundleno = 290 (0x122), region = 56  ;;  %v1133_v2 = vld [vmem:[%s1507_s7] sm:$0xff] (!%p316_p2)   ;;  %1090 = vmatprep.subr.bf16.mxu0 (!%p316_p2), %v1132_v0  ;;  %v1135_v4 = vld [vmem:[%s1507_s7 + $0x8] sm:$0xff] (!%p316_p2)  }
   0x7   : > { %1106 = vmatprep.subr.bf16.mxu1 (!%p316_p2), %v1133_v2  ;;  %1091 = vmatpush3.bf16.msra.mxu0 (!%p316_p2), %v1132_v0  ;;  %v388_v5 = vshrl.u32 (!%p316_p2), %v387_v1, 7  ;;  %v374_v6 = vld [vmem:[%s1501_s1] sm:$0xf] (!%p316_p2) }
   0x8   : > { %1107 = vmatpush3.bf16.msra.mxu1 (!%p316_p2), %v1133_v2  ;;  %1092 = vmatprep.subr.bf16.mxu0 (!%p316_p2), %v1134_v3  ;;  %v375_v11 = vld [vmem:[%s1503_s3] sm:$0xf] (!%p316_p2) }
   0x9   : > { %1108 = vmatprep.subr.bf16.mxu1 (!%p316_p2), %v1135_v4  ;;  %v389_v7 = vsub.s32 (!%p316_p2), 0, %v388_v5  ;;  %v431_v8 = vsub.s32 (!%p316_p2), 1, %v388_v5  ;;  %v495_v9 = vsub.s32 (!%p316_p2), 2, %v388_v5  ;;  %v559_v10 = vsub.s32 (!%p316_p2), 3, %v388_v5  ;;  %v1282_v54 = vld [vmem:[%s1502_s2] ss:$0 sm:$0xff] (!%p316_p2) }
   0xb   : > { %1093 = vmatpush3.bf16.msra.mxu0 (!%p316_p2), %v1134_v3  ;;  %v1235_v14 = vrot.slane (!%p316_p2), %v374_v6, %v389_v7  ;;  %v1238_v16 = vrot.slane (!%p316_p2), %v374_v6, %v431_v8  ;;  %v1240_v17 = vrot.slane (!%p316_p2), %v374_v6, %v495_v9  ;;  %v1242_v18 = vrot.slane (!%p316_p2), %v374_v6, %v559_v10 }
   0xc   : > { %1109 = vmatpush3.bf16.msra.mxu1 (!%p316_p2), %v1135_v4  ;;  %v1247_v22 = vrot.slane (!%p316_p2), %v375_v11, %v389_v7  ;;  %v1249_v23 = vrot.slane (!%p316_p2), %v375_v11, %v431_v8  ;;  %v1251_v24 = vrot.slane (!%p316_p2), %v375_v11, %v495_v9  ;;  %v1253_v25 = vrot.slane (!%p316_p2), %v375_v11, %v559_v10  ;;  %v1297_v7 = vld [vmem:[%s1504_s4] ss:$0 sm:$0xff] (!%p316_p2) }
   0xd   : > { %s1512_s14 = smov (!%p358_p3, %s1011_s14), 1 }
   0xe   : > { %s1122_s23 = smul.u32 352, %s1512_s14 }
   0xf   : > { %s1123_s17 = smul.u32 88, %s1512_s14 }
  0x10   : > { %s1231_s30 = scalar_lea.vmem %s1500_s0, %s1122_s23 }
  0x11   : > { %v376_v12 = vld [vmem:[%s1231_s30] sm:$0xff]  ;;  %v377_v13 = vld [vmem:[%s1231_s30 + $0x8] sm:$0xff]  ;;  %v1019_v15 = vld [vmem:[%s1231_s30 + $0x58] sm:$0xff]  ;;  %s1434_s22 = scalar_lea.vmem %s1509_s9, %s1123_s17  ;;  %s1452_s26 = scalar_lea.vmem %s1510_s10, %s1123_s17 }
  0x12   : > { %v1020_v19 = vld [vmem:[%s1231_s30 + $0x60] sm:$0xff]  ;;  %v1030_v20 = vld [vmem:[%s1231_s30 + $0xb0] sm:$0xff]  ;;  %v1031_v21 = vld [vmem:[%s1231_s30 + $0xb8] sm:$0xff]  ;;  %v391_v26 = vmul.f32 %v1235_v14, %v376_v12  ;;  %v392_v27 = vmul.f32 %v1235_v14, %v377_v13  ;;  %v433_v28 = vmul.f32 %v1019_v15, %v1238_v16  ;;  %v406_v38 = vmul.f32 %v1247_v22, %v376_v12 }
  0x13   : > { %v434_v29 = vmul.f32 %v1020_v19, %v1238_v16  ;;  %v1041_v30 = vld [vmem:[%s1231_s30 + $0x108] sm:$0xff]  ;;  %v1042_v31 = vld [vmem:[%s1231_s30 + $0x110] sm:$0xff]  ;;  %v497_v32 = vmul.f32 %v1030_v20, %v1240_v17  ;;  %v498_v33 = vmul.f32 %v1031_v21, %v1240_v17  ;;  %v407_v39 = vmul.f32 %v1247_v22, %v377_v13  ;;  %v379_v41 = vld [vmem:[%s1231_s30 + $0x18] sm:$0xff] }
  0x14   : > { %v561_v34 = vmul.f32 %v1041_v30, %v1242_v18  ;;  %v562_v35 = vmul.f32 %v1042_v31, %v1242_v18  ;;  %v444_v36 = vadd.f32 %v433_v28, %v391_v26  ;;  %v378_v40 = vld [vmem:[%s1231_s30 + $0x10] sm:$0xff]  ;;  %v459_v42 = vmul.f32 %v1019_v15, %v1249_v23  ;;  %v1021_v46 = vld [vmem:[%s1231_s30 + $0x68] sm:$0xff]  ;;  %v1032_v52 = vld [vmem:[%s1231_s30 + $0xc0] sm:$0xff] }
  0x15   : > { %v445_v37 = vadd.f32 %v434_v29, %v392_v27  ;;  %v460_v43 = vmul.f32 %v1020_v19, %v1249_v23  ;;  %v523_v44 = vmul.f32 %v1030_v20, %v1251_v24  ;;  %v524_v45 = vmul.f32 %v1031_v21, %v1251_v24  ;;  %v1022_v47 = vld [vmem:[%s1231_s30 + $0x70] sm:$0xff]  ;;  %v1033_v53 = vld [vmem:[%s1231_s30 + $0xc8] sm:$0xff]  ;;  %v1043_v63 = vld [vmem:[%s1231_s30 + $0x118] sm:$0xff] }
  0x16   : > { %v508_v48 = vadd.f32 %v497_v32, %v444_v36  ;;  %v587_v50 = vmul.f32 %v1041_v30, %v1253_v25  ;;  %v588_v51 = vmul.f32 %v1042_v31, %v1253_v25  ;;  %v470_v55 = vadd.f32 %v459_v42, %v406_v38  ;;  %v1044_v0 = vld [vmem:[%s1231_s30 + $0x120] sm:$0xff]  ;;  %v1023_v36 = vld [vmem:[%s1231_s30 + $0x78] sm:$0xff]  ;;  %v1034_v42 = vld [vmem:[%s1231_s30 + $0xd0] sm:$0xff] }
  0x17   : > { %v509_v49 = vadd.f32 %v498_v33, %v445_v37  ;;  %v471_v56 = vadd.f32 %v460_v43, %v407_v39  ;;  %v393_v57 = vmul.f32 %v1235_v14, %v378_v40  ;;  %v394_v58 = vmul.f32 %v1235_v14, %v379_v41 }
  0x18   : > { %v572_v59 = vadd.f32 %v561_v34, %v508_v48  ;;  %v435_v61 = vmul.f32 %v1021_v46, %v1238_v16  ;;  %v436_v62 = vmul.f32 %v1022_v47, %v1238_v16  ;;  %v534_v1 = vadd.f32 %v523_v44, %v470_v55  ;;  %v380_v34 = vld [vmem:[%s1231_s30 + $0x20] sm:$0xff]  ;;  %v1045_v48 = vld [vmem:[%s1231_s30 + $0x128] sm:$0xff] }
  0x19   : > { %v573_v60 = vadd.f32 %v562_v35, %v509_v49  ;;  %v535_v2 = vadd.f32 %v524_v45, %v471_v56  ;;  %v499_v3 = vmul.f32 %v1032_v52, %v1240_v17  ;;  %v500_v4 = vmul.f32 %v1033_v53, %v1240_v17  ;;  %v381_v35 = vld [vmem:[%s1231_s30 + $0x28] sm:$0xff] }
  0x1a   : > { %v616_v5 = vadd.f32 %v1282_v54, %v572_v59  ;;  %v446_v8 = vadd.f32 %v435_v61, %v393_v57  ;;  %v447_v9 = vadd.f32 %v436_v62, %v394_v58  ;;  %v598_v10 = vadd.f32 %v587_v50, %v534_v1 }
  0x1b   : > { %v617_v6 = vadd.f32 %v1282_v54, %v573_v60  ;;  %v599_v11 = vadd.f32 %v588_v51, %v535_v2  ;;  %v563_v12 = vmul.f32 %v1043_v63, %v1242_v18  ;;  %v564_v13 = vmul.f32 %v1044_v0, %v1242_v18 }
  0x1c   : > { %v510_v19 = vadd.f32 %v499_v3, %v446_v8  ;;  %v511_v20 = vadd.f32 %v500_v4, %v447_v9  ;;  %v408_v21 = vmul.f32 %v1247_v22, %v378_v40  ;;  %v634_v26 = vadd.f32 %v1297_v7, %v598_v10 }
  0x1d   : > { %v645_v15 = vpack.c.bf16 %v617_v6, %v616_v5  ;;  %v635_v27 = vadd.f32 %v1297_v7, %v599_v11  ;;  %v409_v28 = vmul.f32 %v1247_v22, %v379_v41  ;;  %v461_v29 = vmul.f32 %v1021_v46, %v1249_v23  ;;  %v1024_v41 = vld [vmem:[%s1231_s30 + $0x80] sm:$0xff] }
  0x1e   : > { %v574_v30 = vadd.f32 %v563_v12, %v510_v19  ;;  %v575_v31 = vadd.f32 %v564_v13, %v511_v20  ;;  %v462_v32 = vmul.f32 %v1022_v47, %v1249_v23  ;;  %v525_v33 = vmul.f32 %v1032_v52, %v1251_v24  ;;  %v1035_v47 = vld [vmem:[%s1231_s30 + $0xd8] sm:$0xff]  ;;  %v382_v12 = vld [vmem:[%s1231_s30 + $0x30] sm:$0xff] }
  0x1f   : > { %1094 = vmatprep.mubr.msk.bf16.mxu0 %vm674_vm0, %v645_v15  ;;  %v773_v37 = vpack.c.bf16 %v635_v27, %v634_v26  ;;  %v472_v38 = vadd.f32 %v461_v29, %v408_v21  ;;  %v526_v39 = vmul.f32 %v1033_v53, %v1251_v24  ;;  %v589_v40 = vmul.f32 %v1043_v63, %v1253_v25  ;;  %v1046_v53 = vld [vmem:[%s1231_s30 + $0x130] sm:$0xff]  ;;  %v383_v13 = vld [vmem:[%s1231_s30 + $0x38] sm:$0xff]  ;;  %v1025_v26 = vld [vmem:[%s1231_s30 + $0x88] sm:$0xff] }
  0x20   : > { %v618_v43 = vadd.f32 %v1282_v54, %v574_v30  ;;  %v619_v44 = vadd.f32 %v1282_v54, %v575_v31  ;;  %v473_v45 = vadd.f32 %v462_v32, %v409_v28  ;;  %v590_v46 = vmul.f32 %v1044_v0, %v1253_v25  ;;  %v1026_v27 = vld [vmem:[%s1231_s30 + $0x90] sm:$0xff]  ;;  %v1036_v32 = vld [vmem:[%s1231_s30 + $0xe0] sm:$0xff] }
  0x21   : > { %1110 = vmatprep.mubr.msk.bf16.mxu1 %vm674_vm0, %v773_v37  ;;  %v536_v49 = vadd.f32 %v525_v33, %v472_v38  ;;  %v395_v50 = vmul.f32 %v1235_v14, %v380_v34  ;;  %v396_v51 = vmul.f32 %v1235_v14, %v381_v35  ;;  %v437_v52 = vmul.f32 %v1023_v36, %v1238_v16  ;;  %v1037_v33 = vld [vmem:[%s1231_s30 + $0xe8] sm:$0xff] }
  0x22   : > { %v646_v55 = vpack.c.bf16 %v619_v44, %v618_v43  ;;  %v537_v56 = vadd.f32 %v526_v39, %v473_v45  ;;  %v438_v57 = vmul.f32 %v1024_v41, %v1238_v16  ;;  %v501_v58 = vmul.f32 %v1034_v42, %v1240_v17  ;;  %v1048_v43 = vld [vmem:[%s1231_s30 + $0x140] sm:$0xff] }
  0x23   : > { %v600_v59 = vadd.f32 %v589_v40, %v536_v49  ;;  %v448_v60 = vadd.f32 %v437_v52, %v395_v50  ;;  %v502_v61 = vmul.f32 %v1035_v47, %v1240_v17  ;;  %v565_v62 = vmul.f32 %v1045_v48, %v1242_v18 }
  0x24   : > { %1095 = vmatmul.mubr.msk.bf16.vlgmr.msra.gmra.mrb[0].mxu0 %vm674_vm0, %v646_v55  ;;  %v601_v63 = vadd.f32 %v590_v46, %v537_v56  ;;  %v449_v0 = vadd.f32 %v438_v57, %v396_v51  ;;  %v566_v1 = vmul.f32 %v1046_v53, %v1242_v18  ;;  %v410_v2 = vmul.f32 %v1247_v22, %v380_v34  ;;  %v1047_v34 = vld [vmem:[%s1231_s30 + $0x138] sm:$0xff] }
  0x25   : > { %v636_v3 = vadd.f32 %v1297_v7, %v600_v59  ;;  %v512_v4 = vadd.f32 %v501_v58, %v448_v60  ;;  %v411_v5 = vmul.f32 %v1247_v22, %v381_v35  ;;  %v463_v6 = vmul.f32 %v1023_v36, %v1249_v23 }
  0x26   : > { %v637_v8 = vadd.f32 %v1297_v7, %v601_v63  ;;  %v513_v9 = vadd.f32 %v502_v61, %v449_v0  ;;  %v464_v10 = vmul.f32 %v1024_v41, %v1249_v23  ;;  %v527_v11 = vmul.f32 %v1034_v42, %v1251_v24  ;;  %v384_v61 = vld [vmem:[%s1231_s30 + $0x40] sm:$0xff] }
  0x27   : > { %v576_v15 = vadd.f32 %v565_v62, %v512_v4  ;;  %v474_v19 = vadd.f32 %v463_v6, %v410_v2  ;;  %v528_v20 = vmul.f32 %v1035_v47, %v1251_v24  ;;  %v591_v21 = vmul.f32 %v1045_v48, %v1253_v25  ;;  %v385_v62 = vld [vmem:[%s1231_s30 + $0x48] sm:$0xff] }
  0x28   : > { %v774_v28 = vpack.c.bf16 %v637_v8, %v636_v3  ;;  %v577_v29 = vadd.f32 %v566_v1, %v513_v9  ;;  %v475_v30 = vadd.f32 %v464_v10, %v411_v5  ;;  %v592_v31 = vmul.f32 %v1046_v53, %v1253_v25  ;;  %v1027_v3 = vld [vmem:[%s1231_s30 + $0x98] sm:$0xff]  ;;  %v1028_v9 = vld [vmem:[%s1231_s30 + $0xa0] sm:$0xff]  ;;  %v1038_v10 = vld [vmem:[%s1231_s30 + $0xf0] sm:$0xff] }
  0x29   : > { %v620_v35 = vadd.f32 %v1282_v54, %v576_v15  ;;  %v538_v36 = vadd.f32 %v527_v11, %v474_v19  ;;  %v397_v37 = vmul.f32 %v1235_v14, %v382_v12  ;;  %v398_v38 = vmul.f32 %v1235_v14, %v383_v13  ;;  %v1039_v11 = vld [vmem:[%s1231_s30 + $0xf8] sm:$0xff] }
  0x2a   : > { %1111 = vmatmul.mubr.msk.bf16.vlgmr.msra.gmra.mrb[0].mxu1 %vm674_vm0, %v774_v28  ;;  %v621_v39 = vadd.f32 %v1282_v54, %v577_v29  ;;  %v539_v40 = vadd.f32 %v528_v20, %v475_v30  ;;  %v439_v41 = vmul.f32 %v1025_v26, %v1238_v16  ;;  %v440_v42 = vmul.f32 %v1026_v27, %v1238_v16  ;;  %v1049_v20 = vld [vmem:[%s1231_s30 + $0x148] sm:$0xff]  ;;  %v1050_v29 = vld [vmem:[%s1231_s30 + $0x150] sm:$0xff] }
  0x2b   : > { %v602_v44 = vadd.f32 %v591_v21, %v538_v36  ;;  %v503_v45 = vmul.f32 %v1036_v32, %v1240_v17  ;;  %v504_v46 = vmul.f32 %v1037_v33, %v1240_v17  ;;  %v567_v47 = vmul.f32 %v1047_v34, %v1242_v18 }
  0x2c   : > { %v647_v48 = vpack.c.bf16 %v621_v39, %v620_v35  ;;  %v603_v49 = vadd.f32 %v592_v31, %v539_v40  ;;  %v450_v50 = vadd.f32 %v439_v41, %v397_v37  ;;  %v451_v51 = vadd.f32 %v440_v42, %v398_v38 }
  0x2d   : > { %v638_v52 = vadd.f32 %v1297_v7, %v602_v44  ;;  %v568_v53 = vmul.f32 %v1048_v43, %v1242_v18  ;;  %v412_v55 = vmul.f32 %v1247_v22, %v382_v12  ;;  %v413_v56 = vmul.f32 %v1247_v22, %v383_v13 }
  0x2e   : > { %1098 = vmatprep.mubr.msk.bf16.mxu0 %vm674_vm0, %v647_v48  ;;  %v639_v57 = vadd.f32 %v1297_v7, %v603_v49  ;;  %v514_v58 = vadd.f32 %v503_v45, %v450_v50  ;;  %v515_v59 = vadd.f32 %v504_v46, %v451_v51  ;;  %v465_v60 = vmul.f32 %v1025_v26, %v1249_v23  ;;  %v386_v50 = vld [vmem:[%s1231_s30 + $0x50] sm:$0x1]  ;;  %v1029_v51 = vld [vmem:[%s1231_s30 + $0xa8] sm:$0x1] }
  0x2f   : > { %v466_v63 = vmul.f32 %v1026_v27, %v1249_v23  ;;  %v529_v0 = vmul.f32 %v1036_v32, %v1251_v24  ;;  %v530_v1 = vmul.f32 %v1037_v33, %v1251_v24  ;;  %v593_v2 = vmul.f32 %v1047_v34, %v1253_v25 }
  0x30   : > { %v775_v4 = vpack.c.bf16 %v639_v57, %v638_v52  ;;  %v578_v5 = vadd.f32 %v567_v47, %v514_v58  ;;  %v579_v6 = vadd.f32 %v568_v53, %v515_v59  ;;  %v476_v8 = vadd.f32 %v465_v60, %v412_v55  ;;  %v1040_v57 = vld [vmem:[%s1231_s30 + $0x100] sm:$0x1]  ;;  %v1051_v58 = vld [vmem:[%s1231_s30 + $0x158] sm:$0x1] }
  0x31   : > { %v477_v12 = vadd.f32 %v466_v63, %v413_v56  ;;  %v594_v13 = vmul.f32 %v1048_v43, %v1253_v25  ;;  %v399_v15 = vmul.f32 %v1235_v14, %v384_v61  ;;  %v400_v19 = vmul.f32 %v1235_v14, %v385_v62 }
  0x32   : > { %1114 = vmatprep.mubr.msk.bf16.mxu1 %vm674_vm0, %v775_v4  ;;  %v622_v21 = vadd.f32 %v1282_v54, %v578_v5  ;;  %v623_v26 = vadd.f32 %v1282_v54, %v579_v6  ;;  %v540_v27 = vadd.f32 %v529_v0, %v476_v8  ;;  %v441_v28 = vmul.f32 %v1027_v3, %v1238_v16 }
  0x33   : > { %v541_v30 = vadd.f32 %v530_v1, %v477_v12  ;;  %v442_v31 = vmul.f32 %v1028_v9, %v1238_v16  ;;  %v505_v32 = vmul.f32 %v1038_v10, %v1240_v17  ;;  %v506_v33 = vmul.f32 %v1039_v11, %v1240_v17 }
  0x34   : > { %v648_v34 = vpack.c.bf16 %v623_v26, %v622_v21  ;;  %v604_v35 = vadd.f32 %v593_v2, %v540_v27  ;;  %v452_v36 = vadd.f32 %v441_v28, %v399_v15  ;;  %v569_v37 = vmul.f32 %v1049_v20, %v1242_v18 }
  0x35   : > { %v605_v38 = vadd.f32 %v594_v13, %v541_v30  ;;  %v453_v39 = vadd.f32 %v442_v31, %v400_v19  ;;  %v570_v40 = vmul.f32 %v1050_v29, %v1242_v18  ;;  %v414_v41 = vmul.f32 %v1247_v22, %v384_v61 }
  0x36   : > { %1099 = vmatmul.mubr.msk.bf16.gmra.mrb[4].mxu0 %vm674_vm0, %v648_v34  ;;  %v640_v42 = vadd.f32 %v1297_v7, %v604_v35  ;;  %v516_v43 = vadd.f32 %v505_v32, %v452_v36  ;;  %v415_v44 = vmul.f32 %v1247_v22, %v385_v62  ;;  %v467_v45 = vmul.f32 %v1027_v3, %v1249_v23  ;;  %v1063_v34 = vld [vmem:[%s1508_s8] ss:$0 sm:$0xff] }
  0x37   : > { %v641_v46 = vadd.f32 %v1297_v7, %v605_v38  ;;  %v517_v47 = vadd.f32 %v506_v33, %v453_v39  ;;  %v468_v48 = vmul.f32 %v1028_v9, %v1249_v23  ;;  %v531_v49 = vmul.f32 %v1038_v10, %v1251_v24 }
  0x38   : > { %v580_v52 = vadd.f32 %v569_v37, %v516_v43  ;;  %v478_v53 = vadd.f32 %v467_v45, %v414_v41  ;;  %v532_v55 = vmul.f32 %v1039_v11, %v1251_v24  ;;  %v595_v56 = vmul.f32 %v1049_v20, %v1253_v25 }
  0x39   : > { %v776_v59 = vpack.c.bf16 %v641_v46, %v640_v42  ;;  %v581_v60 = vadd.f32 %v570_v40, %v517_v47  ;;  %v479_v61 = vadd.f32 %v468_v48, %v415_v44  ;;  %v596_v62 = vmul.f32 %v1050_v29, %v1253_v25 }
  0x3a   : > { %v624_v63 = vadd.f32 %v1282_v54, %v580_v52  ;;  %v542_v0 = vadd.f32 %v531_v49, %v478_v53  ;;  %v401_v1 = vmul.f32 %v1235_v14, %v386_v50  ;;  %v443_v2 = vmul.f32 %v1029_v51, %v1238_v16 }
  0x3b   : > { %1115 = vmatmul.mubr.msk.bf16.gmra.mrb[4].mxu1 %vm674_vm0, %v776_v59  ;;  %v625_v3 = vadd.f32 %v1282_v54, %v581_v60  ;;  %v543_v4 = vadd.f32 %v532_v55, %v479_v61  ;;  %v507_v5 = vmul.f32 %v1040_v57, %v1240_v17  ;;  %v571_v6 = vmul.f32 %v1051_v58, %v1242_v18 }
  0x3c   : > { %v606_v8 = vadd.f32 %v595_v56, %v542_v0  ;;  %v454_v9 = vadd.f32 %v443_v2, %v401_v1  ;;  %v416_v10 = vmul.f32 %v1247_v22, %v386_v50  ;;  %v469_v11 = vmul.f32 %v1029_v51, %v1249_v23 }
  0x3d   : > { %v649_v12 = vpack.c.bf16 %v625_v3, %v624_v63  ;;  %v607_v13 = vadd.f32 %v596_v62, %v543_v4  ;;  %v533_v14 = vmul.f32 %v1040_v57, %v1251_v24  ;;  %v597_v20 = vmul.f32 %v1051_v58, %v1253_v25  ;;  %v1429_v25 = vld [vmem:[%s1506_s6] ss:$0 sm:$0xff] }
  0x3e   : > { %v642_v16 = vadd.f32 %v1297_v7, %v606_v8  ;;  %v518_v15 = vadd.f32 %v507_v5, %v454_v9  ;;  %v480_v19 = vadd.f32 %v469_v11, %v416_v10 }
  0x3f   : > { %1102 = vmatprep.mubr.msk.bf16.mxu0 %vm674_vm0, %v649_v12  ;;  %v643_v17 = vadd.f32 %v1297_v7, %v607_v13 }
  0x40   : > { %v582_v18 = vadd.f32 %v571_v6, %v518_v15  ;;  %v544_v21 = vadd.f32 %v533_v14, %v480_v19 }
  0x41   : > { %v777_v22 = vpack.c.bf16 %v643_v17, %v642_v16 }
  0x42   : > { %v626_v23 = vadd.f32 %v1282_v54, %v582_v18  ;;  %v608_v26 = vadd.f32 %v597_v20, %v544_v21 }
  0x43   : > { %1118 = vmatprep.mubr.msk.bf16.mxu1 %vm674_vm0, %v777_v22 }
  0x44   : > { %v650_v24 = vpack.c.bf16 %v626_v23, %v626_v23  ;;  %v644_v27 = vadd.f32 %v1297_v7, %v608_v26 }
  0x46   : > { %1103 = vmatmul.mubr.msk.bf16.gmra.mrb[8].mxu0 %vm674_vm0, %v650_v24  ;;  %v778_v28 = vpack.c.bf16 %v644_v27, %v644_v27 }
  0x48   : > { %1119 = vmatmul.mubr.msk.bf16.gmra.mrb[8].mxu1 %vm674_vm0, %v778_v28 }
  0xf7   : > { %v1096_v54 = vpop.f32.mrb[0].mxu0 }
  0xf8   : > { %v736_v7 = vadd.f32 %v1096_v54, %v1429_v25  ;;  %v727_v29 = vpop.f32.mrb[1].mxu0 }
  0xf9   : > { %v728_v30 = vadd.f32 %v1429_v25, %v727_v29  ;;  %v1097_v31 = vpop.f32.mrb[2].mxu0 }
  0xfa   : > { %902 = vst.msk [vmem:[%s1434_s22 + $0x10] sm:$0xff] %vm674_vm0, %v736_v7  ;;  %v739_v32 = vadd.f32 %v1097_v31, %v1429_v25  ;;  %v730_v33 = vpop.f32.mrb[3].mxu0 }
  0xfb   : > { %900 = vst.msk [vmem:[%s1434_s22] sm:$0xff] %vm674_vm0, %v728_v30  ;;  %v731_v35 = vadd.f32 %v1429_v25, %v730_v33 }
  0xfc   : > { %903 = vst.msk [vmem:[%s1434_s22 + $0x18] sm:$0xff] %vm674_vm0, %v739_v32 }
  0xfd   : > { %v1112_v36 = vpop.f32.mrb[0].mxu1  ;;  %901 = vst.msk [vmem:[%s1434_s22 + $0x8] sm:$0xff] %vm674_vm0, %v731_v35 }
  0xfe   : > { %v863_v37 = vadd.f32 %v1112_v36, %v1063_v34  ;;  %v854_v38 = vpop.f32.mrb[1].mxu1 }
  0xff   : > { %v855_v39 = vadd.f32 %v1063_v34, %v854_v38  ;;  %v1113_v40 = vpop.f32.mrb[2].mxu1 }
 0x100   : > { %914 = vst.msk [vmem:[%s1452_s26 + $0x10] sm:$0xff] %vm674_vm0, %v863_v37  ;;  %v866_v41 = vadd.f32 %v1113_v40, %v1063_v34  ;;  %v857_v42 = vpop.f32.mrb[3].mxu1 }
 0x101   : > { %912 = vst.msk [vmem:[%s1452_s26] sm:$0xff] %vm674_vm0, %v855_v39  ;;  %v858_v43 = vadd.f32 %v1063_v34, %v857_v42 }
 0x102   : > { %915 = vst.msk [vmem:[%s1452_s26 + $0x18] sm:$0xff] %vm674_vm0, %v866_v41 }
 0x103   : > { %913 = vst.msk [vmem:[%s1452_s26 + $0x8] sm:$0xff] %vm674_vm0, %v858_v43 }
 0x109   : > { %v1100_v44 = vpop.f32.mrb[4].mxu0 }
 0x10a   : > { %v752_v45 = vadd.f32 %v1100_v44, %v1429_v25  ;;  %v743_v46 = vpop.f32.mrb[5].mxu0 }
 0x10b   : > { %v744_v47 = vadd.f32 %v1429_v25, %v743_v46  ;;  %v1101_v48 = vpop.f32.mrb[6].mxu0 }
 0x10c   : > { %906 = vst.msk [vmem:[%s1434_s22 + $0x30] sm:$0xff] %vm674_vm0, %v752_v45  ;;  %v755_v49 = vadd.f32 %v1101_v48, %v1429_v25  ;;  %v746_v50 = vpop.f32.mrb[7].mxu0 }
 0x10d   : > { %904 = vst.msk [vmem:[%s1434_s22 + $0x20] sm:$0xff] %vm674_vm0, %v744_v47  ;;  %v747_v51 = vadd.f32 %v1429_v25, %v746_v50 }
 0x10e   : > { %v1116_v52 = vpop.f32.mrb[4].mxu1  ;;  %907 = vst.msk [vmem:[%s1434_s22 + $0x38] sm:$0xff] %vm674_vm0, %v755_v49 }
 0x10f   : > { %v879_v53 = vadd.f32 %v1116_v52, %v1063_v34  ;;  %v870_v55 = vpop.f32.mrb[5].mxu1  ;;  %905 = vst.msk [vmem:[%s1434_s22 + $0x28] sm:$0xff] %vm674_vm0, %v747_v51 }
 0x110   : > { %v871_v56 = vadd.f32 %v1063_v34, %v870_v55  ;;  %v1117_v57 = vpop.f32.mrb[6].mxu1 }
 0x111   : > { %918 = vst.msk [vmem:[%s1452_s26 + $0x30] sm:$0xff] %vm674_vm0, %v879_v53  ;;  %v882_v58 = vadd.f32 %v1117_v57, %v1063_v34  ;;  %v873_v59 = vpop.f32.mrb[7].mxu1 }
 0x112   : > { %916 = vst.msk [vmem:[%s1452_s26 + $0x20] sm:$0xff] %vm674_vm0, %v871_v56  ;;  %v874_v60 = vadd.f32 %v1063_v34, %v873_v59 }
 0x113   : > { %919 = vst.msk [vmem:[%s1452_s26 + $0x38] sm:$0xff] %vm674_vm0, %v882_v58 }
 0x114   : > { %917 = vst.msk [vmem:[%s1452_s26 + $0x28] sm:$0xff] %vm674_vm0, %v874_v60 }
 0x119   : > { %v1104_v61 = vpop.f32.mrb[8].mxu0 }
 0x11a   : > { %v768_v62 = vadd.f32 %v1104_v61, %v1429_v25  ;;  %v759_v63 = vpop.f32.mrb[9].mxu0 }
 0x11b   : > { %v1120_v0 = vpop.f32.mrb[8].mxu1  ;;  %v760_v1 = vadd.f32 %v1429_v25, %v759_v63  ;;  %v1105_v2 = vpop.f32.mrb[10].mxu0 }
 0x11c   : > { %911 = vst.msk [vmem:[%s1434_s22 + $0x50] sm:$0x1] %vm910_vm1, %v768_v62  ;;  %v895_v3 = vadd.f32 %v1120_v0, %v1063_v34  ;;  %v886_v4 = vpop.f32.mrb[9].mxu1  ;;  %v762_v5 = vpop.f32.mrb[11].mxu0 }
 0x11d   : > { %908 = vst.msk [vmem:[%s1434_s22 + $0x40] sm:$0xff] %vm674_vm0, %v760_v1  ;;  %v887_v6 = vadd.f32 %v1063_v34, %v886_v4  ;;  %v1121_v8 = vpop.f32.mrb[10].mxu1  ;;  %v763_v9 = vadd.f32 %v1429_v25, %v762_v5 }
 0x11e   : > { %922 = vst.msk [vmem:[%s1452_s26 + $0x50] sm:$0x1] %vm910_vm1, %v895_v3  ;;  %v889_v10 = vpop.f32.mrb[11].mxu1 }
 0x11f   : > { %920 = vst.msk [vmem:[%s1452_s26 + $0x40] sm:$0xff] %vm674_vm0, %v887_v6  ;;  %909 = vst.msk [vmem:[%s1434_s22 + $0x48] sm:$0xff] %vm674_vm0, %v763_v9  ;;  %v890_v11 = vadd.f32 %v1063_v34, %v889_v10 }
 0x121   : > { %921 = vst.msk [vmem:[%s1452_s26 + $0x48] sm:$0xff] %vm674_vm0, %v890_v11 }
 0x122 PF: > { %s21_s13 = sadd.s32 1, %s1142_s13  }
 0x123   : > { %p18_p4 = scmp.ge.s32.totalorder %s21_s13, 4  }
 0x125   :  { %20 = sbr.rel (!%p18_p4) target bundleno = 1 (0x1), region = 101 }

// kernel: lmhsa_forward.3
= control target key start
LH: loop header
LB: loop body
LE: loop exit
PB: predicated region body
PF: predicated region fallthrough
CT: control target
= control target key end

     0   :  { %s7062_s27 = smov 0   ;;  %s7064_s28 = smov 0   ;;  %s10522_s0 = inlined_call_operand.vmem [shape: f32[2,256,32], index: 0, kind: input, shape index: {}]   ;;  %s10523_s1 = inlined_call_operand.vmem [shape: bf16[32,32], index: 1, kind: input, shape index: {}]   ;;  %s10524_s2 = inlined_call_operand.vmem [shape: f32[1,32], index: 2, kind: input, shape index: {}]   ;;  %s10525_s3 = inlined_call_operand.vmem [shape: f32[2,81,32], index: 3, kind: input, shape index: {}]   ;;  %s10526_s4 = inlined_call_operand.vmem [shape: f32[2,81,32], index: 4, kind: input, shape index: {}]   ;;  %s10527_s5 = inlined_call_operand.vmem [shape: f32[1,4,256,81], index: 5, kind: input, shape index: {}]   ;;  %s10528_s6 = inlined_call_operand.vmem [shape: bf16[32,32], index: 6, kind: input, shape index: {}]   ;;  %s10529_s7 = inlined_call_operand.vmem [shape: f32[1,32], index: 7, kind: input, shape index: {}]   ;;  %s10530_s8 = inlined_call_operand.vmem [shape: f32[2,32,256], index: 8, kind: output, shape index: {}]  }
   0x1   :  { %s7066_s29 = smov 0  }
   0x2 LB: > { %s30_s30 = sadd.s32 1, %s7004_s28  ;;  %p5247_p0 = scmp.ge.s32.totalorder %s7008_s29, 1  ;;  %s7008_s29 = sphi %s7066_s29, %s18_s29   ;;  %s7004_s28 = sphi %s7064_s28, %s11114_s28   ;;  %s7000_s27 = sphi %s7062_s27, %s11113_s27  }
   0x3   : > { %p32_p1 = scmp.ge.s32.totalorder %s30_s30, 2  ;;  %p314_p2 = scmp.lt.s32.totalorder %s7008_s29, 3 }
   0x5   : > { %s11116_s30 = smov (%p32_p1, %s30_s30), 0  ;;  %p315_p3 = pnand %p5247_p0, %p314_p2 }
   0x7   : > { %318 = sbr.rel (%p315_p3) target bundleno = 2008 (0x7d8), region = 52 }
   0xe   : > { %v6470_v0 = vld [vmem:[%s10523_s1] sm:$0xff]   ;;  %p372_p4 = scmp.lt.s32.totalorder %s7000_s27, 1  ;;  %v6471_v1 = vld [vmem:[%s10523_s1 + $0x8] sm:$0xff]   ;;  %vm479_vm0 = vcmask 261120   ;;  %vm771_vm1 = vcmask 64512   ;;  %s7010_s21 = smov 120  }
   0xf   : > { %5732 = vmatprep.subr.bf16.mxu0 %v6470_v0  ;;  %s7011_s22 = smov 112   ;;  %s7012_s23 = smov 104   ;;  %vm1416_vm2 = vcmask 1040384   ;;  %vm999_vm3 = vcmask 662528   ;;  %vm4730_vm4 = vcmask 130048   ;;  %vm4763_vm5 = vcmask 195584  }
  0x10   : > { %s11118_s27 = smov (!%p372_p4, %s7000_s27), 1  ;;  %5733 = vmatpush3.bf16.msra.mxu0 %v6470_v0  ;;  %s7015_s12 = smov 16  }
  0x11   : > { %5734 = vmatprep.subr.bf16.mxu0 %v6471_v1  ;;  %s5518_s13 = sshll.u32 %s11118_s27, 8  ;;  %s6198_s17 = smul.u32 88, %s11118_s27 }
  0x12   : > { %s7092_s16 = scalar_lea.vmem %s10522_s0, %s5518_s13 }
  0x13   : > { %v408_v2 = vld [vmem:[%s7092_s16] sm:$0xff]  ;;  %v409_v3 = vld [vmem:[%s7092_s16 + $0x8] sm:$0xff]  ;;  %v410_v4 = vld [vmem:[%s7092_s16 + $0x10] sm:$0xff]  ;;  %s7113_s20 = scalar_lea.vmem %s10525_s3, %s6198_s17  ;;  %s7211_s26 = scalar_lea.vmem %s10526_s4, %s6198_s17 }
  0x14   : > { %5735 = vmatpush3.bf16.msra.mxu0 %v6471_v1  ;;  %v440_v5 = vpack.c.bf16 %v409_v3, %v408_v2  ;;  %v411_v6 = vld [vmem:[%s7092_s16 + $0x18] sm:$0xff]  ;;  %v412_v7 = vld [vmem:[%s7092_s16 + $0x20] sm:$0xff]  ;;  %v413_v8 = vld [vmem:[%s7092_s16 + $0x28] sm:$0xff]  ;;  %s7016_s17 = smov 24  }
  0x15   : > { %v441_v9 = vpack.c.bf16 %v411_v6, %v410_v4  ;;  %v442_v10 = vpack.c.bf16 %v413_v8, %v412_v7  ;;  %v414_v11 = vld [vmem:[%s7092_s16 + $0x30] sm:$0xff]  ;;  %v415_v12 = vld [vmem:[%s7092_s16 + $0x38] sm:$0xff]  ;;  %v416_v13 = vld [vmem:[%s7092_s16 + $0x40] sm:$0xff] }
  0x16   : > { %5736 = vmatprep.mubr.msk.bf16.mxu0 %vm479_vm0, %v440_v5  ;;  %v417_v14 = vld [vmem:[%s7092_s16 + $0x48] sm:$0xff]  ;;  %v443_v15 = vpack.c.bf16 %v415_v12, %v414_v11  ;;  %v689_v17 = vld [vmem:[%s7113_s20] sm:$0xff]  ;;  %v691_v19 = vld [vmem:[%s7113_s20 + $0x10] sm:$0xff] }
  0x17   : > { %5737 = vmatmul.mubr.msk.bf16.vlgmr.msra.gmra.mrb[0].mxu0 %vm479_vm0, %v441_v9  ;;  %v444_v16 = vpack.c.bf16 %v417_v14, %v416_v13  ;;  %v690_v18 = vld [vmem:[%s7113_s20 + $0x8] sm:$0xff]  ;;  %v692_v20 = vld [vmem:[%s7113_s20 + $0x18] sm:$0xff]  ;;  %v693_v22 = vld [vmem:[%s7113_s20 + $0x20] sm:$0xff] }
  0x18   : > { %5740 = vmatprep.mubr.msk.bf16.mxu0 %vm479_vm0, %v442_v10  ;;  %v7120_v21 = vpack.c.bf16 %v690_v18, %v689_v17  ;;  %v694_v23 = vld [vmem:[%s7113_s20 + $0x28] sm:$0xff]  ;;  %v695_v24 = vld [vmem:[%s7113_s20 + $0x30] sm:$0xff]  ;;  %v419_v26 = vld [vmem:[%s7092_s16 + $0x58] sm:$0xff]  ;;  %v701_v31 = vpack.c.bf16 %v692_v20, %v691_v19 }
  0x19   : > { %v418_v25 = vld [vmem:[%s7092_s16 + $0x50] sm:$0xff]  ;;  %v7128_v27 = vpack.c.bf16 %v694_v23, %v693_v22  ;;  %v696_v28 = vld [vmem:[%s7113_s20 + $0x38] sm:$0xff]  ;;  %v420_v29 = vld [vmem:[%s7092_s16 + $0x60] sm:$0xff] }
  0x1a   : > { %v421_v30 = vld [vmem:[%s7092_s16 + $0x68] sm:$0xff]  ;;  %1670 = vrot.lane.b32.xlu0 %v7120_v21, %s7010_s21  ;;  %6168 = vmatprep.subr.msk.bf16.mxu0 %vm771_vm1, %v7120_v21  ;;  %v821_v32 = vsel %vm771_vm1, %v7120_v21, 0  ;;  %v7141_v33 = vpack.c.bf16 %v696_v28, %v695_v24  ;;  %v697_v34 = vld [vmem:[%s7113_s20 + $0x40] sm:$0xff]  ;;  %v445_v36 = vpack.c.bf16 %v419_v26, %v418_v25  ;;  %v699_v37 = vld [vmem:[%s7113_s20 + $0x50] sm:$0x1]  ;;  %v824_v41 = vsel %vm771_vm1, %v701_v31, 0 }
  0x1b   : > { %1674 = vrot.lane.b32.xlu1 %v7128_v27, %s7010_s21  ;;  %v698_v35 = vld [vmem:[%s7113_s20 + $0x48] sm:$0xff]  ;;  %6169 = vmatprep.subr.msk.bf16.mxu1 %vm771_vm1, %v7120_v21  ;;  %v446_v38 = vpack.c.bf16 %v421_v30, %v420_v29  ;;  %v7155_v40 = vpack.c.bf16 %v699_v37, %v699_v37  ;;  %v422_v42 = vld [vmem:[%s7092_s16 + $0x70] sm:$0xff]  ;;  %v423_v43 = vld [vmem:[%s7092_s16 + $0x78] sm:$0xff]  ;;  %v827_v48 = vsel %vm771_vm1, %v7128_v27, 0  ;;  %s5519_s20 = sshll.u32 %s11118_s27, 6 }
  0x1c   : > { %6162 = vmatpush3.bf16.xpose.msra.mxu1 %v821_v32  ;;  %v7150_v39 = vpack.c.bf16 %v698_v35, %v697_v34  ;;  %v424_v44 = vld [vmem:[%s7092_s16 + $0x80] sm:$0xff]  ;;  %v425_v45 = vld [vmem:[%s7092_s16 + $0x88] sm:$0xff]  ;;  %v447_v46 = vpack.c.bf16 %v423_v43, %v422_v42  ;;  %v426_v49 = vld [vmem:[%s7092_s16 + $0x90] sm:$0xff]  ;;  %v830_v55 = vsel %vm771_vm1, %v7141_v33, 0  ;;  %s405_s24 = scalar_lea.vmem %s10530_s8, %s5519_s20 }
  0x1d   : > { %5769 = vmatpush3.bf16.xpose.msra.mxu0 %v821_v32  ;;  %6171 = vmatprep.subr.msk.bf16.mxu1 %vm771_vm1, %v701_v31  ;;  %v448_v47 = vpack.c.bf16 %v425_v45, %v424_v44  ;;  %v427_v50 = vld [vmem:[%s7092_s16 + $0x98] sm:$0xff]  ;;  %v428_v51 = vld [vmem:[%s7092_s16 + $0xa0] sm:$0xff]  ;;  %v429_v52 = vld [vmem:[%s7092_s16 + $0xa8] sm:$0xff]  ;;  %v836_v25 = vsel %vm771_vm1, %v7155_v40, 0 }
  0x1e   : > { %6170 = vmatprep.subr.msk.bf16.mxu0 %vm771_vm1, %v701_v31  ;;  %1672 = vrot.lane.b32.xlu0 %v701_v31, %s7010_s21  ;;  %v449_v53 = vpack.c.bf16 %v427_v50, %v426_v49  ;;  %v450_v54 = vpack.c.bf16 %v429_v52, %v428_v51  ;;  %v430_v56 = vld [vmem:[%s7092_s16 + $0xb0] sm:$0xff]  ;;  %v431_v57 = vld [vmem:[%s7092_s16 + $0xb8] sm:$0xff]  ;;  %v432_v58 = vld [vmem:[%s7092_s16 + $0xc0] sm:$0xff]  ;;  %v833_v2 = vsel %vm771_vm1, %v7150_v39, 0 }
  0x1f   : > { %5741 = vmatmul.mubr.msk.bf16.gmra.mrb[4].mxu0 %vm479_vm0, %v443_v15  ;;  %1676 = vrot.lane.b32.xlu1 %v7141_v33, %s7010_s21  ;;  %v433_v59 = vld [vmem:[%s7092_s16 + $0xc8] sm:$0xff]  ;;  %v451_v60 = vpack.c.bf16 %v431_v57, %v430_v56  ;;  %v708_v62 = vld [vmem:[%s7211_s26 + $0x10] sm:$0xff]  ;;  %v709_v63 = vld [vmem:[%s7211_s26 + $0x18] sm:$0xff] }
  0x20   : > { %5744 = vmatprep.mubr.msk.bf16.mxu0 %vm479_vm0, %v444_v16  ;;  %v452_v61 = vpack.c.bf16 %v433_v59, %v432_v58  ;;  %v706_v0 = vld [vmem:[%s7211_s26] sm:$0xff]  ;;  %v707_v1 = vld [vmem:[%s7211_s26 + $0x8] sm:$0xff]  ;;  %v434_v3 = vld [vmem:[%s7092_s16 + $0xd0] sm:$0xff]  ;;  %v7235_v7 = vpack.c.bf16 %v709_v63, %v708_v62 }
  0x21   : > { %v435_v4 = vld [vmem:[%s7092_s16 + $0xd8] sm:$0xff]  ;;  %v436_v5 = vld [vmem:[%s7092_s16 + $0xe0] sm:$0xff]  ;;  %v437_v6 = vld [vmem:[%s7092_s16 + $0xe8] sm:$0xff]  ;;  %v7239_v8 = vpack.c.bf16 %v707_v1, %v706_v0  ;;  %v7013_v1 = vmov 0  }
  0x22   : > { %1678 = vrot.lane.b32.xlu0 %v7150_v39, %s7010_s21  ;;  %10694 = vst [vmem:[#allocation2_spill] sm:$0xff] %v7235_v7  ;;  %v710_v9 = vld [vmem:[%s7211_s26 + $0x20] sm:$0xff]  ;;  %v711_v10 = vld [vmem:[%s7211_s26 + $0x28] sm:$0xff]  ;;  %v453_v11 = vpack.c.bf16 %v435_v4, %v434_v3  ;;  %v712_v12 = vld [vmem:[%s7211_s26 + $0x30] sm:$0xff]  ;;  %v454_v14 = vpack.c.bf16 %v437_v6, %v436_v5 }
  0x23   : > { %1680 = vrot.lane.b32.xlu1 %v7155_v40, %s7010_s21  ;;  %10695 = vst [vmem:[#allocation3_spill] sm:$0xff] %v7239_v8  ;;  %v713_v13 = vld [vmem:[%s7211_s26 + $0x38] sm:$0xff]  ;;  %v7249_v15 = vpack.c.bf16 %v711_v10, %v710_v9  ;;  %v714_v17 = vld [vmem:[%s7211_s26 + $0x40] sm:$0xff]  ;;  %v715_v18 = vld [vmem:[%s7211_s26 + $0x48] sm:$0xff] }
  0x24   : > { %6163 = vmatpush3.bf16.xpose.msra.mxu1 %v824_v41  ;;  %v7255_v16 = vpack.c.bf16 %v713_v13, %v712_v12  ;;  %v716_v19 = vld [vmem:[%s7211_s26 + $0x50] sm:$0x1]  ;;  %v7266_v22 = vpack.c.bf16 %v715_v18, %v714_v17 }
  0x25   : > { %5771 = vmatpush3.bf16.xpose.msra.mxu0 %v824_v41  ;;  %6173 = vmatprep.subr.msk.bf16.mxu1 %vm771_vm1, %v7128_v27  ;;  %10696 = vst [vmem:[#allocation4_spill] sm:$0xff] %v7249_v15  ;;  %v438_v20 = vld [vmem:[%s7092_s16 + $0xf0] sm:$0xff]  ;;  %v7270_v23 = vpack.c.bf16 %v716_v19, %v716_v19 }
  0x26   : > { %6172 = vmatprep.subr.msk.bf16.mxu0 %vm771_vm1, %v7128_v27  ;;  %2577 = vrot.lane.b32.xlu0 %v7120_v21, %s7011_s22  ;;  %10697 = vst [vmem:[#allocation5_spill] sm:$0xff] %v7255_v16  ;;  %10698 = vst [vmem:[#allocation6_spill] sm:$0xff] %v7266_v22 }
  0x27   : > { %5745 = vmatmul.mubr.msk.bf16.gmra.mrb[8].mxu0 %vm479_vm0, %v445_v36  ;;  %2579 = vrot.lane.b32.xlu1 %v701_v31, %s7011_s22  ;;  %10699 = vst [vmem:[#allocation7_spill] sm:$0xff] %v7270_v23 }
  0x28   : > { %5748 = vmatprep.mubr.msk.bf16.mxu0 %vm479_vm0, %v446_v38 }
  0x2a   : > { %2581 = vrot.lane.b32.xlu0 %v7128_v27, %s7011_s22 }
  0x2b   : > { %2583 = vrot.lane.b32.xlu1 %v7141_v33, %s7011_s22 }
  0x2c   : > { %6164 = vmatpush3.bf16.xpose.msra.mxu1 %v827_v48 }
  0x2d   : > { %5773 = vmatpush3.bf16.xpose.msra.mxu0 %v827_v48  ;;  %6175 = vmatprep.subr.msk.bf16.mxu1 %vm771_vm1, %v7141_v33 }
  0x2e   : > { %6174 = vmatprep.subr.msk.bf16.mxu0 %vm771_vm1, %v7141_v33  ;;  %2585 = vrot.lane.b32.xlu0 %v7150_v39, %s7011_s22 }
  0x2f   : > { %5749 = vmatmul.mubr.msk.bf16.gmra.mrb[12].mxu0 %vm479_vm0, %v447_v46  ;;  %2587 = vrot.lane.b32.xlu1 %v7155_v40, %s7011_s22 }
  0x30   : > { %5752 = vmatprep.mubr.msk.bf16.mxu0 %vm479_vm0, %v448_v47 }
  0x32   : > { %3478 = vrot.lane.b32.xlu0 %v7120_v21, %s7012_s23  ;;  %v439_v21 = vld [vmem:[%s7092_s16 + $0xf8] sm:$0xff] }
  0x33   : > { %3480 = vrot.lane.b32.xlu1 %v701_v31, %s7012_s23  ;;  %v455_v24 = vpack.c.bf16 %v439_v21, %v438_v20 }
  0x34   : > { %6165 = vmatpush3.bf16.xpose.msra.mxu1 %v830_v55 }
  0x35   : > { %5775 = vmatpush3.bf16.xpose.msra.mxu0 %v830_v55  ;;  %6177 = vmatprep.subr.msk.bf16.mxu1 %vm771_vm1, %v7150_v39 }
  0x36   : > { %6176 = vmatprep.subr.msk.bf16.mxu0 %vm771_vm1, %v7150_v39  ;;  %3482 = vrot.lane.b32.xlu0 %v7128_v27, %s7012_s23 }
  0x37   : > { %5753 = vmatmul.mubr.msk.bf16.gmra.mrb[16].mxu0 %vm479_vm0, %v449_v53  ;;  %3484 = vrot.lane.b32.xlu1 %v7141_v33, %s7012_s23  ;;  %v7309_v33 = vld [vmem:[%s10524_s2] ss:$0 sm:$0xff] }
  0x38   : > { %5756 = vmatprep.mubr.msk.bf16.mxu0 %vm479_vm0, %v450_v54 }
  0x3a   : > { %3486 = vrot.lane.b32.xlu0 %v7150_v39, %s7012_s23 }
  0x3b   : > { %3488 = vrot.lane.b32.xlu1 %v7155_v40, %s7012_s23 }
  0x3c   : > { %6166 = vmatpush3.bf16.xpose.msra.mxu1 %v833_v2 }
  0x3d   : > { %5777 = vmatpush3.bf16.xpose.msra.mxu0 %v833_v2  ;;  %6179 = vmatprep.subr.msk.bf16.mxu1 %vm771_vm1, %v7155_v40  ;;  %v7347_v2 = vsel %vm1416_vm2, 65535, %v7013_v1 }
  0x3e   : > { %6178 = vmatprep.subr.msk.bf16.mxu0 %vm771_vm1, %v7155_v40  ;;  %2285 = vrot.lane.b32.xlu0 %v7235_v7, %s7010_s21  ;;  %10700 = vst [vmem:[#allocation8_spill] sm:$0xff] %v7347_v2  ;;  %v1420_v10 = vand.u32 %v7347_v2, %v7270_v23 }
  0x3f   : > { %5757 = vmatmul.mubr.msk.bf16.gmra.mrb[20].mxu0 %vm479_vm0, %v451_v60  ;;  %2283 = vrot.lane.b32.xlu1 %v7239_v8, %s7010_s21 }
  0x40   : > { %5760 = vmatprep.mubr.msk.bf16.mxu0 %vm479_vm0, %v452_v61 }
  0x42   : > { %2287 = vrot.lane.b32.xlu0 %v7249_v15, %s7010_s21 }
  0x43   : > { %2289 = vrot.lane.b32.xlu1 %v7255_v16, %s7010_s21 }
  0x44   : > { %6167 = vmatpush3.bf16.xpose.msra.mxu1 %v836_v25 }
  0x45   : > { %5779 = vmatpush3.bf16.xpose.msra.mxu0 %v836_v25 }
  0x46   : > { %2291 = vrot.lane.b32.xlu0 %v7266_v22, %s7010_s21  ;;  %5812 = vmatprep.subr.bf16.mxu0 %v7239_v8 }
  0x47   : > { %5761 = vmatmul.mubr.msk.bf16.gmra.mrb[24].mxu0 %vm479_vm0, %v453_v11  ;;  %2293 = vrot.lane.b32.xlu1 %v7270_v23, %s7010_s21 }
  0x48   : > { %5764 = vmatprep.mubr.msk.bf16.mxu0 %vm479_vm0, %v454_v14 }
  0x4a   : > { %3184 = vrot.lane.b32.xlu0 %v7239_v8, %s7011_s22 }
  0x4b   : > { %3186 = vrot.lane.b32.xlu1 %v7235_v7, %s7011_s22 }
  0x4e   : > { %3190 = vrot.lane.b32.xlu0 %v7255_v16, %s7011_s22 }
  0x4f   : > { %5765 = vmatmul.mubr.msk.bf16.gmra.mrb[28].mxu0 %vm479_vm0, %v455_v24  ;;  %3188 = vrot.lane.b32.xlu1 %v7249_v15, %s7011_s22 }
  0x52   : > { %3194 = vrot.lane.b32.xlu0 %v7270_v23, %s7011_s22 }
  0x53   : > { %3192 = vrot.lane.b32.xlu1 %v7266_v22, %s7011_s22 }
  0x8c   : > { %v7292_v26 = vpop.permute.xlu0 %1670 }
  0x8d   : > { %6180 = vmatprep.subr.msk.bf16.mxu1 %vm771_vm1, %v7292_v26  ;;  %v7296_v27 = vpop.permute.xlu1 %1674  ;;  %v1731_v5 = vsel %vm771_vm1, %v7292_v26, 0 }
  0x90   : > { %v1673_v9 = vpop.permute.xlu0 %1672 }
  0x91   : > { %v7298_v28 = vpop.permute.xlu1 %1676  ;;  %v1734_v25 = vsel %vm771_vm1, %v1673_v9, 0 }
  0x95   : > { %v7300_v29 = vpop.permute.xlu1 %1680 }
  0x99   : > { %v7302_v30 = vpop.permute.xlu1 %2579 }
  0x9d   : > { %v7304_v31 = vpop.permute.xlu1 %2583 }
  0xa1   : > { %v7315_v41 = vpop.permute.xlu1 %2587 }
  0xa5   : > { %v7324_v49 = vpop.permute.xlu1 %3480 }
  0xa9   : > { %v7336_v56 = vpop.permute.xlu1 %3484 }
  0xad   : > { %v7350_v4 = vpop.permute.xlu1 %3488 }
  0xb1   : > { %v7369_v20 = vpop.permute.xlu1 %2283 }
  0xea   : > { %v5738_v32 = vpop.f32.mrb[0].mxu0 }
  0xeb   : > { %v562_v34 = vpop.f32.mrb[1].mxu0  ;;  %v571_v36 = vadd.f32 %v5738_v32, %v7309_v33 }
  0xec   : > { %v5739_v35 = vpop.f32.mrb[2].mxu0  ;;  %v563_v39 = vadd.f32 %v7309_v33, %v562_v34 }
  0xed   : > { %v574_v37 = vadd.f32 %v5739_v35, %v7309_v33  ;;  %v565_v38 = vpop.f32.mrb[3].mxu0 }
  0xee   : > { %v566_v40 = vadd.f32 %v7309_v33, %v565_v38 }
  0xef   : > { %v724_v42 = vpack.c.bf16 %v574_v37, %v571_v36 }
  0xf0   : > { %v723_v43 = vpack.c.bf16 %v566_v40, %v563_v39 }
  0xf1   : > { %1634 = vrot.lane.b32.xlu1 %v724_v42, %s7010_s21 }
  0xf2   : > { %v5742_v44 = vpop.f32.mrb[4].mxu0  ;;  %1632 = vrot.lane.b32.xlu0 %v723_v43, %s7010_s21  ;;  %5780 = vmatprep.mubr.msk.bf16.mxu0 %vm771_vm1, %v723_v43 }
  0xf3   : > { %v587_v45 = vadd.f32 %v5742_v44, %v7309_v33  ;;  %v578_v46 = vpop.f32.mrb[5].mxu0  ;;  %5781 = vmatmul.mubr.msk.bf16.vlgmr.msra.gmra.mrb[32].mxu0 %vm771_vm1, %v724_v42 }
  0xf4   : > { %v579_v47 = vadd.f32 %v7309_v33, %v578_v46  ;;  %v5743_v48 = vpop.f32.mrb[6].mxu0  ;;  %5813 = vmatpush3.bf16.msra.mxu0 %v7239_v8 }
  0xf5   : > { %v590_v50 = vadd.f32 %v5743_v48, %v7309_v33  ;;  %2547 = vrot.lane.b32.xlu1 %v724_v42, %s7011_s22  ;;  %v581_v51 = vpop.f32.mrb[7].mxu0  ;;  %5814 = vmatprep.subr.bf16.mxu0 %v7235_v7 }
  0xf6   : > { %v582_v52 = vadd.f32 %v7309_v33, %v581_v51  ;;  %2545 = vrot.lane.b32.xlu0 %v723_v43, %s7011_s22 }
  0xf7   : > { %v726_v53 = vpack.c.bf16 %v590_v50, %v587_v45 }
  0xf8   : > { %v725_v54 = vpack.c.bf16 %v582_v52, %v579_v47  ;;  %5815 = vmatpush3.bf16.msra.mxu0 %v7235_v7 }
  0xf9   : > { %3448 = vrot.lane.b32.xlu1 %v724_v42, %s7012_s23  ;;  %5816 = vmatprep.subr.bf16.mxu0 %v7249_v15 }
  0xfa   : > { %v5746_v55 = vpop.f32.mrb[8].mxu0  ;;  %3446 = vrot.lane.b32.xlu0 %v723_v43, %s7012_s23  ;;  %5784 = vmatprep.mubr.msk.bf16.mxu0 %vm771_vm1, %v725_v54  ;;  %v1737_v43 = vsel %vm771_vm1, %v7296_v27, 0 }
  0xfb   : > { %v603_v57 = vadd.f32 %v5746_v55, %v7309_v33  ;;  %v594_v58 = vpop.f32.mrb[9].mxu0  ;;  %5785 = vmatmul.mubr.msk.bf16.gmra.mrb[36].mxu0 %vm771_vm1, %v726_v53  ;;  %v1740_v55 = vsel %vm771_vm1, %v7298_v28, 0 }
  0xfc   : > { %v595_v59 = vadd.f32 %v7309_v33, %v594_v58  ;;  %v5747_v60 = vpop.f32.mrb[10].mxu0  ;;  %5817 = vmatpush3.bf16.msra.mxu0 %v7249_v15 }
  0xfd   : > { %v606_v61 = vadd.f32 %v5747_v60, %v7309_v33  ;;  %1638 = vrot.lane.b32.xlu1 %v726_v53, %s7010_s21  ;;  %v597_v62 = vpop.f32.mrb[11].mxu0  ;;  %5818 = vmatprep.subr.bf16.mxu0 %v7255_v16 }
  0xfe   : > { %v598_v63 = vadd.f32 %v7309_v33, %v597_v62  ;;  %1636 = vrot.lane.b32.xlu0 %v725_v54, %s7010_s21 }
  0xff   : > { %v728_v0 = vpack.c.bf16 %v606_v61, %v603_v57 }
 0x100   : > { %v727_v3 = vpack.c.bf16 %v598_v63, %v595_v59  ;;  %5819 = vmatpush3.bf16.msra.mxu0 %v7255_v16 }
 0x101   : > { %2551 = vrot.lane.b32.xlu1 %v726_v53, %s7011_s22  ;;  %5820 = vmatprep.subr.bf16.mxu0 %v7266_v22 }
 0x102   : > { %v5750_v6 = vpop.f32.mrb[12].mxu0  ;;  %5788 = vmatprep.mubr.msk.bf16.mxu1 %vm771_vm1, %v727_v3  ;;  %2549 = vrot.lane.b32.xlu0 %v725_v54, %s7011_s22 }
 0x103   : > { %v619_v11 = vadd.f32 %v5750_v6, %v7309_v33  ;;  %v610_v12 = vpop.f32.mrb[13].mxu0  ;;  %5789 = vmatmul.mubr.msk.bf16.vlgmr.msra.gmra.mrb[0].mxu1 %vm771_vm1, %v728_v0 }
 0x104   : > { %v611_v13 = vadd.f32 %v7309_v33, %v610_v12  ;;  %v5751_v14 = vpop.f32.mrb[14].mxu0  ;;  %5857 = vmatpush3.bf16.xpose.msra.mxu1 %v1731_v5  ;;  %5821 = vmatpush3.bf16.msra.mxu0 %v7266_v22 }
 0x105   : > { %v622_v17 = vadd.f32 %v5751_v14, %v7309_v33  ;;  %3452 = vrot.lane.b32.xlu1 %v726_v53, %s7012_s23  ;;  %v613_v18 = vpop.f32.mrb[15].mxu0  ;;  %6181 = vmatprep.subr.msk.bf16.mxu1 %vm771_vm1, %v1673_v9 }
 0x106   : > { %v614_v19 = vadd.f32 %v7309_v33, %v613_v18  ;;  %3450 = vrot.lane.b32.xlu0 %v725_v54, %s7012_s23  ;;  %5822 = vmatprep.subr.bf16.mxu0 %v1420_v10  ;;  %v1679_v54 = vpop.permute.xlu0 %1678 }
 0x107   : > { %v730_v21 = vpack.c.bf16 %v622_v17, %v619_v11  ;;  %v1743_v5 = vsel %vm771_vm1, %v1679_v54, 0 }
 0x108   : > { %v729_v24 = vpack.c.bf16 %v614_v19, %v611_v13  ;;  %5823 = vmatpush3.bf16.msra.mxu0 %v1420_v10 }
 0x109   : > { %1642 = vrot.lane.b32.xlu1 %v728_v0, %s7010_s21  ;;  %5900 = vmatprep.subr.bf16.mxu0 %v7369_v20 }
 0x10a   : > { %v5754_v26 = vpop.f32.mrb[16].mxu0  ;;  %5792 = vmatprep.mubr.msk.bf16.mxu1 %vm771_vm1, %v729_v24  ;;  %1640 = vrot.lane.b32.xlu0 %v727_v3, %s7010_s21  ;;  %v7410_v62 = vpop.permute.xlu0 %2577 }
 0x10b   : > { %v635_v32 = vadd.f32 %v5754_v26, %v7309_v33  ;;  %v626_v34 = vpop.f32.mrb[17].mxu0  ;;  %5793 = vmatmul.mubr.msk.bf16.gmra.mrb[4].mxu1 %vm771_vm1, %v730_v21 }
 0x10c   : > { %v627_v35 = vadd.f32 %v7309_v33, %v626_v34  ;;  %v5755_v36 = vpop.f32.mrb[18].mxu0  ;;  %5859 = vmatpush3.bf16.xpose.msra.mxu1 %v1734_v25  ;;  %v1746_v25 = vsel %vm771_vm1, %v7300_v29, 0  ;;  %v7466_v34 = vpop.permute.xlu1 %2289 }
 0x10d   : > { %v638_v37 = vadd.f32 %v5755_v36, %v7309_v33  ;;  %2555 = vrot.lane.b32.xlu1 %v728_v0, %s7011_s22  ;;  %v629_v38 = vpop.f32.mrb[19].mxu0  ;;  %6182 = vmatprep.subr.msk.bf16.mxu1 %vm771_vm1, %v7296_v27 }
 0x10e   : > { %v630_v39 = vadd.f32 %v7309_v33, %v629_v38  ;;  %2553 = vrot.lane.b32.xlu0 %v727_v3, %s7011_s22  ;;  %v7422_v9 = vpop.permute.xlu0 %2581 }
 0x10f   : > { %v732_v40 = vpack.c.bf16 %v638_v37, %v635_v32 }
 0x110   : > { %v7385_v42 = vpack.c.bf16 %v630_v39, %v627_v35  ;;  %v7473_v36 = vpop.permute.xlu1 %2293 }
 0x111   : > { %3456 = vrot.lane.b32.xlu1 %v728_v0, %s7012_s23  ;;  %10701 = vst [vmem:[#allocation9_spill] sm:$0xff] %v7473_v36 }
 0x112   : > { %v5758_v44 = vpop.f32.mrb[20].mxu0  ;;  %5796 = vmatprep.mubr.msk.bf16.mxu1 %vm771_vm1, %v7385_v42  ;;  %3454 = vrot.lane.b32.xlu0 %v727_v3, %s7012_s23 }
 0x113   : > { %v651_v45 = vadd.f32 %v5758_v44, %v7309_v33  ;;  %v642_v46 = vpop.f32.mrb[21].mxu0  ;;  %5797 = vmatmul.mubr.msk.bf16.gmra.mrb[8].mxu1 %vm771_vm1, %v732_v40 }
 0x114   : > { %v643_v47 = vadd.f32 %v7309_v33, %v642_v46  ;;  %v5759_v48 = vpop.f32.mrb[22].mxu0  ;;  %5861 = vmatpush3.bf16.xpose.msra.mxu1 %v1737_v43  ;;  %v7479_v38 = vpop.permute.xlu1 %3186 }
 0x115   : > { %v654_v50 = vadd.f32 %v5759_v48, %v7309_v33  ;;  %3460 = vrot.lane.b32.xlu1 %v730_v21, %s7012_s23  ;;  %v645_v27 = vpop.f32.mrb[23].mxu0  ;;  %6183 = vmatprep.subr.msk.bf16.mxu1 %vm771_vm1, %v7298_v28  ;;  %10703 = vst [vmem:[#allocation11_spill] sm:$0xff] %v7479_v38 }
 0x116   : > { %v646_v51 = vadd.f32 %v7309_v33, %v645_v27  ;;  %1646 = vrot.lane.b32.xlu0 %v730_v21, %s7010_s21 }
 0x117   : > { %v734_v52 = vpack.c.bf16 %v654_v50, %v651_v45 }
 0x118   : > { %v733_v53 = vpack.c.bf16 %v646_v51, %v643_v47  ;;  %v2638_v47 = vsel %vm771_vm1, %v7410_v62, 0 }
 0x119   : > { %1644 = vrot.lane.b32.xlu1 %v729_v24, %s7010_s21 }
 0x11a   : > { %v5762_v57 = vpop.f32.mrb[24].mxu0  ;;  %5800 = vmatprep.mubr.msk.bf16.mxu1 %vm771_vm1, %v733_v53  ;;  %2559 = vrot.lane.b32.xlu0 %v730_v21, %s7011_s22 }
 0x11b   : > { %v667_v58 = vadd.f32 %v5762_v57, %v7309_v33  ;;  %v658_v59 = vpop.f32.mrb[25].mxu0  ;;  %5801 = vmatmul.mubr.msk.bf16.gmra.mrb[12].mxu1 %vm771_vm1, %v734_v52 }
 0x11c   : > { %v659_v60 = vadd.f32 %v7309_v33, %v658_v59  ;;  %v5763_v61 = vpop.f32.mrb[26].mxu0  ;;  %5863 = vmatpush3.bf16.xpose.msra.mxu1 %v1740_v55 }
 0x11d   : > { %v670_v63 = vadd.f32 %v5763_v61, %v7309_v33  ;;  %v661_v0 = vpop.f32.mrb[27].mxu0  ;;  %2557 = vrot.lane.b32.xlu1 %v729_v24, %s7011_s22  ;;  %6184 = vmatprep.subr.msk.bf16.mxu1 %vm771_vm1, %v1679_v54 }
 0x11e   : > { %v662_v28 = vadd.f32 %v7309_v33, %v661_v0  ;;  %3458 = vrot.lane.b32.xlu0 %v729_v24, %s7012_s23  ;;  %v7434_v24 = vpop.permute.xlu0 %2585 }
 0x11f   : > { %v736_v1 = vpack.c.bf16 %v670_v63, %v667_v58  ;;  %v2644_v58 = vsel %vm771_vm1, %v7422_v9, 0 }
 0x120   : > { %v735_v3 = vpack.c.bf16 %v662_v28, %v659_v60 }
 0x121   : > { %1650 = vrot.lane.b32.xlu1 %v732_v40, %s7010_s21 }
 0x122   : > { %v5766_v6 = vpop.f32.mrb[28].mxu0  ;;  %5804 = vmatprep.mubr.msk.bf16.mxu1 %vm771_vm1, %v735_v3  ;;  %1648 = vrot.lane.b32.xlu0 %v7385_v42, %s7010_s21 }
 0x123   : > { %v683_v10 = vadd.f32 %v5766_v6, %v7309_v33  ;;  %v674_v11 = vpop.f32.mrb[29].mxu0  ;;  %5805 = vmatmul.mubr.msk.bf16.gmra.mrb[16].mxu1 %vm771_vm1, %v736_v1 }
 0x124   : > { %v675_v12 = vadd.f32 %v7309_v33, %v674_v11  ;;  %v5767_v13 = vpop.f32.mrb[30].mxu0  ;;  %5865 = vmatpush3.bf16.xpose.msra.mxu1 %v1743_v5 }
 0x125   : > { %v686_v14 = vadd.f32 %v5767_v13, %v7309_v33  ;;  %v677_v17 = vpop.f32.mrb[31].mxu0  ;;  %2563 = vrot.lane.b32.xlu1 %v732_v40, %s7011_s22  ;;  %6185 = vmatprep.subr.msk.bf16.mxu1 %vm771_vm1, %v7300_v29 }
 0x126   : > { %v678_v18 = vadd.f32 %v7309_v33, %v677_v17  ;;  %2561 = vrot.lane.b32.xlu0 %v7385_v42, %s7011_s22  ;;  %v7447_v33 = vpop.permute.xlu0 %3478 }
 0x127   : > { %v738_v19 = vpack.c.bf16 %v686_v14, %v683_v10  ;;  %v2653_v10 = vsel %vm771_vm1, %v7315_v41, 0 }
 0x128   : > { %v737_v21 = vpack.c.bf16 %v678_v18, %v675_v12 }
 0x129   : > { %3464 = vrot.lane.b32.xlu1 %v732_v40, %s7012_s23  ;;  %v7483_v40 = vpop.permute.xlu1 %3188 }
 0x12a   : > { %5808 = vmatprep.mubr.msk.bf16.mxu1 %vm771_vm1, %v737_v21  ;;  %3462 = vrot.lane.b32.xlu0 %v7385_v42, %s7012_s23  ;;  %v7451_v29 = vpop.permute.xlu0 %3482  ;;  %10705 = vst [vmem:[#allocation13_spill] sm:$0xff] %v7483_v40 }
 0x12b   : > { %5809 = vmatmul.mubr.msk.bf16.gmra.mrb[20].mxu1 %vm771_vm1, %v738_v19 }
 0x12c   : > { %5867 = vmatpush3.bf16.xpose.msra.mxu1 %v1746_v25 }
 0x12d   : > { %3468 = vrot.lane.b32.xlu1 %v734_v52, %s7012_s23  ;;  %6186 = vmatprep.subr.msk.bf16.mxu1 %vm771_vm1, %v7410_v62  ;;  %v7487_v43 = vpop.permute.xlu1 %3192  ;;  %v2647_v62 = vsel %vm771_vm1, %v7304_v31, 0 }
 0x12e   : > { %1654 = vrot.lane.b32.xlu0 %v734_v52, %s7010_s21  ;;  %v7457_v26 = vpop.permute.xlu0 %3486  ;;  %10707 = vst [vmem:[#allocation15_spill] sm:$0xff] %v7487_v43 }
 0x131   : > { %1652 = vrot.lane.b32.xlu1 %v733_v53, %s7010_s21 }
 0x132   : > { %2567 = vrot.lane.b32.xlu0 %v734_v52, %s7011_s22  ;;  %v7461_v32 = vpop.permute.xlu0 %2285  ;;  %v2641_v52 = vsel %vm771_vm1, %v7302_v30, 0 }
 0x135   : > { %2565 = vrot.lane.b32.xlu1 %v733_v53, %s7011_s22 }
 0x136   : > { %3466 = vrot.lane.b32.xlu0 %v733_v53, %s7012_s23  ;;  %v7469_v35 = vpop.permute.xlu0 %2287 }
 0x139   : > { %1658 = vrot.lane.b32.xlu1 %v736_v1, %s7010_s21 }
 0x13a   : > { %1656 = vrot.lane.b32.xlu0 %v735_v3, %s7010_s21  ;;  %v7475_v37 = vpop.permute.xlu0 %2291 }
 0x13b   : > { %10702 = vst [vmem:[#allocation10_spill] sm:$0xff] %v7475_v37 }
 0x13d   : > { %2571 = vrot.lane.b32.xlu1 %v736_v1, %s7011_s22 }
 0x13e   : > { %2569 = vrot.lane.b32.xlu0 %v735_v3, %s7011_s22  ;;  %v7481_v39 = vpop.permute.xlu0 %3184 }
 0x13f   : > { %10704 = vst [vmem:[#allocation12_spill] sm:$0xff] %v7481_v39 }
 0x141   : > { %3472 = vrot.lane.b32.xlu1 %v736_v1, %s7012_s23 }
 0x142   : > { %3470 = vrot.lane.b32.xlu0 %v735_v3, %s7012_s23  ;;  %v7485_v42 = vpop.permute.xlu0 %3190  ;;  %v2650_v3 = vsel %vm771_vm1, %v7434_v24, 0 }
 0x143   : > { %10706 = vst [vmem:[#allocation14_spill] sm:$0xff] %v7485_v42 }
 0x145   : > { %3476 = vrot.lane.b32.xlu1 %v738_v19, %s7012_s23 }
 0x146   : > { %1662 = vrot.lane.b32.xlu0 %v738_v19, %s7010_s21  ;;  %v7489_v44 = vpop.permute.xlu0 %3194 }
 0x147   : > { %10708 = vst [vmem:[#allocation16_spill] sm:$0xff] %v7489_v44 }
 0x149   : > { %1660 = vrot.lane.b32.xlu1 %v737_v21, %s7010_s21 }
 0x14a   : > { %2575 = vrot.lane.b32.xlu0 %v738_v19, %s7011_s22 }
 0x14d   : > { %2573 = vrot.lane.b32.xlu1 %v737_v21, %s7011_s22 }
 0x14e   : > { %3474 = vrot.lane.b32.xlu0 %v737_v21, %s7012_s23 }
 0x163   : > { %v1635_v45 = vpop.permute.xlu1 %1634 }
 0x164   : > { %v1633_v46 = vpop.permute.xlu0 %1632 }
 0x165   : > { %5868 = vmatprep.mubr.msk.bf16.mxu1 %vm771_vm1, %v1633_v46 }
 0x166   : > { %5869 = vmatmul.mubr.msk.bf16.vlgmr.msra.gmra.mrb[24].mxu1 %vm771_vm1, %v1635_v45 }
 0x167   : > { %5945 = vmatpush3.bf16.xpose.msra.mxu1 %v2638_v47  ;;  %v7495_v48 = vpop.permute.xlu1 %2547 }
 0x168   : > { %6187 = vmatprep.subr.msk.bf16.mxu1 %vm771_vm1, %v7302_v30  ;;  %v7499_v50 = vpop.permute.xlu0 %2545 }
 0x16b   : > { %v7501_v27 = vpop.permute.xlu1 %3448 }
 0x16c   : > { %v7503_v51 = vpop.permute.xlu0 %3446 }
 0x16f   : > { %5947 = vmatpush3.bf16.xpose.msra.mxu1 %v2641_v52  ;;  %v1639_v53 = vpop.permute.xlu1 %1638 }
 0x170   : > { %6188 = vmatprep.subr.msk.bf16.mxu1 %vm771_vm1, %v7422_v9  ;;  %v1637_v54 = vpop.permute.xlu0 %1636 }
 0x171   : > { %5872 = vmatprep.mubr.msk.bf16.mxu1 %vm771_vm1, %v1637_v54 }
 0x172   : > { %5873 = vmatmul.mubr.msk.bf16.gmra.mrb[28].mxu1 %vm771_vm1, %v1639_v53 }
 0x173   : > { %v7511_v55 = vpop.permute.xlu1 %2551 }
 0x174   : > { %v7513_v57 = vpop.permute.xlu0 %2549 }
 0x177   : > { %5949 = vmatpush3.bf16.xpose.msra.mxu1 %v2644_v58  ;;  %v7517_v59 = vpop.permute.xlu1 %3452 }
 0x178   : > { %6189 = vmatprep.subr.msk.bf16.mxu1 %vm771_vm1, %v7304_v31  ;;  %v7521_v30 = vpop.permute.xlu0 %3450 }
 0x17b   : > { %v1643_v60 = vpop.permute.xlu1 %1642 }
 0x17c   : > { %v1641_v61 = vpop.permute.xlu0 %1640 }
 0x17d   : > { %5876 = vmatprep.mubr.msk.bf16.mxu1 %vm771_vm1, %v1641_v61 }
 0x17e   : > { %5877 = vmatmul.mubr.msk.bf16.gmra.mrb[32].mxu1 %vm771_vm1, %v1643_v60 }
 0x17f   : > { %5951 = vmatpush3.bf16.xpose.msra.mxu1 %v2647_v62  ;;  %v7527_v63 = vpop.permute.xlu1 %2555 }
 0x180   : > { %6190 = vmatprep.subr.msk.bf16.mxu1 %vm771_vm1, %v7434_v24  ;;  %v7531_v0 = vpop.permute.xlu0 %2553 }
 0x183   : > { %v7533_v28 = vpop.permute.xlu1 %3456 }
 0x184   : > { %v7535_v1 = vpop.permute.xlu0 %3454 }
 0x187   : > { %5953 = vmatpush3.bf16.xpose.msra.mxu1 %v2650_v3  ;;  %v7539_v5 = vpop.permute.xlu1 %3460 }
 0x188   : > { %6191 = vmatprep.subr.msk.bf16.mxu1 %vm771_vm1, %v7315_v41  ;;  %v1647_v31 = vpop.permute.xlu0 %1646 }
 0x18b   : > { %v1645_v6 = vpop.permute.xlu1 %1644 }
 0x18c   : > { %5880 = vmatprep.mubr.msk.bf16.mxu1 %vm771_vm1, %v1645_v6  ;;  %v7544_v9 = vpop.permute.xlu0 %2559  ;;  %v741_v6 = vld [vmem:[%s10527_s5 + $0x10] sm:$0xff] }
 0x18d   : > { %5881 = vmatmul.mubr.msk.bf16.gmra.mrb[36].mxu1 %vm771_vm1, %v1647_v31 }
 0x18f   : > { %5955 = vmatpush3.bf16.xpose.msra.mxu1 %v2653_v10  ;;  %v7549_v11 = vpop.permute.xlu1 %2557  ;;  %v3539_v10 = vsel %vm771_vm1, %v7447_v33, 0 }
 0x190   : > { %6192 = vmatprep.subr.msk.bf16.mxu1 %vm771_vm1, %v7447_v33  ;;  %v7553_v12 = vpop.permute.xlu0 %3458  ;;  %v740_v33 = vld [vmem:[%s10527_s5 + $0x8] sm:$0xff] }
 0x193   : > { %v1651_v13 = vpop.permute.xlu1 %1650 }
 0x194   : > { %v1649_v14 = vpop.permute.xlu0 %1648 }
 0x195   : > { %5884 = vmatprep.mubr.msk.bf16.mxu1 %vm771_vm1, %v1649_v14 }
 0x196   : > { %5885 = vmatmul.mubr.msk.bf16.gmra.mrb[40].mxu1 %vm771_vm1, %v1651_v13 }
 0x197   : > { %v7557_v17 = vpop.permute.xlu1 %2563 }
 0x198   : > { %v7559_v18 = vpop.permute.xlu0 %2561 }
 0x19b   : > { %v7561_v19 = vpop.permute.xlu1 %3464 }
 0x19c   : > { %v7563_v41 = vpop.permute.xlu0 %3462 }
 0x19f   : > { %v7565_v21 = vpop.permute.xlu1 %3468 }
 0x1a0   : > { %v1655_v24 = vpop.permute.xlu0 %1654 }
 0x1a3   : > { %v1653_v25 = vpop.permute.xlu1 %1652 }
 0x1a4   : > { %5888 = vmatprep.mubr.msk.bf16.mxu1 %vm771_vm1, %v1653_v25  ;;  %v7568_v45 = vpop.permute.xlu0 %2567 }
 0x1a5   : > { %5889 = vmatmul.mubr.msk.bf16.gmra.mrb[44].mxu1 %vm771_vm1, %v1655_v24  ;;  %v739_v24 = vld [vmem:[%s10527_s5] sm:$0xff] }
 0x1a7   : > { %v7571_v46 = vpop.permute.xlu1 %2565 }
 0x1a8   : > { %v7573_v47 = vpop.permute.xlu0 %3466 }
 0x1ab   : > { %v1659_v52 = vpop.permute.xlu1 %1658 }
 0x1ac   : > { %v1657_v53 = vpop.permute.xlu0 %1656 }
 0x1ad   : > { %5892 = vmatprep.mubr.msk.bf16.mxu1 %vm771_vm1, %v1657_v53 }
 0x1ae   : > { %5893 = vmatmul.mubr.msk.bf16.gmra.mrb[48].mxu1 %vm771_vm1, %v1659_v52 }
 0x1af   : > { %v7577_v54 = vpop.permute.xlu1 %2571 }
 0x1b0   : > { %v7579_v58 = vpop.permute.xlu0 %2569 }
 0x1b3   : > { %v7581_v60 = vpop.permute.xlu1 %3472 }
 0x1b4   : > { %v7583_v61 = vpop.permute.xlu0 %3470 }
 0x1b7   : > { %v7585_v62 = vpop.permute.xlu1 %3476 }
 0x1b8   : > { %v1663_v31 = vpop.permute.xlu0 %1662 }
 0x1bb   : > { %v1661_v3 = vpop.permute.xlu1 %1660 }
 0x1bc   : > { %5896 = vmatprep.mubr.msk.bf16.mxu1 %vm771_vm1, %v1661_v3  ;;  %v742_v3 = vld [vmem:[%s10527_s5 + $0x18] sm:$0xff] }
 0x1bd   : > { %5897 = vmatmul.mubr.msk.bf16.gmra.mrb[52].mxu1 %vm771_vm1, %v1663_v31 }
 0x1be   : > { %5956 = vmatprep.mubr.msk.bf16.mxu1 %vm771_vm1, %v7499_v50 }
 0x1c5   : > { %5957 = vmatmul.mubr.msk.bf16.vlgmr.msra.gmra.mrb[56].mxu1 %vm771_vm1, %v7495_v48 }
 0x1c6   : > { %6033 = vmatpush3.bf16.xpose.msra.mxu1 %v3539_v10  ;;  %v5782_v13 = vpop.f32.mrb[32].mxu0  ;;  %5960 = vmatprep.mubr.msk.bf16.mxu1 %vm771_vm1, %v7513_v57  ;;  %v3542_v10 = vsel %vm771_vm1, %v7324_v49, 0 }
 0x1c7   : > { %v7600_v14 = vadd.f32 %v5782_v13, %v741_v6  ;;  %6193 = vmatprep.subr.msk.bf16.mxu1 %vm771_vm1, %v7324_v49  ;;  %v872_v50 = vpop.f32.mrb[33].mxu0  ;;  %v745_v6 = vld [vmem:[%s10527_s5 + $0x30] sm:$0xff]  ;;  %v743_v49 = vld [vmem:[%s10527_s5 + $0x20] sm:$0xff] }
 0x1c8   : > { %v5783_v48 = vpop.f32.mrb[34].mxu0  ;;  %v7612_v52 = vadd.f32 %v872_v50, %v739_v24 }
 0x1c9   : > { %v875_v25 = vpop.f32.mrb[35].mxu0  ;;  %v1006_v57 = vsel %vm999_vm3, %v7600_v14, -inf  ;;  %v7628_v13 = vadd.f32 %v5783_v48, %v742_v3  ;;  %v746_v48 = vld [vmem:[%s10527_s5 + $0x38] sm:$0xff] }
 0x1ca   : > { %v7614_v53 = vadd.f32 %v875_v25, %v740_v33  ;;  %1007 = vmax.xlane.f32.xlu0 %v1006_v57  ;;  %v1000_v24 = vsel %vm999_vm3, %v7612_v52, -inf }
 0x1cc   : > { %v1003_v31 = vsel %vm999_vm3, %v7614_v53, -inf }
 0x1cd   : > { %5961 = vmatmul.mubr.msk.bf16.gmra.mrb[60].mxu1 %vm771_vm1, %v7511_v55  ;;  %1004 = vmax.xlane.f32.xlu1 %v1003_v31  ;;  %v1009_v31 = vsel %vm999_vm3, %v7628_v13, -inf }
 0x1ce   : > { %6035 = vmatpush3.bf16.xpose.msra.mxu1 %v3542_v10  ;;  %v5786_v50 = vpop.f32.mrb[36].mxu0  ;;  %5964 = vmatprep.mubr.msk.bf16.mxu1 %vm771_vm1, %v7531_v0  ;;  %v744_v10 = vld [vmem:[%s10527_s5 + $0x28] sm:$0xff] }
 0x1cf   : > { %v7634_v33 = vadd.f32 %v5786_v50, %v745_v6  ;;  %6194 = vmatprep.subr.msk.bf16.mxu1 %vm771_vm1, %v7451_v29  ;;  %1001 = vmax.xlane.f32.xlu0 %v1000_v24  ;;  %v888_v55 = vpop.f32.mrb[37].mxu0  ;;  %v749_v50 = vld [vmem:[%s10527_s5 + $0x50] sm:$0xff]  ;;  %v3545_v24 = vsel %vm771_vm1, %v7451_v29, 0 }
 0x1d0   : > { %v5787_v25 = vpop.f32.mrb[38].mxu0  ;;  %v7646_v3 = vadd.f32 %v888_v55, %v743_v49  ;;  %v747_v55 = vld [vmem:[%s10527_s5 + $0x40] sm:$0xff] }
 0x1d1   : > { %v891_v0 = vpop.f32.mrb[39].mxu0  ;;  %v1018_v57 = vsel %vm999_vm3, %v7634_v33, -inf  ;;  %v7650_v6 = vadd.f32 %v5787_v25, %v746_v48  ;;  %v750_v25 = vld [vmem:[%s10527_s5 + $0x58] sm:$0xff] }
 0x1d2   : > { %1019 = vmax.xlane.f32.xlu1 %v1018_v57  ;;  %v1012_v48 = vsel %vm999_vm3, %v7646_v3, -inf }
 0x1d3   : > { %1010 = vmax.xlane.f32.xlu0 %v1009_v31  ;;  %v1021_v29 = vsel %vm999_vm3, %v7650_v6, -inf }
 0x1d5   : > { %5965 = vmatmul.mubr.msk.bf16.gmra.mrb[64].mxu1 %vm771_vm1, %v7527_v63  ;;  %v7672_v63 = vadd.f32 %v891_v0, %v744_v10 }
 0x1d6   : > { %6037 = vmatpush3.bf16.xpose.msra.mxu1 %v3545_v24  ;;  %v5790_v49 = vpop.f32.mrb[0].mxu1  ;;  %5968 = vmatprep.mubr.msk.bf16.mxu1 %vm771_vm1, %v7549_v11 }
 0x1d7   : > { %v7674_v57 = vadd.f32 %v5790_v49, %v749_v50  ;;  %6195 = vmatprep.subr.msk.bf16.mxu1 %vm771_vm1, %v7336_v56  ;;  %1013 = vmax.xlane.f32.xlu1 %v1012_v48  ;;  %v904_v31 = vpop.f32.mrb[1].mxu1  ;;  %v1015_v10 = vsel %vm999_vm3, %v7672_v63, -inf  ;;  %v748_v50 = vld [vmem:[%s10527_s5 + $0x48] sm:$0xff]  ;;  %v3548_v48 = vsel %vm771_vm1, %v7336_v56, 0 }
 0x1d8   : > { %1022 = vmax.xlane.f32.xlu0 %v1021_v29  ;;  %v7680_v11 = vadd.f32 %v904_v31, %v747_v55  ;;  %v5791_v24 = vpop.f32.mrb[2].mxu1  ;;  %v753_v55 = vld [vmem:[%s10527_s5 + $0x70] sm:$0xff]  ;;  %v751_v29 = vld [vmem:[%s10527_s5 + $0x60] sm:$0xff] }
 0x1d9   : > { %v7682_v23 = vadd.f32 %v5791_v24, %v750_v25  ;;  %v907_v22 = vpop.f32.mrb[3].mxu1  ;;  %v1030_v0 = vsel %vm999_vm3, %v7674_v57, -inf  ;;  %v754_v24 = vld [vmem:[%s10527_s5 + $0x78] sm:$0xff] }
 0x1da   : > { %v1024_v49 = vsel %vm999_vm3, %v7680_v11, -inf }
 0x1db   : > { %1031 = vmax.xlane.f32.xlu1 %v1030_v0  ;;  %v1033_v25 = vsel %vm999_vm3, %v7682_v23, -inf }
 0x1dc   : > { %1016 = vmax.xlane.f32.xlu0 %v1015_v10 }
 0x1dd   : > { %5969 = vmatmul.mubr.msk.bf16.gmra.mrb[68].mxu1 %vm771_vm1, %v7544_v9  ;;  %v7710_v9 = vadd.f32 %v907_v22, %v748_v50  ;;  %v752_v22 = vld [vmem:[%s10527_s5 + $0x68] sm:$0xff] }
 0x1de   : > { %6039 = vmatpush3.bf16.xpose.msra.mxu1 %v3548_v48  ;;  %v5794_v31 = vpop.f32.mrb[4].mxu1  ;;  %5972 = vmatprep.mubr.msk.bf16.mxu1 %vm771_vm1, %v7559_v18 }
 0x1df   : > { %v7712_v0 = vadd.f32 %v5794_v31, %v753_v55  ;;  %6196 = vmatprep.subr.msk.bf16.mxu1 %vm771_vm1, %v7457_v26  ;;  %1025 = vmax.xlane.f32.xlu1 %v1024_v49  ;;  %v920_v56 = vpop.f32.mrb[5].mxu1  ;;  %v1027_v50 = vsel %vm999_vm3, %v7710_v9, -inf  ;;  %v757_v55 = vld [vmem:[%s10527_s5 + $0x90] sm:$0xff] }
 0x1e0   : > { %1034 = vmax.xlane.f32.xlu0 %v1033_v25  ;;  %v7716_v10 = vadd.f32 %v920_v56, %v751_v29  ;;  %v5795_v48 = vpop.f32.mrb[6].mxu1  ;;  %v3551_v29 = vsel %vm771_vm1, %v7457_v26, 0 }
 0x1e1   : > { %v7718_v16 = vadd.f32 %v5795_v48, %v754_v24  ;;  %v1042_v18 = vsel %vm999_vm3, %v7712_v0, -inf  ;;  %v923_v15 = vpop.f32.mrb[7].mxu1  ;;  %v755_v24 = vld [vmem:[%s10527_s5 + $0x80] sm:$0xff] }
 0x1e2   : > { %v1036_v49 = vsel %vm999_vm3, %v7716_v10, -inf  ;;  %v7732_v25 = vadd.f32 %v923_v15, %v752_v22  ;;  %v758_v15 = vld [vmem:[%s10527_s5 + $0x98] sm:$0xff] }
 0x1e3   : > { %1043 = vmax.xlane.f32.xlu1 %v1042_v18  ;;  %v1045_v31 = vsel %vm999_vm3, %v7718_v16, -inf }
 0x1e4   : > { %1028 = vmax.xlane.f32.xlu0 %v1027_v50  ;;  %v1039_v50 = vsel %vm999_vm3, %v7732_v25, -inf }
 0x1e5   : > { %5973 = vmatmul.mubr.msk.bf16.gmra.mrb[72].mxu1 %vm771_vm1, %v7557_v17 }
 0x1e6   : > { %6041 = vmatpush3.bf16.xpose.msra.mxu1 %v3551_v29  ;;  %v5798_v56 = vpop.f32.mrb[8].mxu1  ;;  %5976 = vmatprep.mubr.msk.bf16.mxu1 %vm771_vm1, %v7571_v46 }
 0x1e7   : > { %v7748_v17 = vadd.f32 %v5798_v56, %v757_v55  ;;  %6197 = vmatprep.subr.msk.bf16.mxu1 %vm771_vm1, %v7350_v4  ;;  %1037 = vmax.xlane.f32.xlu1 %v1036_v49  ;;  %v936_v26 = vpop.f32.mrb[9].mxu1  ;;  %v756_v55 = vld [vmem:[%s10527_s5 + $0x88] sm:$0xff]  ;;  %v761_v49 = vld [vmem:[%s10527_s5 + $0xb0] sm:$0xff]  ;;  %v3554_v56 = vsel %vm771_vm1, %v7350_v4, 0 }
 0x1e8   : > { %1046 = vmax.xlane.f32.xlu0 %v1045_v31  ;;  %v7752_v48 = vadd.f32 %v936_v26, %v755_v24  ;;  %v5799_v18 = vpop.f32.mrb[10].mxu1  ;;  %v759_v26 = vld [vmem:[%s10527_s5 + $0xa0] sm:$0xff] }
 0x1e9   : > { %v7754_v22 = vadd.f32 %v5799_v18, %v758_v15  ;;  %v1054_v46 = vsel %vm999_vm3, %v7748_v17, -inf  ;;  %v939_v29 = vpop.f32.mrb[11].mxu1 }
 0x1ea   : > { %v1048_v31 = vsel %vm999_vm3, %v7752_v48, -inf  ;;  %v7768_v24 = vadd.f32 %v939_v29, %v756_v55 }
 0x1eb   : > { %1055 = vmax.xlane.f32.xlu1 %v1054_v46  ;;  %v1057_v15 = vsel %vm999_vm3, %v7754_v22, -inf  ;;  %v762_v46 = vld [vmem:[%s10527_s5 + $0xb8] sm:$0xff] }
 0x1ec   : > { %1040 = vmax.xlane.f32.xlu0 %v1039_v50 }
 0x1ed   : > { %5977 = vmatmul.mubr.msk.bf16.gmra.mrb[76].mxu1 %vm771_vm1, %v7568_v45 }
 0x1ee   : > { %6043 = vmatpush3.bf16.xpose.msra.mxu1 %v3554_v56  ;;  %v5802_v18 = vpop.f32.mrb[12].mxu1  ;;  %5980 = vmatprep.mubr.msk.bf16.mxu1 %vm771_vm1, %v7579_v58  ;;  %v1051_v58 = vsel %vm999_vm3, %v7768_v24, -inf }
 0x1ef   : > { %v7784_v45 = vadd.f32 %v5802_v18, %v761_v49  ;;  %1049 = vmax.xlane.f32.xlu1 %v1048_v31  ;;  %v952_v4 = vpop.f32.mrb[13].mxu1  ;;  %v760_v49 = vld [vmem:[%s10527_s5 + $0xa8] sm:$0xff]  ;;  %v765_v31 = vld [vmem:[%s10527_s5 + $0xd0] sm:$0xff] }
 0x1f0   : > { %1058 = vmax.xlane.f32.xlu0 %v1057_v15  ;;  %v7786_v50 = vadd.f32 %v952_v4, %v759_v26  ;;  %v5803_v29 = vpop.f32.mrb[14].mxu1  ;;  %v2574_v26 = vpop.permute.xlu1 %2573  ;;  %v763_v4 = vld [vmem:[%s10527_s5 + $0xc0] sm:$0xff] }
 0x1f1   : > { %v7788_v55 = vadd.f32 %v5803_v29, %v762_v46  ;;  %v1066_v56 = vsel %vm999_vm3, %v7784_v45, -inf  ;;  %v955_v44 = vpop.f32.mrb[15].mxu1 }
 0x1f2   : > { %v1060_v15 = vsel %vm999_vm3, %v7786_v50, -inf  ;;  %v7802_v18 = vadd.f32 %v955_v44, %v760_v49 }
 0x1f3   : > { %1067 = vmax.xlane.f32.xlu1 %v1066_v56  ;;  %v1069_v46 = vsel %vm999_vm3, %v7788_v55, -inf  ;;  %v766_v56 = vld [vmem:[%s10527_s5 + $0xd8] sm:$0xff] }
 0x1f4   : > { %1052 = vmax.xlane.f32.xlu0 %v1051_v58 }
 0x1f5   : > { %5981 = vmatmul.mubr.msk.bf16.gmra.mrb[80].mxu1 %vm771_vm1, %v7577_v54 }
 0x1f6   : > { %v5806_v29 = vpop.f32.mrb[16].mxu1  ;;  %5984 = vmatprep.mubr.msk.bf16.mxu1 %vm771_vm1, %v2574_v26  ;;  %v1063_v26 = vsel %vm999_vm3, %v7802_v18, -inf }
 0x1f7   : > { %v7815_v58 = vadd.f32 %v5806_v29, %v765_v31  ;;  %1061 = vmax.xlane.f32.xlu1 %v1060_v15  ;;  %v968_v44 = vpop.f32.mrb[17].mxu1  ;;  %v764_v31 = vld [vmem:[%s10527_s5 + $0xc8] sm:$0xff]  ;;  %v2576_v15 = vpop.permute.xlu0 %2575 }
 0x1f8   : > { %1070 = vmax.xlane.f32.xlu0 %v1069_v46  ;;  %v7817_v54 = vadd.f32 %v968_v44, %v763_v4  ;;  %v5807_v49 = vpop.f32.mrb[18].mxu1  ;;  %v769_v46 = vld [vmem:[%s10527_s5 + $0xf0] sm:$0xff] }
 0x1f9   : > { %v7819_v43 = vadd.f32 %v5807_v49, %v766_v56  ;;  %v1078_v42 = vsel %vm999_vm3, %v7815_v58, -inf  ;;  %v971_v7 = vpop.f32.mrb[19].mxu1  ;;  %v770_v49 = vld [vmem:[%s10527_s5 + $0xf8] sm:$0xff] }
 0x1fa   : > { %v1072_v4 = vsel %vm999_vm3, %v7817_v54, -inf  ;;  %v7833_v29 = vadd.f32 %v971_v7, %v764_v31 }
 0x1fb   : > { %1079 = vmax.xlane.f32.xlu1 %v1078_v42  ;;  %v1081_v56 = vsel %vm999_vm3, %v7819_v43, -inf  ;;  %v767_v42 = vld [vmem:[%s10527_s5 + $0xe0] sm:$0xff] }
 0x1fc   : > { %1064 = vmax.xlane.f32.xlu0 %v1063_v26 }
 0x1fd   : > { %5985 = vmatmul.mubr.msk.bf16.gmra.mrb[84].mxu1 %vm771_vm1, %v2576_v15 }
 0x1fe   : > { %v5810_v44 = vpop.f32.mrb[20].mxu1  ;;  %6044 = vmatprep.mubr.msk.bf16.mxu1 %vm771_vm1, %v7503_v51  ;;  %v1075_v51 = vsel %vm999_vm3, %v7833_v29, -inf }
 0x1ff   : > { %v7846_v26 = vadd.f32 %v5810_v44, %v769_v46  ;;  %1073 = vmax.xlane.f32.xlu1 %v1072_v4  ;;  %v984_v7 = vpop.f32.mrb[21].mxu1  ;;  %v768_v46 = vld [vmem:[%s10527_s5 + $0xe8] sm:$0xff] }
 0x200   : > { %1082 = vmax.xlane.f32.xlu0 %v1081_v56  ;;  %v7848_v31 = vadd.f32 %v984_v7, %v767_v42  ;;  %v5811_v15 = vpop.f32.mrb[22].mxu1 }
 0x201   : > { %v7850_v40 = vadd.f32 %v5811_v15, %v770_v49  ;;  %v1090_v8 = vsel %vm999_vm3, %v7846_v26, -inf  ;;  %v987_v38 = vpop.f32.mrb[23].mxu1  ;;  %v5311_v15 = vld [vmem:[%s10527_s5 + $0x130] sm:$0xff] }
 0x202   : > { %v1084_v4 = vsel %vm999_vm3, %v7848_v31, -inf  ;;  %v7863_v56 = vadd.f32 %v987_v38, %v768_v46  ;;  %v3475_v38 = vpop.permute.xlu0 %3474  ;;  %v5312_v46 = vld [vmem:[%s10527_s5 + $0x138] sm:$0xff] }
 0x203   : > { %1091 = vmax.xlane.f32.xlu1 %v1090_v8  ;;  %v1093_v42 = vsel %vm999_vm3, %v7850_v40, -inf }
 0x204   : > { %1076 = vmax.xlane.f32.xlu0 %v1075_v51  ;;  %v1087_v8 = vsel %vm999_vm3, %v7863_v56, -inf  ;;  %v5309_v51 = vld [vmem:[%s10527_s5 + $0x120] sm:$0xff] }
 0x205   : > { %6045 = vmatmul.mubr.msk.bf16.vlgmr.msra.gmra.mrb[88].mxu1 %vm771_vm1, %v7501_v27  ;;  %v5307_v27 = vld [vmem:[%s10527_s5 + $0x110] sm:$0xff] }
 0x206   : > { %6048 = vmatprep.mubr.msk.bf16.mxu1 %vm771_vm1, %v7521_v30  ;;  %v5305_v30 = vld [vmem:[%s10527_s5 + $0x100] sm:$0xff] }
 0x207   : > { %1085 = vmax.xlane.f32.xlu1 %v1084_v4 }
 0x208   : > { %1094 = vmax.xlane.f32.xlu0 %v1093_v42 }
 0x20c   : > { %1088 = vmax.xlane.f32.xlu0 %v1087_v8 }
 0x20d   : > { %6049 = vmatmul.mubr.msk.bf16.gmra.mrb[92].mxu1 %vm771_vm1, %v7517_v59 }
 0x20e   : > { %6052 = vmatprep.mubr.msk.bf16.mxu1 %vm771_vm1, %v7535_v1 }
 0x215   : > { %6053 = vmatmul.mubr.msk.bf16.gmra.mrb[96].mxu1 %vm771_vm1, %v7533_v28  ;;  %v5308_v28 = vld [vmem:[%s10527_s5 + $0x118] sm:$0xff] }
 0x216   : > { %6056 = vmatprep.mubr.msk.bf16.mxu1 %vm771_vm1, %v7553_v12 }
 0x21d   : > { %6057 = vmatmul.mubr.msk.bf16.gmra.mrb[100].mxu1 %vm771_vm1, %v7539_v5 }
 0x21e   : > { %6060 = vmatprep.mubr.msk.bf16.mxu1 %vm771_vm1, %v7563_v41 }
 0x225   : > { %6061 = vmatmul.mubr.msk.bf16.gmra.mrb[104].mxu1 %vm771_vm1, %v7561_v19  ;;  %v5306_v19 = vld [vmem:[%s10527_s5 + $0x108] sm:$0xff] }
 0x226   : > { %6064 = vmatprep.mubr.msk.bf16.mxu1 %vm771_vm1, %v7573_v47 }
 0x22d   : > { %6065 = vmatmul.mubr.msk.bf16.gmra.mrb[108].mxu1 %vm771_vm1, %v7565_v21 }
 0x22e   : > { %6068 = vmatprep.mubr.msk.bf16.mxu1 %vm771_vm1, %v7583_v61 }
 0x235   : > { %6069 = vmatmul.mubr.msk.bf16.gmra.mrb[112].mxu1 %vm771_vm1, %v7581_v60 }
 0x236   : > { %6072 = vmatprep.mubr.msk.bf16.mxu1 %vm771_vm1, %v3475_v38  ;;  %v5310_v38 = vld [vmem:[%s10527_s5 + $0x128] sm:$0xff] }
 0x239   : > { %v5870_v59 = vpop.f32.mrb[24].mxu1 }
 0x23a   : > { %v7903_v1 = vadd.f32 %v5870_v59, %v5307_v27  ;;  %v1782_v5 = vpop.f32.mrb[25].mxu1 }
 0x23b   : > { %v5871_v12 = vpop.f32.mrb[26].mxu1  ;;  %v7908_v41 = vadd.f32 %v5305_v30, %v1782_v5 }
 0x23c   : > { %v7910_v21 = vadd.f32 %v5871_v12, %v5308_v28  ;;  %v1785_v47 = vpop.f32.mrb[27].mxu1  ;;  %v1915_v60 = vsel %vm999_vm3, %v7903_v1, -inf }
 0x23d   : > { %6073 = vmatmul.mubr.msk.bf16.gmra.mrb[116].mxu1 %vm771_vm1, %v7585_v62  ;;  %1916 = vmax.xlane.f32.xlu1 %v1915_v60  ;;  %v7916_v61 = vadd.f32 %v5306_v19, %v1785_v47  ;;  %v1909_v49 = vsel %vm999_vm3, %v7908_v41, -inf  ;;  %v5315_v60 = vld [vmem:[%s10527_s5 + $0x150] sm:$0xff] }
 0x23e   : > { %v1918_v44 = vsel %vm999_vm3, %v7910_v21, -inf }
 0x23f   : > { %1919 = vmax.xlane.f32.xlu0 %v1918_v44  ;;  %v1912_v7 = vsel %vm999_vm3, %v7916_v61, -inf }
 0x241   : > { %1910 = vmax.xlane.f32.xlu1 %v1909_v49  ;;  %v5313_v49 = vld [vmem:[%s10527_s5 + $0x140] sm:$0xff] }
 0x243   : > { %1913 = vmax.xlane.f32.xlu0 %v1912_v7  ;;  %v5316_v7 = vld [vmem:[%s10527_s5 + $0x158] sm:$0xff] }
 0x245   : > { %v5874_v62 = vpop.f32.mrb[28].mxu1 }
 0x246   : > { %v7933_v4 = vadd.f32 %v5874_v62, %v5311_v15  ;;  %v1798_v42 = vpop.f32.mrb[29].mxu1 }
 0x247   : > { %v5875_v8 = vpop.f32.mrb[30].mxu1  ;;  %v7938_v27 = vadd.f32 %v5309_v51, %v1798_v42 }
 0x248   : > { %v7940_v59 = vadd.f32 %v5875_v8, %v5312_v46  ;;  %v1801_v30 = vpop.f32.mrb[31].mxu1  ;;  %v1927_v28 = vsel %vm999_vm3, %v7933_v4, -inf  ;;  %v5314_v46 = vld [vmem:[%s10527_s5 + $0x148] sm:$0xff] }
 0x249   : > { %10709 = vst [vmem:[#allocation17_spill] sm:$0xff] %v7938_v27  ;;  %1928 = vmax.xlane.f32.xlu1 %v1927_v28  ;;  %v7944_v5 = vadd.f32 %v5310_v38, %v1801_v30  ;;  %v1921_v19 = vsel %vm999_vm3, %v7938_v27, -inf }
 0x24a   : > { %10710 = vst [vmem:[#allocation18_spill] sm:$0xff] %v7940_v59  ;;  %v1930_v12 = vsel %vm999_vm3, %v7940_v59, -inf }
 0x24b   : > { %10711 = vst [vmem:[#allocation19_spill] sm:$0xff] %v7944_v5  ;;  %1931 = vmax.xlane.f32.xlu0 %v1930_v12  ;;  %v1924_v47 = vsel %vm999_vm3, %v7944_v5, -inf }
 0x24d   : > { %1922 = vmax.xlane.f32.xlu1 %v1921_v19 }
 0x24f   : > { %1925 = vmax.xlane.f32.xlu0 %v1924_v47 }
 0x251   : > { %v5878_v44 = vpop.f32.mrb[32].mxu1 }
 0x252   : > { %v7961_v15 = vadd.f32 %v5878_v44, %v5315_v60  ;;  %v1814_v62 = vpop.f32.mrb[33].mxu1  ;;  %v5319_v60 = vld [vmem:[%s10527_s5 + $0x170] sm:$0xff] }
 0x253   : > { %v5879_v51 = vpop.f32.mrb[34].mxu1  ;;  %v7966_v42 = vadd.f32 %v5313_v49, %v1814_v62  ;;  %v5317_v49 = vld [vmem:[%s10527_s5 + $0x160] sm:$0xff] }
 0x254   : > { %v7968_v8 = vadd.f32 %v5879_v51, %v5316_v7  ;;  %v1817_v38 = vpop.f32.mrb[35].mxu1  ;;  %v1939_v30 = vsel %vm999_vm3, %v7961_v15, -inf  ;;  %v5320_v7 = vld [vmem:[%s10527_s5 + $0x178] sm:$0xff] }
 0x255   : > { %1940 = vmax.xlane.f32.xlu1 %v1939_v30  ;;  %v7972_v28 = vadd.f32 %v5314_v46, %v1817_v38  ;;  %v1933_v19 = vsel %vm999_vm3, %v7966_v42, -inf  ;;  %v5318_v30 = vld [vmem:[%s10527_s5 + $0x168] sm:$0xff] }
 0x256   : > { %10712 = vst [vmem:[#allocation20_spill] sm:$0xff] %v7968_v8  ;;  %v1942_v12 = vsel %vm999_vm3, %v7968_v8, -inf }
 0x257   : > { %10713 = vst [vmem:[#allocation21_spill] sm:$0xff] %v7972_v28  ;;  %1943 = vmax.xlane.f32.xlu0 %v1942_v12  ;;  %v1936_v47 = vsel %vm999_vm3, %v7972_v28, -inf  ;;  %v1008_v62 = vpop.xlane.xlu0 %1007 }
 0x259   : > { %1934 = vmax.xlane.f32.xlu1 %v1933_v19 }
 0x25b   : > { %1937 = vmax.xlane.f32.xlu0 %v1936_v47 }
 0x260   : > { %v5882_v44 = vpop.f32.mrb[36].mxu1 }
 0x261   : > { %v7989_v51 = vadd.f32 %v5882_v44, %v5319_v60  ;;  %v1830_v46 = vpop.f32.mrb[37].mxu1  ;;  %v1002_v44 = vpop.xlane.xlu0 %1001 }
 0x262   : > { %v5883_v38 = vpop.f32.mrb[38].mxu1  ;;  %v7994_v12 = vadd.f32 %v5317_v49, %v1830_v46  ;;  %v5323_v49 = vld [vmem:[%s10527_s5 + $0x190] sm:$0xff] }
 0x263   : > { %10714 = vst [vmem:[#allocation22_spill] sm:$0xff] %v7989_v51  ;;  %v7996_v19 = vadd.f32 %v5883_v38, %v5320_v7  ;;  %v1833_v47 = vpop.f32.mrb[39].mxu1  ;;  %v1951_v28 = vsel %vm999_vm3, %v7989_v51, -inf  ;;  %v5324_v38 = vld [vmem:[%s10527_s5 + $0x198] sm:$0xff] }
 0x264   : > { %10715 = vst [vmem:[#allocation23_spill] sm:$0xff] %v7994_v12  ;;  %1952 = vmax.xlane.f32.xlu1 %v1951_v28  ;;  %v8000_v39 = vadd.f32 %v5318_v30, %v1833_v47  ;;  %v1945_v5 = vsel %vm999_vm3, %v7994_v12, -inf  ;;  %v5321_v28 = vld [vmem:[%s10527_s5 + $0x180] sm:$0xff] }
 0x265   : > { %10716 = vst [vmem:[#allocation24_spill] sm:$0xff] %v7996_v19  ;;  %v1954_v60 = vsel %vm999_vm3, %v7996_v19, -inf  ;;  %v1011_v59 = vpop.xlane.xlu0 %1010 }
 0x266   : > { %10717 = vst [vmem:[#allocation25_spill] sm:$0xff] %v8000_v39  ;;  %1955 = vmax.xlane.f32.xlu0 %v1954_v60  ;;  %v1948_v46 = vsel %vm999_vm3, %v8000_v39, -inf  ;;  %v1099_v36 = vsub.f32 %v7628_v13, %v1011_v59  ;;  %v5327_v13 = vld [vmem:[%s10527_s5 + $0x1b0] sm:$0xff] }
 0x268   : > { %1946 = vmax.xlane.f32.xlu1 %v1945_v5  ;;  %v5322_v5 = vld [vmem:[%s10527_s5 + $0x188] sm:$0xff] }
 0x269   : > { %v5886_v7 = vpop.f32.mrb[40].mxu1 }
 0x26a   : > { %v8017_v30 = vadd.f32 %v5886_v7, %v5323_v49  ;;  %v1846_v47 = vpop.f32.mrb[41].mxu1  ;;  %1949 = vmax.xlane.f32.xlu0 %v1948_v46  ;;  %v1098_v49 = vsub.f32 %v7600_v14, %v1008_v62  ;;  %v1134_v62 = vmul.f32 1.442695, %v1099_v36 }
 0x26b   : > { %v5887_v60 = vpop.f32.mrb[42].mxu1  ;;  %v8022_v51 = vadd.f32 %v5321_v28, %v1846_v47 }
 0x26c   : > { %10718 = vst [vmem:[#allocation26_spill] sm:$0xff] %v8017_v30  ;;  %v8024_v19 = vadd.f32 %v5887_v60, %v5324_v38  ;;  %v1849_v12 = vpop.f32.mrb[43].mxu1  ;;  %v1963_v39 = vsel %vm999_vm3, %v8017_v30, -inf  ;;  %v1005_v38 = vpop.xlane.xlu1 %1004  ;;  %v1132_v47 = vmul.f32 1.442695, %v1098_v49  ;;  %v1096_v60 = vsub.f32 %v7612_v52, %v1002_v44  ;;  %v5325_v52 = vld [vmem:[%s10527_s5 + $0x1a0] sm:$0xff] }
 0x26d   : > { %10719 = vst [vmem:[#allocation27_spill] sm:$0xff] %v8022_v51  ;;  %1964 = vmax.xlane.f32.xlu1 %v1963_v39  ;;  %v8029_v7 = vadd.f32 %v5322_v5, %v1849_v12  ;;  %v1957_v28 = vsel %vm999_vm3, %v8022_v51, -inf  ;;  %v1097_v14 = vsub.f32 %v7614_v53, %v1005_v38  ;;  %v5328_v44 = vld [vmem:[%s10527_s5 + $0x1b8] sm:$0xff]  ;;  %v1023_v38 = vpop.xlane.xlu0 %1022 }
 0x26e   : > { %10720 = vst [vmem:[#allocation28_spill] sm:$0xff] %v8024_v19  ;;  %v1966_v46 = vsel %vm999_vm3, %v8024_v19, -inf  ;;  %6474 = vpow2.f32 %v1132_v47  ;;  %v1128_v12 = vmul.f32 1.442695, %v1096_v60 }
 0x26f   : > { %10721 = vst [vmem:[#allocation29_spill] sm:$0xff] %v8029_v7  ;;  %1967 = vmax.xlane.f32.xlu0 %v1966_v46  ;;  %v1960_v39 = vsel %vm999_vm3, %v8029_v7, -inf  ;;  %v1130_v59 = vmul.f32 1.442695, %v1097_v14  ;;  %6476 = vpow2.f32 %v1134_v62 }
 0x270   : > { %v1020_v49 = vpop.xlane.xlu1 %1019  ;;  %6478 = vpow2.f32 %v1128_v12 }
 0x271   : > { %1958 = vmax.xlane.f32.xlu1 %v1957_v28  ;;  %v5326_v28 = vld [vmem:[%s10527_s5 + $0x1a8] sm:$0xff]  ;;  %6480 = vpow2.f32 %v1130_v59 }
 0x273   : > { %1961 = vmax.xlane.f32.xlu0 %v1960_v39 }
 0x278   : > { %v5890_v5 = vpop.f32.mrb[44].mxu1 }
 0x279   : > { %v8049_v53 = vadd.f32 %v5890_v5, %v5327_v13  ;;  %v1862_v36 = vpop.f32.mrb[45].mxu1  ;;  %v1102_v13 = vsub.f32 %v7634_v33, %v1020_v49  ;;  %v1014_v5 = vpop.xlane.xlu1 %1013 }
 0x27a   : > { %v5891_v46 = vpop.f32.mrb[46].mxu1  ;;  %v8054_v47 = vadd.f32 %v5325_v52, %v1862_v36  ;;  %v1103_v36 = vsub.f32 %v7650_v6, %v1023_v38  ;;  %v1100_v33 = vsub.f32 %v7646_v3, %v1014_v5 }
 0x27b   : > { %10722 = vst [vmem:[#allocation30_spill] sm:$0xff] %v8049_v53  ;;  %v8056_v60 = vadd.f32 %v5891_v46, %v5328_v44  ;;  %v1865_v39 = vpop.f32.mrb[47].mxu1  ;;  %v1975_v14 = vsel %vm999_vm3, %v8049_v53, -inf  ;;  %v8067_v44 = vpop.eup %6474 }
 0x27c   : > { %10723 = vst [vmem:[#allocation31_spill] sm:$0xff] %v8054_v47  ;;  %1976 = vmax.xlane.f32.xlu1 %v1975_v14  ;;  %v8060_v62 = vadd.f32 %v5326_v28, %v1865_v39  ;;  %v1969_v52 = vsel %vm999_vm3, %v8054_v47, -inf  ;;  %v1017_v46 = vpop.xlane.xlu0 %1016  ;;  %v8072_v39 = vpop.eup %6476  ;;  %v1140_v14 = vmul.f32 1.442695, %v1102_v13  ;;  %v1198_v47 = vsel %vm999_vm3, %v8067_v44, 0.0 }
 0x27d   : > { %10724 = vst [vmem:[#allocation32_spill] sm:$0xff] %v8056_v60  ;;  %v1978_v12 = vsel %vm999_vm3, %v8056_v60, -inf  ;;  %v8077_v53 = vpop.eup %6478  ;;  %v1142_v6 = vmul.f32 1.442695, %v1103_v36  ;;  %v1101_v38 = vsub.f32 %v7672_v63, %v1017_v46  ;;  %v1201_v3 = vsel %vm999_vm3, %v8072_v39, 0.0  ;;  %v1032_v19 = vpop.xlane.xlu1 %1031 }
 0x27e   : > { %10725 = vst [vmem:[#allocation33_spill] sm:$0xff] %v8060_v62  ;;  %1979 = vmax.xlane.f32.xlu0 %v1978_v12  ;;  %v1972_v28 = vsel %vm999_vm3, %v8060_v62, -inf  ;;  %v8085_v13 = vpop.eup %6480  ;;  %6482 = vpow2.f32 %v1140_v14  ;;  %v1136_v5 = vmul.f32 1.442695, %v1100_v33  ;;  %v1192_v63 = vsel %vm999_vm3, %v8077_v53, 0.0 }
 0x27f   : > { %6484 = vpow2.f32 %v1142_v6  ;;  %v1138_v46 = vmul.f32 1.442695, %v1101_v38  ;;  %v1195_v33 = vsel %vm999_vm3, %v8085_v13, 0.0 }
 0x280   : > { %1970 = vmax.xlane.f32.xlu1 %v1969_v52  ;;  %v5331_v52 = vld [vmem:[%s10527_s5 + $0x1d0] sm:$0xff]  ;;  %6486 = vpow2.f32 %v1136_v5  ;;  %v1106_v5 = vsub.f32 %v7674_v57, %v1032_v19 }
 0x281   : > { %v5894_v59 = vpop.f32.mrb[48].mxu1  ;;  %6488 = vpow2.f32 %v1138_v46 }
 0x282   : > { %v1878_v49 = vpop.f32.mrb[49].mxu1  ;;  %1973 = vmax.xlane.f32.xlu0 %v1972_v28  ;;  %v5332_v28 = vld [vmem:[%s10527_s5 + $0x1d8] sm:$0xff]  ;;  %v8090_v36 = vadd.f32 %v5894_v59, %v5331_v52  ;;  %v5330_v59 = vld [vmem:[%s10527_s5 + $0x1c8] sm:$0xff]  ;;  %v1035_v52 = vpop.xlane.xlu0 %1034 }
 0x283   : > { %v5895_v12 = vpop.f32.mrb[50].mxu1 }
 0x284   : > { %v1881_v7 = vpop.f32.mrb[51].mxu1  ;;  %1199 = vadd.xlane.f32.xlu1 %v1198_v47  ;;  %10726 = vst [vmem:[#allocation34_spill] sm:$0xff] %v8090_v36  ;;  %v5329_v47 = vld [vmem:[%s10527_s5 + $0x1c0] sm:$0xff]  ;;  %v8097_v14 = vadd.f32 %v5895_v12, %v5332_v28  ;;  %v1987_v38 = vsel %vm999_vm3, %v8090_v36, -inf  ;;  %v1026_v28 = vpop.xlane.xlu1 %1025  ;;  %v1148_v36 = vmul.f32 1.442695, %v1106_v5 }
 0x285   : > { %v8104_v6 = vadd.f32 %v5329_v47, %v1878_v49  ;;  %v1107_v49 = vsub.f32 %v7682_v23, %v1035_v52  ;;  %v1104_v57 = vsub.f32 %v7680_v11, %v1026_v28 }
 0x286   : > { %1202 = vadd.xlane.f32.xlu0 %v1201_v3  ;;  %10727 = vst [vmem:[#allocation35_spill] sm:$0xff] %v8097_v14  ;;  %v8108_v3 = vadd.f32 %v5330_v59, %v1881_v7  ;;  %v1990_v12 = vsel %vm999_vm3, %v8097_v14, -inf  ;;  %v1029_v46 = vpop.xlane.xlu0 %1028  ;;  %6490 = vpow2.f32 %v1148_v36 }
 0x287   : > { %10728 = vst [vmem:[#allocation36_spill] sm:$0xff] %v8104_v6  ;;  %v1150_v23 = vmul.f32 1.442695, %v1107_v49  ;;  %v1105_v52 = vsub.f32 %v7710_v9, %v1029_v46  ;;  %v1144_v28 = vmul.f32 1.442695, %v1104_v57 }
 0x288   : > { %1193 = vadd.xlane.f32.xlu1 %v1192_v63  ;;  %10729 = vst [vmem:[#allocation37_spill] sm:$0xff] %v8108_v3  ;;  %v1981_v63 = vsel %vm999_vm3, %v8104_v6, -inf  ;;  %v1984_v7 = vsel %vm999_vm3, %v8108_v3, -inf  ;;  %v1044_v36 = vpop.xlane.xlu1 %1043 }
 0x289   : > { %6492 = vpow2.f32 %v1150_v23  ;;  %v1146_v46 = vmul.f32 1.442695, %v1105_v52 }
 0x28a   : > { %1196 = vadd.xlane.f32.xlu0 %v1195_v33  ;;  %v8115_v33 = vpop.eup %6482  ;;  %6494 = vpow2.f32 %v1144_v28  ;;  %v1047_v52 = vpop.xlane.xlu0 %1046 }
 0x28b   : > { %10730 = vst [vmem:[#allocation38_spill] sm:$0xff] %v8115_v33  ;;  %v8120_v59 = vpop.eup %6484  ;;  %v1210_v6 = vsel %vm999_vm3, %v8115_v33, 0.0  ;;  %6496 = vpow2.f32 %v1146_v46 }
 0x28c   : > { %1988 = vmax.xlane.f32.xlu1 %v1987_v38  ;;  %v8125_v51 = vpop.eup %6486  ;;  %v1213_v5 = vsel %vm999_vm3, %v8120_v59, 0.0  ;;  %v1038_v62 = vpop.xlane.xlu1 %1037 }
 0x28d   : > { %v8133_v11 = vpop.eup %6488  ;;  %v1204_v9 = vsel %vm999_vm3, %v8125_v51, 0.0 }
 0x28e   : > { %1991 = vmax.xlane.f32.xlu0 %v1990_v12  ;;  %v1041_v46 = vpop.xlane.xlu0 %1040 }
 0x290   : > { %v5898_v47 = vpop.f32.mrb[52].mxu1  ;;  %1982 = vmax.xlane.f32.xlu1 %v1981_v63  ;;  %v5335_v63 = vld [vmem:[%s10527_s5 + $0x1f0] sm:$0xff] }
 0x291   : > { %v1894_v38 = vpop.f32.mrb[53].mxu1  ;;  %v8138_v49 = vadd.f32 %v5898_v47, %v5335_v63  ;;  %v5334_v47 = vld [vmem:[%s10527_s5 + $0x1e8] sm:$0xff] }
 0x292   : > { %v5899_v19 = vpop.f32.mrb[54].mxu1  ;;  %1985 = vmax.xlane.f32.xlu0 %v1984_v7  ;;  %v5336_v7 = vld [vmem:[%s10527_s5 + $0x1f8] sm:$0xff] }
 0x293   : > { %v1897_v12 = vpop.f32.mrb[55].mxu1  ;;  %10731 = vst [vmem:[#allocation39_spill] sm:$0xff] %v8138_v49  ;;  %v8145_v57 = vadd.f32 %v5899_v19, %v5336_v7  ;;  %v1110_v7 = vsub.f32 %v7712_v0, %v1044_v36  ;;  %v1108_v36 = vsub.f32 %v7716_v10, %v1038_v62 }
 0x294   : > { %1211 = vadd.xlane.f32.xlu1 %v1210_v6  ;;  %v5333_v6 = vld [vmem:[%s10527_s5 + $0x1e0] sm:$0xff]  ;;  %v8156_v19 = vadd.f32 %v5334_v47, %v1897_v12 }
 0x295   : > { %10732 = vst [vmem:[#allocation40_spill] sm:$0xff] %v8145_v57  ;;  %v8152_v63 = vadd.f32 %v5333_v6, %v1894_v38  ;;  %v2002_v28 = vsel %vm999_vm3, %v8145_v57, -inf  ;;  %v8163_v38 = vpop.eup %6490  ;;  %v1111_v6 = vsub.f32 %v7718_v16, %v1047_v52  ;;  %v1156_v0 = vmul.f32 1.442695, %v1110_v7 }
 0x296   : > { %1214 = vadd.xlane.f32.xlu0 %v1213_v5  ;;  %v1207_v5 = vsel %vm999_vm3, %v8133_v11, 0.0  ;;  %10734 = vst [vmem:[#allocation42_spill] sm:$0xff] %v8156_v19  ;;  %10735 = vst [vmem:[#allocation43_spill] sm:$0xff] %v8163_v38  ;;  %v1996_v47 = vsel %vm999_vm3, %v8156_v19, -inf  ;;  %v1222_v16 = vsel %vm999_vm3, %v8163_v38, 0.0  ;;  %v5371_v19 = vld [vmem:[%s10527_s5 + $0x210] sm:$0xff] }
 0x297   : > { %10733 = vst [vmem:[#allocation41_spill] sm:$0xff] %v8152_v63  ;;  %6498 = vpow2.f32 %v1156_v0  ;;  %v1152_v7 = vmul.f32 1.442695, %v1108_v36  ;;  %v1059_v0 = vpop.xlane.xlu0 %1058 }
 0x298   : > { %v5958_v30 = vpop.f32.mrb[56].mxu1  ;;  %1205 = vadd.xlane.f32.xlu1 %v1204_v9  ;;  %v1999_v9 = vsel %vm999_vm3, %v8138_v49, -inf  ;;  %v1109_v49 = vsub.f32 %v7732_v25, %v1041_v46 }
 0x299   : > { %v2689_v3 = vpop.f32.mrb[57].mxu1  ;;  %v8194_v57 = vadd.f32 %v5958_v30, %v5371_v19 }
 0x29a   : > { %v5959_v23 = vpop.f32.mrb[58].mxu1  ;;  %1208 = vadd.xlane.f32.xlu0 %v1207_v5  ;;  %v1993_v5 = vsel %vm999_vm3, %v8152_v63, -inf  ;;  %v1154_v46 = vmul.f32 1.442695, %v1109_v49  ;;  %v5370_v49 = vld [vmem:[%s10527_s5 + $0x208] sm:$0xff] }
 0x29b   : > { %v2692_v14 = vpop.f32.mrb[59].mxu1  ;;  %10739 = vst [vmem:[#allocation47_spill] sm:$0xff] %v8194_v57 }
 0x29c   : > { %2000 = vmax.xlane.f32.xlu1 %v1999_v9  ;;  %v8172_v9 = vpop.eup %6492 }
 0x29d   : > { %10736 = vst [vmem:[#allocation44_spill] sm:$0xff] %v8172_v9  ;;  %v8181_v52 = vpop.eup %6494  ;;  %v1225_v10 = vsel %vm999_vm3, %v8172_v9, 0.0 }
 0x29e   : > { %2003 = vmax.xlane.f32.xlu0 %v2002_v28  ;;  %10737 = vst [vmem:[#allocation45_spill] sm:$0xff] %v8181_v52  ;;  %v8189_v62 = vpop.eup %6496  ;;  %v1216_v25 = vsel %vm999_vm3, %v8181_v52, 0.0  ;;  %v1053_v52 = vpop.xlane.xlu0 %1052 }
 0x29f   : > { %10738 = vst [vmem:[#allocation46_spill] sm:$0xff] %v8189_v62  ;;  %v1219_v30 = vsel %vm999_vm3, %v8189_v62, 0.0 }
 0x2a0   : > { %v8166_v60 = vpop.f32.mrb[60].mxu1  ;;  %1994 = vmax.xlane.f32.xlu1 %v1993_v5  ;;  %v1158_v5 = vmul.f32 1.442695, %v1111_v6  ;;  %v1056_v6 = vpop.xlane.xlu1 %1055 }
 0x2a1   : > { %v8168_v12 = vpop.f32.mrb[61].mxu1  ;;  %v1114_v62 = vsub.f32 %v7748_v17, %v1056_v6 }
 0x2a2   : > { %v8175_v28 = vpop.f32.mrb[62].mxu1  ;;  %1997 = vmax.xlane.f32.xlu0 %v1996_v47  ;;  %v5372_v47 = vld [vmem:[%s10527_s5 + $0x218] sm:$0xff]  ;;  %6500 = vpow2.f32 %v1158_v5 }
 0x2a3   : > { %v8177_v63 = vpop.f32.mrb[63].mxu1  ;;  %v8203_v36 = vadd.f32 %v5959_v23, %v5372_v47  ;;  %6502 = vpow2.f32 %v1152_v7  ;;  %v2822_v23 = vsel %vm999_vm3, %v8194_v57, -inf  ;;  %v1164_v17 = vmul.f32 1.442695, %v1114_v62  ;;  %v5375_v62 = vld [vmem:[%s10527_s5 + $0x230] sm:$0xff] }
 0x2a4   : > { %1223 = vadd.xlane.f32.xlu1 %v1222_v16  ;;  %v5369_v16 = vld [vmem:[%s10527_s5 + $0x200] sm:$0xff]  ;;  %6504 = vpow2.f32 %v1154_v46  ;;  %v1050_v47 = vpop.xlane.xlu1 %1049 }
 0x2a5   : > { %10740 = vst [vmem:[#allocation48_spill] sm:$0xff] %v8203_v36  ;;  %v8214_v5 = vadd.f32 %v5369_v16, %v2689_v3  ;;  %v2825_v7 = vsel %vm999_vm3, %v8203_v36, -inf  ;;  %v8227_v16 = vpop.eup %6498  ;;  %v1112_v6 = vsub.f32 %v7752_v48, %v1050_v47  ;;  %v1113_v36 = vsub.f32 %v7768_v24, %v1053_v52  ;;  %v1071_v48 = vpop.xlane.xlu0 %1070 }
 0x2a6   : > { %1226 = vadd.xlane.f32.xlu0 %v1225_v10  ;;  %10743 = vst [vmem:[#allocation51_spill] sm:$0xff] %v8227_v16  ;;  %6506 = vpow2.f32 %v1164_v17  ;;  %v8259_v24 = vadd.f32 %v8166_v60, %v5375_v62 }
 0x2a7   : > { %10741 = vst [vmem:[#allocation49_spill] sm:$0xff] %v8214_v5  ;;  %v2816_v3 = vsel %vm999_vm3, %v8214_v5, -inf }
 0x2a8   : > { %v8201_v38 = vpop.f32.mrb[64].mxu1  ;;  %1217 = vadd.xlane.f32.xlu1 %v1216_v25  ;;  %v8220_v25 = vadd.f32 %v5370_v49, %v2692_v14  ;;  %10747 = vst [vmem:[#allocation55_spill] sm:$0xff] %v8259_v24 }
 0x2a9   : > { %v8205_v9 = vpop.f32.mrb[65].mxu1  ;;  %v1065_v62 = vpop.xlane.xlu0 %1064 }
 0x2aa   : > { %v8212_v19 = vpop.f32.mrb[66].mxu1  ;;  %1220 = vadd.xlane.f32.xlu0 %v1219_v30  ;;  %10742 = vst [vmem:[#allocation50_spill] sm:$0xff] %v8220_v25  ;;  %v1115_v30 = vsub.f32 %v7754_v22, %v1059_v0  ;;  %v2819_v14 = vsel %vm999_vm3, %v8220_v25, -inf  ;;  %v1234_v22 = vsel %vm999_vm3, %v8227_v16, 0.0  ;;  %v1160_v25 = vmul.f32 1.442695, %v1112_v6 }
 0x2ab   : > { %v8216_v10 = vpop.f32.mrb[67].mxu1  ;;  %v5376_v16 = vld [vmem:[%s10527_s5 + $0x238] sm:$0xff]  ;;  %v1117_v2 = vsub.f32 %v7802_v18, %v1065_v62 }
 0x2ac   : > { %2823 = vmax.xlane.f32.xlu1 %v2822_v23  ;;  %v8236_v49 = vpop.eup %6500  ;;  %v8269_v6 = vadd.f32 %v8175_v28, %v5376_v16  ;;  %v2834_v28 = vsel %vm999_vm3, %v8259_v24, -inf  ;;  %v1119_v24 = vsub.f32 %v7788_v55, %v1071_v48 }
 0x2ad   : > { %10744 = vst [vmem:[#allocation52_spill] sm:$0xff] %v8236_v49  ;;  %v8245_v0 = vpop.eup %6502  ;;  %v1237_v47 = vsel %vm999_vm3, %v8236_v49, 0.0 }
 0x2ae   : > { %2826 = vmax.xlane.f32.xlu0 %v2825_v7  ;;  %v1068_v7 = vpop.xlane.xlu1 %1067  ;;  %10745 = vst [vmem:[#allocation53_spill] sm:$0xff] %v8245_v0  ;;  %v1228_v52 = vsel %vm999_vm3, %v8245_v0, 0.0  ;;  %10748 = vst [vmem:[#allocation56_spill] sm:$0xff] %v8269_v6  ;;  %v2837_v16 = vsel %vm999_vm3, %v8269_v6, -inf }
 0x2b0   : > { %v8230_v57 = vpop.f32.mrb[68].mxu1  ;;  %2817 = vmax.xlane.f32.xlu1 %v2816_v3  ;;  %v1166_v3 = vmul.f32 1.442695, %v1115_v30  ;;  %v1162_v30 = vmul.f32 1.442695, %v1113_v36  ;;  %v5374_v36 = vld [vmem:[%s10527_s5 + $0x228] sm:$0xff] }
 0x2b1   : > { %v8232_v46 = vpop.f32.mrb[69].mxu1 }
 0x2b2   : > { %v8239_v23 = vpop.f32.mrb[70].mxu1  ;;  %2820 = vmax.xlane.f32.xlu0 %v2819_v14  ;;  %v8253_v14 = vpop.eup %6504  ;;  %6508 = vpow2.f32 %v1166_v3 }
 0x2b3   : > { %v8241_v5 = vpop.f32.mrb[71].mxu1  ;;  %10746 = vst [vmem:[#allocation54_spill] sm:$0xff] %v8253_v14  ;;  %v1062_v17 = vpop.xlane.xlu1 %1061  ;;  %v1231_v60 = vsel %vm999_vm3, %v8253_v14, 0.0  ;;  %6510 = vpow2.f32 %v1160_v25  ;;  %v8288_v25 = vadd.f32 %v5374_v36, %v8177_v63  ;;  %v1118_v14 = vsub.f32 %v7784_v45, %v1068_v7 }
 0x2b4   : > { %1235 = vadd.xlane.f32.xlu1 %v1234_v22  ;;  %v5373_v22 = vld [vmem:[%s10527_s5 + $0x220] sm:$0xff]  ;;  %6512 = vpow2.f32 %v1162_v30  ;;  %v8302_v63 = vpop.xlane.xlu0 %1082 }
 0x2b5   : > { %10750 = vst [vmem:[#allocation58_spill] sm:$0xff] %v8288_v25  ;;  %v2831_v45 = vsel %vm999_vm3, %v8288_v25, -inf  ;;  %v5379_v25 = vld [vmem:[%s10527_s5 + $0x250] sm:$0xff] }
 0x2b6   : > { %1238 = vadd.xlane.f32.xlu0 %v1237_v47  ;;  %v8331_v18 = vadd.f32 %v8201_v38, %v5379_v25 }
 0x2b8   : > { %v8266_v49 = vpop.f32.mrb[72].mxu1  ;;  %1229 = vadd.xlane.f32.xlu1 %v1228_v52  ;;  %v8281_v52 = vadd.f32 %v5373_v22, %v8168_v12  ;;  %v8297_v22 = vpop.eup %6506  ;;  %10755 = vst [vmem:[#allocation63_spill] sm:$0xff] %v8331_v18 }
 0x2b9   : > { %v8271_v47 = vpop.f32.mrb[73].mxu1  ;;  %10751 = vst [vmem:[#allocation59_spill] sm:$0xff] %v8297_v22  ;;  %v1246_v55 = vsel %vm999_vm3, %v8297_v22, 0.0  ;;  %v5380_v22 = vld [vmem:[%s10527_s5 + $0x258] sm:$0xff] }
 0x2ba   : > { %v8278_v3 = vpop.f32.mrb[74].mxu1  ;;  %1232 = vadd.xlane.f32.xlu0 %v1231_v60  ;;  %10749 = vst [vmem:[#allocation57_spill] sm:$0xff] %v8281_v52  ;;  %v8293_v60 = vpop.xlane.xlu1 %1079  ;;  %v2828_v12 = vsel %vm999_vm3, %v8281_v52, -inf }
 0x2bb   : > { %v8283_v0 = vpop.f32.mrb[75].mxu1 }
 0x2bc   : > { %2835 = vmax.xlane.f32.xlu1 %v2834_v28  ;;  %v8308_v7 = vpop.eup %6508  ;;  %v1172_v28 = vmul.f32 1.442695, %v1118_v14 }
 0x2bd   : > { %10752 = vst [vmem:[#allocation60_spill] sm:$0xff] %v8308_v7  ;;  %v8317_v48 = vpop.eup %6510 }
 0x2be   : > { %2838 = vmax.xlane.f32.xlu0 %v2837_v16  ;;  %v1116_v16 = vsub.f32 %v7786_v50, %v1062_v17  ;;  %10753 = vst [vmem:[#allocation61_spill] sm:$0xff] %v8317_v48  ;;  %v1074_v14 = vpop.xlane.xlu1 %1073  ;;  %v1249_v50 = vsel %vm999_vm3, %v8308_v7, 0.0  ;;  %v8325_v17 = vpop.eup %6512  ;;  %6514 = vpow2.f32 %v1172_v28  ;;  %v1240_v62 = vsel %vm999_vm3, %v8317_v48, 0.0  ;;  %v5377_v7 = vld [vmem:[%s10527_s5 + $0x240] sm:$0xff] }
 0x2bf   : > { %10754 = vst [vmem:[#allocation62_spill] sm:$0xff] %v8325_v17  ;;  %v1243_v38 = vsel %vm999_vm3, %v8325_v17, 0.0  ;;  %v8353_v48 = vadd.f32 %v5377_v7, %v8205_v9 }
 0x2c0   : > { %v8300_v30 = vpop.f32.mrb[76].mxu1  ;;  %2829 = vmax.xlane.f32.xlu1 %v2828_v12  ;;  %v1174_v12 = vmul.f32 1.442695, %v1119_v24  ;;  %v1077_v24 = vpop.xlane.xlu0 %1076 }
 0x2c1   : > { %v8304_v36 = vpop.f32.mrb[77].mxu1  ;;  %10757 = vst [vmem:[#allocation65_spill] sm:$0xff] %v8353_v48  ;;  %v2840_v9 = vsel %vm999_vm3, %v8353_v48, -inf }
 0x2c2   : > { %v8311_v6 = vpop.f32.mrb[78].mxu1  ;;  %2832 = vmax.xlane.f32.xlu0 %v2831_v45  ;;  %v1168_v45 = vmul.f32 1.442695, %v1116_v16  ;;  %6516 = vpow2.f32 %v1174_v12  ;;  %v8341_v16 = vadd.f32 %v8212_v19, %v5380_v22  ;;  %v1092_v12 = vpop.xlane.xlu1 %1091  ;;  %v2846_v19 = vsel %vm999_vm3, %v8331_v18, -inf }
 0x2c3   : > { %v8313_v52 = vpop.f32.mrb[79].mxu1 }
 0x2c4   : > { %1247 = vadd.xlane.f32.xlu1 %v1246_v55  ;;  %v1170_v55 = vmul.f32 1.442695, %v1117_v2  ;;  %10756 = vst [vmem:[#allocation64_spill] sm:$0xff] %v8341_v16  ;;  %6518 = vpow2.f32 %v1168_v45  ;;  %v5378_v2 = vld [vmem:[%s10527_s5 + $0x248] sm:$0xff]  ;;  %v8359_v22 = vpop.xlane.xlu0 %1094  ;;  %v2849_v17 = vsel %vm999_vm3, %v8341_v16, -inf }
 0x2c5   : > { %v8362_v45 = vadd.f32 %v5378_v2, %v8216_v10 }
 0x2c6   : > { %1250 = vadd.xlane.f32.xlu0 %v1249_v50  ;;  %6520 = vpow2.f32 %v1170_v55  ;;  %v1123_v55 = vsub.f32 %v7819_v43, %v8302_v63  ;;  %v1086_v10 = vpop.xlane.xlu1 %1085 }
 0x2c7   : > { %10758 = vst [vmem:[#allocation66_spill] sm:$0xff] %v8362_v45  ;;  %v2843_v16 = vsel %vm999_vm3, %v8362_v45, -inf  ;;  %v1121_v45 = vsub.f32 %v7833_v29, %v1077_v24  ;;  %v5384_v29 = vld [vmem:[%s10527_s5 + $0x278] sm:$0xff] }
 0x2c8   : > { %v8338_v28 = vpop.f32.mrb[80].mxu1  ;;  %1241 = vadd.xlane.f32.xlu1 %v1240_v62  ;;  %v8370_v7 = vpop.eup %6514  ;;  %v1182_v37 = vmul.f32 1.442695, %v1123_v55 }
 0x2c9   : > { %v8343_v50 = vpop.f32.mrb[81].mxu1  ;;  %10759 = vst [vmem:[#allocation67_spill] sm:$0xff] %v8370_v7  ;;  %v8385_v48 = vpop.xlane.xlu0 %1088  ;;  %v1258_v63 = vsel %vm999_vm3, %v8370_v7, 0.0  ;;  %v1126_v7 = vsub.f32 %v7846_v26, %v1092_v12  ;;  %v8420_v12 = vadd.f32 %v8239_v23, %v5384_v29 }
 0x2ca   : > { %v8350_v25 = vpop.f32.mrb[82].mxu1  ;;  %1244 = vadd.xlane.f32.xlu0 %v1243_v38  ;;  %v1122_v38 = vsub.f32 %v7815_v58, %v8293_v60  ;;  %v1120_v60 = vsub.f32 %v7817_v54, %v1074_v14  ;;  %v8397_v54 = vpop.xlane.xlu1 %1916 }
 0x2cb   : > { %v8355_v62 = vpop.f32.mrb[83].mxu1  ;;  %10764 = vst [vmem:[#allocation72_spill] sm:$0xff] %v8420_v12 }
 0x2cc   : > { %2847 = vmax.xlane.f32.xlu1 %v2846_v19  ;;  %v8380_v18 = vpop.eup %6516  ;;  %v1180_v58 = vmul.f32 1.442695, %v1122_v38  ;;  %v5383_v38 = vld [vmem:[%s10527_s5 + $0x270] sm:$0xff]  ;;  %v1176_v8 = vmul.f32 1.442695, %v1120_v60 }
 0x2cd   : > { %10760 = vst [vmem:[#allocation68_spill] sm:$0xff] %v8380_v18  ;;  %v1261_v14 = vsel %vm999_vm3, %v8380_v18, 0.0  ;;  %v8408_v24 = vadd.f32 %v8230_v57, %v5383_v38  ;;  %v8410_v55 = vpop.xlane.xlu0 %1919  ;;  %v1178_v18 = vmul.f32 1.442695, %v1121_v45  ;;  %v1188_v38 = vmul.f32 1.442695, %v1126_v7 }
 0x2ce   : > { %2850 = vmax.xlane.f32.xlu0 %v2849_v17  ;;  %6522 = vpow2.f32 %v1180_v58  ;;  %v5381_v58 = vld [vmem:[%s10527_s5 + $0x260] sm:$0xff]  ;;  %v5382_v45 = vld [vmem:[%s10527_s5 + $0x268] sm:$0xff]  ;;  %v8435_v23 = vpop.xlane.xlu1 %1910 }
 0x2cf   : > { %10763 = vst [vmem:[#allocation71_spill] sm:$0xff] %v8408_v24  ;;  %6524 = vpow2.f32 %v1182_v37  ;;  %v1124_v37 = vsub.f32 %v7848_v31, %v1086_v10  ;;  %v8442_v31 = vadd.f32 %v5382_v45, %v8241_v5  ;;  %v2861_v10 = vsel %vm999_vm3, %v8420_v12, -inf }
 0x2d0   : > { %v8374_v19 = vpop.f32.mrb[84].mxu1  ;;  %2841 = vmax.xlane.f32.xlu1 %v2840_v9  ;;  %v8391_v9 = vpop.eup %6518  ;;  %6526 = vpow2.f32 %v1176_v8  ;;  %v2858_v8 = vsel %vm999_vm3, %v8408_v24, -inf }
 0x2d1   : > { %v8376_v2 = vpop.f32.mrb[85].mxu1  ;;  %10761 = vst [vmem:[#allocation69_spill] sm:$0xff] %v8391_v9  ;;  %6528 = vpow2.f32 %v1178_v18  ;;  %10766 = vst [vmem:[#allocation74_spill] sm:$0xff] %v8442_v31  ;;  %v8444_v7 = vpop.xlane.xlu0 %1913 }
 0x2d2   : > { %v8383_v17 = vpop.f32.mrb[86].mxu1  ;;  %2844 = vmax.xlane.f32.xlu0 %v2843_v16  ;;  %v8401_v16 = vpop.eup %6520  ;;  %6530 = vpow2.f32 %v1188_v38 }
 0x2d3   : > { %v8387_v43 = vpop.f32.mrb[87].mxu1  ;;  %10762 = vst [vmem:[#allocation70_spill] sm:$0xff] %v8401_v16  ;;  %v1255_v57 = vsel %vm999_vm3, %v8401_v16, 0.0 }
 0x2d4   : > { %1259 = vadd.xlane.f32.xlu1 %v1258_v63  ;;  %v1252_v63 = vsel %vm999_vm3, %v8391_v9, 0.0 }
 0x2d6   : > { %1262 = vadd.xlane.f32.xlu0 %v1261_v14 }
 0x2d8   : > { %v8417_v26 = vpop.f32.mrb[88].mxu1  ;;  %1253 = vadd.xlane.f32.xlu1 %v1252_v63  ;;  %v8433_v63 = vadd.f32 %v5381_v58, %v8232_v46  ;;  %v1184_v46 = vmul.f32 1.442695, %v1124_v37  ;;  %v8448_v58 = vpop.xlane.xlu1 %1928 }
 0x2d9   : > { %v8422_v60 = vpop.f32.mrb[89].mxu1  ;;  %v8452_v16 = vpop.eup %6522 }
 0x2da   : > { %v8430_v14 = vpop.f32.mrb[90].mxu1  ;;  %1256 = vadd.xlane.f32.xlu0 %v1255_v57  ;;  %10765 = vst [vmem:[#allocation73_spill] sm:$0xff] %v8433_v63  ;;  %v2852_v57 = vsel %vm999_vm3, %v8433_v63, -inf  ;;  %10767 = vst [vmem:[#allocation75_spill] sm:$0xff] %v8452_v16  ;;  %v8456_v5 = vpop.xlane.xlu0 %1931  ;;  %6532 = vpow2.f32 %v1184_v46  ;;  %v1270_v63 = vsel %vm999_vm3, %v8452_v16, 0.0  ;;  %v5387_v46 = vld [vmem:[%s10527_s5 + $0x290] sm:$0xff] }
 0x2db   : > { %v8437_v29 = vpop.f32.mrb[91].mxu1  ;;  %10768 = vst [vmem:[#allocation76_spill] sm:$0xff] %v8456_v5  ;;  %v8462_v38 = vpop.eup %6524 }
 0x2dc   : > { %2859 = vmax.xlane.f32.xlu1 %v2858_v8  ;;  %v2855_v8 = vsel %vm999_vm3, %v8442_v31, -inf  ;;  %10769 = vst [vmem:[#allocation77_spill] sm:$0xff] %v8462_v38  ;;  %v8470_v12 = vpop.eup %6526  ;;  %v1273_v24 = vsel %vm999_vm3, %v8462_v38, 0.0  ;;  %v8492_v38 = vadd.f32 %v8266_v49, %v5387_v46 }
 0x2dd   : > { %10770 = vst [vmem:[#allocation78_spill] sm:$0xff] %v8470_v12  ;;  %v8476_v31 = vpop.eup %6528  ;;  %v1264_v16 = vsel %vm999_vm3, %v8470_v12, 0.0  ;;  %v5385_v12 = vld [vmem:[%s10527_s5 + $0x280] sm:$0xff] }
 0x2de   : > { %2862 = vmax.xlane.f32.xlu0 %v2861_v10  ;;  %10772 = vst [vmem:[#allocation80_spill] sm:$0xff] %v8476_v31  ;;  %v8485_v9 = vpop.eup %6530  ;;  %10775 = vst [vmem:[#allocation83_spill] sm:$0xff] %v8492_v38 }
 0x2df   : > { %10774 = vst [vmem:[#allocation82_spill] sm:$0xff] %v8485_v9  ;;  %v1282_v49 = vsel %vm999_vm3, %v8485_v9, 0.0  ;;  %v5388_v9 = vld [vmem:[%s10527_s5 + $0x298] sm:$0xff] }
 0x2e0   : > { %v8454_v18 = vpop.f32.mrb[92].mxu1  ;;  %2853 = vmax.xlane.f32.xlu1 %v2852_v57  ;;  %v8472_v57 = vpop.xlane.xlu1 %1922 }
 0x2e1   : > { %v8458_v45 = vpop.f32.mrb[93].mxu1  ;;  %10771 = vst [vmem:[#allocation79_spill] sm:$0xff] %v8472_v57  ;;  %v5391_v57 = vld [vmem:[%s10527_s5 + $0x2b0] sm:$0xff] }
 0x2e2   : > { %v8464_v37 = vpop.f32.mrb[94].mxu1  ;;  %2856 = vmax.xlane.f32.xlu0 %v2855_v8  ;;  %v8481_v8 = vpop.xlane.xlu0 %1925 }
 0x2e3   : > { %v8466_v10 = vpop.f32.mrb[95].mxu1  ;;  %10773 = vst [vmem:[#allocation81_spill] sm:$0xff] %v8481_v8 }
 0x2e4   : > { %1271 = vadd.xlane.f32.xlu1 %v1270_v63  ;;  %v1127_v63 = vsub.f32 %v7850_v40, %v8359_v22  ;;  %v8494_v33 = vpop.xlane.xlu1 %1940 }
 0x2e6   : > { %1274 = vadd.xlane.f32.xlu0 %v1273_v24  ;;  %v1267_v24 = vsel %vm999_vm3, %v8476_v31, 0.0  ;;  %v8505_v40 = vpop.xlane.xlu0 %1943  ;;  %v1190_v46 = vmul.f32 1.442695, %v1127_v63  ;;  %v1125_v31 = vsub.f32 %v7863_v56, %v8385_v48  ;;  %v8527_v63 = vadd.f32 %v8300_v30, %v5391_v57 }
 0x2e7   : > { %10776 = vst [vmem:[#allocation84_spill] sm:$0xff] %v8505_v40  ;;  %v2870_v40 = vsel %vm999_vm3, %v8492_v38, -inf  ;;  %v8539_v38 = vadd.f32 %v8278_v3, %v5388_v9 }
 0x2e8   : > { %v8489_v5 = vpop.f32.mrb[96].mxu1  ;;  %1265 = vadd.xlane.f32.xlu1 %v1264_v16  ;;  %v8511_v16 = vpop.eup %6532  ;;  %10779 = vst [vmem:[#allocation87_spill] sm:$0xff] %v8527_v63  ;;  %6534 = vpow2.f32 %v1190_v46  ;;  %v2882_v9 = vsel %vm999_vm3, %v8527_v63, -inf  ;;  %v5390_v63 = vld [vmem:[%s10527_s5 + $0x2a8] sm:$0xff] }
 0x2e9   : > { %v8496_v27 = vpop.f32.mrb[97].mxu1  ;;  %10777 = vst [vmem:[#allocation85_spill] sm:$0xff] %v8511_v16  ;;  %v8529_v56 = vpop.xlane.xlu1 %1934  ;;  %v1276_v48 = vsel %vm999_vm3, %v8511_v16, 0.0  ;;  %10780 = vst [vmem:[#allocation88_spill] sm:$0xff] %v8539_v38 }
 0x2ea   : > { %v8503_v8 = vpop.f32.mrb[98].mxu1  ;;  %1268 = vadd.xlane.f32.xlu0 %v1267_v24  ;;  %v8519_v24 = vadd.f32 %v5385_v12, %v8271_v47  ;;  %v5389_v47 = vld [vmem:[%s10527_s5 + $0x2a0] sm:$0xff] }
 0x2eb   : > { %v8507_v22 = vpop.f32.mrb[99].mxu1  ;;  %v8553_v16 = vadd.f32 %v5389_v47, %v8304_v36  ;;  %v2873_v36 = vsel %vm999_vm3, %v8539_v38, -inf }
 0x2ec   : > { %1283 = vadd.xlane.f32.xlu1 %v1282_v49  ;;  %10778 = vst [vmem:[#allocation86_spill] sm:$0xff] %v8519_v24  ;;  %v1186_v49 = vmul.f32 1.442695, %v1125_v31  ;;  %v2864_v57 = vsel %vm999_vm3, %v8519_v24, -inf  ;;  %v5386_v31 = vld [vmem:[%s10527_s5 + $0x288] sm:$0xff]  ;;  %v5392_v24 = vld [vmem:[%s10527_s5 + $0x2b8] sm:$0xff] }
 0x2ed   : > { %10783 = vst [vmem:[#allocation91_spill] sm:$0xff] %v8553_v16  ;;  %v8572_v47 = vadd.f32 %v8311_v6, %v5392_v24  ;;  %v8592_v24 = vadd.f32 %v5390_v63, %v8313_v52  ;;  %v5395_v52 = vld [vmem:[%s10527_s5 + $0x2d0] sm:$0xff] }
 0x2ee   : > { %2871 = vmax.xlane.f32.xlu0 %v2870_v40  ;;  %v8541_v40 = vpop.xlane.xlu0 %1937  ;;  %6536 = vpow2.f32 %v1186_v49  ;;  %v2876_v49 = vsel %vm999_vm3, %v8553_v16, -inf }
 0x2ef   : > { %10781 = vst [vmem:[#allocation89_spill] sm:$0xff] %v8541_v40  ;;  %v8565_v40 = vadd.f32 %v5386_v31, %v8283_v0  ;;  %10787 = vst [vmem:[#allocation95_spill] sm:$0xff] %v8572_v47 }
 0x2f0   : > { %v8536_v12 = vpop.f32.mrb[100].mxu1  ;;  %1277 = vadd.xlane.f32.xlu1 %v1276_v48  ;;  %10790 = vst [vmem:[#allocation98_spill] sm:$0xff] %v8592_v24 }
 0x2f1   : > { %v8543_v30 = vpop.f32.mrb[101].mxu1  ;;  %v8555_v48 = vpop.xlane.xlu1 %1952  ;;  %10785 = vst [vmem:[#allocation93_spill] sm:$0xff] %v8565_v40 }
 0x2f2   : > { %10782 = vst [vmem:[#allocation90_spill] sm:$0xff] %v8543_v30  ;;  %v8550_v46 = vpop.f32.mrb[102].mxu1  ;;  %2865 = vmax.xlane.f32.xlu0 %v2864_v57  ;;  %10784 = vst [vmem:[#allocation92_spill] sm:$0xff] %v8555_v48  ;;  %v8587_v38 = vpop.eup %6534 }
 0x2f3   : > { %v8557_v3 = vpop.f32.mrb[103].mxu1  ;;  %v8567_v57 = vpop.xlane.xlu0 %1955  ;;  %10789 = vst [vmem:[#allocation97_spill] sm:$0xff] %v8587_v38 }
 0x2f4   : > { %2883 = vmax.xlane.f32.xlu1 %v2882_v9  ;;  %10786 = vst [vmem:[#allocation94_spill] sm:$0xff] %v8567_v57  ;;  %v5400_v57 = vld [vmem:[%s10527_s5 + $0x2f8] sm:$0xff] }
 0x2f5   : > { %v8581_v0 = vpop.xlane.xlu1 %1946  ;;  %v8611_v63 = vadd.f32 %v8383_v17, %v5400_v57  ;;  %v5393_v57 = vld [vmem:[%s10527_s5 + $0x2c0] sm:$0xff] }
 0x2f6   : > { %2874 = vmax.xlane.f32.xlu0 %v2873_v36  ;;  %10788 = vst [vmem:[#allocation96_spill] sm:$0xff] %v8581_v0  ;;  %v2867_v36 = vsel %vm999_vm3, %v8565_v40, -inf  ;;  %v1285_v40 = vsel %vm999_vm3, %v8587_v38, 0.0 }
 0x2f7   : > { %v8594_v16 = vpop.xlane.xlu0 %1949  ;;  %10793 = vst [vmem:[#allocation101_spill] sm:$0xff] %v8611_v63 }
 0x2f8   : > { %v8579_v9 = vpop.f32.mrb[104].mxu1  ;;  %2877 = vmax.xlane.f32.xlu1 %v2876_v49  ;;  %10791 = vst [vmem:[#allocation99_spill] sm:$0xff] %v8594_v16  ;;  %v2885_v49 = vsel %vm999_vm3, %v8572_v47, -inf  ;;  %v8605_v0 = vpop.eup %6536  ;;  %v2879_v47 = vsel %vm999_vm3, %v8592_v24, -inf  ;;  %v8623_v16 = vadd.f32 %v8338_v28, %v5395_v52  ;;  %v2909_v28 = vsel %vm999_vm3, %v8611_v63, -inf  ;;  %v5434_v52 = vld [vmem:[%s10527_s5 + $0x308] sm:$0xff] }
 0x2f9   : > { %v8583_v31 = vpop.f32.mrb[105].mxu1  ;;  %10792 = vst [vmem:[#allocation100_spill] sm:$0xff] %v8605_v0  ;;  %v1279_v17 = vsel %vm999_vm3, %v8605_v0, 0.0  ;;  %v8647_v0 = vadd.f32 %v5393_v57, %v8343_v50  ;;  %v5440_v50 = vld [vmem:[%s10527_s5 + $0x338] sm:$0xff] }
 0x2fa   : > { %v8589_v6 = vpop.f32.mrb[106].mxu1  ;;  %2868 = vmax.xlane.f32.xlu0 %v2867_v36  ;;  %v8613_v36 = vpop.xlane.xlu1 %1964  ;;  %10795 = vst [vmem:[#allocation103_spill] sm:$0xff] %v8623_v16 }
 0x2fb   : > { %v8596_v48 = vpop.f32.mrb[107].mxu1  ;;  %10794 = vst [vmem:[#allocation102_spill] sm:$0xff] %v8613_v36  ;;  %10799 = vst [vmem:[#allocation107_spill] sm:$0xff] %v8647_v0 }
 0x2fc   : > { %2886 = vmax.xlane.f32.xlu1 %v2885_v49  ;;  %v5436_v49 = vld [vmem:[%s10527_s5 + $0x318] sm:$0xff]  ;;  %v8625_v30 = vpop.xlane.xlu0 %1967 }
 0x2fd   : > { %10796 = vst [vmem:[#allocation104_spill] sm:$0xff] %v8625_v30  ;;  %v8637_v36 = vadd.f32 %v8430_v14, %v5436_v49  ;;  %v5396_v14 = vld [vmem:[%s10527_s5 + $0x2d8] sm:$0xff]  ;;  %v8657_v49 = vadd.f32 %v5434_v52, %v8437_v29  ;;  %v2888_v29 = vsel %vm999_vm3, %v8647_v0, -inf  ;;  %v5394_v52 = vld [vmem:[%s10527_s5 + $0x2c8] sm:$0xff] }
 0x2fe   : > { %1286 = vadd.xlane.f32.xlu0 %v1285_v40  ;;  %v8649_v30 = vpop.xlane.xlu1 %1958  ;;  %v5438_v0 = vld [vmem:[%s10527_s5 + $0x328] sm:$0xff] }
 0x2ff   : > { %10797 = vst [vmem:[#allocation105_spill] sm:$0xff] %v8637_v36  ;;  %10800 = vst [vmem:[#allocation108_spill] sm:$0xff] %v8657_v49 }
 0x300   : > { %v8620_v38 = vpop.f32.mrb[108].mxu1  ;;  %2880 = vmax.xlane.f32.xlu1 %v2879_v47  ;;  %v8659_v63 = vpop.xlane.xlu0 %1961 }
 0x301   : > { %v8627_v40 = vpop.f32.mrb[109].mxu1  ;;  %10801 = vst [vmem:[#allocation109_spill] sm:$0xff] %v8659_v63 }
 0x302   : > { %v8634_v24 = vpop.f32.mrb[110].mxu1  ;;  %1280 = vadd.xlane.f32.xlu0 %v1279_v17  ;;  %v2894_v17 = vsel %vm999_vm3, %v8623_v16, -inf  ;;  %v8669_v16 = vadd.f32 %v8350_v25, %v5396_v14  ;;  %v3720_v14 = vsel %vm999_vm3, %v8657_v49, -inf }
 0x303   : > { %v8639_v47 = vpop.f32.mrb[111].mxu1 }
 0x304   : > { %10798 = vst [vmem:[#allocation106_spill] sm:$0xff] %v8639_v47  ;;  %2910 = vmax.xlane.f32.xlu1 %v2909_v28  ;;  %v3726_v28 = vsel %vm999_vm3, %v8637_v36, -inf  ;;  %10803 = vst [vmem:[#allocation111_spill] sm:$0xff] %v8669_v16 }
 0x306   : > { %2895 = vmax.xlane.f32.xlu0 %v2894_v17 }
 0x308   : > { %v8666_v57 = vpop.f32.mrb[112].mxu1  ;;  %3727 = vmax.xlane.f32.xlu1 %v3726_v28 }
 0x309   : > { %10802 = vst [vmem:[#allocation110_spill] sm:$0xff] %v8666_v57  ;;  %v8671_v47 = vpop.f32.mrb[113].mxu1  ;;  %v8673_v17 = vpop.xlane.xlu1 %1976  ;;  %v8683_v57 = vadd.f32 %v8464_v37, %v5440_v50  ;;  %v2897_v37 = vsel %vm999_vm3, %v8669_v16, -inf  ;;  %v5399_v50 = vld [vmem:[%s10527_s5 + $0x2f0] sm:$0xff] }
 0x30a   : > { %10804 = vst [vmem:[#allocation112_spill] sm:$0xff] %v8673_v17  ;;  %v8680_v36 = vpop.f32.mrb[114].mxu1  ;;  %2889 = vmax.xlane.f32.xlu0 %v2888_v29  ;;  %v8695_v17 = vadd.f32 %v5394_v52, %v8355_v62  ;;  %v8705_v29 = vadd.f32 %v5438_v0, %v8466_v10  ;;  %v5444_v62 = vld [vmem:[%s10527_s5 + $0x358] sm:$0xff]  ;;  %v8717_v16 = vadd.f32 %v8374_v19, %v5399_v50 }
 0x30b   : > { %10805 = vst [vmem:[#allocation113_spill] sm:$0xff] %v8680_v36  ;;  %10806 = vst [vmem:[#allocation114_spill] sm:$0xff] %v8683_v57  ;;  %v8685_v28 = vpop.f32.mrb[115].mxu1  ;;  %v8687_v25 = vpop.xlane.xlu0 %1979  ;;  %v2007_v0 = vsub.f32 %v7903_v1, %v8397_v54  ;;  %v5442_v1 = vld [vmem:[%s10527_s5 + $0x348] sm:$0xff] }
 0x30c   : > { %3721 = vmax.xlane.f32.xlu1 %v3720_v14  ;;  %10808 = vst [vmem:[#allocation116_spill] sm:$0xff] %v8705_v29  ;;  %v3738_v14 = vsel %vm999_vm3, %v8683_v57, -inf  ;;  %10810 = vst [vmem:[#allocation118_spill] sm:$0xff] %v8717_v16  ;;  %v2891_v10 = vsel %vm999_vm3, %v8695_v17, -inf  ;;  %v5397_v57 = vld [vmem:[%s10527_s5 + $0x2e0] sm:$0xff] }
 0x30d   : > { %v8697_v36 = vpop.xlane.xlu1 %1970  ;;  %v8741_v54 = vadd.f32 %v5397_v57, %v8376_v2 }
 0x30e   : > { %10807 = vst [vmem:[#allocation115_spill] sm:$0xff] %v8697_v36  ;;  %2898 = vmax.xlane.f32.xlu0 %v2897_v37 }
 0x30f   : > { %v8707_v49 = vpop.xlane.xlu0 %1973 }
 0x310   : > { %v8714_v52 = vpop.f32.mrb[116].mxu1  ;;  %3739 = vmax.xlane.f32.xlu1 %v3738_v14  ;;  %v8731_v14 = vadd.f32 %v8503_v8, %v5444_v62  ;;  %v2906_v8 = vsel %vm999_vm3, %v8717_v16, -inf  ;;  %v2041_v62 = vmul.f32 1.442695, %v2007_v0  ;;  %v5448_v0 = vld [vmem:[%s10527_s5 + $0x378] sm:$0xff] }
 0x311   : > { %10809 = vst [vmem:[#allocation117_spill] sm:$0xff] %v8714_v52  ;;  %v8719_v36 = vpop.f32.mrb[117].mxu1  ;;  %v1200_v37 = vpop.xlane.xlu1 %1199  ;;  %v3732_v52 = vsel %vm999_vm3, %v8705_v29, -inf  ;;  %v5398_v29 = vld [vmem:[%s10527_s5 + $0x2e8] sm:$0xff] }
 0x312   : > { %v8728_v63 = vpop.f32.mrb[118].mxu1  ;;  %2892 = vmax.xlane.f32.xlu0 %v2891_v10  ;;  %10812 = vst [vmem:[#allocation120_spill] sm:$0xff] %v8731_v14  ;;  %v2005_v10 = vsub.f32 %v7908_v41, %v8435_v23  ;;  %v3750_v57 = vsel %vm999_vm3, %v8731_v14, -inf  ;;  %v8759_v41 = vadd.f32 %v5398_v29, %v8387_v43  ;;  %v5446_v29 = vld [vmem:[%s10527_s5 + $0x368] sm:$0xff] }
 0x313   : > { %10811 = vst [vmem:[#allocation119_spill] sm:$0xff] %v8728_v63  ;;  %v8733_v19 = vpop.f32.mrb[119].mxu1  ;;  %v1203_v50 = vpop.xlane.xlu0 %1202 }
 0x314   : > { %3733 = vmax.xlane.f32.xlu1 %v3732_v52  ;;  %6538 = vrcp.f32 %v1203_v50  ;;  %v8751_v52 = vadd.f32 %v5442_v1, %v8507_v22  ;;  %10814 = vst [vmem:[#allocation122_spill] sm:$0xff] %v8759_v41  ;;  %v2900_v22 = vsel %vm999_vm3, %v8741_v54, -inf  ;;  %v8769_v50 = vadd.f32 %v8550_v46, %v5448_v0  ;;  %v5433_v46 = vld [vmem:[%s10527_s5 + $0x300] sm:$0xff] }
 0x315   : > { %v1194_v63 = vpop.xlane.xlu1 %1193 }
 0x316   : > { %6540 = vrcp.f32 %v1194_v63  ;;  %2907 = vmax.xlane.f32.xlu0 %v2906_v8  ;;  %10813 = vst [vmem:[#allocation121_spill] sm:$0xff] %v8751_v52  ;;  %v2037_v63 = vmul.f32 1.442695, %v2005_v10  ;;  %10815 = vst [vmem:[#allocation123_spill] sm:$0xff] %v8769_v50  ;;  %v3744_v43 = vsel %vm999_vm3, %v8751_v52, -inf  ;;  %v2903_v10 = vsel %vm999_vm3, %v8759_v41, -inf }
 0x317   : > { %6542 = vrcp.f32 %v1200_v37  ;;  %v1197_v2 = vpop.xlane.xlu0 %1196  ;;  %v5435_v37 = vld [vmem:[%s10527_s5 + $0x310] sm:$0xff] }
 0x318   : > { %6544 = vrcp.f32 %v1197_v2  ;;  %3751 = vmax.xlane.f32.xlu1 %v3750_v57  ;;  %v8779_v8 = vadd.f32 %v8417_v26, %v5435_v37  ;;  %v8789_v57 = vadd.f32 %v5446_v29, %v8557_v3  ;;  %v3762_v26 = vsel %vm999_vm3, %v8769_v50, -inf  ;;  %v5439_v3 = vld [vmem:[%s10527_s5 + $0x330] sm:$0xff] }
 0x319   : > { %v8761_v23 = vpop.xlane.xlu1 %1988  ;;  %6546 = vpow2.f32 %v2041_v62  ;;  %v8812_v16 = vadd.f32 %v8454_v18, %v5439_v3 }
 0x31a   : > { %2901 = vmax.xlane.f32.xlu0 %v2900_v22  ;;  %10816 = vst [vmem:[#allocation124_spill] sm:$0xff] %v8779_v8  ;;  %6548 = vpow2.f32 %v2037_v63  ;;  %10817 = vst [vmem:[#allocation125_spill] sm:$0xff] %v8789_v57  ;;  %v3723_v52 = vsel %vm999_vm3, %v8779_v8, -inf }
 0x31b   : > { %v8771_v1 = vpop.xlane.xlu0 %1991 }
 0x31c   : > { %3745 = vmax.xlane.f32.xlu1 %v3744_v43  ;;  %v8796_v43 = vadd.f32 %v5433_v46, %v8422_v60 }
 0x31d   : > { %v8781_v62 = vpop.xlane.xlu1 %1982 }
 0x31e   : > { %2904 = vmax.xlane.f32.xlu0 %v2903_v10  ;;  %v6539_v2 = vpop.eup %6538 }
 0x31f   : > { %v8791_v0 = vpop.xlane.xlu0 %1985  ;;  %v1323_v29 = vmul.f32 %v6539_v2, %v8072_v39  ;;  %v3717_v39 = vsel %vm999_vm3, %v8796_v43, -inf }
 0x320   : > { %v6541_v22 = vpop.eup %6540  ;;  %3763 = vmax.xlane.f32.xlu1 %v3762_v26  ;;  %v3756_v26 = vsel %vm999_vm3, %v8789_v57, -inf }
 0x321   : > { %v6543_v37 = vpop.eup %6542  ;;  %v1212_v63 = vpop.xlane.xlu1 %1211  ;;  %v1320_v50 = vmul.f32 %v6541_v22, %v8077_v53  ;;  %v5437_v53 = vld [vmem:[%s10527_s5 + $0x320] sm:$0xff] }
 0x322   : > { %v6545_v10 = vpop.eup %6544  ;;  %3724 = vmax.xlane.f32.xlu0 %v3723_v52  ;;  %v1322_v8 = vmul.f32 %v6543_v37, %v8067_v44  ;;  %v5443_v37 = vld [vmem:[%s10527_s5 + $0x350] sm:$0xff] }
 0x323   : > { %v1215_v14 = vpop.xlane.xlu0 %1214  ;;  %v1321_v60 = vmul.f32 %v6545_v10, %v8085_v13  ;;  %v8808_v46 = vpop.eup %6546  ;;  %v8859_v10 = vadd.f32 %v8489_v5, %v5443_v37  ;;  %v10822_v37 = vld [vmem:[#allocation17_spill] sm:$0xff] }
 0x324   : > { %3757 = vmax.xlane.f32.xlu1 %v3756_v26  ;;  %6550 = vrcp.f32 %v1215_v14  ;;  %v1353_v2 = vpack.c.bf16 %v1323_v29, %v1322_v8  ;;  %v2107_v13 = vsel %vm999_vm3, %v8808_v46, 0.0  ;;  %v8822_v18 = vpop.eup %6548  ;;  %v2008_v14 = vsub.f32 %v7910_v21, %v8410_v55 }
 0x325   : > { %v1206_v41 = vpop.xlane.xlu1 %1205  ;;  %v1352_v52 = vpack.c.bf16 %v1321_v60, %v1320_v50  ;;  %v5451_v50 = vld [vmem:[%s10527_s5 + $0x390] sm:$0xff]  ;;  %v8833_v8 = vadd.f32 %v5437_v53, %v8458_v45  ;;  %v3735_v21 = vsel %vm999_vm3, %v8812_v16, -inf  ;;  %v2011_v55 = vsub.f32 %v7933_v4, %v8448_v58  ;;  %v5449_v4 = vld [vmem:[%s10527_s5 + $0x380] sm:$0xff] }
 0x326   : > { %6552 = vrcp.f32 %v1206_v41  ;;  %3718 = vmax.xlane.f32.xlu0 %v3717_v39  ;;  %v2006_v41 = vsub.f32 %v7916_v61, %v8444_v7  ;;  %v8847_v61 = vadd.f32 %v8579_v9, %v5451_v50  ;;  %v2043_v45 = vmul.f32 1.442695, %v2008_v14  ;;  %v5447_v50 = vld [vmem:[%s10527_s5 + $0x370] sm:$0xff] }
 0x327   : > { %6554 = vrcp.f32 %v1212_v63  ;;  %5824 = vmatprep.mubr.msk.bf16.mxu0 %vm999_vm3, %v1352_v52  ;;  %v1209_v44 = vpop.xlane.xlu0 %1208  ;;  %v2015_v63 = vsub.f32 %v7961_v15, %v8494_v33  ;;  %v3729_v3 = vsel %vm999_vm3, %v8833_v8, -inf  ;;  %v2049_v29 = vmul.f32 1.442695, %v2011_v55  ;;  %v5441_v15 = vld [vmem:[%s10527_s5 + $0x340] sm:$0xff]  ;;  %v5452_v52 = vld [vmem:[%s10527_s5 + $0x398] sm:$0xff] }
 0x328   : > { %6556 = vrcp.f32 %v1209_v44  ;;  %2108 = vadd.xlane.f32.xlu1 %v2107_v13  ;;  %5825 = vmatmul.mubr.msk.bf16.vlgmr.msra.gmra.mrb[40].mxu0 %vm999_vm3, %v1353_v2  ;;  %10818 = vst [vmem:[#allocation126_spill] sm:$0xff] %v8847_v61  ;;  %v2039_v58 = vmul.f32 1.442695, %v2006_v41  ;;  %v8871_v26 = vadd.f32 %v5449_v4, %v8583_v31  ;;  %v8881_v2 = vadd.f32 %v5441_v15, %v8496_v27 }
 0x329   : > { %5901 = vmatpush3.bf16.msra.mxu0 %v7369_v20  ;;  %v8836_v22 = vpop.xlane.xlu1 %2000  ;;  %v2101_v20 = vsel %vm999_vm3, %v8822_v18, 0.0  ;;  %6558 = vpow2.f32 %v2043_v45  ;;  %v2057_v39 = vmul.f32 1.442695, %v2015_v63  ;;  %v3747_v44 = vsel %vm999_vm3, %v8859_v10, -inf  ;;  %v5450_v45 = vld [vmem:[%s10527_s5 + $0x388] sm:$0xff] }
 0x32a   : > { %5902 = vmatprep.subr.bf16.mxu0 %v7461_v32  ;;  %3736 = vmax.xlane.f32.xlu0 %v3735_v21  ;;  %10819 = vst [vmem:[#allocation127_spill] sm:$0xff] %v8871_v26  ;;  %6560 = vpow2.f32 %v2039_v58  ;;  %v2013_v14 = vsub.f32 %v7966_v42, %v8529_v56  ;;  %v3765_v21 = vsel %vm999_vm3, %v8871_v26, -inf  ;;  %v10821_v56 = vld [vmem:[#allocation79_spill] sm:$0xff]  ;;  %v8907_v63 = vadd.f32 %v8536_v12, %v5447_v50  ;;  %v10825_v58 = vld [vmem:[#allocation84_spill] sm:$0xff] }
 0x32b   : > { %v8849_v7 = vpop.xlane.xlu0 %2003  ;;  %6562 = vpow2.f32 %v2049_v29 }
 0x32c   : > { %2102 = vadd.xlane.f32.xlu1 %v2101_v20  ;;  %v2009_v20 = vsub.f32 %v10822_v37, %v10821_v56  ;;  %6564 = vpow2.f32 %v2057_v39  ;;  %10824 = vst [vmem:[#allocation79_spill] sm:$0xff] %v8907_v63  ;;  %v2053_v15 = vmul.f32 1.442695, %v2013_v14  ;;  %v10832_v14 = vld [vmem:[#allocation18_spill] sm:$0xff] }
 0x32d   : > { %5903 = vmatpush3.bf16.msra.mxu0 %v7461_v32  ;;  %v8862_v9 = vpop.xlane.xlu1 %1994  ;;  %v3771_v32 = vsel %vm999_vm3, %v8847_v61, -inf }
 0x32e   : > { %5904 = vmatprep.subr.bf16.mxu0 %v7469_v35  ;;  %3730 = vmax.xlane.f32.xlu0 %v3729_v3  ;;  %v6551_v33 = vpop.eup %6550  ;;  %v10826_v3 = vld [vmem:[#allocation20_spill] sm:$0xff] }
 0x32f   : > { %v8873_v5 = vpop.xlane.xlu0 %1997  ;;  %v1327_v27 = vmul.f32 %v6551_v33, %v8120_v59  ;;  %v10823_v59 = vld [vmem:[#allocation38_spill] sm:$0xff]  ;;  %v2016_v29 = vsub.f32 %v10826_v3, %v10825_v58 }
 0x330   : > { %v6553_v60 = vpop.eup %6552  ;;  %3772 = vmax.xlane.f32.xlu1 %v3771_v32  ;;  %v5445_v33 = vld [vmem:[%s10527_s5 + $0x360] sm:$0xff] }
 0x331   : > { %v6555_v53 = vpop.eup %6554  ;;  %5905 = vmatpush3.bf16.msra.mxu0 %v7469_v35  ;;  %v1224_v31 = vpop.xlane.xlu1 %1223  ;;  %v8894_v35 = vadd.f32 %v8589_v6, %v5452_v52  ;;  %v1324_v55 = vmul.f32 %v6553_v60, %v8125_v51  ;;  %v10827_v32 = vld [vmem:[#allocation10_spill] sm:$0xff]  ;;  %v10829_v52 = vld [vmem:[#allocation8_spill] sm:$0xff] }
 0x332   : > { %v6557_v13 = vpop.eup %6556  ;;  %5906 = vmatprep.subr.bf16.mxu0 %v7466_v34  ;;  %3748 = vmax.xlane.f32.xlu0 %v3747_v44  ;;  %v1326_v6 = vmul.f32 %v6555_v53, %v10823_v59  ;;  %v10830_v53 = vld [vmem:[#allocation9_spill] sm:$0xff] }
 0x333   : > { %10820 = vst [vmem:[#allocation128_spill] sm:$0xff] %v8894_v35  ;;  %v1227_v41 = vpop.xlane.xlu0 %1226  ;;  %v1325_v42 = vmul.f32 %v6557_v13, %v8133_v11  ;;  %v3741_v11 = vsel %vm999_vm3, %v8881_v2, -inf  ;;  %v3774_v39 = vsel %vm999_vm3, %v8894_v35, -inf  ;;  %v2349_v44 = vand.u32 %v10830_v53, %v10829_v52  ;;  %v10831_v13 = vld [vmem:[#allocation76_spill] sm:$0xff] }
 0x334   : > { %3766 = vmax.xlane.f32.xlu1 %v3765_v21  ;;  %6566 = vrcp.f32 %v1227_v41  ;;  %v1355_v12 = vpack.c.bf16 %v1327_v27, %v1326_v6  ;;  %v2012_v50 = vsub.f32 %v10832_v14, %v10831_v13  ;;  %v2045_v41 = vmul.f32 1.442695, %v2009_v20  ;;  %v10835_v6 = vld [vmem:[#allocation81_spill] sm:$0xff]  ;;  %v10839_v14 = vld [vmem:[#allocation96_spill] sm:$0xff] }
 0x335   : > { %5907 = vmatpush3.bf16.msra.mxu0 %v7466_v34  ;;  %v1218_v51 = vpop.xlane.xlu1 %1217  ;;  %v1354_v4 = vpack.c.bf16 %v1325_v42, %v1324_v55  ;;  %v8919_v34 = vadd.f32 %v5450_v45, %v8596_v48  ;;  %v10833_v48 = vld [vmem:[#allocation90_spill] sm:$0xff]  ;;  %v3759_v21 = vsel %vm999_vm3, %v8907_v63, -inf  ;;  %v8937_v55 = vpop.eup %6558  ;;  %v2059_v42 = vmul.f32 1.442695, %v2016_v29  ;;  %v10838_v29 = vld [vmem:[#allocation12_spill] sm:$0xff] }
 0x336   : > { %6568 = vrcp.f32 %v1218_v51  ;;  %5908 = vmatprep.subr.bf16.mxu0 %v10827_v32  ;;  %3742 = vmax.xlane.f32.xlu0 %v3741_v11  ;;  %v8930_v27 = vadd.f32 %v5445_v33, %v10833_v48  ;;  %v8939_v56 = vpop.eup %6560  ;;  %v2051_v59 = vmul.f32 1.442695, %v2012_v50  ;;  %v10836_v51 = vld [vmem:[#allocation19_spill] sm:$0xff]  ;;  %v10841_v48 = vld [vmem:[#allocation44_spill] sm:$0xff] }
 0x337   : > { %10828 = vst [vmem:[#allocation17_spill] sm:$0xff] %v8919_v34  ;;  %6570 = vrcp.f32 %v1224_v31  ;;  %5828 = vmatprep.mubr.msk.bf16.mxu0 %vm999_vm3, %v1354_v4  ;;  %v1221_v60 = vpop.xlane.xlu0 %1220  ;;  %v3768_v20 = vsel %vm999_vm3, %v8919_v34, -inf  ;;  %v8945_v45 = vpop.eup %6562  ;;  %v2010_v11 = vsub.f32 %v10836_v51, %v10835_v6  ;;  %v10840_v50 = vld [vmem:[#allocation23_spill] sm:$0xff]  ;;  %v10842_v6 = vld [vmem:[#allocation45_spill] sm:$0xff]  ;;  %v10843_v51 = vld [vmem:[#allocation46_spill] sm:$0xff] }
 0x338   : > { %6572 = vrcp.f32 %v1221_v60  ;;  %3775 = vmax.xlane.f32.xlu1 %v3774_v39  ;;  %5829 = vmatmul.mubr.msk.bf16.gmra.mrb[44].mxu0 %vm999_vm3, %v1355_v12  ;;  %10834 = vst [vmem:[#allocation38_spill] sm:$0xff] %v8930_v27  ;;  %v3753_v58 = vsel %vm999_vm3, %v8930_v27, -inf  ;;  %v8953_v3 = vpop.eup %6564  ;;  %v10858_v27 = vld [vmem:[#allocation92_spill] sm:$0xff] }
 0x339   : > { %5909 = vmatpush3.bf16.msra.mxu0 %v10827_v32  ;;  %v8933_v31 = vpop.xlane.xlu1 %2823  ;;  %6574 = vpow2.f32 %v2053_v15  ;;  %10837 = vst [vmem:[#allocation84_spill] sm:$0xff] %v8953_v3  ;;  %v2119_v32 = vsel %vm999_vm3, %v8945_v45, 0.0  ;;  %v2047_v60 = vmul.f32 1.442695, %v2010_v11 }
 0x33a   : > { %5910 = vmatprep.subr.bf16.mxu0 %v2349_v44  ;;  %3760 = vmax.xlane.f32.xlu0 %v3759_v21  ;;  %6576 = vpow2.f32 %v2045_v41  ;;  %v2017_v41 = vsub.f32 %v10840_v50, %v10839_v14  ;;  %v10845_v50 = vld [vmem:[#allocation94_spill] sm:$0xff] }
 0x33b   : > { %v8941_v37 = vpop.xlane.xlu0 %2826  ;;  %6578 = vpow2.f32 %v2059_v42 }
 0x33c   : > { %3769 = vmax.xlane.f32.xlu1 %v3768_v20  ;;  %6580 = vpow2.f32 %v2051_v59  ;;  %v2131_v20 = vsel %vm999_vm3, %v8953_v3, 0.0  ;;  %v10859_v3 = vld [vmem:[#allocation22_spill] sm:$0xff] }
 0x33d   : > { %5911 = vmatpush3.bf16.msra.mxu0 %v2349_v44  ;;  %v8949_v4 = vpop.xlane.xlu1 %2817  ;;  %v2110_v44 = vsel %vm999_vm3, %v8937_v55, 0.0  ;;  %6582 = vpow2.f32 %v2047_v60 }
 0x33e   : > { %5988 = vmatprep.subr.bf16.mxu0 %v10838_v29  ;;  %3754 = vmax.xlane.f32.xlu0 %v3753_v58  ;;  %v6567_v15 = vpop.eup %6566 }
 0x33f   : > { %v8956_v33 = vpop.xlane.xlu0 %2820  ;;  %v1331_v21 = vmul.f32 %v6567_v15, %v10841_v48  ;;  %v10846_v48 = vld [vmem:[#allocation24_spill] sm:$0xff] }
 0x340   : > { %v6569_v12 = vpop.eup %6568  ;;  %2120 = vadd.xlane.f32.xlu1 %v2119_v32  ;;  %v10844_v32 = vld [vmem:[#allocation43_spill] sm:$0xff]  ;;  %v2020_v61 = vsub.f32 %v10846_v48, %v10845_v50  ;;  %v10851_v48 = vld [vmem:[#allocation33_spill] sm:$0xff] }
 0x341   : > { %v6571_v39 = vpop.eup %6570  ;;  %v1236_v53 = vpop.xlane.xlu1 %1235  ;;  %v1328_v59 = vmul.f32 %v6569_v12, %v10842_v6  ;;  %v2061_v12 = vmul.f32 1.442695, %v2017_v41  ;;  %v10847_v6 = vld [vmem:[#allocation32_spill] sm:$0xff]  ;;  %v5458_v50 = vld [vmem:[%s10527_s5 + $0x3c8] sm:$0xff] }
 0x342   : > { %v6573_v13 = vpop.eup %6572  ;;  %2111 = vadd.xlane.f32.xlu0 %v2110_v44  ;;  %v1330_v34 = vmul.f32 %v6571_v39, %v10844_v32  ;;  %v2104_v44 = vsel %vm999_vm3, %v8939_v56, 0.0  ;;  %v2067_v41 = vmul.f32 1.442695, %v2020_v61 }
 0x343   : > { %v1239_v42 = vpop.xlane.xlu0 %1238  ;;  %v1329_v11 = vmul.f32 %v6573_v13, %v10843_v51  ;;  %v8969_v58 = vpop.eup %6574  ;;  %v10848_v51 = vld [vmem:[#allocation89_spill] sm:$0xff] }
 0x344   : > { %2132 = vadd.xlane.f32.xlu1 %v2131_v20  ;;  %6584 = vrcp.f32 %v1239_v42  ;;  %v8974_v14 = vpop.eup %6576  ;;  %v1357_v13 = vpack.c.bf16 %v1331_v21, %v1330_v34  ;;  %v2125_v39 = vsel %vm999_vm3, %v8969_v58, 0.0  ;;  %v5457_v20 = vld [vmem:[%s10527_s5 + $0x3c0] sm:$0xff]  ;;  %v5455_v21 = vld [vmem:[%s10527_s5 + $0x3b0] sm:$0xff] }
 0x345   : > { %v1230_v35 = vpop.xlane.xlu1 %1229  ;;  %v1356_v15 = vpack.c.bf16 %v1329_v11, %v1328_v59  ;;  %v8981_v42 = vpop.eup %6578  ;;  %v2113_v34 = vsel %vm999_vm3, %v8974_v14, 0.0  ;;  %v2028_v59 = vsub.f32 %v10847_v6, %v8687_v25  ;;  %v10849_v11 = vld [vmem:[#allocation21_spill] sm:$0xff]  ;;  %v9013_v25 = vadd.f32 %v8620_v38, %v5455_v21 }
 0x346   : > { %6586 = vrcp.f32 %v1230_v35  ;;  %2105 = vadd.xlane.f32.xlu0 %v2104_v44  ;;  %v2014_v32 = vsub.f32 %v10849_v11, %v10848_v51  ;;  %v9001_v44 = vadd.f32 %v5457_v20, %v8671_v47  ;;  %v2134_v61 = vsel %vm999_vm3, %v8981_v42, 0.0 }
 0x347   : > { %6588 = vrcp.f32 %v1236_v53  ;;  %5832 = vmatprep.mubr.msk.bf16.mxu0 %vm999_vm3, %v1356_v15  ;;  %v1233_v60 = vpop.xlane.xlu0 %1232  ;;  %v8991_v53 = vpop.eup %6580  ;;  %10852 = vst [vmem:[#allocation10_spill] sm:$0xff] %v9013_v25  ;;  %v9022_v6 = vadd.f32 %v5458_v50, %v8685_v28  ;;  %v10854_v28 = vld [vmem:[#allocation35_spill] sm:$0xff] }
 0x348   : > { %6590 = vrcp.f32 %v1233_v60  ;;  %2126 = vadd.xlane.f32.xlu1 %v2125_v39  ;;  %5833 = vmatmul.mubr.msk.bf16.gmra.mrb[48].mxu0 %vm999_vm3, %v1357_v13  ;;  %10850 = vst [vmem:[#allocation20_spill] sm:$0xff] %v9001_v44  ;;  %v2122_v47 = vsel %vm999_vm3, %v8991_v53, 0.0  ;;  %v9019_v60 = vpop.eup %6582  ;;  %v2083_v39 = vmul.f32 1.442695, %v2028_v59  ;;  %v3789_v38 = vsel %vm999_vm3, %v9001_v44, -inf  ;;  %v10856_v44 = vld [vmem:[#allocation53_spill] sm:$0xff] }
 0x349   : > { %v8987_v35 = vpop.xlane.xlu1 %2835  ;;  %6592 = vpow2.f32 %v2061_v12  ;;  %v2026_v12 = vsub.f32 %v10851_v48, %v8707_v49  ;;  %10853 = vst [vmem:[#allocation8_spill] sm:$0xff] %v9022_v6  ;;  %v2032_v50 = vsub.f32 %v10854_v28, %v8771_v1  ;;  %v10855_v48 = vld [vmem:[#allocation52_spill] sm:$0xff]  ;;  %v10860_v1 = vld [vmem:[#allocation51_spill] sm:$0xff]  ;;  %v2116_v28 = vsel %vm999_vm3, %v9019_v60, 0.0 }
 0x34a   : > { %2114 = vadd.xlane.f32.xlu0 %v2113_v34  ;;  %6594 = vpow2.f32 %v2067_v41  ;;  %v2055_v34 = vmul.f32 1.442695, %v2014_v32  ;;  %v3783_v41 = vsel %vm999_vm3, %v9013_v25, -inf  ;;  %v5453_v32 = vld [vmem:[%s10527_s5 + $0x3a0] sm:$0xff] }
 0x34b   : > { %v9003_v15 = vpop.xlane.xlu0 %2838  ;;  %v2079_v51 = vmul.f32 1.442695, %v2026_v12  ;;  %6596 = vpow2.f32 %v2083_v39  ;;  %v10857_v25 = vld [vmem:[#allocation54_spill] sm:$0xff]  ;;  %v2019_v39 = vsub.f32 %v10859_v3, %v10858_v27  ;;  %v10862_v27 = vld [vmem:[#allocation37_spill] sm:$0xff] }
 0x34c   : > { %2135 = vadd.xlane.f32.xlu1 %v2134_v61  ;;  %6598 = vpow2.f32 %v2055_v34  ;;  %v2030_v3 = vsub.f32 %v10862_v27, %v8791_v0  ;;  %v10866_v0 = vld [vmem:[#allocation102_spill] sm:$0xff] }
 0x34d   : > { %v9015_v13 = vpop.xlane.xlu1 %2829  ;;  %6600 = vpow2.f32 %v2079_v51 }
 0x34e   : > { %2123 = vadd.xlane.f32.xlu0 %v2122_v47  ;;  %v6585_v20 = vpop.eup %6584 }
 0x34f   : > { %v9024_v49 = vpop.xlane.xlu0 %2832  ;;  %v1335_v47 = vmul.f32 %v6585_v20, %v10855_v48  ;;  %v9046_v20 = vadd.f32 %v5453_v32, %v8627_v40  ;;  %v10865_v32 = vld [vmem:[#allocation25_spill] sm:$0xff] }
 0x350   : > { %v6587_v21 = vpop.eup %6586  ;;  %3790 = vmax.xlane.f32.xlu1 %v3789_v38  ;;  %v3792_v38 = vsel %vm999_vm3, %v9022_v6, -inf }
 0x351   : > { %v6589_v11 = vpop.eup %6588  ;;  %v1248_v61 = vpop.xlane.xlu1 %1247  ;;  %v1332_v26 = vmul.f32 %v6587_v21, %v10856_v44  ;;  %10861 = vst [vmem:[#allocation9_spill] sm:$0xff] %v9046_v20  ;;  %v2091_v21 = vmul.f32 1.442695, %v2032_v50  ;;  %v10867_v50 = vld [vmem:[#allocation26_spill] sm:$0xff] }
 0x352   : > { %v6591_v59 = vpop.eup %6590  ;;  %3784 = vmax.xlane.f32.xlu0 %v3783_v41  ;;  %v1334_v41 = vmul.f32 %v6589_v11, %v10860_v1  ;;  %v2087_v1 = vmul.f32 1.442695, %v2030_v3 }
 0x353   : > { %v1251_v12 = vpop.xlane.xlu0 %1250  ;;  %v1333_v63 = vmul.f32 %v6591_v59, %v10857_v25  ;;  %v9040_v57 = vpop.eup %6592  ;;  %v5456_v25 = vld [vmem:[%s10527_s5 + $0x3b8] sm:$0xff] }
 0x354   : > { %3793 = vmax.xlane.f32.xlu1 %v3792_v38  ;;  %6602 = vrcp.f32 %v1251_v12  ;;  %v1359_v51 = vpack.c.bf16 %v1335_v47, %v1334_v41  ;;  %v2137_v11 = vsel %vm999_vm3, %v9040_v57, 0.0  ;;  %v9058_v59 = vpop.eup %6594  ;;  %v2023_v47 = vsub.f32 %v10867_v50, %v10866_v0  ;;  %v10869_v41 = vld [vmem:[#allocation40_spill] sm:$0xff] }
 0x355   : > { %v1242_v34 = vpop.xlane.xlu1 %1241  ;;  %v1358_v44 = vpack.c.bf16 %v1333_v63, %v1332_v26  ;;  %10863 = vst [vmem:[#allocation76_spill] sm:$0xff] %v9058_v59  ;;  %v2065_v26 = vmul.f32 1.442695, %v2019_v39  ;;  %v10864_v63 = vld [vmem:[#allocation99_spill] sm:$0xff]  ;;  %v3777_v38 = vsel %vm999_vm3, %v9046_v20, -inf  ;;  %v9083_v27 = vpop.eup %6596  ;;  %v10882_v20 = vld [vmem:[#allocation28_spill] sm:$0xff] }
 0x356   : > { %6604 = vrcp.f32 %v1242_v34  ;;  %2117 = vadd.xlane.f32.xlu0 %v2116_v28  ;;  %v2018_v48 = vsub.f32 %v10865_v32, %v10864_v63  ;;  %v5454_v39 = vld [vmem:[%s10527_s5 + $0x3a8] sm:$0xff]  ;;  %v2036_v34 = vsub.f32 %v10869_v41, %v8849_v7  ;;  %10871 = vst [vmem:[#allocation90_spill] sm:$0xff] %v9083_v27  ;;  %v9087_v3 = vpop.eup %6598  ;;  %v2073_v7 = vmul.f32 1.442695, %v2023_v47 }
 0x357   : > { %6606 = vrcp.f32 %v1248_v61  ;;  %5836 = vmatprep.mubr.msk.bf16.mxu0 %vm999_vm3, %v1358_v44  ;;  %v1245_v40 = vpop.xlane.xlu0 %1244  ;;  %v9066_v61 = vadd.f32 %v8634_v24, %v5456_v25  ;;  %v10870_v28 = vld [vmem:[#allocation27_spill] sm:$0xff]  ;;  %v2146_v25 = vsel %vm999_vm3, %v9058_v59, 0.0  ;;  %v9096_v0 = vpop.eup %6600  ;;  %v2170_v47 = vsel %vm999_vm3, %v9083_v27, 0.0 }
 0x358   : > { %6608 = vrcp.f32 %v1245_v40  ;;  %2138 = vadd.xlane.f32.xlu1 %v2137_v11  ;;  %5837 = vmatmul.mubr.msk.bf16.gmra.mrb[52].mxu0 %vm999_vm3, %v1359_v51  ;;  %v2021_v44 = vsub.f32 %v10870_v28, %v8649_v30  ;;  %v2063_v51 = vmul.f32 1.442695, %v2018_v48  ;;  %v10872_v40 = vld [vmem:[#allocation42_spill] sm:$0xff]  ;;  %10875 = vst [vmem:[#allocation19_spill] sm:$0xff] %v9096_v0 }
 0x359   : > { %10868 = vst [vmem:[#allocation18_spill] sm:$0xff] %v9066_v61  ;;  %v9068_v12 = vpop.xlane.xlu1 %2847  ;;  %6610 = vpow2.f32 %v2091_v21  ;;  %v2034_v21 = vsub.f32 %v10872_v40, %v8873_v5  ;;  %v10873_v11 = vld [vmem:[#allocation106_spill] sm:$0xff]  ;;  %v3786_v32 = vsel %vm999_vm3, %v9066_v61, -inf  ;;  %v10877_v40 = vld [vmem:[#allocation60_spill] sm:$0xff] }
 0x35a   : > { %3778 = vmax.xlane.f32.xlu0 %v3777_v38  ;;  %6612 = vpow2.f32 %v2065_v26  ;;  %v9090_v63 = vadd.f32 %v5454_v39, %v10873_v11  ;;  %v2099_v26 = vmul.f32 1.442695, %v2036_v34  ;;  %v2069_v50 = vmul.f32 1.442695, %v2021_v44  ;;  %v10876_v34 = vld [vmem:[#allocation48_spill] sm:$0xff] }
 0x35b   : > { %v9079_v24 = vpop.xlane.xlu0 %2850  ;;  %6614 = vpow2.f32 %v2087_v1  ;;  %v2095_v39 = vmul.f32 1.442695, %v2034_v21  ;;  %v2915_v44 = vsub.f32 %v10876_v34, %v8941_v37  ;;  %v10878_v21 = vld [vmem:[#allocation61_spill] sm:$0xff]  ;;  %v10883_v37 = vld [vmem:[#allocation59_spill] sm:$0xff] }
 0x35c   : > { %2147 = vadd.xlane.f32.xlu1 %v2146_v25  ;;  %10874 = vst [vmem:[#allocation81_spill] sm:$0xff] %v9090_v63  ;;  %6616 = vpow2.f32 %v2063_v51  ;;  %v3780_v25 = vsel %vm999_vm3, %v9090_v63, -inf  ;;  %v2164_v51 = vsel %vm999_vm3, %v9096_v0, 0.0  ;;  %v10881_v63 = vld [vmem:[#allocation104_spill] sm:$0xff] }
 0x35d   : > { %v9092_v30 = vpop.xlane.xlu1 %2841  ;;  %6618 = vpow2.f32 %v2073_v7  ;;  %v10879_v7 = vld [vmem:[#allocation62_spill] sm:$0xff] }
 0x35e   : > { %3787 = vmax.xlane.f32.xlu0 %v3786_v32  ;;  %v6603_v48 = vpop.eup %6602  ;;  %6620 = vpow2.f32 %v2099_v26  ;;  %v2024_v26 = vsub.f32 %v10882_v20, %v10881_v63 }
 0x35f   : > { %v9098_v5 = vpop.xlane.xlu0 %2844  ;;  %v1339_v11 = vmul.f32 %v6603_v48, %v10877_v40  ;;  %6622 = vpow2.f32 %v2069_v50  ;;  %v2128_v50 = vsel %vm999_vm3, %v9087_v3, 0.0 }
 0x360   : > { %v6605_v38 = vpop.eup %6604  ;;  %2171 = vadd.xlane.f32.xlu1 %v2170_v47  ;;  %6624 = vpow2.f32 %v2095_v39 }
 0x361   : > { %v6607_v41 = vpop.eup %6606  ;;  %v1260_v28 = vpop.xlane.xlu1 %1259  ;;  %v1336_v47 = vmul.f32 %v6605_v38, %v10878_v21  ;;  %v2950_v38 = vmul.f32 1.442695, %v2915_v44  ;;  %v10889_v44 = vld [vmem:[#allocation30_spill] sm:$0xff] }
 0x362   : > { %v6609_v1 = vpop.eup %6608  ;;  %3781 = vmax.xlane.f32.xlu0 %v3780_v25  ;;  %v1338_v25 = vmul.f32 %v6607_v41, %v10883_v37  ;;  %v2075_v41 = vmul.f32 1.442695, %v2024_v26  ;;  %v10890_v26 = vld [vmem:[#allocation55_spill] sm:$0xff] }
 0x363   : > { %v1263_v32 = vpop.xlane.xlu0 %1262  ;;  %v1337_v6 = vmul.f32 %v6609_v1, %v10879_v7  ;;  %v9111_v61 = vpop.eup %6610  ;;  %v10884_v1 = vld [vmem:[#allocation50_spill] sm:$0xff] }
 0x364   : > { %10880 = vst [vmem:[#allocation12_spill] sm:$0xff] %v9111_v61  ;;  %2165 = vadd.xlane.f32.xlu1 %v2164_v51  ;;  %6626 = vrcp.f32 %v1263_v32  ;;  %v9118_v40 = vpop.eup %6612  ;;  %v2913_v21 = vsub.f32 %v10884_v1, %v8956_v33  ;;  %v1361_v7 = vpack.c.bf16 %v1339_v11, %v1338_v25  ;;  %v2182_v63 = vsel %vm999_vm3, %v9111_v61, 0.0  ;;  %v10887_v32 = vld [vmem:[#allocation29_spill] sm:$0xff]  ;;  %v10888_v33 = vld [vmem:[#allocation112_spill] sm:$0xff]  ;;  %v10893_v1 = vld [vmem:[#allocation31_spill] sm:$0xff] }
 0x365   : > { %v1254_v48 = vpop.xlane.xlu1 %1253  ;;  %v1360_v34 = vpack.c.bf16 %v1337_v6, %v1336_v47  ;;  %v9125_v39 = vpop.eup %6614  ;;  %v10886_v6 = vld [vmem:[#allocation109_spill] sm:$0xff]  ;;  %v2027_v11 = vsub.f32 %v10889_v44, %v10888_v33  ;;  %v2143_v47 = vsel %vm999_vm3, %v9118_v40, 0.0 }
 0x366   : > { %6628 = vrcp.f32 %v1254_v48  ;;  %2129 = vadd.xlane.f32.xlu0 %v2128_v50  ;;  %10885 = vst [vmem:[#allocation96_spill] sm:$0xff] %v9125_v39  ;;  %v2022_v51 = vsub.f32 %v10887_v32, %v10886_v6  ;;  %v9136_v37 = vpop.eup %6616  ;;  %v2946_v25 = vmul.f32 1.442695, %v2913_v21  ;;  %v2918_v48 = vsub.f32 %v10890_v26, %v8987_v35 }
 0x367   : > { %6630 = vrcp.f32 %v1260_v28  ;;  %5840 = vmatprep.mubr.msk.bf16.mxu0 %vm999_vm3, %v1360_v34  ;;  %v1257_v20 = vpop.xlane.xlu0 %1256  ;;  %v9140_v50 = vpop.eup %6618  ;;  %v10892_v34 = vld [vmem:[#allocation115_spill] sm:$0xff]  ;;  %v2081_v33 = vmul.f32 1.442695, %v2027_v11 }
 0x368   : > { %6632 = vrcp.f32 %v1257_v20  ;;  %2183 = vadd.xlane.f32.xlu1 %v2182_v63  ;;  %5841 = vmatmul.mubr.msk.bf16.gmra.mrb[56].mxu0 %vm999_vm3, %v1361_v7  ;;  %10891 = vst [vmem:[#allocation23_spill] sm:$0xff] %v9140_v50  ;;  %v2025_v7 = vsub.f32 %v10893_v1, %v10892_v34  ;;  %v2176_v63 = vsel %vm999_vm3, %v9125_v39, 0.0  ;;  %v9148_v6 = vpop.eup %6620  ;;  %v2071_v32 = vmul.f32 1.442695, %v2022_v51 }
 0x369   : > { %v9132_v28 = vpop.xlane.xlu1 %2859  ;;  %6634 = vpow2.f32 %v2950_v38  ;;  %10894 = vst [vmem:[#allocation44_spill] sm:$0xff] %v9148_v6  ;;  %v10895_v38 = vld [vmem:[#allocation57_spill] sm:$0xff]  ;;  %v9152_v35 = vpop.eup %6622  ;;  %v2956_v34 = vmul.f32 1.442695, %v2918_v48  ;;  %v2155_v39 = vsel %vm999_vm3, %v9140_v50, 0.0  ;;  %v10897_v48 = vld [vmem:[#allocation58_spill] sm:$0xff] }
 0x36a   : > { %2144 = vadd.xlane.f32.xlu0 %v2143_v47  ;;  %6636 = vpow2.f32 %v2075_v41  ;;  %v2916_v21 = vsub.f32 %v10895_v38, %v9015_v13  ;;  %v2140_v47 = vsel %vm999_vm3, %v9136_v37, 0.0  ;;  %v9158_v26 = vpop.eup %6624  ;;  %v2077_v41 = vmul.f32 1.442695, %v2025_v7  ;;  %v10902_v50 = vld [vmem:[#allocation34_spill] sm:$0xff] }
 0x36b   : > { %v9144_v20 = vpop.xlane.xlu0 %2862  ;;  %10896 = vst [vmem:[#allocation45_spill] sm:$0xff] %v9158_v26  ;;  %6638 = vpow2.f32 %v2946_v25  ;;  %v2194_v13 = vsel %vm999_vm3, %v9148_v6, 0.0  ;;  %v2917_v7 = vsub.f32 %v10897_v48, %v9024_v49  ;;  %v10903_v49 = vld [vmem:[#allocation67_spill] sm:$0xff] }
 0x36c   : > { %2177 = vadd.xlane.f32.xlu1 %v2176_v63  ;;  %6640 = vpow2.f32 %v2071_v32  ;;  %v2952_v11 = vmul.f32 1.442695, %v2916_v21  ;;  %v2188_v32 = vsel %vm999_vm3, %v9158_v26, 0.0  ;;  %v10899_v21 = vld [vmem:[#allocation69_spill] sm:$0xff] }
 0x36d   : > { %v9154_v44 = vpop.xlane.xlu1 %2853  ;;  %6642 = vpow2.f32 %v2081_v33  ;;  %v10900_v33 = vld [vmem:[#allocation70_spill] sm:$0xff] }
 0x36e   : > { %2141 = vadd.xlane.f32.xlu0 %v2140_v47  ;;  %v6627_v1 = vpop.eup %6626  ;;  %6644 = vpow2.f32 %v2956_v34  ;;  %v10898_v47 = vld [vmem:[#allocation68_spill] sm:$0xff]  ;;  %v2031_v34 = vsub.f32 %v10902_v50, %v8761_v23 }
 0x36f   : > { %v9160_v51 = vpop.xlane.xlu0 %2856  ;;  %v1343_v27 = vmul.f32 %v6627_v1, %v10898_v47  ;;  %6646 = vpow2.f32 %v2077_v41  ;;  %v2149_v41 = vsel %vm999_vm3, %v9152_v35, 0.0 }
 0x370   : > { %v6629_v63 = vpop.eup %6628  ;;  %2195 = vadd.xlane.f32.xlu1 %v2194_v13  ;;  %6648 = vpow2.f32 %v2952_v11  ;;  %v2089_v11 = vmul.f32 1.442695, %v2031_v34 }
 0x371   : > { %v6631_v38 = vpop.eup %6630  ;;  %v1272_v61 = vpop.xlane.xlu1 %1271  ;;  %v1340_v13 = vmul.f32 %v6629_v63, %v10899_v21  ;;  %v2954_v63 = vmul.f32 1.442695, %v2917_v7 }
 0x372   : > { %v6633_v25 = vpop.eup %6632  ;;  %2156 = vadd.xlane.f32.xlu0 %v2155_v39  ;;  %v1342_v39 = vmul.f32 %v6631_v38, %v10903_v49 }
 0x373   : > { %v1275_v6 = vpop.xlane.xlu0 %1274  ;;  %v1341_v0 = vmul.f32 %v6633_v25, %v10900_v33  ;;  %v9173_v59 = vpop.eup %6634  ;;  %v10904_v25 = vld [vmem:[#allocation65_spill] sm:$0xff] }
 0x374   : > { %10901 = vst [vmem:[#allocation46_spill] sm:$0xff] %v9173_v59  ;;  %2189 = vadd.xlane.f32.xlu1 %v2188_v32  ;;  %6650 = vrcp.f32 %v1275_v6  ;;  %v9180_v47 = vpop.eup %6636  ;;  %v2920_v21 = vsub.f32 %v10904_v25, %v9092_v30  ;;  %v1363_v33 = vpack.c.bf16 %v1343_v27, %v1342_v39  ;;  %v3017_v50 = vsel %vm999_vm3, %v9173_v59, 0.0  ;;  %v10908_v32 = vld [vmem:[#allocation71_spill] sm:$0xff] }
 0x375   : > { %v1266_v1 = vpop.xlane.xlu1 %1265  ;;  %v1362_v48 = vpack.c.bf16 %v1341_v0, %v1340_v13  ;;  %v9187_v6 = vpop.eup %6638  ;;  %v10906_v0 = vld [vmem:[#allocation36_spill] sm:$0xff]  ;;  %v2926_v13 = vsub.f32 %v10908_v32, %v9132_v28 }
 0x376   : > { %6652 = vrcp.f32 %v1266_v1  ;;  %2150 = vadd.xlane.f32.xlu0 %v2149_v41  ;;  %10905 = vst [vmem:[#allocation43_spill] sm:$0xff] %v9187_v6  ;;  %v2029_v38 = vsub.f32 %v10906_v0, %v8781_v62  ;;  %v9196_v27 = vpop.eup %6640  ;;  %v2960_v7 = vmul.f32 1.442695, %v2920_v21  ;;  %v3011_v49 = vsel %vm999_vm3, %v9187_v6, 0.0  ;;  %v10911_v41 = vld [vmem:[#allocation39_spill] sm:$0xff] }
 0x377   : > { %6654 = vrcp.f32 %v1272_v61  ;;  %5844 = vmatprep.mubr.msk.bf16.mxu0 %vm999_vm3, %v1362_v48  ;;  %v1269_v23 = vpop.xlane.xlu0 %1268  ;;  %v2158_v61 = vsel %vm999_vm3, %v9180_v47, 0.0  ;;  %10907 = vst [vmem:[#allocation94_spill] sm:$0xff] %v9196_v27  ;;  %v9200_v34 = vpop.eup %6642  ;;  %v2035_v48 = vsub.f32 %v10911_v41, %v8836_v22  ;;  %v2152_v28 = vsel %vm999_vm3, %v9196_v27, 0.0  ;;  %v10914_v41 = vld [vmem:[#allocation77_spill] sm:$0xff] }
 0x378   : > { %6656 = vrcp.f32 %v1269_v23  ;;  %3018 = vadd.xlane.f32.xlu1 %v3017_v50  ;;  %5845 = vmatmul.mubr.msk.bf16.gmra.mrb[60].mxu0 %vm999_vm3, %v1363_v33  ;;  %10909 = vst [vmem:[#allocation24_spill] sm:$0xff] %v9200_v34  ;;  %v9206_v39 = vpop.eup %6644  ;;  %v2085_v1 = vmul.f32 1.442695, %v2029_v38  ;;  %v2972_v33 = vmul.f32 1.442695, %v2926_v13  ;;  %v10913_v38 = vld [vmem:[#allocation41_spill] sm:$0xff] }
 0x379   : > { %v9192_v30 = vpop.xlane.xlu1 %1283  ;;  %6658 = vpow2.f32 %v2954_v63  ;;  %10910 = vst [vmem:[#allocation32_spill] sm:$0xff] %v9206_v39  ;;  %v9210_v63 = vpop.eup %6646  ;;  %v2097_v0 = vmul.f32 1.442695, %v2035_v48  ;;  %v10916_v48 = vld [vmem:[#allocation78_spill] sm:$0xff] }
 0x37a   : > { %2159 = vadd.xlane.f32.xlu0 %v2158_v61  ;;  %6660 = vpow2.f32 %v2089_v11  ;;  %v9216_v21 = vpop.eup %6648  ;;  %v3026_v11 = vsel %vm999_vm3, %v9206_v39, 0.0  ;;  %v2033_v61 = vsub.f32 %v10913_v38, %v8862_v9  ;;  %v10915_v39 = vld [vmem:[#allocation47_spill] sm:$0xff]  ;;  %v10917_v38 = vld [vmem:[#allocation80_spill] sm:$0xff] }
 0x37b   : > { %v9202_v62 = vpop.xlane.xlu0 %2871  ;;  %10912 = vst [vmem:[#allocation89_spill] sm:$0xff] %v9216_v21  ;;  %6662 = vpow2.f32 %v2960_v7  ;;  %v2167_v7 = vsel %vm999_vm3, %v9200_v34, 0.0  ;;  %v2914_v59 = vsub.f32 %v10915_v39, %v8933_v31  ;;  %v3020_v9 = vsel %vm999_vm3, %v9216_v21, 0.0 }
 0x37c   : > { %3012 = vadd.xlane.f32.xlu1 %v3011_v49  ;;  %6664 = vpow2.f32 %v2085_v1  ;;  %v2093_v34 = vmul.f32 1.442695, %v2033_v61  ;;  %v2161_v39 = vsel %vm999_vm3, %v9210_v63, 0.0 }
 0x37d   : > { %v9212_v25 = vpop.xlane.xlu1 %1277  ;;  %6666 = vpow2.f32 %v2972_v33  ;;  %v10919_v33 = vld [vmem:[#allocation49_spill] sm:$0xff] }
 0x37e   : > { %2153 = vadd.xlane.f32.xlu0 %v2152_v28  ;;  %v6651_v23 = vpop.eup %6650  ;;  %6668 = vpow2.f32 %v2097_v0 }
 0x37f   : > { %v9218_v50 = vpop.xlane.xlu0 %2865  ;;  %v1347_v28 = vmul.f32 %v6651_v23, %v10914_v41  ;;  %v10920_v23 = vld [vmem:[#allocation75_spill] sm:$0xff]  ;;  %6670 = vpow2.f32 %v2093_v34 }
 0x380   : > { %v6653_v22 = vpop.eup %6652  ;;  %3027 = vadd.xlane.f32.xlu1 %v3026_v11 }
 0x381   : > { %v6655_v32 = vpop.eup %6654  ;;  %v9224_v49 = vpop.xlane.xlu1 %2883  ;;  %v1344_v11 = vmul.f32 %v6653_v22, %v10916_v48 }
 0x382   : > { %v6657_v13 = vpop.eup %6656  ;;  %2168 = vadd.xlane.f32.xlu0 %v2167_v7  ;;  %v2912_v7 = vsub.f32 %v10919_v33, %v8949_v4  ;;  %v1346_v41 = vmul.f32 %v6655_v32, %v10920_v23  ;;  %v10924_v33 = vld [vmem:[#allocation56_spill] sm:$0xff] }
 0x383   : > { %v9231_v1 = vpop.xlane.xlu0 %2874  ;;  %v1345_v6 = vmul.f32 %v6657_v13, %v10917_v38  ;;  %v9237_v26 = vpop.eup %6658  ;;  %v2948_v13 = vmul.f32 1.442695, %v2914_v59  ;;  %v5460_v38 = vld [vmem:[%s10527_s5 + $0x3d8] sm:$0xff] }
 0x384   : > { %10918 = vst [vmem:[#allocation21_spill] sm:$0xff] %v9237_v26  ;;  %3021 = vadd.xlane.f32.xlu1 %v3020_v9  ;;  %v9246_v27 = vpop.eup %6660  ;;  %v1365_v22 = vpack.c.bf16 %v1347_v28, %v1346_v41  ;;  %v3023_v4 = vsel %vm999_vm3, %v9237_v26, 0.0  ;;  %v2944_v32 = vmul.f32 1.442695, %v2912_v7  ;;  %v2919_v7 = vsub.f32 %v10924_v33, %v9003_v15  ;;  %v10931_v33 = vld [vmem:[#allocation86_spill] sm:$0xff]  ;;  %v10941_v26 = vld [vmem:[#allocation100_spill] sm:$0xff] }
 0x385   : > { %v9242_v31 = vpop.xlane.xlu1 %2877  ;;  %v1364_v21 = vpack.c.bf16 %v1345_v6, %v1344_v11  ;;  %v9253_v61 = vpop.eup %6662  ;;  %v2179_v28 = vsel %vm999_vm3, %v9246_v27, 0.0  ;;  %6672 = vpow2.f32 %v2948_v13 }
 0x386   : > { %2162 = vadd.xlane.f32.xlu0 %v2161_v39  ;;  %10921 = vst [vmem:[#allocation33_spill] sm:$0xff] %v9253_v61  ;;  %v9260_v59 = vpop.eup %6664  ;;  %v3032_v34 = vsel %vm999_vm3, %v9253_v61, 0.0  ;;  %6674 = vpow2.f32 %v2944_v32 }
 0x387   : > { %5848 = vmatprep.mubr.msk.bf16.mxu0 %vm999_vm3, %v1364_v21  ;;  %v9249_v0 = vpop.xlane.xlu0 %2868  ;;  %v10922_v21 = vld [vmem:[#allocation72_spill] sm:$0xff]  ;;  %v9266_v11 = vpop.eup %6666 }
 0x388   : > { %3024 = vadd.xlane.f32.xlu1 %v3023_v4  ;;  %5849 = vmatmul.mubr.msk.bf16.gmra.mrb[64].mxu0 %vm999_vm3, %v1365_v22  ;;  %v2927_v9 = vsub.f32 %v10922_v21, %v9144_v20  ;;  %10923 = vst [vmem:[#allocation35_spill] sm:$0xff] %v9266_v11  ;;  %v2173_v20 = vsel %vm999_vm3, %v9260_v59, 0.0  ;;  %v9277_v41 = vpop.eup %6668  ;;  %v10926_v22 = vld [vmem:[#allocation74_spill] sm:$0xff]  ;;  %v10927_v4 = vld [vmem:[#allocation113_spill] sm:$0xff] }
 0x389   : > { %v9256_v6 = vpop.xlane.xlu1 %2886  ;;  %10925 = vst [vmem:[#allocation52_spill] sm:$0xff] %v9277_v41  ;;  %v2925_v13 = vsub.f32 %v10926_v22, %v9160_v51  ;;  %v9283_v32 = vadd.f32 %v10927_v4, %v5460_v38  ;;  %v5461_v21 = vld [vmem:[%s10527_s5 + $0x3e0] sm:$0xff]  ;;  %v5462_v4 = vld [vmem:[%s10527_s5 + $0x3e8] sm:$0xff] }
 0x38a   : > { %2180 = vadd.xlane.f32.xlu0 %v2179_v28  ;;  %v2974_v39 = vmul.f32 1.442695, %v2927_v9  ;;  %v3050_v28 = vsel %vm999_vm3, %v9266_v11, 0.0  ;;  %v2958_v9 = vmul.f32 1.442695, %v2919_v7  ;;  %v9302_v7 = vadd.f32 %v5461_v21, %v8719_v36  ;;  %v10937_v11 = vld [vmem:[#allocation66_spill] sm:$0xff] }
 0x38b   : > { %v1287_v48 = vpop.xlane.xlu0 %1286  ;;  %10928 = vst [vmem:[#allocation53_spill] sm:$0xff] %v9283_v32  ;;  %v2970_v38 = vmul.f32 1.442695, %v2925_v13 }
 0x38c   : > { %3033 = vadd.xlane.f32.xlu1 %v3032_v34  ;;  %6676 = vrcp.f32 %v1287_v48  ;;  %v10929_v48 = vld [vmem:[#allocation63_spill] sm:$0xff]  ;;  %v2191_v34 = vsel %vm999_vm3, %v9277_v41, 0.0  ;;  %10932 = vst [vmem:[#allocation92_spill] sm:$0xff] %v9302_v7 }
 0x38d   : > { %v9273_v23 = vpop.xlane.xlu1 %2880  ;;  %6678 = vrcp.f32 %v9212_v25  ;;  %v2922_v51 = vsub.f32 %v10929_v48, %v9068_v12  ;;  %v3798_v12 = vsel %vm999_vm3, %v9283_v32, -inf }
 0x38e   : > { %2174 = vadd.xlane.f32.xlu0 %v2173_v20  ;;  %6680 = vrcp.f32 %v9192_v30  ;;  %v9297_v30 = vpop.eup %6670  ;;  %v2928_v20 = vsub.f32 %v10931_v33, %v9218_v50 }
 0x38f   : > { %v1281_v15 = vpop.xlane.xlu0 %1280  ;;  %10930 = vst [vmem:[#allocation54_spill] sm:$0xff] %v9297_v30  ;;  %v9313_v50 = vpop.eup %6672  ;;  %v2185_v36 = vsel %vm999_vm3, %v9297_v30, 0.0 }
 0x390   : > { %6682 = vrcp.f32 %v1281_v15  ;;  %3051 = vadd.xlane.f32.xlu1 %v3050_v28  ;;  %v2964_v15 = vmul.f32 1.442695, %v2922_v51  ;;  %10934 = vst [vmem:[#allocation22_spill] sm:$0xff] %v9313_v50  ;;  %v9319_v21 = vpop.eup %6674  ;;  %v2976_v48 = vmul.f32 1.442695, %v2928_v20  ;;  %v9324_v51 = vadd.f32 %v5462_v4, %v8733_v19  ;;  %v10938_v4 = vld [vmem:[#allocation83_spill] sm:$0xff] }
 0x391   : > { %v9293_v25 = vpop.xlane.xlu1 %2910  ;;  %6684 = vpow2.f32 %v2974_v39  ;;  %v10933_v39 = vld [vmem:[#allocation64_spill] sm:$0xff] }
 0x392   : > { %2192 = vadd.xlane.f32.xlu0 %v2191_v34  ;;  %6686 = vpow2.f32 %v2958_v9  ;;  %v2923_v13 = vsub.f32 %v10933_v39, %v9079_v24  ;;  %v10935_v34 = vld [vmem:[#allocation93_spill] sm:$0xff]  ;;  %10936 = vst [vmem:[#allocation51_spill] sm:$0xff] %v9324_v51 }
 0x393   : > { %v9304_v22 = vpop.xlane.xlu0 %2895  ;;  %6688 = vpow2.f32 %v2970_v38  ;;  %v2929_v33 = vsub.f32 %v10935_v34, %v9249_v0  ;;  %v2921_v38 = vsub.f32 %v10937_v11, %v9098_v5  ;;  %v3014_v0 = vsel %vm999_vm3, %v9313_v50, 0.0  ;;  %v10940_v11 = vld [vmem:[#allocation85_spill] sm:$0xff] }
 0x394   : > { %3799 = vmax.xlane.f32.xlu1 %v3798_v12  ;;  %v3801_v12 = vsel %vm999_vm3, %v9302_v7, -inf  ;;  %6690 = vpow2.f32 %v2964_v15  ;;  %v2966_v32 = vmul.f32 1.442695, %v2923_v13  ;;  %v10939_v7 = vld [vmem:[#allocation97_spill] sm:$0xff]  ;;  %v3804_v5 = vsel %vm999_vm3, %v9324_v51, -inf }
 0x395   : > { %v9315_v28 = vpop.xlane.xlu1 %3727  ;;  %6692 = vpow2.f32 %v2976_v48  ;;  %v2978_v34 = vmul.f32 1.442695, %v2929_v33  ;;  %v2962_v50 = vmul.f32 1.442695, %v2921_v38  ;;  %v10944_v33 = vld [vmem:[#allocation82_spill] sm:$0xff] }
 0x396   : > { %2186 = vadd.xlane.f32.xlu0 %v2185_v36  ;;  %v6677_v9 = vpop.eup %6676  ;;  %v2930_v36 = vsub.f32 %v10938_v4, %v9202_v62  ;;  %6694 = vpow2.f32 %v2966_v32  ;;  %v10943_v62 = vld [vmem:[#allocation73_spill] sm:$0xff] }
 0x397   : > { %v9326_v24 = vpop.xlane.xlu0 %2889  ;;  %v6679_v39 = vpop.eup %6678  ;;  %v1351_v15 = vmul.f32 %v6677_v9, %v10939_v7  ;;  %v2924_v48 = vsub.f32 %v10943_v62, %v9154_v44  ;;  %v3008_v9 = vsel %vm999_vm3, %v9319_v21, 0.0  ;;  %6696 = vpow2.f32 %v2978_v34 }
 0x398   : > { %3802 = vmax.xlane.f32.xlu1 %v3801_v12  ;;  %v6681_v20 = vpop.eup %6680  ;;  %v1348_v12 = vmul.f32 %v6679_v39, %v10940_v11  ;;  %v2980_v39 = vmul.f32 1.442695, %v2930_v36  ;;  %6698 = vpow2.f32 %v2962_v50 }
 0x399   : > { %v9332_v61 = vpop.xlane.xlu1 %3721 }
 0x39a   : > { %v6683_v19 = vpop.eup %6682  ;;  %3015 = vadd.xlane.f32.xlu0 %v3014_v0  ;;  %v1350_v0 = vmul.f32 %v6681_v20, %v10944_v33  ;;  %6700 = vpow2.f32 %v2980_v39  ;;  %v10950_v33 = vld [vmem:[#allocation91_spill] sm:$0xff] }
 0x39b   : > { %v9339_v13 = vpop.xlane.xlu0 %2898  ;;  %v1349_v30 = vmul.f32 %v6683_v19, %v10941_v26  ;;  %v9345_v41 = vpop.eup %6684  ;;  %v10945_v26 = vld [vmem:[#allocation88_spill] sm:$0xff] }
 0x39c   : > { %10942 = vst [vmem:[#allocation37_spill] sm:$0xff] %v9345_v41  ;;  %3805 = vmax.xlane.f32.xlu1 %v3804_v5  ;;  %v9354_v51 = vpop.eup %6686  ;;  %v2931_v19 = vsub.f32 %v10945_v26, %v9231_v1  ;;  %v1367_v32 = vpack.c.bf16 %v1351_v15, %v1350_v0  ;;  %v3053_v38 = vsel %vm999_vm3, %v9345_v41, 0.0  ;;  %v2932_v0 = vsub.f32 %v10950_v33, %v9242_v31  ;;  %v10952_v26 = vld [vmem:[#allocation98_spill] sm:$0xff]  ;;  %v10954_v31 = vld [vmem:[#allocation87_spill] sm:$0xff] }
 0x39d   : > { %v9350_v7 = vpop.xlane.xlu1 %3739  ;;  %v1366_v4 = vpack.c.bf16 %v1349_v30, %v1348_v12  ;;  %v9363_v20 = vpop.eup %6688  ;;  %v2968_v30 = vmul.f32 1.442695, %v2924_v48  ;;  %v3029_v1 = vsel %vm999_vm3, %v9354_v51, 0.0 }
 0x39e   : > { %3009 = vadd.xlane.f32.xlu0 %v3008_v9  ;;  %10946 = vst [vmem:[#allocation99_spill] sm:$0xff] %v9363_v20  ;;  %v9370_v34 = vpop.eup %6690  ;;  %v2982_v15 = vmul.f32 1.442695, %v2931_v19  ;;  %v3047_v11 = vsel %vm999_vm3, %v9363_v20, 0.0  ;;  %v2933_v19 = vsub.f32 %v10952_v26, %v9273_v23  ;;  %v10956_v23 = vld [vmem:[#allocation95_spill] sm:$0xff] }
 0x39f   : > { %5852 = vmatprep.mubr.msk.bf16.mxu0 %vm999_vm3, %v1366_v4  ;;  %v9359_v44 = vpop.xlane.xlu0 %2892  ;;  %10947 = vst [vmem:[#allocation25_spill] sm:$0xff] %v9370_v34  ;;  %v9376_v50 = vpop.eup %6692  ;;  %6702 = vpow2.f32 %v2968_v30  ;;  %v3038_v62 = vsel %vm999_vm3, %v9370_v34, 0.0 }
 0x3a0   : > { %3054 = vadd.xlane.f32.xlu1 %v3053_v38  ;;  %5853 = vmatmul.mubr.msk.bf16.gmra.mrb[68].mxu0 %vm999_vm3, %v1367_v32  ;;  %10948 = vst [vmem:[#allocation102_spill] sm:$0xff] %v9376_v50  ;;  %v9382_v48 = vpop.eup %6694  ;;  %6704 = vpow2.f32 %v2982_v15  ;;  %v3056_v4 = vsel %vm999_vm3, %v9376_v50, 0.0  ;;  %v2984_v15 = vmul.f32 1.442695, %v2932_v0  ;;  %v2986_v26 = vmul.f32 1.442695, %v2933_v19 }
 0x3a1   : > { %v9366_v36 = vpop.xlane.xlu1 %3733  ;;  %10949 = vst [vmem:[#allocation26_spill] sm:$0xff] %v9382_v48  ;;  %v9390_v39 = vpop.eup %6696  ;;  %v3041_v38 = vsel %vm999_vm3, %v9382_v48, 0.0  ;;  %v5459_v0 = vld [vmem:[%s10527_s5 + $0x3d0] sm:$0xff]  ;;  %v10966_v48 = vld [vmem:[#allocation119_spill] sm:$0xff] }
 0x3a2   : > { %3030 = vadd.xlane.f32.xlu0 %v3029_v1  ;;  %10951 = vst [vmem:[#allocation40_spill] sm:$0xff] %v9390_v39  ;;  %v9398_v30 = vpop.eup %6698  ;;  %v2934_v1 = vsub.f32 %v10954_v31, %v9224_v49  ;;  %6706 = vpow2.f32 %v2984_v15  ;;  %v10959_v31 = vld [vmem:[#allocation107_spill] sm:$0xff]  ;;  %v10960_v15 = vld [vmem:[#allocation110_spill] sm:$0xff] }
 0x3a3   : > { %v9372_v5 = vpop.xlane.xlu0 %2907  ;;  %10953 = vst [vmem:[#allocation27_spill] sm:$0xff] %v9398_v30  ;;  %v3035_v41 = vsel %vm999_vm3, %v9398_v30, 0.0  ;;  %6708 = vpow2.f32 %v2986_v26 }
 0x3a4   : > { %3048 = vadd.xlane.f32.xlu1 %v3047_v11  ;;  %v9406_v33 = vpop.eup %6700 }
 0x3a5   : > { %v9378_v12 = vpop.xlane.xlu1 %3751  ;;  %10955 = vst [vmem:[#allocation42_spill] sm:$0xff] %v9406_v33  ;;  %v3062_v19 = vsel %vm999_vm3, %v9406_v33, 0.0  ;;  %v5464_v33 = vld [vmem:[%s10527_s5 + $0x3f8] sm:$0xff] }
 0x3a6   : > { %3039 = vadd.xlane.f32.xlu0 %v3038_v62  ;;  %v3059_v62 = vsel %vm999_vm3, %v9390_v39, 0.0  ;;  %v2936_v39 = vsub.f32 %v10959_v31, %v9326_v24  ;;  %v9433_v24 = vadd.f32 %v10960_v15, %v5459_v0  ;;  %v10965_v15 = vld [vmem:[#allocation111_spill] sm:$0xff] }
 0x3a7   : > { %v9386_v9 = vpop.xlane.xlu0 %2901 }
 0x3a8   : > { %3057 = vadd.xlane.f32.xlu1 %v3056_v4  ;;  %v2935_v4 = vsub.f32 %v10956_v23, %v9256_v6  ;;  %v5463_v23 = vld [vmem:[%s10527_s5 + $0x3f0] sm:$0xff]  ;;  %10961 = vst [vmem:[#allocation60_spill] sm:$0xff] %v9433_v24  ;;  %v2992_v34 = vmul.f32 1.442695, %v2936_v39 }
 0x3a9   : > { %v9394_v32 = vpop.xlane.xlu1 %3745  ;;  %v9414_v49 = vpop.eup %6702 }
 0x3aa   : > { %3042 = vadd.xlane.f32.xlu0 %v3041_v38  ;;  %10958 = vst [vmem:[#allocation48_spill] sm:$0xff] %v9414_v49  ;;  %v2988_v38 = vmul.f32 1.442695, %v2934_v1  ;;  %v2990_v20 = vmul.f32 1.442695, %v2935_v4  ;;  %v2937_v1 = vsub.f32 %v8695_v17, %v9359_v44  ;;  %v3044_v31 = vsel %vm999_vm3, %v9414_v49, 0.0 }
 0x3ab   : > { %v9402_v11 = vpop.xlane.xlu0 %2904  ;;  %v10962_v4 = vld [vmem:[#allocation103_spill] sm:$0xff]  ;;  %v10963_v17 = vld [vmem:[#allocation117_spill] sm:$0xff]  ;;  %v2939_v49 = vsub.f32 %v10965_v15, %v9339_v13 }
 0x3ac   : > { %3060 = vadd.xlane.f32.xlu1 %v3059_v62  ;;  %v9425_v62 = vpop.eup %6704  ;;  %6710 = vpow2.f32 %v2988_v38  ;;  %v2938_v26 = vsub.f32 %v10962_v4, %v9304_v22  ;;  %v9445_v44 = vadd.f32 %v10963_v17, %v5463_v23  ;;  %v2994_v30 = vmul.f32 1.442695, %v2937_v1 }
 0x3ad   : > { %v9410_v50 = vpop.xlane.xlu1 %3763  ;;  %6712 = vpow2.f32 %v2990_v20  ;;  %v9452_v38 = vadd.f32 %v10966_v48, %v5464_v33  ;;  %v3795_v22 = vsel %vm999_vm3, %v9433_v24, -inf  ;;  %v2940_v23 = vsub.f32 %v8741_v54, %v9386_v9  ;;  %v9464_v1 = vpop.eup %6706  ;;  %v10968_v33 = vld [vmem:[#allocation122_spill] sm:$0xff] }
 0x3ae   : > { %10957 = vst [vmem:[#allocation106_spill] sm:$0xff] %v9410_v50  ;;  %3036 = vadd.xlane.f32.xlu0 %v3035_v41  ;;  %10964 = vst [vmem:[#allocation61_spill] sm:$0xff] %v9445_v44  ;;  %v2996_v39 = vmul.f32 1.442695, %v2938_v26  ;;  %6714 = vpow2.f32 %v2992_v34  ;;  %v3807_v13 = vsel %vm999_vm3, %v9445_v44, -inf  ;;  %v9472_v54 = vpop.eup %6708  ;;  %v10969_v9 = vld [vmem:[#allocation118_spill] sm:$0xff] }
 0x3af   : > { %v9421_v6 = vpop.xlane.xlu0 %3724  ;;  %10967 = vst [vmem:[#allocation62_spill] sm:$0xff] %v9452_v38  ;;  %v2998_v48 = vmul.f32 1.442695, %v2939_v49  ;;  %6716 = vpow2.f32 %v2994_v30  ;;  %v3810_v34 = vsel %vm999_vm3, %v9452_v38, -inf  ;;  %v2942_v26 = vsub.f32 %v10969_v9, %v9372_v5  ;;  %v10971_v9 = vld [vmem:[#allocation108_spill] sm:$0xff] }
 0x3b0   : > { %3063 = vadd.xlane.f32.xlu1 %v3062_v19  ;;  %v3065_v19 = vsel %vm999_vm3, %v9425_v62, 0.0  ;;  %6718 = vpow2.f32 %v2996_v39  ;;  %v3000_v17 = vmul.f32 1.442695, %v2940_v23  ;;  %v3068_v30 = vsel %vm999_vm3, %v9464_v1, 0.0 }
 0x3b1   : > { %v9435_v41 = vpop.xlane.xlu1 %3757  ;;  %6720 = vpow2.f32 %v2998_v48  ;;  %v3071_v39 = vsel %vm999_vm3, %v9472_v54, 0.0  ;;  %v3004_v23 = vmul.f32 1.442695, %v2942_v26 }
 0x3b2   : > { %3045 = vadd.xlane.f32.xlu0 %v3044_v31  ;;  %v2941_v31 = vsub.f32 %v10968_v33, %v9402_v11  ;;  %v10970_v11 = vld [vmem:[#allocation101_spill] sm:$0xff]  ;;  %6722 = vpow2.f32 %v3000_v17 }
 0x3b3   : > { %v3719_v0 = vpop.xlane.xlu0 %3718  ;;  %v2943_v15 = vsub.f32 %v10970_v11, %v9293_v25 }
 0x3b4   : > { %3066 = vadd.xlane.f32.xlu1 %v3065_v19  ;;  %v3813_v33 = vsub.f32 %v8796_v43, %v3719_v0  ;;  %v10972_v0 = vld [vmem:[#allocation124_spill] sm:$0xff] }
 0x3b5   : > { %v9454_v50 = vpop.xlane.xlu1 %2108  ;;  %v3815_v17 = vsub.f32 %v10972_v0, %v9421_v6 }
 0x3b6   : > { %3796 = vmax.xlane.f32.xlu0 %v3795_v22  ;;  %v9478_v49 = vpop.eup %6710  ;;  %v3002_v22 = vmul.f32 1.442695, %v2941_v31  ;;  %v3006_v31 = vmul.f32 1.442695, %v2943_v15 }
 0x3b7   : > { %v9460_v20 = vpop.xlane.xlu0 %3736  ;;  %v9486_v5 = vpop.eup %6712  ;;  %v3074_v25 = vsel %vm999_vm3, %v9478_v49, 0.0 }
 0x3b8   : > { %3808 = vmax.xlane.f32.xlu1 %v3807_v13  ;;  %v9493_v48 = vpop.eup %6714  ;;  %6724 = vpow2.f32 %v3002_v22  ;;  %v3077_v26 = vsel %vm999_vm3, %v9486_v5, 0.0  ;;  %v10974_v22 = vld [vmem:[#allocation105_spill] sm:$0xff] }
 0x3b9   : > { %v9468_v4 = vpop.xlane.xlu1 %2102  ;;  %v9501_v43 = vpop.eup %6716  ;;  %6726 = vpow2.f32 %v3004_v23 }
 0x3ba   : > { %3811 = vmax.xlane.f32.xlu0 %v3810_v34  ;;  %v9509_v15 = vpop.eup %6718  ;;  %6728 = vpow2.f32 %v3006_v31  ;;  %v3083_v6 = vsel %vm999_vm3, %v9501_v43, 0.0 }
 0x3bb   : > { %v3731_v19 = vpop.xlane.xlu0 %3730  ;;  %10973 = vst [vmem:[#allocation104_spill] sm:$0xff] %v9509_v15  ;;  %v9517_v23 = vpop.eup %6720 }
 0x3bc   : > { %3069 = vadd.xlane.f32.xlu1 %v3068_v30  ;;  %v3814_v30 = vsub.f32 %v10971_v9, %v9332_v61  ;;  %v3080_v61 = vsel %vm999_vm3, %v9493_v48, 0.0  ;;  %10975 = vst [vmem:[#allocation28_spill] sm:$0xff] %v9517_v23  ;;  %v9525_v31 = vpop.eup %6722 }
 0x3bd   : > { %v9482_v13 = vpop.xlane.xlu1 %3772  ;;  %10977 = vst [vmem:[#allocation59_spill] sm:$0xff] %v9525_v31 }
 0x3be   : > { %3072 = vadd.xlane.f32.xlu0 %v3071_v39  ;;  %v3845_v39 = vmul.f32 1.442695, %v3813_v33  ;;  %v3847_v9 = vmul.f32 1.442695, %v3814_v30  ;;  %v3849_v33 = vmul.f32 1.442695, %v3815_v17 }
 0x3bf   : > { %v9489_v34 = vpop.xlane.xlu0 %3748  ;;  %v3089_v17 = vsel %vm999_vm3, %v9517_v23, 0.0 }
 0x3c0   : > { %3075 = vadd.xlane.f32.xlu1 %v3074_v25  ;;  %v3816_v25 = vsub.f32 %v10974_v22, %v9315_v28  ;;  %6730 = vpow2.f32 %v3845_v39  ;;  %v3086_v28 = vsel %vm999_vm3, %v9509_v15, 0.0 }
 0x3c1   : > { %v9497_v11 = vpop.xlane.xlu1 %3766  ;;  %6732 = vpow2.f32 %v3847_v9 }
 0x3c2   : > { %3078 = vadd.xlane.f32.xlu0 %v3077_v26  ;;  %v10976_v26 = vld [vmem:[#allocation116_spill] sm:$0xff]  ;;  %v3851_v30 = vmul.f32 1.442695, %v3816_v25  ;;  %v9532_v39 = vpop.eup %6724  ;;  %6734 = vpow2.f32 %v3849_v33 }
 0x3c3   : > { %v9505_v38 = vpop.xlane.xlu0 %3742  ;;  %v3818_v0 = vsub.f32 %v10976_v26, %v9366_v36  ;;  %10979 = vst [vmem:[#allocation109_spill] sm:$0xff] %v9532_v39  ;;  %v3092_v26 = vsel %vm999_vm3, %v9525_v31, 0.0  ;;  %v9538_v25 = vpop.eup %6726  ;;  %v3095_v9 = vsel %vm999_vm3, %v9532_v39, 0.0 }
 0x3c4   : > { %3081 = vadd.xlane.f32.xlu1 %v3080_v61  ;;  %v3817_v61 = vsub.f32 %v8833_v8, %v3731_v19  ;;  %10980 = vst [vmem:[#allocation29_spill] sm:$0xff] %v9538_v25  ;;  %6736 = vpow2.f32 %v3851_v30 }
 0x3c5   : > { %v9513_v44 = vpop.xlane.xlu1 %3775  ;;  %v3855_v36 = vmul.f32 1.442695, %v3818_v0  ;;  %v3098_v0 = vsel %vm999_vm3, %v9538_v25, 0.0 }
 0x3c6   : > { %3084 = vadd.xlane.f32.xlu0 %v3083_v6  ;;  %v3853_v8 = vmul.f32 1.442695, %v3817_v61 }
 0x3c7   : > { %v9521_v24 = vpop.xlane.xlu0 %3760  ;;  %6738 = vpow2.f32 %v3855_v36 }
 0x3c8   : > { %3087 = vadd.xlane.f32.xlu1 %v3086_v28  ;;  %v9542_v28 = vpop.eup %6728  ;;  %6740 = vpow2.f32 %v3853_v8 }
 0x3c9   : > { %v9528_v22 = vpop.xlane.xlu1 %3769  ;;  %10981 = vst [vmem:[#allocation112_spill] sm:$0xff] %v9542_v28  ;;  %v3101_v61 = vsel %vm999_vm3, %v9542_v28, 0.0 }
 0x3ca   : > { %10978 = vst [vmem:[#allocation50_spill] sm:$0xff] %v9528_v22  ;;  %3090 = vadd.xlane.f32.xlu0 %v3089_v17  ;;  %v9546_v17 = vpop.eup %6730  ;;  %v3819_v22 = vsub.f32 %v8812_v16, %v9460_v20  ;;  %v10985_v20 = vld [vmem:[#allocation114_spill] sm:$0xff] }
 0x3cb   : > { %v9534_v6 = vpop.xlane.xlu0 %3754  ;;  %10982 = vst [vmem:[#allocation30_spill] sm:$0xff] %v9546_v17  ;;  %v3820_v8 = vsub.f32 %v10985_v20, %v9350_v7 }
 0x3cc   : > { %3093 = vadd.xlane.f32.xlu1 %v3092_v26  ;;  %v9554_v26 = vpop.eup %6732 }
 0x3cd   : > { %v2121_v19 = vpop.xlane.xlu1 %2120  ;;  %10983 = vst [vmem:[#allocation55_spill] sm:$0xff] %v9554_v26  ;;  %v9560_v16 = vpop.eup %6734  ;;  %v3859_v25 = vmul.f32 1.442695, %v3820_v8 }
 0x3ce   : > { %3096 = vadd.xlane.f32.xlu0 %v3095_v9  ;;  %v3909_v9 = vsel %vm999_vm3, %v9546_v17, 0.0  ;;  %10984 = vst [vmem:[#allocation115_spill] sm:$0xff] %v9560_v16  ;;  %v3915_v17 = vsel %vm999_vm3, %v9560_v16, 0.0 }
 0x3cf   : > { %v2112_v33 = vpop.xlane.xlu0 %2111 }
 0x3d0   : > { %3099 = vadd.xlane.f32.xlu1 %v3098_v0  ;;  %6742 = vrcp.f32 %v2112_v33  ;;  %v3857_v33 = vmul.f32 1.442695, %v3819_v22 }
 0x3d1   : > { %v9550_v30 = vpop.xlane.xlu1 %2132  ;;  %6744 = vrcp.f32 %v9468_v4  ;;  %v3912_v4 = vsel %vm999_vm3, %v9554_v26, 0.0 }
 0x3d2   : > { %3102 = vadd.xlane.f32.xlu0 %v3101_v61  ;;  %6746 = vrcp.f32 %v9454_v50  ;;  %v9568_v61 = vpop.eup %6736 }
 0x3d3   : > { %v2106_v36 = vpop.xlane.xlu0 %2105  ;;  %10986 = vst [vmem:[#allocation31_spill] sm:$0xff] %v9568_v61  ;;  %v9572_v28 = vpop.eup %6738  ;;  %v3918_v22 = vsel %vm999_vm3, %v9568_v61, 0.0 }
 0x3d4   : > { %6748 = vrcp.f32 %v2106_v36  ;;  %3910 = vadd.xlane.f32.xlu1 %v3909_v9  ;;  %10987 = vst [vmem:[#allocation57_spill] sm:$0xff] %v9572_v28  ;;  %v9576_v36 = vpop.eup %6740 }
 0x3d5   : > { %v9564_v0 = vpop.xlane.xlu1 %2126  ;;  %6750 = vpow2.f32 %v3857_v33  ;;  %10988 = vst [vmem:[#allocation58_spill] sm:$0xff] %v9576_v36  ;;  %v3921_v8 = vsel %vm999_vm3, %v9576_v36, 0.0 }
 0x3d6   : > { %3913 = vadd.xlane.f32.xlu0 %v3912_v4  ;;  %6752 = vpow2.f32 %v3859_v25  ;;  %v3924_v25 = vsel %vm999_vm3, %v9572_v28, 0.0 }
 0x3d7   : > { %v2115_v50 = vpop.xlane.xlu0 %2114 }
 0x3d8   : > { %3916 = vadd.xlane.f32.xlu1 %v3915_v17 }
 0x3d9   : > { %v2136_v7 = vpop.xlane.xlu1 %2135 }
 0x3da   : > { %3919 = vadd.xlane.f32.xlu0 %v3918_v22  ;;  %v6743_v9 = vpop.eup %6742 }
 0x3db   : > { %v2124_v20 = vpop.xlane.xlu0 %2123  ;;  %v6745_v26 = vpop.eup %6744  ;;  %v2232_v33 = vmul.f32 %v6743_v9, %v8937_v55 }
 0x3dc   : > { %v6747_v4 = vpop.eup %6746  ;;  %v2229_v61 = vmul.f32 %v6745_v26, %v8822_v18  ;;  %6754 = vrcp.f32 %v2124_v20  ;;  %v10990_v26 = vld [vmem:[#allocation11_spill] sm:$0xff] }
 0x3dd   : > { %v9578_v31 = vpop.xlane.xlu1 %3790  ;;  %v2231_v15 = vmul.f32 %v6747_v4, %v8808_v46  ;;  %6756 = vrcp.f32 %v2115_v50  ;;  %v10993_v4 = vld [vmem:[#allocation2_spill] sm:$0xff] }
 0x3de   : > { %10989 = vst [vmem:[#allocation68_spill] sm:$0xff] %v9578_v31  ;;  %v6749_v17 = vpop.eup %6748  ;;  %3922 = vadd.xlane.f32.xlu0 %v3921_v8  ;;  %6758 = vrcp.f32 %v2121_v19  ;;  %v10991_v19 = vld [vmem:[#allocation3_spill] sm:$0xff] }
 0x3df   : > { %v9583_v16 = vpop.xlane.xlu0 %3784  ;;  %v2230_v22 = vmul.f32 %v6749_v17, %v8939_v56  ;;  %v9592_v31 = vpop.eup %6750  ;;  %v2262_v36 = vpack.c.bf16 %v2232_v33, %v2231_v15  ;;  %v10994_v17 = vld [vmem:[#allocation14_spill] sm:$0xff] }
 0x3e0   : > { %v3927_v18 = vsel %vm999_vm3, %v9592_v31, 0.0  ;;  %v9599_v56 = vpop.eup %6752 }
 0x3e1   : > { %v9588_v39 = vpop.xlane.xlu1 %3793  ;;  %v2261_v23 = vpack.c.bf16 %v2230_v22, %v2229_v61  ;;  %v10992_v61 = vld [vmem:[#allocation13_spill] sm:$0xff] }
 0x3e2   : > { %3925 = vadd.xlane.f32.xlu0 %v3924_v25 }
 0x3e3   : > { %5912 = vmatprep.mubr.msk.bf16.mxu0 %vm999_vm3, %v2261_v23  ;;  %v2118_v55 = vpop.xlane.xlu0 %2117 }
 0x3e4   : > { %5913 = vmatmul.mubr.msk.bf16.vlgmr.msra.gmra.mrb[72].mxu0 %vm999_vm3, %v2262_v36  ;;  %6760 = vrcp.f32 %v2118_v55 }
 0x3e5   : > { %5989 = vmatpush3.bf16.msra.mxu0 %v10838_v29  ;;  %v2139_v46 = vpop.xlane.xlu1 %2138  ;;  %v3930_v29 = vsel %vm999_vm3, %v9599_v56, 0.0  ;;  %6762 = vrcp.f32 %v2136_v7 }
 0x3e6   : > { %5990 = vmatprep.subr.bf16.mxu0 %v10990_v26  ;;  %3928 = vadd.xlane.f32.xlu0 %v3927_v18  ;;  %v6755_v36 = vpop.eup %6754  ;;  %6764 = vrcp.f32 %v9564_v0 }
 0x3e7   : > { %v9602_v15 = vpop.xlane.xlu0 %3778  ;;  %v6757_v9 = vpop.eup %6756  ;;  %v2236_v25 = vmul.f32 %v6755_v36, %v8991_v53  ;;  %6766 = vrcp.f32 %v9550_v30  ;;  %v3821_v30 = vsub.f32 %v8881_v2, %v9505_v38  ;;  %v3823_v2 = vsub.f32 %v8859_v10, %v9489_v34 }
 0x3e8   : > { %v6759_v8 = vpop.eup %6758  ;;  %v2233_v55 = vmul.f32 %v6757_v9, %v8974_v14  ;;  %v10996_v14 = vld [vmem:[#allocation16_spill] sm:$0xff] }
 0x3e9   : > { %5991 = vmatpush3.bf16.msra.mxu0 %v10990_v26  ;;  %v2148_v23 = vpop.xlane.xlu1 %2147  ;;  %4085 = vrot.lane.b32.xlu1 %v10991_v19, %s7012_s23  ;;  %v2235_v19 = vmul.f32 %v6759_v8, %v8945_v45  ;;  %v3250_v53 = vand.u32 %v10996_v14, %v10829_v52  ;;  %v3861_v38 = vmul.f32 1.442695, %v3821_v30  ;;  %v3865_v34 = vmul.f32 1.442695, %v3823_v2 }
 0x3ea   : > { %5992 = vmatprep.subr.bf16.mxu0 %v10992_v61  ;;  %3931 = vadd.xlane.f32.xlu0 %v3930_v29  ;;  %v10995_v29 = vld [vmem:[#allocation15_spill] sm:$0xff] }
 0x3eb   : > { %v9610_v50 = vpop.xlane.xlu0 %3787  ;;  %v2264_v28 = vpack.c.bf16 %v2236_v25, %v2235_v19  ;;  %v10999_v19 = vld [vmem:[#allocation120_spill] sm:$0xff] }
 0x3ed   : > { %5993 = vmatpush3.bf16.msra.mxu0 %v10992_v61  ;;  %v9613_v20 = vpop.xlane.xlu1 %2171  ;;  %4087 = vrot.lane.b32.xlu1 %v10993_v4, %s7012_s23 }
 0x3ee   : > { %5994 = vmatprep.subr.bf16.mxu0 %v10994_v17  ;;  %v6761_v33 = vpop.eup %6760 }
 0x3ef   : > { %v9618_v22 = vpop.xlane.xlu0 %3781  ;;  %v2234_v18 = vmul.f32 %v6761_v33, %v9019_v60  ;;  %v6763_v9 = vpop.eup %6762 }
 0x3f0   : > { %v6765_v8 = vpop.eup %6764 }
 0x3f1   : > { %5995 = vmatpush3.bf16.msra.mxu0 %v10994_v17  ;;  %v9624_v26 = vpop.xlane.xlu1 %2165  ;;  %v2263_v61 = vpack.c.bf16 %v2234_v18, %v2233_v55  ;;  %v2240_v18 = vmul.f32 %v6763_v9, %v8981_v42 }
 0x3f2   : > { %5996 = vmatprep.subr.bf16.mxu0 %v10995_v29 }
 0x3f3   : > { %v2130_v4 = vpop.xlane.xlu0 %2129  ;;  %5916 = vmatprep.mubr.msk.bf16.mxu0 %vm999_vm3, %v2263_v61  ;;  %v11000_v61 = vld [vmem:[#allocation4_spill] sm:$0xff] }
 0x3f4   : > { %6768 = vrcp.f32 %v2130_v4  ;;  %5917 = vmatmul.mubr.msk.bf16.gmra.mrb[76].mxu0 %vm999_vm3, %v2264_v28  ;;  %v2237_v4 = vmul.f32 %v6765_v8, %v8969_v58 }
 0x3f5   : > { %v9634_v60 = vpop.xlane.xlu1 %2183  ;;  %5997 = vmatpush3.bf16.msra.mxu0 %v10995_v29  ;;  %6770 = vrcp.f32 %v2139_v46  ;;  %v6767_v46 = vpop.eup %6766  ;;  %v3824_v29 = vsub.f32 %v10999_v19, %v9378_v12 }
 0x3f6   : > { %5998 = vmatprep.subr.bf16.mxu0 %v3250_v53 }
 0x3f7   : > { %v2145_v45 = vpop.xlane.xlu0 %2144 }
 0x3f8   : > { %6772 = vrcp.f32 %v2145_v45  ;;  %v11001_v45 = vld [vmem:[#allocation84_spill] sm:$0xff] }
 0x3f9   : > { %v9637_v0 = vpop.xlane.xlu1 %2177  ;;  %5999 = vmatpush3.bf16.msra.mxu0 %v3250_v53  ;;  %6774 = vrcp.f32 %v2148_v23 }
 0x3fb   : > { %v9641_v7 = vpop.f32.mrb[40].mxu0  ;;  %v2142_v36 = vpop.xlane.xlu0 %2141 }
 0x3fc   : > { %6776 = vrcp.f32 %v2142_v36  ;;  %v9643_v28 = vpop.f32.mrb[41].mxu0  ;;  %v2239_v36 = vmul.f32 %v6767_v46, %v11001_v45 }
 0x3fd   : > { %10997 = vst [vmem:[#allocation69_spill] sm:$0xff] %v9643_v28  ;;  %v9645_v17 = vpop.f32.mrb[42].mxu0  ;;  %v9647_v33 = vpop.xlane.xlu1 %2195  ;;  %6778 = vpow2.f32 %v3861_v38  ;;  %v11002_v38 = vld [vmem:[#allocation121_spill] sm:$0xff] }
 0x3fe   : > { %v9649_v25 = vpop.f32.mrb[43].mxu0  ;;  %v6769_v55 = vpop.eup %6768  ;;  %v2266_v42 = vpack.c.bf16 %v2240_v18, %v2239_v36  ;;  %6780 = vpow2.f32 %v3865_v34  ;;  %v3822_v18 = vsub.f32 %v11002_v38, %v9394_v32 }
 0x3ff   : > { %10998 = vst [vmem:[#allocation70_spill] sm:$0xff] %v9649_v25  ;;  %v2157_v23 = vpop.xlane.xlu0 %2156  ;;  %v2238_v14 = vmul.f32 %v6769_v55, %v9087_v3  ;;  %v6771_v10 = vpop.eup %6770  ;;  %v3867_v25 = vmul.f32 1.442695, %v3824_v29  ;;  %v11003_v29 = vld [vmem:[#allocation76_spill] sm:$0xff] }
 0x400   : > { %4089 = vrot.lane.b32.xlu0 %v11000_v61, %s7012_s23  ;;  %v2241_v46 = vmul.f32 %v6771_v10, %v9040_v57 }
 0x401   : > { %v9660_v53 = vpop.xlane.xlu1 %2189  ;;  %v2265_v28 = vpack.c.bf16 %v2238_v14, %v2237_v4  ;;  %6782 = vpow2.f32 %v3867_v25  ;;  %v3863_v14 = vmul.f32 1.442695, %v3822_v18 }
 0x402   : > { %v6773_v9 = vpop.eup %6772 }
 0x403   : > { %v2151_v30 = vpop.xlane.xlu0 %2150  ;;  %5920 = vmatprep.mubr.msk.bf16.mxu0 %vm999_vm3, %v2265_v28  ;;  %v6775_v12 = vpop.eup %6774  ;;  %v2243_v2 = vmul.f32 %v6773_v9, %v9118_v40 }
 0x404   : > { %5921 = vmatmul.mubr.msk.bf16.gmra.mrb[80].mxu0 %vm999_vm3, %v2266_v42  ;;  %v2244_v61 = vmul.f32 %v6775_v12, %v11003_v29  ;;  %v11005_v29 = vld [vmem:[#allocation94_spill] sm:$0xff] }
 0x405   : > { %v9665_v58 = vpop.xlane.xlu1 %3018 }
 0x406   : > { %v6777_v3 = vpop.eup %6776 }
 0x407   : > { %v2160_v8 = vpop.xlane.xlu0 %2159  ;;  %v2242_v55 = vmul.f32 %v6777_v3, %v9136_v37  ;;  %v2268_v37 = vpack.c.bf16 %v2244_v61, %v2243_v2  ;;  %v9680_v25 = vpop.eup %6778  ;;  %v11006_v61 = vld [vmem:[#allocation23_spill] sm:$0xff] }
 0x408   : > { %6784 = vrcp.f32 %v2160_v8  ;;  %v3933_v10 = vsel %vm999_vm3, %v9680_v25, 0.0  ;;  %v9691_v34 = vpop.eup %6780 }
 0x409   : > { %v9672_v28 = vpop.xlane.xlu1 %3012  ;;  %v2267_v19 = vpack.c.bf16 %v2242_v55, %v2241_v46  ;;  %6786 = vrcp.f32 %v2151_v30  ;;  %v3939_v8 = vsel %vm999_vm3, %v9691_v34, 0.0 }
 0x40a   : > { %6788 = vrcp.f32 %v2157_v23 }
 0x40b   : > { %v9675_v4 = vpop.f32.mrb[44].mxu0  ;;  %5924 = vmatprep.mubr.msk.bf16.mxu0 %vm999_vm3, %v2267_v19  ;;  %v2154_v57 = vpop.xlane.xlu0 %2153 }
 0x40c   : > { %6790 = vrcp.f32 %v2154_v57  ;;  %v9678_v40 = vpop.f32.mrb[45].mxu0  ;;  %5925 = vmatmul.mubr.msk.bf16.gmra.mrb[84].mxu0 %vm999_vm3, %v2268_v37  ;;  %v9695_v42 = vpop.eup %6782 }
 0x40d   : > { %11004 = vst [vmem:[#allocation34_spill] sm:$0xff] %v9678_v40  ;;  %v9683_v32 = vpop.f32.mrb[46].mxu0  ;;  %v9685_v45 = vpop.xlane.xlu1 %3027  ;;  %6792 = vpow2.f32 %v3863_v14 }
 0x40e   : > { %v9687_v36 = vpop.f32.mrb[47].mxu0 }
 0x40f   : > { %v2169_v23 = vpop.xlane.xlu0 %2168 }
 0x410   : > { %6794 = vrcp.f32 %v2169_v23 }
 0x411   : > { %v9693_v30 = vpop.xlane.xlu1 %3021  ;;  %3934 = vadd.xlane.f32.xlu1 %v3933_v10  ;;  %6796 = vrcp.f32 %v9624_v26 }
 0x412   : > { %v6785_v9 = vpop.eup %6784  ;;  %6798 = vrcp.f32 %v9613_v20  ;;  %v3942_v20 = vsel %vm999_vm3, %v9695_v42, 0.0 }
 0x413   : > { %v2163_v12 = vpop.xlane.xlu0 %2162  ;;  %v6787_v3 = vpop.eup %6786  ;;  %v2248_v38 = vmul.f32 %v6785_v9, %v9180_v47 }
 0x414   : > { %6800 = vrcp.f32 %v2163_v12  ;;  %v6789_v46 = vpop.eup %6788  ;;  %v2245_v19 = vmul.f32 %v6787_v3, %v9152_v35 }
 0x415   : > { %v3025_v55 = vpop.xlane.xlu1 %3024  ;;  %3940 = vadd.xlane.f32.xlu1 %v3939_v8  ;;  %v2247_v57 = vmul.f32 %v6789_v46, %v11006_v61 }
 0x416   : > { %v6791_v2 = vpop.eup %6790 }
 0x417   : > { %v2181_v18 = vpop.xlane.xlu0 %2180  ;;  %v2246_v26 = vmul.f32 %v6791_v2, %v11005_v29  ;;  %v9709_v23 = vpop.eup %6792  ;;  %v2270_v47 = vpack.c.bf16 %v2248_v38, %v2247_v57  ;;  %v11013_v57 = vld [vmem:[#allocation90_spill] sm:$0xff] }
 0x418   : > { %6802 = vrcp.f32 %v2181_v18  ;;  %v11011_v18 = vld [vmem:[#allocation24_spill] sm:$0xff] }
 0x419   : > { %v9707_v37 = vpop.xlane.xlu1 %3033  ;;  %3943 = vadd.xlane.f32.xlu1 %v3942_v20  ;;  %v2269_v14 = vpack.c.bf16 %v2246_v26, %v2245_v19  ;;  %6804 = vrcp.f32 %v9637_v0  ;;  %v11012_v20 = vld [vmem:[#allocation19_spill] sm:$0xff] }
 0x41a   : > { %v6795_v10 = vpop.eup %6794  ;;  %6806 = vrcp.f32 %v9634_v60  ;;  %v3936_v60 = vsel %vm999_vm3, %v9709_v23, 0.0 }
 0x41b   : > { %v9713_v35 = vpop.f32.mrb[48].mxu0  ;;  %5928 = vmatprep.mubr.msk.bf16.mxu0 %vm999_vm3, %v2269_v14  ;;  %v2175_v9 = vpop.xlane.xlu0 %2174  ;;  %v2251_v19 = vmul.f32 %v6795_v10, %v11011_v18 }
 0x41c   : > { %11007 = vst [vmem:[#allocation67_spill] sm:$0xff] %v9713_v35  ;;  %v6797_v12 = vpop.eup %6796  ;;  %6808 = vrcp.f32 %v2175_v9  ;;  %v9716_v3 = vpop.f32.mrb[49].mxu0  ;;  %5929 = vmatmul.mubr.msk.bf16.gmra.mrb[88].mxu0 %vm999_vm3, %v2270_v47 }
 0x41d   : > { %11008 = vst [vmem:[#allocation65_spill] sm:$0xff] %v9716_v3  ;;  %v6799_v8 = vpop.eup %6798  ;;  %v9719_v46 = vpop.f32.mrb[50].mxu0  ;;  %v2250_v61 = vmul.f32 %v6797_v12, %v11012_v20 }
 0x41e   : > { %11009 = vst [vmem:[#allocation36_spill] sm:$0xff] %v9719_v46  ;;  %v9721_v2 = vpop.xlane.xlu1 %3051  ;;  %v6801_v0 = vpop.eup %6800  ;;  %v2252_v14 = vmul.f32 %v6799_v8, %v11013_v57  ;;  %v11031_v46 = vld [vmem:[#allocation89_spill] sm:$0xff] }
 0x41f   : > { %v9723_v38 = vpop.f32.mrb[51].mxu0  ;;  %3937 = vadd.xlane.f32.xlu0 %v3936_v60  ;;  %v2193_v29 = vpop.xlane.xlu0 %2192  ;;  %v2249_v26 = vmul.f32 %v6801_v0, %v9210_v63 }
 0x420   : > { %11010 = vst [vmem:[#allocation71_spill] sm:$0xff] %v9723_v38  ;;  %6810 = vrcp.f32 %v2193_v29  ;;  %v2272_v3 = vpack.c.bf16 %v2252_v14, %v2251_v19  ;;  %v11014_v19 = vld [vmem:[#allocation96_spill] sm:$0xff] }
 0x421   : > { %v2271_v9 = vpack.c.bf16 %v2250_v61, %v2249_v26  ;;  %6812 = vrcp.f32 %v9660_v53  ;;  %v11015_v29 = vld [vmem:[#allocation12_spill] sm:$0xff]  ;;  %v11016_v61 = vld [vmem:[#allocation5_spill] sm:$0xff] }
 0x422   : > { %v9731_v47 = vpop.xlane.xlu1 %3799  ;;  %v6803_v38 = vpop.eup %6802  ;;  %6814 = vrcp.f32 %v9647_v33 }
 0x423   : > { %5932 = vmatprep.mubr.msk.bf16.mxu0 %vm999_vm3, %v2271_v9  ;;  %v2187_v10 = vpop.xlane.xlu0 %2186  ;;  %v6805_v60 = vpop.eup %6804  ;;  %v2255_v0 = vmul.f32 %v6803_v38, %v9246_v27 }
 0x424   : > { %6816 = vrcp.f32 %v2187_v10  ;;  %5933 = vmatmul.mubr.msk.bf16.gmra.mrb[92].mxu0 %vm999_vm3, %v2272_v3  ;;  %v6807_v63 = vpop.eup %6806  ;;  %v2254_v33 = vmul.f32 %v6805_v60, %v11014_v19 }
 0x425   : > { %6818 = vrcp.f32 %v9665_v58  ;;  %v2256_v26 = vmul.f32 %v6807_v63, %v11015_v29  ;;  %v11021_v63 = vld [vmem:[#allocation52_spill] sm:$0xff] }
 0x426   : > { %v9737_v12 = vpop.xlane.xlu1 %3802  ;;  %v6809_v8 = vpop.eup %6808  ;;  %6820 = vrcp.f32 %v9672_v28 }
 0x427   : > { %v3016_v53 = vpop.xlane.xlu0 %3015  ;;  %v2253_v18 = vmul.f32 %v6809_v8, %v9260_v59  ;;  %v2274_v27 = vpack.c.bf16 %v2256_v26, %v2255_v0  ;;  %v11022_v0 = vld [vmem:[#allocation54_spill] sm:$0xff] }
 0x428   : > { %6822 = vrcp.f32 %v3016_v53 }
 0x429   : > { %v2273_v3 = vpack.c.bf16 %v2254_v33, %v2253_v18  ;;  %6824 = vrcp.f32 %v3025_v55  ;;  %v11023_v18 = vld [vmem:[#allocation45_spill] sm:$0xff]  ;;  %v11024_v33 = vld [vmem:[#allocation44_spill] sm:$0xff] }
 0x42a   : > { %v9745_v20 = vpop.xlane.xlu1 %3805  ;;  %4091 = vrot.lane.b32.xlu1 %v11016_v61, %s7012_s23  ;;  %v6811_v38 = vpop.eup %6810  ;;  %6826 = vrcp.f32 %v9693_v30 }
 0x42b   : > { %v9750_v58 = vpop.f32.mrb[52].mxu0  ;;  %5936 = vmatprep.mubr.msk.bf16.mxu0 %vm999_vm3, %v2273_v3  ;;  %v3010_v59 = vpop.xlane.xlu0 %3009  ;;  %v2259_v30 = vmul.f32 %v6811_v38, %v11021_v63 }
 0x42c   : > { %11017 = vst [vmem:[#allocation39_spill] sm:$0xff] %v9750_v58  ;;  %v6813_v28 = vpop.eup %6812  ;;  %6828 = vrcp.f32 %v3010_v59  ;;  %v9753_v57 = vpop.f32.mrb[53].mxu0  ;;  %5937 = vmatmul.mubr.msk.bf16.gmra.mrb[96].mxu0 %vm999_vm3, %v2274_v27  ;;  %v11030_v58 = vld [vmem:[#allocation46_spill] sm:$0xff] }
 0x42d   : > { %11018 = vst [vmem:[#allocation41_spill] sm:$0xff] %v9753_v57  ;;  %v6815_v14 = vpop.eup %6814  ;;  %v9756_v55 = vpop.f32.mrb[54].mxu0  ;;  %v2258_v19 = vmul.f32 %v6813_v28, %v11023_v18  ;;  %v11025_v28 = vld [vmem:[#allocation6_spill] sm:$0xff] }
 0x42e   : > { %11019 = vst [vmem:[#allocation77_spill] sm:$0xff] %v9756_v55  ;;  %v3055_v9 = vpop.xlane.xlu1 %3054  ;;  %v6817_v10 = vpop.eup %6816  ;;  %v2260_v29 = vmul.f32 %v6815_v14, %v11024_v33 }
 0x42f   : > { %v9758_v60 = vpop.f32.mrb[55].mxu0  ;;  %v3031_v8 = vpop.xlane.xlu0 %3030  ;;  %v2257_v53 = vmul.f32 %v6817_v10, %v11022_v0 }
 0x430   : > { %11020 = vst [vmem:[#allocation47_spill] sm:$0xff] %v9758_v60  ;;  %v6819_v26 = vpop.eup %6818  ;;  %6830 = vrcp.f32 %v3031_v8  ;;  %v2276_v59 = vpack.c.bf16 %v2260_v29, %v2259_v30  ;;  %v11026_v8 = vld [vmem:[#allocation22_spill] sm:$0xff]  ;;  %v11029_v29 = vld [vmem:[#allocation21_spill] sm:$0xff] }
 0x431   : > { %v2275_v61 = vpack.c.bf16 %v2258_v19, %v2257_v53  ;;  %v6821_v27 = vpop.eup %6820  ;;  %6832 = vrcp.f32 %v9685_v45  ;;  %v11027_v53 = vld [vmem:[#allocation38_spill] sm:$0xff]  ;;  %v11028_v19 = vld [vmem:[#allocation43_spill] sm:$0xff] }
 0x432   : > { %v3049_v3 = vpop.xlane.xlu1 %3048  ;;  %v6823_v57 = vpop.eup %6822  ;;  %v3825_v30 = vsub.f32 %v11027_v53, %v9534_v6  ;;  %v3137_v33 = vmul.f32 %v6821_v27, %v11028_v19 }
 0x433   : > { %5940 = vmatprep.mubr.msk.bf16.mxu0 %vm999_vm3, %v2275_v61  ;;  %v3040_v60 = vpop.xlane.xlu0 %3039  ;;  %v6825_v38 = vpop.eup %6824  ;;  %v3138_v0 = vmul.f32 %v6823_v57, %v11026_v8 }
 0x434   : > { %5941 = vmatmul.mubr.msk.bf16.gmra.mrb[100].mxu0 %vm999_vm3, %v2276_v59  ;;  %v6827_v10 = vpop.eup %6826  ;;  %v3141_v61 = vmul.f32 %v6825_v38, %v11029_v29  ;;  %v3139_v59 = vmul.f32 %v6819_v26, %v11030_v58  ;;  %v3869_v40 = vmul.f32 1.442695, %v3825_v30 }
 0x435   : > { %4093 = vrot.lane.b32.xlu0 %v11025_v28, %s7012_s23  ;;  %v3140_v28 = vmul.f32 %v6827_v10, %v11031_v46 }
 0x436   : > { %v3058_v63 = vpop.xlane.xlu1 %3057  ;;  %v6829_v14 = vpop.eup %6828  ;;  %v3169_v57 = vpack.c.bf16 %v3139_v59, %v3138_v0  ;;  %v11033_v0 = vld [vmem:[#allocation32_spill] sm:$0xff]  ;;  %v11036_v59 = vld [vmem:[#allocation123_spill] sm:$0xff] }
 0x437   : > { %v3043_v18 = vpop.xlane.xlu0 %3042  ;;  %v3136_v45 = vmul.f32 %v6829_v14, %v9319_v21  ;;  %v3170_v27 = vpack.c.bf16 %v3141_v61, %v3140_v28  ;;  %v11035_v61 = vld [vmem:[#allocation106_spill] sm:$0xff] }
 0x438   : > { %6834 = vrcp.f32 %v3043_v18  ;;  %v3828_v28 = vsub.f32 %v11036_v59, %v11035_v61  ;;  %v11042_v61 = vld [vmem:[#allocation48_spill] sm:$0xff]  ;;  %v11043_v59 = vld [vmem:[#allocation99_spill] sm:$0xff] }
 0x439   : > { %v3168_v35 = vpack.c.bf16 %v3137_v33, %v3136_v45  ;;  %6836 = vrcp.f32 %v9707_v37  ;;  %v11032_v37 = vld [vmem:[#allocation125_spill] sm:$0xff]  ;;  %v11034_v45 = vld [vmem:[#allocation79_spill] sm:$0xff] }
 0x43a   : > { %v3061_v55 = vpop.xlane.xlu1 %3060  ;;  %v6831_v8 = vpop.eup %6830  ;;  %6838 = vrcp.f32 %v3040_v60  ;;  %v3826_v60 = vsub.f32 %v11032_v37, %v9435_v41  ;;  %v3827_v19 = vsub.f32 %v11034_v45, %v9521_v24  ;;  %v11040_v37 = vld [vmem:[#allocation127_spill] sm:$0xff] }
 0x43b   : > { %v9778_v6 = vpop.f32.mrb[56].mxu0  ;;  %6000 = vmatprep.mubr.msk.bf16.mxu0 %vm999_vm3, %v3168_v35  ;;  %v3037_v21 = vpop.xlane.xlu0 %3036  ;;  %v3143_v35 = vmul.f32 %v6831_v8, %v9354_v51 }
 0x43c   : > { %6840 = vrcp.f32 %v3037_v21  ;;  %v9781_v38 = vpop.f32.mrb[57].mxu0  ;;  %6001 = vmatmul.mubr.msk.bf16.vlgmr.msra.gmra.mrb[104].mxu0 %vm999_vm3, %v3169_v57  ;;  %v6833_v58 = vpop.eup %6832  ;;  %v3871_v18 = vmul.f32 1.442695, %v3826_v60  ;;  %v3873_v24 = vmul.f32 1.442695, %v3827_v19  ;;  %v3829_v60 = vsub.f32 %v11040_v37, %v9497_v11 }
 0x43d   : > { %v9784_v26 = vpop.f32.mrb[58].mxu0  ;;  %6004 = vmatprep.mubr.msk.bf16.mxu0 %vm999_vm3, %v3170_v27  ;;  %6842 = vrcp.f32 %v3049_v3  ;;  %v3142_v53 = vmul.f32 %v6833_v58, %v11033_v0  ;;  %v11039_v27 = vld [vmem:[#allocation27_spill] sm:$0xff]  ;;  %v3875_v19 = vmul.f32 1.442695, %v3828_v28 }
 0x43e   : > { %v3064_v46 = vpop.xlane.xlu1 %3063  ;;  %v9789_v10 = vpop.f32.mrb[59].mxu0  ;;  %6844 = vpow2.f32 %v3869_v40 }
 0x43f   : > { %v3046_v14 = vpop.xlane.xlu0 %3045  ;;  %v3171_v33 = vpack.c.bf16 %v3143_v35, %v3142_v53  ;;  %v11041_v35 = vld [vmem:[#allocation25_spill] sm:$0xff] }
 0x440   : > { %6846 = vrcp.f32 %v3046_v14 }
 0x441   : > { %6848 = vrcp.f32 %v3055_v9 }
 0x442   : > { %v3067_v30 = vpop.xlane.xlu1 %3066  ;;  %6850 = vrcp.f32 %v3061_v55  ;;  %v6835_v29 = vpop.eup %6834  ;;  %v11037_v55 = vld [vmem:[#allocation26_spill] sm:$0xff] }
 0x443   : > { %6852 = vrcp.f32 %v9721_v2  ;;  %v9796_v41 = vpop.xlane.xlu0 %3796  ;;  %v6837_v3 = vpop.eup %6836  ;;  %v3147_v57 = vmul.f32 %v6835_v29, %v11037_v55  ;;  %v11038_v2 = vld [vmem:[#allocation33_spill] sm:$0xff] }
 0x444   : > { %6854 = vrcp.f32 %v3058_v63  ;;  %6005 = vmatmul.mubr.msk.bf16.gmra.mrb[108].mxu0 %vm999_vm3, %v3171_v33  ;;  %v6839_v51 = vpop.eup %6838  ;;  %v3144_v21 = vmul.f32 %v6837_v3, %v11038_v2  ;;  %v3877_v2 = vmul.f32 1.442695, %v3829_v60  ;;  %v11045_v60 = vld [vmem:[#allocation37_spill] sm:$0xff] }
 0x445   : > { %6856 = vpow2.f32 %v3871_v18  ;;  %v3146_v14 = vmul.f32 %v6839_v51, %v11041_v35 }
 0x446   : > { %v9799_v40 = vpop.xlane.xlu1 %3808  ;;  %v6841_v9 = vpop.eup %6840  ;;  %6858 = vrcp.f32 %v3067_v30 }
 0x447   : > { %v9804_v8 = vpop.xlane.xlu0 %3811  ;;  %v3145_v58 = vmul.f32 %v6841_v9, %v11039_v27  ;;  %v6843_v63 = vpop.eup %6842  ;;  %6860 = vpow2.f32 %v3873_v24  ;;  %v3173_v33 = vpack.c.bf16 %v3147_v57, %v3146_v14 }
 0x448   : > { %v9811_v0 = vpop.eup %6844  ;;  %6862 = vrcp.f32 %v3064_v46  ;;  %v3149_v51 = vmul.f32 %v6843_v63, %v11043_v59 }
 0x449   : > { %v3172_v18 = vpack.c.bf16 %v3145_v58, %v3144_v21  ;;  %v3945_v57 = vsel %vm999_vm3, %v9811_v0, 0.0  ;;  %v11044_v58 = vld [vmem:[#allocation126_spill] sm:$0xff] }
 0x44a   : > { %v3070_v53 = vpop.xlane.xlu1 %3069  ;;  %v6847_v45 = vpop.eup %6846  ;;  %v3831_v63 = vsub.f32 %v11044_v58, %v9482_v13 }
 0x44b   : > { %v6849_v29 = vpop.eup %6848  ;;  %v9813_v3 = vpop.f32.mrb[60].mxu0  ;;  %6008 = vmatprep.mubr.msk.bf16.mxu0 %vm999_vm3, %v3172_v18  ;;  %v3148_v11 = vmul.f32 %v6847_v45, %v11042_v61  ;;  %6864 = vrcp.f32 %v3070_v53  ;;  %v11046_v53 = vld [vmem:[#allocation40_spill] sm:$0xff] }
 0x44c   : > { %v3073_v9 = vpop.xlane.xlu0 %3072  ;;  %v6851_v55 = vpop.eup %6850  ;;  %6009 = vmatmul.mubr.msk.bf16.gmra.mrb[112].mxu0 %vm999_vm3, %v3173_v33  ;;  %v3151_v35 = vmul.f32 %v6849_v29, %v11045_v60  ;;  %v11047_v33 = vld [vmem:[#allocation128_spill] sm:$0xff] }
 0x44d   : > { %v9818_v30 = vpop.f32.mrb[61].mxu0  ;;  %v6853_v28 = vpop.eup %6852  ;;  %6866 = vrcp.f32 %v3073_v9  ;;  %v3174_v21 = vpack.c.bf16 %v3149_v51, %v3148_v11  ;;  %v3153_v18 = vmul.f32 %v6851_v55, %v11046_v53  ;;  %v3832_v9 = vsub.f32 %v11047_v33, %v9513_v44  ;;  %v11049_v11 = vld [vmem:[#allocation102_spill] sm:$0xff] }
 0x44e   : > { %v9821_v24 = vpop.f32.mrb[62].mxu0  ;;  %v3076_v46 = vpop.xlane.xlu1 %3075  ;;  %6868 = vpow2.f32 %v3875_v19  ;;  %3946 = vadd.xlane.f32.xlu1 %v3945_v57  ;;  %v11048_v19 = vld [vmem:[#allocation35_spill] sm:$0xff]  ;;  %v3881_v51 = vmul.f32 1.442695, %v3831_v63 }
 0x44f   : > { %v6855_v27 = vpop.eup %6854  ;;  %v9827_v37 = vpop.f32.mrb[63].mxu0  ;;  %6012 = vmatprep.mubr.msk.bf16.mxu0 %vm999_vm3, %v3174_v21  ;;  %6870 = vpow2.f32 %v3877_v2  ;;  %v3150_v61 = vmul.f32 %v6853_v28, %v11048_v19  ;;  %v3883_v60 = vmul.f32 1.442695, %v3832_v9  ;;  %v11051_v9 = vld [vmem:[#allocation81_spill] sm:$0xff] }
 0x450   : > { %v3079_v14 = vpop.xlane.xlu0 %3078  ;;  %v9832_v45 = vpop.eup %6856  ;;  %v3152_v59 = vmul.f32 %v6855_v27, %v11049_v11  ;;  %v11050_v27 = vld [vmem:[#allocation9_spill] sm:$0xff]  ;;  %v3834_v19 = vsub.f32 %v11051_v9, %v9618_v22 }
 0x451   : > { %6872 = vrcp.f32 %v3079_v14  ;;  %v3175_v29 = vpack.c.bf16 %v3151_v35, %v3150_v61  ;;  %v6859_v57 = vpop.eup %6858  ;;  %v3948_v55 = vsel %vm999_vm3, %v9832_v45, 0.0  ;;  %v3833_v63 = vsub.f32 %v11050_v27, %v9602_v15  ;;  %v11052_v61 = vld [vmem:[#allocation42_spill] sm:$0xff] }
 0x452   : > { %v3082_v13 = vpop.xlane.xlu1 %3081  ;;  %6874 = vrcp.f32 %v3076_v46  ;;  %v3176_v58 = vpack.c.bf16 %v3153_v18, %v3152_v59  ;;  %v9840_v2 = vpop.eup %6860  ;;  %v3155_v35 = vmul.f32 %v6859_v57, %v9425_v62 }
 0x453   : > { %6876 = vrcp.f32 %v3082_v13  ;;  %v6863_v44 = vpop.eup %6862  ;;  %v3951_v18 = vsel %vm999_vm3, %v9840_v2, 0.0 }
 0x454   : > { %v3085_v21 = vpop.xlane.xlu0 %3084  ;;  %3949 = vadd.xlane.f32.xlu0 %v3948_v55  ;;  %6013 = vmatmul.mubr.msk.bf16.gmra.mrb[116].mxu0 %vm999_vm3, %v3175_v29  ;;  %v3154_v13 = vmul.f32 %v6863_v44, %v11052_v61 }
 0x455   : > { %6878 = vrcp.f32 %v3085_v21  ;;  %6016 = vmatprep.mubr.msk.bf16.mxu0 %vm999_vm3, %v3176_v58  ;;  %v6865_v46 = vpop.eup %6864 }
 0x456   : > { %v3088_v28 = vpop.xlane.xlu1 %3087  ;;  %6880 = vpow2.f32 %v3881_v51  ;;  %v3156_v62 = vmul.f32 %v6865_v46, %v9464_v1  ;;  %v3885_v51 = vmul.f32 1.442695, %v3833_v63  ;;  %v3177_v29 = vpack.c.bf16 %v3155_v35, %v3154_v13 }
 0x457   : > { %v6867_v14 = vpop.eup %6866  ;;  %6882 = vpow2.f32 %v3883_v60 }
 0x458   : > { %v3091_v53 = vpop.xlane.xlu0 %3090  ;;  %v9849_v33 = vpop.eup %6868  ;;  %3952 = vadd.xlane.f32.xlu0 %v3951_v18  ;;  %v3157_v11 = vmul.f32 %v6867_v14, %v9472_v54  ;;  %v3887_v54 = vmul.f32 1.442695, %v3834_v19  ;;  %v11056_v18 = vld [vmem:[#allocation7_spill] sm:$0xff] }
 0x459   : > { %6884 = vrcp.f32 %v3091_v53  ;;  %v9856_v59 = vpop.eup %6870  ;;  %v3954_v22 = vsel %vm999_vm3, %v9849_v33, 0.0 }
 0x45a   : > { %v3094_v15 = vpop.xlane.xlu1 %3093  ;;  %6886 = vrcp.f32 %v3088_v28  ;;  %v3178_v58 = vpack.c.bf16 %v3157_v11, %v3156_v62  ;;  %v11054_v28 = vld [vmem:[#allocation10_spill] sm:$0xff]  ;;  %v3957_v19 = vsel %vm999_vm3, %v9856_v59, 0.0 }
 0x45b   : > { %v6873_v57 = vpop.eup %6872  ;;  %6888 = vrcp.f32 %v3094_v15  ;;  %v9858_v21 = vpop.f32.mrb[64].mxu0  ;;  %v3835_v46 = vsub.f32 %v11054_v28, %v9583_v16 }
 0x45c   : > { %v3097_v55 = vpop.xlane.xlu0 %3096  ;;  %v6875_v60 = vpop.eup %6874  ;;  %3955 = vadd.xlane.f32.xlu0 %v3954_v22  ;;  %6017 = vmatmul.mubr.msk.bf16.gmra.mrb[120].mxu0 %vm999_vm3, %v3177_v29  ;;  %v3159_v53 = vmul.f32 %v6873_v57, %v9486_v5 }
 0x45d   : > { %6890 = vrcp.f32 %v3097_v55  ;;  %v9862_v44 = vpop.f32.mrb[65].mxu0  ;;  %v6877_v1 = vpop.eup %6876  ;;  %6020 = vmatprep.mubr.msk.bf16.mxu0 %vm999_vm3, %v3178_v58  ;;  %v3158_v13 = vmul.f32 %v6875_v60, %v9478_v49  ;;  %v3889_v11 = vmul.f32 1.442695, %v3835_v46 }
 0x45e   : > { %11053 = vst [vmem:[#allocation78_spill] sm:$0xff] %v9862_v44  ;;  %v9867_v27 = vpop.f32.mrb[66].mxu0  ;;  %v3100_v63 = vpop.xlane.xlu1 %3099  ;;  %6892 = vpow2.f32 %v3885_v51  ;;  %v3160_v5 = vmul.f32 %v6877_v1, %v9493_v48  ;;  %v11057_v51 = vld [vmem:[#allocation18_spill] sm:$0xff]  ;;  %v11059_v1 = vld [vmem:[#allocation20_spill] sm:$0xff]  ;;  %v11074_v44 = vld [vmem:[#allocation115_spill] sm:$0xff] }
 0x45f   : > { %v6879_v35 = vpop.eup %6878  ;;  %v9870_v14 = vpop.f32.mrb[67].mxu0  ;;  %4095 = vrot.lane.b32.xlu1 %v11056_v18, %s7012_s23  ;;  %6894 = vpow2.f32 %v3887_v54  ;;  %v3836_v29 = vsub.f32 %v11057_v51, %v9610_v50  ;;  %v3179_v57 = vpack.c.bf16 %v3159_v53, %v3158_v13  ;;  %v11058_v54 = vld [vmem:[#allocation68_spill] sm:$0xff]  ;;  %s7014_s23 = smov 8  }
 0x460   : > { %11055 = vst [vmem:[#allocation80_spill] sm:$0xff] %v9870_v14  ;;  %v3103_v9 = vpop.xlane.xlu0 %3102  ;;  %v3161_v16 = vmul.f32 %v6879_v35, %v9501_v43  ;;  %v9878_v61 = vpop.eup %6880  ;;  %3958 = vadd.xlane.f32.xlu0 %v3957_v19  ;;  %v3837_v28 = vsub.f32 %v11059_v1, %v11058_v54  ;;  %v11062_v13 = vld [vmem:[#allocation104_spill] sm:$0xff]  ;;  %v11065_v1 = vld [vmem:[#allocation50_spill] sm:$0xff] }
 0x461   : > { %6896 = vrcp.f32 %v3103_v9  ;;  %v9882_v62 = vpop.eup %6882  ;;  %v3963_v22 = vsel %vm999_vm3, %v9878_v61, 0.0  ;;  %v3891_v46 = vmul.f32 1.442695, %v3836_v29  ;;  %v11061_v9 = vld [vmem:[#allocation109_spill] sm:$0xff] }
 0x462   : > { %v3911_v15 = vpop.xlane.xlu1 %3910  ;;  %6898 = vrcp.f32 %v3100_v63  ;;  %v3180_v58 = vpack.c.bf16 %v3161_v16, %v3160_v5  ;;  %v11060_v63 = vld [vmem:[#allocation28_spill] sm:$0xff]  ;;  %v3966_v18 = vsel %vm999_vm3, %v9882_v62, 0.0  ;;  %v11063_v5 = vld [vmem:[#allocation59_spill] sm:$0xff]  ;;  %v3893_v29 = vmul.f32 1.442695, %v3837_v28 }
 0x463   : > { %v6885_v55 = vpop.eup %6884  ;;  %6900 = vrcp.f32 %v3911_v15 }
 0x464   : > { %v3914_v43 = vpop.xlane.xlu0 %3913  ;;  %v6887_v49 = vpop.eup %6886  ;;  %3964 = vadd.xlane.f32.xlu0 %v3963_v22  ;;  %6021 = vmatmul.mubr.msk.bf16.gmra.mrb[124].mxu0 %vm999_vm3, %v3179_v57  ;;  %v3163_v35 = vmul.f32 %v6885_v55, %v11060_v63  ;;  %v11064_v55 = vld [vmem:[#allocation8_spill] sm:$0xff] }
 0x465   : > { %6902 = vrcp.f32 %v3914_v43  ;;  %v6889_v48 = vpop.eup %6888  ;;  %6024 = vmatprep.mubr.msk.bf16.mxu0 %vm999_vm3, %v3180_v58  ;;  %v3838_v43 = vsub.f32 %v11064_v55, %v9588_v39  ;;  %v11067_v39 = vld [vmem:[#allocation60_spill] sm:$0xff] }
 0x466   : > { %6904 = vpow2.f32 %v3889_v11  ;;  %v3917_v60 = vpop.xlane.xlu1 %3916  ;;  %v3162_v11 = vmul.f32 %v6887_v49, %v11062_v13  ;;  %v3164_v51 = vmul.f32 %v6889_v48, %v11063_v5  ;;  %v11066_v48 = vld [vmem:[#allocation17_spill] sm:$0xff]  ;;  %v11069_v5 = vld [vmem:[#allocation55_spill] sm:$0xff] }
 0x467   : > { %v6891_v50 = vpop.eup %6890  ;;  %6906 = vrcp.f32 %v3917_v60  ;;  %v3830_v63 = vsub.f32 %v11066_v48, %v11065_v1 }
 0x468   : > { %v3920_v53 = vpop.xlane.xlu0 %3919  ;;  %v3165_v19 = vmul.f32 %v6891_v50, %v11061_v9  ;;  %v9896_v16 = vpop.eup %6892  ;;  %3967 = vadd.xlane.f32.xlu0 %v3966_v18  ;;  %v3181_v22 = vpack.c.bf16 %v3163_v35, %v3162_v11  ;;  %v3895_v18 = vmul.f32 1.442695, %v3838_v43  ;;  %v11068_v9 = vld [vmem:[#allocation112_spill] sm:$0xff] }
 0x469   : > { %6908 = vrcp.f32 %v3920_v53  ;;  %v9900_v57 = vpop.eup %6894  ;;  %v3969_v50 = vsel %vm999_vm3, %v9896_v16, 0.0  ;;  %v3879_v55 = vmul.f32 1.442695, %v3830_v63 }
 0x46a   : > { %v4086_v15 = vpop.permute.xlu1 %4085  ;;  %6910 = vpow2.f32 %v3891_v46  ;;  %v3182_v49 = vpack.c.bf16 %v3165_v19, %v3164_v51  ;;  %v3839_v46 = vsub.f32 %v11067_v39, %v9796_v41  ;;  %v11073_v39 = vld [vmem:[#allocation92_spill] sm:$0xff] }
 0x46b   : > { %6076 = vmatprep.subr.bf16.mxu0 %v4086_v15  ;;  %v6897_v58 = vpop.eup %6896  ;;  %6912 = vpow2.f32 %v3893_v29  ;;  %v11071_v29 = vld [vmem:[#allocation53_spill] sm:$0xff] }
 0x46c   : > { %6077 = vmatpush3.bf16.msra.mxu0 %v4086_v15  ;;  %v9904_v60 = vpop.xlane.xlu0 %3922  ;;  %v6899_v54 = vpop.eup %6898  ;;  %3970 = vadd.xlane.f32.xlu0 %v3969_v50  ;;  %v3167_v19 = vmul.f32 %v6897_v58, %v11068_v9  ;;  %v3972_v15 = vsel %vm999_vm3, %v9900_v57, 0.0  ;;  %v3840_v43 = vsub.f32 %v11071_v29, %v9731_v47  ;;  %v11072_v58 = vld [vmem:[#allocation30_spill] sm:$0xff]  ;;  %6914 = vpow2.f32 %v3895_v18 }
 0x46d   : > { %6025 = vmatmul.mubr.msk.bf16.gmra.mrb[128].mxu0 %vm999_vm3, %v3181_v22  ;;  %v6901_v28 = vpop.eup %6900  ;;  %v11070_v22 = vld [vmem:[#allocation29_spill] sm:$0xff]  ;;  %6916 = vpow2.f32 %v3879_v55 }
 0x46e   : > { %v4088_v35 = vpop.permute.xlu1 %4087  ;;  %6028 = vmatprep.mubr.msk.bf16.mxu0 %vm999_vm3, %v3182_v49  ;;  %v3166_v50 = vmul.f32 %v6899_v54, %v11070_v22  ;;  %v3897_v49 = vmul.f32 1.442695, %v3839_v46  ;;  %v4037_v1 = vmul.f32 %v6901_v28, %v11072_v58  ;;  %v11079_v55 = vld [vmem:[#allocation61_spill] sm:$0xff]  ;;  %v11081_v58 = vld [vmem:[#allocation62_spill] sm:$0xff] }
 0x46f   : > { %v6903_v53 = vpop.eup %6902  ;;  %6078 = vmatprep.subr.bf16.mxu0 %v4088_v35  ;;  %v3843_v22 = vsub.f32 %v11079_v55, %v9799_v40 }
 0x470   : > { %v9915_v13 = vpop.eup %6904  ;;  %6079 = vmatpush3.bf16.msra.mxu0 %v4088_v35  ;;  %v9917_v11 = vpop.xlane.xlu0 %3925  ;;  %v4038_v51 = vmul.f32 %v6903_v53, %v11069_v5  ;;  %3973 = vadd.xlane.f32.xlu0 %v3972_v15  ;;  %v3841_v35 = vsub.f32 %v11073_v39, %v9737_v12  ;;  %v3183_v9 = vpack.c.bf16 %v3167_v19, %v3166_v50  ;;  %v11075_v53 = vld [vmem:[#allocation31_spill] sm:$0xff]  ;;  %v3899_v12 = vmul.f32 1.442695, %v3840_v43 }
 0x471   : > { %v6907_v41 = vpop.eup %6906  ;;  %v3975_v47 = vsel %vm999_vm3, %v9915_v13, 0.0  ;;  %6918 = vpow2.f32 %v3897_v49 }
 0x472   : > { %v9929_v14 = vmul.f32 %v6907_v41, %v11074_v44  ;;  %v4069_v46 = vpack.c.bf16 %v4038_v51, %v4037_v1  ;;  %v11078_v44 = vld [vmem:[#allocation51_spill] sm:$0xff]  ;;  %v3901_v51 = vmul.f32 1.442695, %v3841_v35  ;;  %v3844_v1 = vsub.f32 %v11081_v58, %v9804_v8 }
 0x473   : > { %v6909_v48 = vpop.eup %6908  ;;  %v9934_v15 = vpop.f32.mrb[68].mxu0  ;;  %v3842_v19 = vsub.f32 %v11078_v44, %v9745_v20 }
 0x474   : > { %v9932_v63 = vmul.f32 %v6909_v48, %v11075_v53  ;;  %11076 = vst [vmem:[#allocation49_spill] sm:$0xff] %v9934_v15  ;;  %v3929_v54 = vpop.xlane.xlu0 %3928  ;;  %v9938_v28 = vpop.eup %6910  ;;  %3976 = vadd.xlane.f32.xlu0 %v3975_v47  ;;  %v3905_v48 = vmul.f32 1.442695, %v3843_v22 }
 0x475   : > { %v9940_v18 = vpop.f32.mrb[69].mxu0  ;;  %6029 = vmatmul.mubr.msk.bf16.gmra.mrb[132].mxu0 %vm999_vm3, %v3183_v9  ;;  %6920 = vrcp.f32 %v3929_v54  ;;  %v3978_v43 = vsel %vm999_vm3, %v9938_v28, 0.0  ;;  %v9956_v20 = vpop.eup %6912  ;;  %v3903_v49 = vmul.f32 1.442695, %v3842_v19  ;;  %v3907_v9 = vmul.f32 1.442695, %v3844_v1 }
 0x476   : > { %11077 = vst [vmem:[#allocation75_spill] sm:$0xff] %v9940_v18  ;;  %v9947_v41 = vpop.f32.mrb[70].mxu0  ;;  %6088 = vmatprep.mubr.msk.bf16.mxu0 %vm999_vm3, %v4069_v46  ;;  %v3981_v40 = vsel %vm999_vm3, %v9956_v20, 0.0  ;;  %v9962_v35 = vpop.eup %6914 }
 0x477   : > { %v9952_v50 = vpop.f32.mrb[71].mxu0  ;;  %v9964_v53 = vpop.eup %6916  ;;  %v3984_v8 = vsel %vm999_vm3, %v9962_v35, 0.0 }
 0x478   : > { %11080 = vst [vmem:[#allocation72_spill] sm:$0xff] %v9952_v50  ;;  %v3932_v29 = vpop.xlane.xlu0 %3931  ;;  %3979 = vadd.xlane.f32.xlu0 %v3978_v43 }
 0x479   : > { %6922 = vrcp.f32 %v3932_v29 }
 0x47a   : > { %6924 = vpow2.f32 %v3899_v12  ;;  %v3960_v12 = vsel %vm999_vm3, %v9964_v53, 0.0 }
 0x47b   : > { %6926 = vpow2.f32 %v3901_v51  ;;  %v9966_v54 = vpop.eup %6918 }
 0x47c   : > { %v4090_v39 = vpop.permute.xlu0 %4089  ;;  %3982 = vadd.xlane.f32.xlu0 %v3981_v40  ;;  %6928 = vpow2.f32 %v3903_v49  ;;  %v3987_v19 = vsel %vm999_vm3, %v9966_v54, 0.0 }
 0x47d   : > { %6080 = vmatprep.subr.bf16.mxu0 %v4090_v39  ;;  %6930 = vpow2.f32 %v3905_v48 }
 0x47e   : > { %6081 = vmatpush3.bf16.msra.mxu0 %v4090_v39  ;;  %6932 = vpow2.f32 %v3907_v9 }
 0x47f   : > { %v6921_v47 = vpop.eup %6920 }
 0x480   : > { %3985 = vadd.xlane.f32.xlu0 %v3984_v8  ;;  %v9977_v51 = vmul.f32 %v6921_v47, %v9592_v31 }
 0x483   : > { %v6923_v46 = vpop.eup %6922  ;;  %3961 = vadd.xlane.f32.xlu1 %v3960_v12 }
 0x484   : > { %v9972_v44 = vpop.eup %6924  ;;  %v9980_v55 = vmul.f32 %v6923_v46, %v9599_v56  ;;  %3988 = vadd.xlane.f32.xlu0 %v3987_v19 }
 0x485   : > { %v9982_v22 = vpop.eup %6926  ;;  %v3990_v43 = vsel %vm999_vm3, %v9972_v44, 0.0 }
 0x486   : > { %v9988_v49 = vpop.eup %6928  ;;  %v3993_v58 = vsel %vm999_vm3, %v9982_v22, 0.0 }
 0x487   : > { %3991 = vadd.xlane.f32.xlu1 %v3990_v43  ;;  %v9992_v31 = vpop.eup %6930  ;;  %v3996_v56 = vsel %vm999_vm3, %v9988_v49, 0.0 }
 0x488   : > { %3994 = vadd.xlane.f32.xlu0 %v3993_v58  ;;  %v9996_v1 = vpop.eup %6932  ;;  %v3999_v48 = vsel %vm999_vm3, %v9992_v31, 0.0 }
 0x489   : > { %v4002_v40 = vsel %vm999_vm3, %v9996_v1, 0.0 }
 0x48b   : > { %3997 = vadd.xlane.f32.xlu1 %v3996_v56 }
 0x48c   : > { %4000 = vadd.xlane.f32.xlu0 %v3999_v48 }
 0x48f   : > { %4003 = vadd.xlane.f32.xlu1 %v4002_v40 }
 0x49e   : > { %v3935_v39 = vpop.xlane.xlu1 %3934 }
 0x4a2   : > { %v3941_v9 = vpop.xlane.xlu1 %3940 }
 0x4a3   : > { %6934 = vrcp.f32 %v3941_v9 }
 0x4a6   : > { %v3944_v8 = vpop.xlane.xlu1 %3943 }
 0x4a7   : > { %6936 = vrcp.f32 %v3944_v8 }
 0x4a8   : > { %6938 = vrcp.f32 %v9917_v11 }
 0x4a9   : > { %6940 = vrcp.f32 %v9904_v60 }
 0x4aa   : > { %v4092_v47 = vpop.permute.xlu1 %4091 }
 0x4ab   : > { %6082 = vmatprep.subr.bf16.mxu0 %v4092_v47 }
 0x4ac   : > { %6083 = vmatpush3.bf16.msra.mxu0 %v4092_v47  ;;  %v3938_v46 = vpop.xlane.xlu0 %3937 }
 0x4ad   : > { %v6935_v12 = vpop.eup %6934  ;;  %6942 = vrcp.f32 %v3938_v46 }
 0x4ae   : > { %v10003_v58 = vmul.f32 %v6935_v12, %v9691_v34  ;;  %6944 = vrcp.f32 %v3935_v39 }
 0x4b0   : > { %v4094_v19 = vpop.permute.xlu0 %4093 }
 0x4b1   : > { %v6937_v43 = vpop.eup %6936  ;;  %6084 = vmatprep.subr.bf16.mxu0 %v4094_v19 }
 0x4b2   : > { %6085 = vmatpush3.bf16.msra.mxu0 %v4094_v19  ;;  %v10006_v56 = vmul.f32 %v6937_v43, %v9695_v42 }
 0x4b7   : > { %v5914_v40 = vpop.f32.mrb[72].mxu0 }
 0x4b8   : > { %v2385_v9 = vpop.f32.mrb[73].mxu0 }
 0x4b9   : > { %v5915_v8 = vpop.f32.mrb[74].mxu0 }
 0x4ba   : > { %v6230_v29 = vpack.i.bf16 %v5915_v8, %v5914_v40  ;;  %v2388_v47 = vpop.f32.mrb[75].mxu0 }
 0x4bb   : > { %v6235_v5 = vpack.i.bf16 %v2388_v47, %v2385_v9 }
 0x4bc   : > { %6231 = vrot.lane.b32.xlu1 %v6230_v29, %s7014_s23 }
 0x4bd   : > { %6236 = vrot.lane.b32.xlu0 %v6235_v5, %s7014_s23 }
 0x4c7   : > { %v5918_v19 = vpop.f32.mrb[76].mxu0 }
 0x4c8   : > { %v2401_v34 = vpop.f32.mrb[77].mxu0 }
 0x4c9   : > { %v5919_v12 = vpop.f32.mrb[78].mxu0 }
 0x4ca   : > { %v6240_v18 = vpack.i.bf16 %v5919_v12, %v5918_v19  ;;  %v2404_v42 = vpop.f32.mrb[79].mxu0  ;;  %v6939_v19 = vpop.eup %6938 }
 0x4cb   : > { %v6245_v43 = vpack.i.bf16 %v2404_v42, %v2401_v34  ;;  %v6941_v34 = vpop.eup %6940 }
 0x4cc   : > { %6241 = vrot.lane.b32.xlu0 %v6240_v18, %s7014_s23  ;;  %v6943_v15 = vpop.eup %6942 }
 0x4cd   : > { %6246 = vrot.lane.b32.xlu1 %v6245_v43, %s7014_s23  ;;  %v11082_v43 = vld [vmem:[#allocation57_spill] sm:$0xff] }
 0x4ce   : > { %v4042_v50 = vmul.f32 %v6939_v19, %v11082_v43  ;;  %v6945_v19 = vpop.eup %6944 }
 0x4d7   : > { %v5922_v40 = vpop.f32.mrb[80].mxu0 }
 0x4d8   : > { %v2417_v9 = vpop.f32.mrb[81].mxu0 }
 0x4d9   : > { %v5923_v8 = vpop.f32.mrb[82].mxu0 }
 0x4da   : > { %v6250_v29 = vpack.i.bf16 %v5923_v8, %v5922_v40  ;;  %v2420_v47 = vpop.f32.mrb[83].mxu0 }
 0x4db   : > { %v3947_v5 = vpop.xlane.xlu1 %3946  ;;  %v6255_v48 = vpack.i.bf16 %v2420_v47, %v2417_v9  ;;  %v11083_v9 = vld [vmem:[#allocation58_spill] sm:$0xff] }
 0x4dc   : > { %6251 = vrot.lane.b32.xlu0 %v6250_v29, %s7014_s23  ;;  %v4041_v29 = vmul.f32 %v6941_v34, %v11083_v9  ;;  %v4046_v34 = vmul.f32 %v6943_v15, %v9709_v23 }
 0x4dd   : > { %6256 = vrot.lane.b32.xlu1 %v6255_v48, %s7014_s23 }
 0x4de   : > { %v4071_v47 = vpack.c.bf16 %v4042_v50, %v4041_v29  ;;  %v11086_v29 = vpack.c.bf16 %v10006_v56, %v10003_v58 }
 0x4df   : > { %v4096_v18 = vpop.permute.xlu1 %4095  ;;  %v5926_v12 = vpop.f32.mrb[84].mxu0 }
 0x4e0   : > { %v4151_v11 = vand.u32 %v4096_v18, %v10829_v52  ;;  %v2433_v60 = vpop.f32.mrb[85].mxu0  ;;  %v11084_v52 = vpack.c.bf16 %v9932_v63, %v9929_v14 }
 0x4e1   : > { %v3950_v42 = vpop.xlane.xlu0 %3949  ;;  %v5927_v40 = vpop.f32.mrb[86].mxu0 }
 0x4e2   : > { %6086 = vmatprep.subr.bf16.mxu0 %v4151_v11  ;;  %v6260_v8 = vpack.i.bf16 %v5927_v40, %v5926_v12  ;;  %v2436_v46 = vpop.f32.mrb[87].mxu0  ;;  %6946 = vrcp.f32 %v3950_v42 }
 0x4e3   : > { %6087 = vmatpush3.bf16.msra.mxu0 %v4151_v11  ;;  %v6265_v39 = vpack.i.bf16 %v2436_v46, %v2433_v60  ;;  %6948 = vrcp.f32 %v3947_v5  ;;  %v4045_v11 = vmul.f32 %v6945_v19, %v9680_v25  ;;  %v11085_v60 = vpack.c.bf16 %v9980_v55, %v9977_v51 }
 0x4e4   : > { %6261 = vrot.lane.b32.xlu0 %v6260_v8, %s7014_s23 }
 0x4e5   : > { %v3953_v48 = vpop.xlane.xlu0 %3952  ;;  %6266 = vrot.lane.b32.xlu1 %v6265_v39, %s7014_s23  ;;  %v4073_v12 = vpack.c.bf16 %v4046_v34, %v4045_v11 }
 0x4e6   : > { %6089 = vmatmul.mubr.msk.bf16.vlgmr.msra.gmra.mrb[136].mxu0 %vm999_vm3, %v11084_v52 }
 0x4e7   : > { %6092 = vmatprep.mubr.msk.bf16.mxu0 %vm999_vm3, %v4071_v47 }
 0x4e9   : > { %v3956_v18 = vpop.xlane.xlu0 %3955 }
 0x4ea   : > { %6950 = vrcp.f32 %v3956_v18 }
 0x4eb   : > { %6952 = vrcp.f32 %v3953_v48 }
 0x4ec   : > { %v6947_v5 = vpop.eup %6946 }
 0x4ed   : > { %v3959_v50 = vpop.xlane.xlu0 %3958  ;;  %v6949_v63 = vpop.eup %6948  ;;  %v4050_v23 = vmul.f32 %v6947_v5, %v9832_v45 }
 0x4ee   : > { %6093 = vmatmul.mubr.msk.bf16.gmra.mrb[140].mxu0 %vm999_vm3, %v11085_v60  ;;  %v4049_v46 = vmul.f32 %v6949_v63, %v9811_v0  ;;  %6954 = vrcp.f32 %v3959_v50 }
 0x4ef   : > { %v5930_v14 = vpop.f32.mrb[88].mxu0  ;;  %6096 = vmatprep.mubr.msk.bf16.mxu0 %vm999_vm3, %v4073_v12 }
 0x4f0   : > { %v2449_v42 = vpop.f32.mrb[89].mxu0  ;;  %v4075_v55 = vpack.c.bf16 %v4050_v23, %v4049_v46 }
 0x4f1   : > { %v5931_v43 = vpop.f32.mrb[90].mxu0  ;;  %v3965_v40 = vpop.xlane.xlu0 %3964 }
 0x4f2   : > { %v6270_v15 = vpack.i.bf16 %v5931_v43, %v5930_v14  ;;  %v2452_v25 = vpop.f32.mrb[91].mxu0  ;;  %6956 = vrcp.f32 %v3965_v40 }
 0x4f3   : > { %v6275_v8 = vpack.i.bf16 %v2452_v25, %v2449_v42 }
 0x4f4   : > { %6271 = vrot.lane.b32.xlu0 %v6270_v15, %s7014_s23  ;;  %v6951_v9 = vpop.eup %6950 }
 0x4f5   : > { %6276 = vrot.lane.b32.xlu1 %v6275_v8, %s7014_s23  ;;  %v3968_v51 = vpop.xlane.xlu0 %3967  ;;  %v6953_v39 = vpop.eup %6952  ;;  %v4052_v0 = vmul.f32 %v6951_v9, %v9849_v33 }
 0x4f6   : > { %6097 = vmatmul.mubr.msk.bf16.gmra.mrb[144].mxu0 %vm999_vm3, %v11086_v29  ;;  %v4051_v58 = vmul.f32 %v6953_v39, %v9840_v2  ;;  %6958 = vrcp.f32 %v3968_v51 }
 0x4f7   : > { %v10043_v48 = vpop.f32.mrb[92].mxu0  ;;  %6100 = vmatprep.mubr.msk.bf16.mxu0 %vm999_vm3, %v4075_v55 }
 0x4f8   : > { %v10046_v45 = vpop.f32.mrb[93].mxu0  ;;  %v4076_v34 = vpack.c.bf16 %v4052_v0, %v4051_v58  ;;  %v6955_v50 = vpop.eup %6954 }
 0x4f9   : > { %v10049_v47 = vpop.f32.mrb[94].mxu0  ;;  %v3971_v52 = vpop.xlane.xlu0 %3970 }
 0x4fa   : > { %v10053_v18 = vpop.f32.mrb[95].mxu0 }
 0x4fc   : > { %v6957_v51 = vpop.eup %6956 }
 0x4fd   : > { %v3974_v11 = vpop.xlane.xlu0 %3973 }
 0x4fe   : > { %6101 = vmatmul.mubr.msk.bf16.gmra.mrb[148].mxu0 %vm999_vm3, %v4076_v34  ;;  %6960 = vrcp.f32 %v3974_v11 }
 0x4ff   : > { %v10059_v12 = vpop.f32.mrb[96].mxu0  ;;  %6962 = vrcp.f32 %v3971_v52 }
 0x500   : > { %v10061_v33 = vpop.f32.mrb[97].mxu0  ;;  %v6959_v52 = vpop.eup %6958 }
 0x501   : > { %v10063_v5 = vpop.f32.mrb[98].mxu0  ;;  %v3977_v60 = vpop.xlane.xlu0 %3976 }
 0x502   : > { %v10067_v63 = vpop.f32.mrb[99].mxu0 }
 0x505   : > { %v3980_v42 = vpop.xlane.xlu0 %3979 }
 0x507   : > { %v10071_v43 = vpop.f32.mrb[100].mxu0 }
 0x508   : > { %v10073_v23 = vpop.f32.mrb[101].mxu0  ;;  %v6961_v14 = vpop.eup %6960 }
 0x509   : > { %v10075_v15 = vpop.f32.mrb[102].mxu0  ;;  %v3983_v9 = vpop.xlane.xlu0 %3982 }
 0x50a   : > { %v10079_v8 = vpop.f32.mrb[103].mxu0 }
 0x50d   : > { %v3986_v58 = vpop.xlane.xlu0 %3985 }
 0x50f   : > { %v6002_v55 = vpop.f32.mrb[104].mxu0 }
 0x510   : > { %v3962_v29 = vpop.xlane.xlu1 %3961  ;;  %v3286_v39 = vpop.f32.mrb[105].mxu0 }
 0x511   : > { %6964 = vrcp.f32 %v3962_v29  ;;  %v6003_v0 = vpop.f32.mrb[106].mxu0  ;;  %v3989_v46 = vpop.xlane.xlu0 %3988 }
 0x512   : > { %v6280_v34 = vpack.i.bf16 %v6003_v0, %v6002_v55  ;;  %v3289_v2 = vpop.f32.mrb[107].mxu0  ;;  %6966 = vrcp.f32 %v3980_v42  ;;  %v6963_v0 = vpop.eup %6962  ;;  %v4053_v42 = vmul.f32 %v6955_v50, %v9856_v59 }
 0x513   : > { %v6285_v25 = vpack.i.bf16 %v3289_v2, %v3286_v39  ;;  %6968 = vrcp.f32 %v3986_v58 }
 0x514   : > { %6281 = vrot.lane.b32.xlu0 %v6280_v34, %s7015_s12  ;;  %v3992_v40 = vpop.xlane.xlu1 %3991  ;;  %6970 = vrcp.f32 %v3977_v60  ;;  %v4058_v60 = vmul.f32 %v6961_v14, %v9900_v57 }
 0x515   : > { %6286 = vrot.lane.b32.xlu1 %v6285_v25, %s7015_s12  ;;  %6972 = vrcp.f32 %v3983_v9  ;;  %v4056_v25 = vmul.f32 %v6959_v52, %v9882_v62  ;;  %v4055_v9 = vmul.f32 %v6957_v51, %v9878_v61 }
 0x516   : > { %6974 = vrcp.f32 %v3992_v40 }
 0x517   : > { %v6006_v11 = vpop.f32.mrb[108].mxu0  ;;  %v4078_v52 = vpack.c.bf16 %v4056_v25, %v4055_v9 }
 0x518   : > { %v3302_v29 = vpop.f32.mrb[109].mxu0  ;;  %v3998_v19 = vpop.xlane.xlu1 %3997 }
 0x519   : > { %v6007_v55 = vpop.f32.mrb[110].mxu0  ;;  %6976 = vrcp.f32 %v3998_v19 }
 0x51a   : > { %v6290_v2 = vpack.i.bf16 %v6007_v55, %v6006_v11  ;;  %v3305_v39 = vpop.f32.mrb[111].mxu0  ;;  %v3995_v11 = vpop.xlane.xlu0 %3994  ;;  %6978 = vrcp.f32 %v3989_v46 }
 0x51b   : > { %v6965_v56 = vpop.eup %6964  ;;  %v6295_v34 = vpack.i.bf16 %v3305_v39, %v3302_v29  ;;  %v4057_v29 = vmul.f32 %v6963_v0, %v9896_v16  ;;  %6980 = vrcp.f32 %v3995_v11 }
 0x51c   : > { %6291 = vrot.lane.b32.xlu0 %v6290_v2, %s7015_s12  ;;  %v4054_v58 = vmul.f32 %v6965_v56, %v9964_v53  ;;  %v6967_v39 = vpop.eup %6966  ;;  %v4004_v19 = vpop.xlane.xlu1 %4003 }
 0x51d   : > { %6296 = vrot.lane.b32.xlu1 %v6295_v34, %s7015_s12  ;;  %v4079_v59 = vpack.c.bf16 %v4058_v60, %v4057_v29  ;;  %v6969_v53 = vpop.eup %6968  ;;  %v4060_v40 = vmul.f32 %v6967_v39, %v9938_v28  ;;  %6982 = vrcp.f32 %v4004_v19 }
 0x51e   : > { %v4077_v55 = vpack.c.bf16 %v4054_v58, %v4053_v42  ;;  %v6971_v61 = vpop.eup %6970  ;;  %v4062_v46 = vmul.f32 %v6969_v53, %v9962_v35  ;;  %v4001_v51 = vpop.xlane.xlu0 %4000 }
 0x51f   : > { %v6010_v62 = vpop.f32.mrb[112].mxu0  ;;  %v6973_v16 = vpop.eup %6972  ;;  %v4059_v0 = vmul.f32 %v6971_v61, %v9915_v13  ;;  %6984 = vrcp.f32 %v4001_v51 }
 0x520   : > { %v3318_v2 = vpop.f32.mrb[113].mxu0  ;;  %6104 = vmatprep.mubr.msk.bf16.mxu0 %vm999_vm3, %v4077_v55  ;;  %v4061_v34 = vmul.f32 %v6973_v16, %v9956_v20  ;;  %v6975_v58 = vpop.eup %6974 }
 0x521   : > { %v6011_v57 = vpop.f32.mrb[114].mxu0  ;;  %6105 = vmatmul.mubr.msk.bf16.gmra.mrb[152].mxu0 %vm999_vm3, %v4078_v52  ;;  %v4080_v42 = vpack.c.bf16 %v4060_v40, %v4059_v0  ;;  %v4064_v52 = vmul.f32 %v6975_v58, %v9972_v44 }
 0x522   : > { %v6300_v56 = vpack.i.bf16 %v6011_v57, %v6010_v62  ;;  %v3321_v14 = vpop.f32.mrb[115].mxu0  ;;  %6108 = vmatprep.mubr.msk.bf16.mxu0 %vm999_vm3, %v4079_v59  ;;  %v4081_v9 = vpack.c.bf16 %v4062_v46, %v4061_v34 }
 0x523   : > { %v6305_v50 = vpack.i.bf16 %v3321_v14, %v3318_v2  ;;  %v6977_v11 = vpop.eup %6976 }
 0x524   : > { %6301 = vrot.lane.b32.xlu0 %v6300_v56, %s7015_s12  ;;  %v6979_v55 = vpop.eup %6978  ;;  %v4066_v20 = vmul.f32 %v6977_v11, %v9988_v49 }
 0x525   : > { %6306 = vrot.lane.b32.xlu1 %v6305_v50, %s7015_s12  ;;  %v6981_v62 = vpop.eup %6980  ;;  %v4063_v39 = vmul.f32 %v6979_v55, %v9966_v54 }
 0x526   : > { %v4065_v2 = vmul.f32 %v6981_v62, %v9982_v22 }
 0x527   : > { %v6014_v25 = vpop.f32.mrb[116].mxu0  ;;  %v4082_v53 = vpack.c.bf16 %v4064_v52, %v4063_v39  ;;  %v6983_v57 = vpop.eup %6982 }
 0x528   : > { %v3334_v60 = vpop.f32.mrb[117].mxu0  ;;  %v4083_v56 = vpack.c.bf16 %v4066_v20, %v4065_v2  ;;  %v4068_v22 = vmul.f32 %v6983_v57, %v9996_v1 }
 0x529   : > { %v6015_v28 = vpop.f32.mrb[118].mxu0  ;;  %6109 = vmatmul.mubr.msk.bf16.gmra.mrb[156].mxu0 %vm999_vm3, %v4080_v42  ;;  %v6985_v44 = vpop.eup %6984 }
 0x52a   : > { %v6310_v35 = vpack.i.bf16 %v6015_v28, %v6014_v25  ;;  %v3337_v29 = vpop.f32.mrb[119].mxu0  ;;  %6112 = vmatprep.mubr.msk.bf16.mxu0 %vm999_vm3, %v4081_v9  ;;  %v4067_v19 = vmul.f32 %v6985_v44, %v9992_v31 }
 0x52b   : > { %v6315_v13 = vpack.i.bf16 %v3337_v29, %v3334_v60 }
 0x52c   : > { %6311 = vrot.lane.b32.xlu0 %v6310_v35, %s7015_s12  ;;  %v4084_v40 = vpack.c.bf16 %v4068_v22, %v4067_v19 }
 0x52d   : > { %6316 = vrot.lane.b32.xlu1 %v6315_v13, %s7015_s12 }
 0x52e   : > { %v10162_v52 = vpop.permute.xlu1 %6231 }
 0x52f   : > { %v10110_v59 = vpop.f32.mrb[120].mxu0  ;;  %v10160_v13 = vpop.permute.xlu0 %6236 }
 0x530   : > { %v10112_v61 = vpop.f32.mrb[121].mxu0 }
 0x531   : > { %v10114_v14 = vpop.f32.mrb[122].mxu0  ;;  %6113 = vmatmul.mubr.msk.bf16.gmra.mrb[160].mxu0 %vm999_vm3, %v4082_v53 }
 0x532   : > { %v6335_v49 = vpack.i.bf16 %v10114_v14, %v10110_v59  ;;  %v3353_v16 = vpop.f32.mrb[123].mxu0  ;;  %6116 = vmatprep.mubr.msk.bf16.mxu0 %vm999_vm3, %v4083_v56 }
 0x533   : > { %v6330_v54 = vpack.i.bf16 %v3353_v16, %v10112_v61 }
 0x537   : > { %v10123_v50 = vpop.f32.mrb[124].mxu0 }
 0x538   : > { %v10125_v46 = vpop.f32.mrb[125].mxu0 }
 0x539   : > { %v10127_v51 = vpop.f32.mrb[126].mxu0  ;;  %6117 = vmatmul.mubr.msk.bf16.gmra.mrb[164].mxu0 %vm999_vm3, %v4084_v40 }
 0x53a   : > { %v6375_v0 = vpack.i.bf16 %v10127_v51, %v10123_v50  ;;  %v10132_v34 = vpop.f32.mrb[127].mxu0  ;;  %v11090_v50 = vpack.i.bf16 %v10067_v63, %v10061_v33 }
 0x53b   : > { %v6370_v25 = vpack.i.bf16 %v10132_v34, %v10125_v46 }
 0x53e   : > { %v10164_v20 = vpop.permute.xlu0 %6241 }
 0x53f   : > { %v10166_v39 = vpop.permute.xlu1 %6246 }
 0x540   : > { %v10136_v1 = vpop.f32.mrb[128].mxu0 }
 0x541   : > { %v10138_v31 = vpop.f32.mrb[129].mxu0 }
 0x542   : > { %v10140_v42 = vpop.f32.mrb[130].mxu0 }
 0x543   : > { %v10144_v60 = vpop.f32.mrb[131].mxu0 }
 0x544   : > { %v11092_v33 = vpack.i.bf16 %v10144_v60, %v10138_v31  ;;  %v11094_v31 = vpack.i.bf16 %v10079_v8, %v10073_v23 }
 0x548   : > { %v10148_v11 = vpop.f32.mrb[132].mxu0 }
 0x549   : > { %v10150_v28 = vpop.f32.mrb[133].mxu0 }
 0x54a   : > { %v10152_v55 = vpop.f32.mrb[134].mxu0 }
 0x54b   : > { %v10156_v29 = vpop.f32.mrb[135].mxu0 }
 0x54c   : > { %v11096_v23 = vpack.i.bf16 %v10156_v29, %v10150_v28  ;;  %v6234_v28 = vunpack.i.h.bf16 %v10162_v52  ;;  %v6233_v29 = vunpack.i.l.bf16 %v10162_v52  ;;  %v11097_v52 = vld [vmem:[#allocation70_spill] sm:$0xff] }
 0x54e   : > { %v10168_v2 = vpop.permute.xlu0 %6251 }
 0x54f   : > { %v10170_v59 = vpop.permute.xlu1 %6256 }
 0x556   : > { %v10172_v53 = vpop.permute.xlu0 %6261 }
 0x557   : > { %v10174_v57 = vpop.permute.xlu1 %6266 }
 0x566   : > { %v6272_v61 = vpop.permute.xlu0 %6271 }
 0x567   : > { %v6274_v56 = vunpack.i.h.bf16 %v6272_v61  ;;  %v6273_v14 = vunpack.i.l.bf16 %v6272_v61  ;;  %v6277_v44 = vpop.permute.xlu1 %6276  ;;  %v6472_v61 = vld [vmem:[%s10528_s6] sm:$0xff]  }
 0x568   : > { %v6279_v16 = vunpack.i.h.bf16 %v6277_v44  ;;  %v6278_v22 = vunpack.i.l.bf16 %v6277_v44  ;;  %6120 = vmatprep.subr.bf16.mxu1 %v6472_v61 }
 0x569   : > { %v10178_v19 = vsel %vm771_vm1, %v9784_v26, %v6274_v56  ;;  %v10182_v40 = vsel %vm771_vm1, %v9778_v6, %v6273_v14  ;;  %6121 = vmatpush3.bf16.msra.mxu1 %v6472_v61  ;;  %v6473_v26 = vld [vmem:[%s10528_s6 + $0x8] sm:$0xff]  }
 0x56a   : > { %v10186_v62 = vsel %vm771_vm1, %v9789_v10, %v6279_v16  ;;  %v10190_v35 = vsel %vm771_vm1, %v9781_v38, %v6278_v22  ;;  %6122 = vmatprep.subr.bf16.mxu1 %v6473_v26 }
 0x56d   : > { %6123 = vmatpush3.bf16.msra.mxu1 %v6473_v26 }
 0x5b9   : > { %v6090_v6 = vpop.f32.mrb[136].mxu0 }
 0x5ba   : > { %v4187_v56 = vpop.f32.mrb[137].mxu0 }
 0x5bb   : > { %v6091_v10 = vpop.f32.mrb[138].mxu0 }
 0x5bc   : > { %v6320_v14 = vpack.i.bf16 %v6091_v10, %v6090_v6  ;;  %v4190_v44 = vpop.f32.mrb[139].mxu0 }
 0x5bd   : > { %v6325_v16 = vpack.i.bf16 %v4190_v44, %v4187_v56  ;;  %v11087_v56 = vpack.i.bf16 %v10049_v47, %v10043_v48 }
 0x5be   : > { %6321 = vrot.lane.b32.xlu0 %v6320_v14, %s7016_s17 }
 0x5bf   : > { %6326 = vrot.lane.b32.xlu1 %v6325_v16, %s7016_s17 }
 0x5c1   : > { %v6094_v38 = vpop.f32.mrb[140].mxu0 }
 0x5c2   : > { %6336 = vrot.lane.b32.xlu0 %v6335_v49, %s7015_s12  ;;  %v4203_v22 = vpop.f32.mrb[141].mxu0  ;;  %v11088_v49 = vpack.i.bf16 %v10053_v18, %v10046_v45 }
 0x5c3   : > { %6331 = vrot.lane.b32.xlu1 %v6330_v54, %s7015_s12  ;;  %v6095_v61 = vpop.f32.mrb[142].mxu0 }
 0x5c4   : > { %v6340_v9 = vpack.i.bf16 %v6095_v61, %v6094_v38  ;;  %v4206_v26 = vpop.f32.mrb[143].mxu0  ;;  %v11089_v38 = vpack.i.bf16 %v10063_v5, %v10059_v12  ;;  %v11091_v12 = vpack.i.bf16 %v10140_v42, %v10136_v1  ;;  %v11093_v1 = vpack.i.bf16 %v10075_v15, %v10071_v43 }
 0x5c5   : > { %v6345_v58 = vpack.i.bf16 %v4206_v26, %v4203_v22  ;;  %v11095_v43 = vpack.i.bf16 %v10152_v55, %v10148_v11 }
 0x5c6   : > { %6341 = vrot.lane.b32.xlu0 %v6340_v9, %s7016_s17 }
 0x5c7   : > { %6346 = vrot.lane.b32.xlu1 %v6345_v58, %s7016_s17 }
 0x5c9   : > { %v6098_v6 = vpop.f32.mrb[144].mxu0 }
 0x5ca   : > { %6356 = vrot.lane.b32.xlu0 %v11087_v56, %s7014_s23  ;;  %v4219_v10 = vpop.f32.mrb[145].mxu0 }
 0x5cb   : > { %6351 = vrot.lane.b32.xlu1 %v11088_v49, %s7014_s23  ;;  %v6099_v54 = vpop.f32.mrb[146].mxu0 }
 0x5cc   : > { %v6360_v14 = vpack.i.bf16 %v6099_v54, %v6098_v6  ;;  %v4222_v44 = vpop.f32.mrb[147].mxu0 }
 0x5cd   : > { %v6365_v16 = vpack.i.bf16 %v4222_v44, %v4219_v10 }
 0x5ce   : > { %6361 = vrot.lane.b32.xlu0 %v6360_v14, %s7016_s17 }
 0x5cf   : > { %6366 = vrot.lane.b32.xlu1 %v6365_v16, %s7016_s17 }
 0x5d1   : > { %v6102_v58 = vpop.f32.mrb[148].mxu0 }
 0x5d2   : > { %6376 = vrot.lane.b32.xlu0 %v6375_v0, %s7015_s12  ;;  %v4235_v48 = vpop.f32.mrb[149].mxu0 }
 0x5d3   : > { %6371 = vrot.lane.b32.xlu1 %v6370_v25, %s7015_s12  ;;  %v6103_v45 = vpop.f32.mrb[150].mxu0 }
 0x5d4   : > { %v6380_v47 = vpack.i.bf16 %v6103_v45, %v6102_v58  ;;  %v4238_v18 = vpop.f32.mrb[151].mxu0  ;;  %v6282_v45 = vpop.permute.xlu0 %6281 }
 0x5d5   : > { %v6385_v9 = vpack.i.bf16 %v4238_v18, %v4235_v48 }
 0x5d6   : > { %6381 = vrot.lane.b32.xlu0 %v6380_v47, %s7016_s17  ;;  %v6287_v47 = vpop.permute.xlu1 %6286 }
 0x5d7   : > { %6386 = vrot.lane.b32.xlu1 %v6385_v9, %s7016_s17 }
 0x5d8   : > { %v6292_v18 = vpop.permute.xlu0 %6291 }
 0x5da   : > { %6396 = vrot.lane.b32.xlu0 %v11089_v38, %s7014_s23  ;;  %v10264_v9 = vpop.permute.xlu1 %6296  ;;  %v6239_v38 = vunpack.i.h.bf16 %v10160_v13 }
 0x5db   : > { %6391 = vrot.lane.b32.xlu1 %v11090_v50, %s7014_s23  ;;  %v6238_v50 = vunpack.i.l.bf16 %v10160_v13 }
 0x5dc   : > { %v10266_v11 = vpop.permute.xlu0 %6301 }
 0x5de   : > { %v10268_v55 = vpop.permute.xlu1 %6306 }
 0x5f4   : > { %v6106_v46 = vpop.f32.mrb[152].mxu0 }
 0x5f5   : > { %v4251_v51 = vpop.f32.mrb[153].mxu0 }
 0x5f6   : > { %v6107_v0 = vpop.f32.mrb[154].mxu0 }
 0x5f7   : > { %v6400_v34 = vpack.i.bf16 %v6107_v0, %v6106_v46  ;;  %v4254_v25 = vpop.f32.mrb[155].mxu0  ;;  %v10274_v46 = vpop.permute.xlu0 %6311  ;;  %v6284_v0 = vunpack.i.h.bf16 %v6282_v45 }
 0x5f8   : > { %v6405_v22 = vpack.i.bf16 %v4254_v25, %v4251_v51  ;;  %v10276_v51 = vpop.permute.xlu1 %6316  ;;  %v4701_v25 = vsel %vm771_vm1, %v9645_v17, %v6234_v28  ;;  %v6298_v28 = vunpack.i.l.bf16 %v10264_v9 }
 0x5f9   : > { %6401 = vrot.lane.b32.xlu0 %v6400_v34, %s7016_s17  ;;  %v6283_v34 = vunpack.i.l.bf16 %v6282_v45  ;;  %v6293_v45 = vunpack.i.l.bf16 %v6292_v18 }
 0x5fa   : > { %6406 = vrot.lane.b32.xlu1 %v6405_v22, %s7016_s17  ;;  %v4700_v22 = vsel %vm771_vm1, %v9641_v7, %v6233_v29  ;;  %v4734_v7 = vsel %vm4730_vm4, %v4701_v25, %v6284_v0 }
 0x5fc   : > { %v6110_v61 = vpop.f32.mrb[156].mxu0 }
 0x5fd   : > { %6416 = vrot.lane.b32.xlu0 %v11091_v12, %s7015_s12  ;;  %v4267_v5 = vpop.f32.mrb[157].mxu0  ;;  %v6288_v12 = vunpack.i.l.bf16 %v6287_v47 }
 0x5fe   : > { %6411 = vrot.lane.b32.xlu1 %v11092_v33, %s7015_s12  ;;  %v6111_v63 = vpop.f32.mrb[158].mxu0  ;;  %v11098_v33 = vld [vmem:[#allocation69_spill] sm:$0xff] }
 0x5ff   : > { %v6420_v26 = vpack.i.bf16 %v6111_v63, %v6110_v61  ;;  %v4270_v6 = vpop.f32.mrb[159].mxu0  ;;  %v6289_v61 = vunpack.i.h.bf16 %v6287_v47  ;;  %v4698_v13 = vsel %vm771_vm1, %v11098_v33, %v6238_v50  ;;  %v6244_v63 = vunpack.i.h.bf16 %v10164_v20  ;;  %v11099_v50 = vld [vmem:[#allocation34_spill] sm:$0xff] }
 0x600   : > { %v6425_v56 = vpack.i.bf16 %v4270_v6, %v4267_v5  ;;  %v4699_v5 = vsel %vm771_vm1, %v11097_v52, %v6239_v38  ;;  %v6243_v6 = vunpack.i.l.bf16 %v10164_v20  ;;  %v6248_v20 = vunpack.i.l.bf16 %v10166_v39 }
 0x601   : > { %6421 = vrot.lane.b32.xlu0 %v6420_v26, %s7016_s17  ;;  %v6299_v47 = vunpack.i.h.bf16 %v10264_v9  ;;  %v6253_v9 = vunpack.i.l.bf16 %v10168_v2 }
 0x602   : > { %6426 = vrot.lane.b32.xlu1 %v6425_v56, %s7016_s17  ;;  %v6249_v56 = vunpack.i.h.bf16 %v10166_v39  ;;  %v4705_v39 = vsel %vm771_vm1, %v9683_v32, %v6244_v63  ;;  %v4704_v29 = vsel %vm771_vm1, %v9675_v4, %v6243_v6  ;;  %v4702_v0 = vsel %vm771_vm1, %v11099_v50, %v6248_v20 }
 0x603   : > { %v4737_v32 = vsel %vm4730_vm4, %v4704_v29, %v6293_v45  ;;  %v6259_v63 = vunpack.i.h.bf16 %v10170_v59 }
 0x604   : > { %v6114_v10 = vpop.f32.mrb[160].mxu0  ;;  %v4703_v38 = vsel %vm771_vm1, %v9687_v36, %v6249_v56  ;;  %v4735_v36 = vsel %vm4730_vm4, %v4702_v0, %v6298_v28 }
 0x605   : > { %6436 = vrot.lane.b32.xlu0 %v11093_v1, %s7014_s23  ;;  %v4283_v42 = vpop.f32.mrb[161].mxu0 }
 0x606   : > { %6431 = vrot.lane.b32.xlu1 %v11094_v31, %s7014_s23  ;;  %v6115_v60 = vpop.f32.mrb[162].mxu0 }
 0x607   : > { %v6440_v49 = vpack.i.bf16 %v6115_v60, %v6114_v10  ;;  %v4286_v54 = vpop.f32.mrb[163].mxu0 }
 0x608   : > { %v6445_v14 = vpack.i.bf16 %v4286_v54, %v4283_v42  ;;  %v4733_v42 = vsel %vm4730_vm4, %v4700_v22, %v6283_v34  ;;  %v4732_v54 = vsel %vm4730_vm4, %v4699_v5, %v6289_v61  ;;  %v4736_v5 = vsel %vm4730_vm4, %v4703_v38, %v6299_v47 }
 0x609   : > { %6441 = vrot.lane.b32.xlu0 %v6440_v49, %s7016_s17  ;;  %v4731_v49 = vsel %vm4730_vm4, %v4698_v13, %v6288_v12 }
 0x60a   : > { %6446 = vrot.lane.b32.xlu1 %v6445_v14, %s7016_s17 }
 0x60c   : > { %v6118_v44 = vpop.f32.mrb[164].mxu0 }
 0x60d   : > { %6456 = vrot.lane.b32.xlu0 %v11095_v43, %s7015_s12  ;;  %v4299_v15 = vpop.f32.mrb[165].mxu0 }
 0x60e   : > { %6451 = vrot.lane.b32.xlu1 %v11096_v23, %s7015_s12  ;;  %v6119_v8 = vpop.f32.mrb[166].mxu0 }
 0x60f   : > { %v6465_v16 = vpack.i.bf16 %v6119_v8, %v6118_v44  ;;  %v4302_v58 = vpop.f32.mrb[167].mxu0 }
 0x610   : > { %v6460_v48 = vpack.i.bf16 %v4302_v58, %v4299_v15 }
 0x611   : > { %6466 = vrot.lane.b32.xlu0 %v6465_v16, %s7016_s17 }
 0x612   : > { %6461 = vrot.lane.b32.xlu1 %v6460_v48, %s7016_s17  ;;  %v6294_v48 = vunpack.i.h.bf16 %v6292_v18  ;;  %v6254_v18 = vunpack.i.h.bf16 %v10168_v2 }
 0x614   : > { %v4738_v4 = vsel %vm4730_vm4, %v4705_v39, %v6294_v48 }
 0x630   : > { %v6322_v26 = vpop.permute.xlu0 %6321 }
 0x631   : > { %v6324_v17 = vunpack.i.h.bf16 %v6322_v26  ;;  %v6323_v10 = vunpack.i.l.bf16 %v6322_v26  ;;  %v6327_v1 = vpop.permute.xlu1 %6326 }
 0x632   : > { %v6329_v31 = vunpack.i.h.bf16 %v6327_v1  ;;  %v6328_v60 = vunpack.i.l.bf16 %v6327_v1 }
 0x633   : > { %v4766_v14 = vsel %vm4763_vm5, %v4733_v42, %v6323_v10  ;;  %v4767_v44 = vsel %vm4763_vm5, %v4734_v7, %v6324_v17  ;;  %v6258_v17 = vunpack.i.l.bf16 %v10170_v59  ;;  %v6304_v7 = vunpack.i.h.bf16 %v10266_v11  ;;  %v11102_v59 = vld [vmem:[#allocation71_spill] sm:$0xff] }
 0x634   : > { %v4797_v43 = vpack.c.bf16 %v4767_v44, %v4766_v14  ;;  %v4764_v15 = vsel %vm4763_vm5, %v4731_v49, %v6328_v60  ;;  %v4765_v23 = vsel %vm4763_vm5, %v4732_v54, %v6329_v31  ;;  %v10298_v8 = vpop.permute.xlu0 %6336  ;;  %v6303_v42 = vunpack.i.l.bf16 %v10266_v11  ;;  %v11100_v49 = vld [vmem:[#allocation36_spill] sm:$0xff]  ;;  %v11101_v14 = vld [vmem:[#allocation67_spill] sm:$0xff] }
 0x635   : > { %v4796_v16 = vpack.c.bf16 %v4765_v23, %v4764_v15  ;;  %v10300_v58 = vpop.permute.xlu1 %6331  ;;  %v6309_v31 = vunpack.i.h.bf16 %v10268_v55  ;;  %v6308_v60 = vunpack.i.l.bf16 %v10268_v55  ;;  %v4709_v54 = vsel %vm771_vm1, %v11100_v49, %v6254_v18  ;;  %v11103_v15 = vld [vmem:[#allocation65_spill] sm:$0xff] }
 0x636   : > { %v4708_v44 = vsel %vm771_vm1, %v11101_v14, %v6253_v9  ;;  %v4707_v20 = vsel %vm771_vm1, %v11102_v59, %v6259_v63  ;;  %v4706_v11 = vsel %vm771_vm1, %v11103_v15, %v6258_v17  ;;  %v6264_v23 = vunpack.i.h.bf16 %v10172_v53  ;;  %v11105_v63 = vld [vmem:[#allocation39_spill] sm:$0xff]  ;;  %v11107_v17 = vld [vmem:[#allocation41_spill] sm:$0xff] }
 0x637   : > { %6124 = vmatprep.mubr.msk.bf16.mxu1 %vm479_vm0, %v4796_v16  ;;  %v4741_v45 = vsel %vm4730_vm4, %v4708_v44, %v6303_v42  ;;  %v4742_v47 = vsel %vm4730_vm4, %v4709_v54, %v6304_v7  ;;  %v4739_v29 = vsel %vm4730_vm4, %v4706_v11, %v6308_v60  ;;  %v4740_v38 = vsel %vm4730_vm4, %v4707_v20, %v6309_v31 }
 0x638   : > { %v6342_v34 = vpop.permute.xlu0 %6341  ;;  %6125 = vmatmul.mubr.msk.bf16.vlgmr.msra.gmra.mrb[120].mxu1 %vm479_vm0, %v4797_v43 }
 0x639   : > { %v6344_v25 = vunpack.i.h.bf16 %v6342_v34  ;;  %v6343_v22 = vunpack.i.l.bf16 %v6342_v34  ;;  %v6347_v61 = vpop.permute.xlu1 %6346  ;;  %v6263_v34 = vunpack.i.l.bf16 %v10172_v53  ;;  %v6319_v53 = vunpack.i.h.bf16 %v10276_v51 }
 0x63a   : > { %v6349_v12 = vunpack.i.h.bf16 %v6347_v61  ;;  %v6348_v52 = vunpack.i.l.bf16 %v6347_v61  ;;  %v6269_v61 = vunpack.i.h.bf16 %v10174_v57 }
 0x63b   : > { %v4770_v33 = vsel %vm4763_vm5, %v4737_v32, %v6343_v22  ;;  %v4771_v13 = vsel %vm4763_vm5, %v4738_v4, %v6344_v25  ;;  %v6268_v32 = vunpack.i.l.bf16 %v10174_v57 }
 0x63c   : > { %v4799_v2 = vpack.c.bf16 %v4771_v13, %v4770_v33  ;;  %v4769_v26 = vsel %vm4763_vm5, %v4736_v5, %v6349_v12  ;;  %v4768_v6 = vsel %vm4763_vm5, %v4735_v36, %v6348_v52  ;;  %v10325_v56 = vpop.permute.xlu0 %6356  ;;  %v6314_v52 = vunpack.i.h.bf16 %v10274_v46  ;;  %v11104_v33 = vld [vmem:[#allocation77_spill] sm:$0xff] }
 0x63d   : > { %v4798_v10 = vpack.c.bf16 %v4769_v26, %v4768_v6  ;;  %v10328_v1 = vpop.permute.xlu1 %6351  ;;  %v6313_v36 = vunpack.i.l.bf16 %v10274_v46  ;;  %v6318_v5 = vunpack.i.l.bf16 %v10276_v51  ;;  %v4713_v13 = vsel %vm771_vm1, %v11104_v33, %v6264_v23  ;;  %v11106_v26 = vld [vmem:[#allocation47_spill] sm:$0xff] }
 0x63e   : > { %v4711_v6 = vsel %vm771_vm1, %v11106_v26, %v6269_v61  ;;  %v4710_v46 = vsel %vm771_vm1, %v11107_v17, %v6268_v32  ;;  %v4746_v31 = vsel %vm4730_vm4, %v4713_v13, %v6314_v52  ;;  %v6338_v23 = vunpack.i.l.bf16 %v10298_v8 }
 0x63f   : > { %6128 = vmatprep.mubr.msk.bf16.mxu1 %vm479_vm0, %v4798_v10  ;;  %v4743_v54 = vsel %vm4730_vm4, %v4710_v46, %v6318_v5  ;;  %v4744_v14 = vsel %vm4730_vm4, %v4711_v6, %v6319_v53 }
 0x640   : > { %v6362_v43 = vpop.permute.xlu0 %6361  ;;  %6129 = vmatmul.mubr.msk.bf16.gmra.mrb[124].mxu1 %vm479_vm0, %v4799_v2  ;;  %v4712_v2 = vsel %vm771_vm1, %v11105_v63, %v6263_v34 }
 0x641   : > { %v6364_v55 = vunpack.i.h.bf16 %v6362_v43  ;;  %v6363_v16 = vunpack.i.l.bf16 %v6362_v43  ;;  %v6367_v48 = vpop.permute.xlu1 %6366  ;;  %v4745_v42 = vsel %vm4730_vm4, %v4712_v2, %v6313_v36 }
 0x642   : > { %v6369_v28 = vunpack.i.h.bf16 %v6367_v48  ;;  %v6368_v39 = vunpack.i.l.bf16 %v6367_v48  ;;  %v6334_v48 = vunpack.i.h.bf16 %v10300_v58 }
 0x643   : > { %v4774_v50 = vsel %vm4763_vm5, %v4741_v45, %v6363_v16  ;;  %v4775_v0 = vsel %vm4763_vm5, %v4742_v47, %v6364_v55  ;;  %v6339_v16 = vunpack.i.h.bf16 %v10298_v8  ;;  %v6333_v47 = vunpack.i.l.bf16 %v10300_v58 }
 0x644   : > { %v4801_v18 = vpack.c.bf16 %v4775_v0, %v4774_v50  ;;  %v4773_v9 = vsel %vm4763_vm5, %v4740_v38, %v6369_v28  ;;  %v4772_v25 = vsel %vm4763_vm5, %v4739_v29, %v6368_v39  ;;  %v10354_v22 = vpop.permute.xlu0 %6376  ;;  %v4749_v28 = vsel %vm4730_vm4, %v10182_v40, %v6338_v23 }
 0x645   : > { %v4800_v4 = vpack.c.bf16 %v4773_v9, %v4772_v25  ;;  %v10358_v12 = vpop.permute.xlu1 %6371  ;;  %v4750_v29 = vsel %vm4730_vm4, %v10178_v19, %v6339_v16  ;;  %v4748_v38 = vsel %vm4730_vm4, %v10186_v62, %v6334_v48  ;;  %v4747_v8 = vsel %vm4730_vm4, %v10190_v35, %v6333_v47  ;;  %v11108_v48 = vld [vmem:[#allocation80_spill] sm:$0xff] }
 0x646   : > { %v6358_v25 = vunpack.i.l.bf16 %v10325_v56  ;;  %v6354_v40 = vunpack.i.h.bf16 %v10328_v1  ;;  %v6353_v62 = vunpack.i.l.bf16 %v10328_v1  ;;  %v6379_v36 = vunpack.i.h.bf16 %v10354_v22 }
 0x647   : > { %6132 = vmatprep.mubr.msk.bf16.mxu1 %vm479_vm0, %v4800_v4  ;;  %v6378_v53 = vunpack.i.l.bf16 %v10354_v22  ;;  %v6374_v33 = vunpack.i.h.bf16 %v10358_v12  ;;  %v6373_v13 = vunpack.i.l.bf16 %v10358_v12 }
 0x648   : > { %v6382_v57 = vpop.permute.xlu0 %6381  ;;  %6133 = vmatmul.mubr.msk.bf16.gmra.mrb[128].mxu1 %vm479_vm0, %v4801_v18  ;;  %v6359_v18 = vunpack.i.h.bf16 %v10325_v56  ;;  %v4720_v63 = vsel %vm771_vm1, %v9813_v3, %v6358_v25  ;;  %v4719_v2 = vsel %vm771_vm1, %v9827_v37, %v6354_v40  ;;  %v4718_v22 = vsel %vm771_vm1, %v9818_v30, %v6353_v62 }
 0x649   : > { %v6384_v10 = vunpack.i.h.bf16 %v6382_v57  ;;  %v6383_v7 = vunpack.i.l.bf16 %v6382_v57  ;;  %v6387_v51 = vpop.permute.xlu1 %6386  ;;  %v4753_v26 = vsel %vm4730_vm4, %v4720_v63, %v6378_v53  ;;  %v4751_v3 = vsel %vm4730_vm4, %v4718_v22, %v6373_v13  ;;  %v11111_v22 = vld [vmem:[#allocation72_spill] sm:$0xff] }
 0x64a   : > { %v6389_v60 = vunpack.i.h.bf16 %v6387_v51  ;;  %v6388_v49 = vunpack.i.l.bf16 %v6387_v51  ;;  %v4721_v1 = vsel %vm771_vm1, %v9821_v24, %v6359_v18  ;;  %v4752_v24 = vsel %vm4730_vm4, %v4719_v2, %v6374_v33 }
 0x64b   : > { %v4778_v44 = vsel %vm4763_vm5, %v4745_v42, %v6383_v7  ;;  %v4779_v59 = vsel %vm4763_vm5, %v4746_v31, %v6384_v10  ;;  %v4754_v12 = vsel %vm4730_vm4, %v4721_v1, %v6379_v36  ;;  %v11110_v1 = vld [vmem:[#allocation49_spill] sm:$0xff] }
 0x64c   : > { %v4803_v20 = vpack.c.bf16 %v4779_v59, %v4778_v44  ;;  %v4777_v43 = vsel %vm4763_vm5, %v4744_v14, %v6389_v60  ;;  %v4776_v15 = vsel %vm4763_vm5, %v4743_v54, %v6388_v49  ;;  %v10385_v55 = vpop.permute.xlu0 %6396 }
 0x64d   : > { %v4802_v11 = vpack.c.bf16 %v4777_v43, %v4776_v15  ;;  %v10389_v45 = vpop.permute.xlu1 %6391  ;;  %v6399_v37 = vunpack.i.h.bf16 %v10385_v55  ;;  %v6398_v30 = vunpack.i.l.bf16 %v10385_v55 }
 0x64e   : > { %v6394_v31 = vunpack.i.h.bf16 %v10389_v45  ;;  %v6393_v44 = vunpack.i.l.bf16 %v10389_v45  ;;  %v11109_v45 = vld [vmem:[#allocation78_spill] sm:$0xff] }
 0x64f   : > { %6136 = vmatprep.mubr.msk.bf16.mxu1 %vm479_vm0, %v4802_v11  ;;  %v4725_v55 = vsel %vm771_vm1, %v9867_v27, %v6399_v37  ;;  %v4724_v16 = vsel %vm771_vm1, %v9858_v21, %v6398_v30 }
 0x650   : > { %6137 = vmatmul.mubr.msk.bf16.gmra.mrb[132].mxu1 %vm479_vm0, %v4803_v20  ;;  %v4723_v47 = vsel %vm771_vm1, %v11108_v48, %v6394_v31 }
 0x66b   : > { %v6402_v39 = vpop.permute.xlu0 %6401 }
 0x66c   : > { %v6404_v50 = vunpack.i.h.bf16 %v6402_v39  ;;  %v6403_v0 = vunpack.i.l.bf16 %v6402_v39  ;;  %v6407_v34 = vpop.permute.xlu1 %6406  ;;  %v4722_v39 = vsel %vm771_vm1, %v11109_v45, %v6393_v44 }
 0x66d   : > { %v6409_v9 = vunpack.i.h.bf16 %v6407_v34  ;;  %v6408_v58 = vunpack.i.l.bf16 %v6407_v34 }
 0x66e   : > { %v4782_v61 = vsel %vm4763_vm5, %v4749_v28, %v6403_v0  ;;  %v4783_v19 = vsel %vm4763_vm5, %v4750_v29, %v6404_v50 }
 0x66f   : > { %v4805_v32 = vpack.c.bf16 %v4783_v19, %v4782_v61  ;;  %v4781_v4 = vsel %vm4763_vm5, %v4748_v38, %v6409_v9  ;;  %v4780_v52 = vsel %vm4763_vm5, %v4747_v8, %v6408_v58  ;;  %v6417_v35 = vpop.permute.xlu0 %6416 }
 0x670   : > { %v4804_v5 = vpack.c.bf16 %v4781_v4, %v4780_v52  ;;  %v6412_v56 = vpop.permute.xlu1 %6411  ;;  %v6418_v59 = vunpack.i.l.bf16 %v6417_v35  ;;  %v6419_v15 = vunpack.i.h.bf16 %v6417_v35 }
 0x671   : > { %v6414_v11 = vunpack.i.h.bf16 %v6412_v56  ;;  %v6413_v23 = vunpack.i.l.bf16 %v6412_v56 }
 0x672   : > { %6140 = vmatprep.mubr.msk.bf16.mxu1 %vm479_vm0, %v4804_v5  ;;  %v4757_v29 = vsel %vm4730_vm4, %v4724_v16, %v6418_v59  ;;  %v4758_v34 = vsel %vm4730_vm4, %v4725_v55, %v6419_v15 }
 0x673   : > { %v6422_v57 = vpop.permute.xlu0 %6421  ;;  %6141 = vmatmul.mubr.msk.bf16.gmra.mrb[136].mxu1 %vm479_vm0, %v4805_v32  ;;  %v4756_v27 = vsel %vm4730_vm4, %v4723_v47, %v6414_v11  ;;  %v4755_v18 = vsel %vm4730_vm4, %v4722_v39, %v6413_v23 }
 0x674   : > { %v6424_v6 = vunpack.i.h.bf16 %v6422_v57  ;;  %v6423_v17 = vunpack.i.l.bf16 %v6422_v57  ;;  %v6427_v46 = vpop.permute.xlu1 %6426 }
 0x675   : > { %v6429_v10 = vunpack.i.h.bf16 %v6427_v46  ;;  %v6428_v7 = vunpack.i.l.bf16 %v6427_v46 }
 0x676   : > { %v4786_v51 = vsel %vm4763_vm5, %v4753_v26, %v6423_v17  ;;  %v4787_v42 = vsel %vm4763_vm5, %v4754_v12, %v6424_v6  ;;  %v11112_v26 = vld [vmem:[#allocation75_spill] sm:$0xff] }
 0x677   : > { %v4807_v60 = vpack.c.bf16 %v4787_v42, %v4786_v51  ;;  %v4785_v49 = vsel %vm4763_vm5, %v4752_v24, %v6429_v10  ;;  %v4784_v54 = vsel %vm4763_vm5, %v4751_v3, %v6428_v7  ;;  %v6437_v14 = vpop.permute.xlu0 %6436 }
 0x678   : > { %v4806_v20 = vpack.c.bf16 %v4785_v49, %v4784_v54  ;;  %v6432_v43 = vpop.permute.xlu1 %6431  ;;  %v6439_v9 = vunpack.i.h.bf16 %v6437_v14  ;;  %v6438_v40 = vunpack.i.l.bf16 %v6437_v14  ;;  %v10475_v54 = vld [vmem:[%s10529_s7] ss:$0 sm:$0xff] }
 0x679   : > { %v6434_v4 = vunpack.i.h.bf16 %v6432_v43  ;;  %v6433_v52 = vunpack.i.l.bf16 %v6432_v43 }
 0x67a   : > { %6144 = vmatprep.mubr.msk.bf16.mxu1 %vm479_vm0, %v4806_v20  ;;  %v4729_v13 = vsel %vm771_vm1, %v9947_v41, %v6439_v9  ;;  %v4728_v63 = vsel %vm771_vm1, %v11110_v1, %v6438_v40 }
 0x67b   : > { %v6442_v28 = vpop.permute.xlu0 %6441  ;;  %6145 = vmatmul.mubr.msk.bf16.gmra.mrb[140].mxu1 %vm479_vm0, %v4807_v60  ;;  %v4727_v57 = vsel %vm771_vm1, %v11111_v22, %v6434_v4  ;;  %v4726_v12 = vsel %vm771_vm1, %v11112_v26, %v6433_v52 }
 0x67c   : > { %v6444_v38 = vunpack.i.h.bf16 %v6442_v28  ;;  %v6443_v50 = vunpack.i.l.bf16 %v6442_v28  ;;  %v6447_v0 = vpop.permute.xlu1 %6446 }
 0x67d   : > { %v6449_v8 = vunpack.i.h.bf16 %v6447_v0  ;;  %v6448_v21 = vunpack.i.l.bf16 %v6447_v0 }
 0x67e   : > { %v4790_v58 = vsel %vm4763_vm5, %v4757_v29, %v6443_v50  ;;  %v4791_v25 = vsel %vm4763_vm5, %v4758_v34, %v6444_v38 }
 0x67f   : > { %v4809_v61 = vpack.c.bf16 %v4791_v25, %v4790_v58  ;;  %v4789_v19 = vsel %vm4763_vm5, %v4756_v27, %v6449_v8  ;;  %v4788_v62 = vsel %vm4763_vm5, %v4755_v18, %v6448_v21  ;;  %v6457_v32 = vpop.permute.xlu0 %6456 }
 0x680   : > { %v4808_v35 = vpack.c.bf16 %v4789_v19, %v4788_v62  ;;  %v6452_v36 = vpop.permute.xlu1 %6451  ;;  %v6459_v53 = vunpack.i.h.bf16 %v6457_v32  ;;  %v6458_v5 = vunpack.i.l.bf16 %v6457_v32 }
 0x681   : > { %v6454_v56 = vunpack.i.h.bf16 %v6452_v36  ;;  %v6453_v33 = vunpack.i.l.bf16 %v6452_v36 }
 0x682   : > { %6148 = vmatprep.mubr.msk.bf16.mxu1 %vm479_vm0, %v4808_v35  ;;  %v4761_v24 = vsel %vm4730_vm4, %v4728_v63, %v6458_v5  ;;  %v4762_v3 = vsel %vm4730_vm4, %v4729_v13, %v6459_v53 }
 0x683   : > { %v6467_v2 = vpop.permute.xlu0 %6466  ;;  %6149 = vmatmul.mubr.msk.bf16.gmra.mrb[144].mxu1 %vm479_vm0, %v4809_v61  ;;  %v4760_v7 = vsel %vm4730_vm4, %v4727_v57, %v6454_v56  ;;  %v4759_v37 = vsel %vm4730_vm4, %v4726_v12, %v6453_v33 }
 0x684   : > { %v6469_v6 = vunpack.i.h.bf16 %v6467_v2  ;;  %v6468_v17 = vunpack.i.l.bf16 %v6467_v2  ;;  %v6462_v46 = vpop.permute.xlu1 %6461 }
 0x685   : > { %v6464_v41 = vunpack.i.h.bf16 %v6462_v46  ;;  %v6463_v10 = vunpack.i.l.bf16 %v6462_v46 }
 0x686   : > { %v4794_v30 = vsel %vm4763_vm5, %v4761_v24, %v6468_v17  ;;  %v4795_v51 = vsel %vm4763_vm5, %v4762_v3, %v6469_v6 }
 0x687   : > { %v4811_v42 = vpack.c.bf16 %v4795_v51, %v4794_v30  ;;  %v4793_v31 = vsel %vm4763_vm5, %v4760_v7, %v6464_v41  ;;  %v4792_v60 = vsel %vm4763_vm5, %v4759_v37, %v6463_v10 }
 0x688   : > { %v4810_v49 = vpack.c.bf16 %v4793_v31, %v4792_v60 }
 0x68a   : > { %6152 = vmatprep.mubr.msk.bf16.mxu1 %vm479_vm0, %v4810_v49 }
 0x68b   : > { %6153 = vmatmul.mubr.msk.bf16.gmra.mrb[148].mxu1 %vm479_vm0, %v4811_v42 }
 0x70b   : > { %v6126_v14 = vpop.f32.mrb[120].mxu1 }
 0x70c   : > { %v4917_v44 = vpop.f32.mrb[121].mxu1  ;;  %v4926_v55 = vadd.f32 %v6126_v14, %v10475_v54 }
 0x70d   : > { %v4918_v59 = vadd.f32 %v10475_v54, %v4917_v44  ;;  %v6127_v20 = vpop.f32.mrb[122].mxu1 }
 0x70e   : > { %v4920_v43 = vpop.f32.mrb[123].mxu1  ;;  %v4929_v47 = vadd.f32 %v6127_v20, %v10475_v54 }
 0x70f   : > { %5044 = vxpose.xlu1.b32.start [1/16] (narrow) %v4918_v59, 32  ;;  %v4921_v15 = vadd.f32 %v10475_v54, %v4920_v43 }
 0x713   : > { %v6130_v11 = vpop.f32.mrb[124].mxu1  ;;  %5045 = vxpose.xlu1.b32.cont [2/16] (narrow) %v4921_v15, 32 }
 0x714   : > { %v4933_v23 = vpop.f32.mrb[125].mxu1  ;;  %v4942_v27 = vadd.f32 %v6130_v11, %v10475_v54 }
 0x715   : > { %v6131_v16 = vpop.f32.mrb[126].mxu1  ;;  %v4934_v39 = vadd.f32 %v10475_v54, %v4933_v23 }
 0x716   : > { %v4936_v48 = vpop.f32.mrb[127].mxu1  ;;  %v4945_v18 = vadd.f32 %v6131_v16, %v10475_v54 }
 0x717   : > { %5046 = vxpose.xlu1.b32.cont [3/16] (narrow) %v4926_v55, 32  ;;  %v4937_v50 = vadd.f32 %v10475_v54, %v4936_v48 }
 0x71b   : > { %v6134_v28 = vpop.f32.mrb[128].mxu1  ;;  %5047 = vxpose.xlu1.b32.cont [4/16] (narrow) %v4929_v47, 32 }
 0x71c   : > { %v4949_v45 = vpop.f32.mrb[129].mxu1  ;;  %v4958_v25 = vadd.f32 %v6134_v28, %v10475_v54 }
 0x71d   : > { %v6135_v29 = vpop.f32.mrb[130].mxu1  ;;  %v4950_v9 = vadd.f32 %v10475_v54, %v4949_v45 }
 0x71e   : > { %v4952_v38 = vpop.f32.mrb[131].mxu1  ;;  %v4961_v40 = vadd.f32 %v6135_v29, %v10475_v54 }
 0x71f   : > { %5048 = vxpose.xlu1.b32.cont [5/16] (narrow) %v4934_v39, 32  ;;  %v4953_v58 = vadd.f32 %v10475_v54, %v4952_v38 }
 0x723   : > { %v6138_v0 = vpop.f32.mrb[132].mxu1  ;;  %5049 = vxpose.xlu1.b32.cont [6/16] (narrow) %v4937_v50, 32 }
 0x724   : > { %v4965_v34 = vpop.f32.mrb[133].mxu1  ;;  %v4974_v62 = vadd.f32 %v6138_v0, %v10475_v54 }
 0x725   : > { %v6139_v8 = vpop.f32.mrb[134].mxu1  ;;  %v4966_v61 = vadd.f32 %v10475_v54, %v4965_v34 }
 0x726   : > { %v4968_v21 = vpop.f32.mrb[135].mxu1  ;;  %v4977_v36 = vadd.f32 %v6139_v8, %v10475_v54 }
 0x727   : > { %5050 = vxpose.xlu1.b32.cont [7/16] (narrow) %v4942_v27, 32  ;;  %v4969_v19 = vadd.f32 %v10475_v54, %v4968_v21 }
 0x72b   : > { %5051 = vxpose.xlu1.b32.cont [8/16] (narrow) %v4945_v18, 32 }
 0x72f   : > { %5052 = vxpose.xlu1.b32.cont [9/16] (narrow) %v4950_v9, 32 }
 0x733   : > { %5053 = vxpose.xlu1.b32.cont [10/16] (narrow) %v4953_v58, 32 }
 0x737   : > { %5054 = vxpose.xlu1.b32.cont [11/16] (narrow) %v4958_v25, 32 }
 0x73b   : > { %5055 = vxpose.xlu1.b32.cont [12/16] (narrow) %v4961_v40, 32 }
 0x73f   : > { %5056 = vxpose.xlu1.b32.cont [13/16] (narrow) %v4966_v61, 32 }
 0x743   : > { %5057 = vxpose.xlu1.b32.cont [14/16] (narrow) %v4969_v19, 32 }
 0x746   : > { %v6142_v32 = vpop.f32.mrb[136].mxu1 }
 0x747   : > { %v4981_v4 = vpop.f32.mrb[137].mxu1  ;;  %5058 = vxpose.xlu1.b32.cont [15/16] (narrow) %v4974_v62, 32  ;;  %v4990_v13 = vadd.f32 %v6142_v32, %v10475_v54 }
 0x748   : > { %v4982_v52 = vadd.f32 %v10475_v54, %v4981_v4  ;;  %v6143_v35 = vpop.f32.mrb[138].mxu1 }
 0x749   : > { %v4984_v53 = vpop.f32.mrb[139].mxu1  ;;  %v4993_v2 = vadd.f32 %v6143_v35, %v10475_v54 }
 0x74a   : > { %5076 = vxpose.xlu0.b32.start [1/16] (narrow) %v4982_v52, 32  ;;  %v4985_v5 = vadd.f32 %v10475_v54, %v4984_v53 }
 0x74b   : > { %5059 = vxpose.xlu1.b32.end [16/16] (narrow) %v4977_v36, 32 }
 0x74e   : > { %v6146_v56 = vpop.f32.mrb[140].mxu1  ;;  %5077 = vxpose.xlu0.b32.cont [2/16] (narrow) %v4985_v5, 32 }
 0x74f   : > { %v4997_v33 = vpop.f32.mrb[141].mxu1  ;;  %v5006_v3 = vadd.f32 %v6146_v56, %v10475_v54 }
 0x750   : > { %v6147_v1 = vpop.f32.mrb[142].mxu1  ;;  %v4998_v26 = vadd.f32 %v10475_v54, %v4997_v33 }
 0x751   : > { %v5000_v63 = vpop.f32.mrb[143].mxu1  ;;  %v5009_v7 = vadd.f32 %v6147_v1, %v10475_v54 }
 0x752   : > { %5078 = vxpose.xlu0.b32.cont [3/16] (narrow) %v4990_v13, 32  ;;  %v5001_v17 = vadd.f32 %v10475_v54, %v5000_v63 }
 0x756   : > { %v6150_v22 = vpop.f32.mrb[144].mxu1  ;;  %5079 = vxpose.xlu0.b32.cont [4/16] (narrow) %v4993_v2, 32 }
 0x757   : > { %v5013_v57 = vpop.f32.mrb[145].mxu1  ;;  %v5022_v51 = vadd.f32 %v6150_v22, %v10475_v54 }
 0x758   : > { %v6151_v12 = vpop.f32.mrb[146].mxu1  ;;  %v5014_v37 = vadd.f32 %v10475_v54, %v5013_v57 }
 0x759   : > { %v5016_v6 = vpop.f32.mrb[147].mxu1  ;;  %v5025_v42 = vadd.f32 %v6151_v12, %v10475_v54 }
 0x75a   : > { %5080 = vxpose.xlu0.b32.cont [5/16] (narrow) %v4998_v26, 32  ;;  %v5017_v30 = vadd.f32 %v10475_v54, %v5016_v6 }
 0x75e   : > { %v6154_v46 = vpop.f32.mrb[148].mxu1  ;;  %5081 = vxpose.xlu0.b32.cont [6/16] (narrow) %v5001_v17, 32 }
 0x75f   : > { %v5029_v24 = vpop.f32.mrb[149].mxu1  ;;  %v5038_v49 = vadd.f32 %v6154_v46, %v10475_v54 }
 0x760   : > { %v6155_v41 = vpop.f32.mrb[150].mxu1  ;;  %v5030_v31 = vadd.f32 %v10475_v54, %v5029_v24 }
 0x761   : > { %v5032_v10 = vpop.f32.mrb[151].mxu1  ;;  %v5041_v14 = vadd.f32 %v6155_v41, %v10475_v54 }
 0x762   : > { %5082 = vxpose.xlu0.b32.cont [7/16] (narrow) %v5006_v3, 32  ;;  %v5033_v60 = vadd.f32 %v10475_v54, %v5032_v10 }
 0x766   : > { %5083 = vxpose.xlu0.b32.cont [8/16] (narrow) %v5009_v7, 32 }
 0x76a   : > { %5084 = vxpose.xlu0.b32.cont [9/16] (narrow) %v5014_v37, 32 }
 0x76e   : > { %5085 = vxpose.xlu0.b32.cont [10/16] (narrow) %v5017_v30, 32 }
 0x772   : > { %5086 = vxpose.xlu0.b32.cont [11/16] (narrow) %v5022_v51, 32 }
 0x776   : > { %5087 = vxpose.xlu0.b32.cont [12/16] (narrow) %v5025_v42, 32 }
 0x77a   : > { %5088 = vxpose.xlu0.b32.cont [13/16] (narrow) %v5030_v31, 32 }
 0x77e   : > { %5089 = vxpose.xlu0.b32.cont [14/16] (narrow) %v5033_v60, 32 }
 0x782   : > { %5090 = vxpose.xlu0.b32.cont [15/16] (narrow) %v5038_v49, 32 }
 0x786   : > { %5091 = vxpose.xlu0.b32.end [16/16] (narrow) %v5041_v14, 32 }
 0x78f   : > { %v5060_v44 = vpop.trf.xlu1 }
 0x790   : > { %5108 = vst [vmem:[%s405_s24] sm:$0xff] %v5060_v44 }
 0x793   : > { %v5061_v59 = vpop.trf.xlu1 }
 0x794   : > { %5110 = vst [vmem:[%s405_s24 + $0x10] sm:$0xff] %v5061_v59 }
 0x797   : > { %v5062_v20 = vpop.trf.xlu1 }
 0x798   : > { %5112 = vst [vmem:[%s405_s24 + $0x20] sm:$0xff] %v5062_v20 }
 0x79b   : > { %v5063_v43 = vpop.trf.xlu1 }
 0x79c   : > { %5114 = vst [vmem:[%s405_s24 + $0x30] sm:$0xff] %v5063_v43 }
 0x7ca   : > { %v5092_v15 = vpop.trf.xlu0 }
 0x7cb   : > { %5109 = vst [vmem:[%s405_s24 + $0x8] sm:$0xff] %v5092_v15 }
 0x7ce   : > { %v5093_v11 = vpop.trf.xlu0 }
 0x7cf   : > { %5111 = vst [vmem:[%s405_s24 + $0x18] sm:$0xff] %v5093_v11 }
 0x7d2   : > { %v5094_v23 = vpop.trf.xlu0 }
 0x7d3   : > { %5113 = vst [vmem:[%s405_s24 + $0x28] sm:$0xff] %v5094_v23 }
 0x7d6   : > { %v5095_v54 = vpop.trf.xlu0 }
 0x7d7   : > { %5115 = vst [vmem:[%s405_s24 + $0x38] sm:$0xff] %v5095_v54 }
 0x7d8 PF: > { %s18_s29 = sadd.s32 1, %s7008_s29   ;;  %s11113_s27 = smov %s7004_s28 }
 0x7d9   : > { %p15_p5 = scmp.ge.s32.totalorder %s18_s29, 4   ;;  %s11114_s28 = smov %s11116_s30 }
 0x7db   :  { %17 = sbr.rel (!%p15_p5) target bundleno = 2 (0x2), region = 94 }

</bundles_post_ra>
